<compile_context>
chip_gen: v6e
topology: v6e:2x2x1
jax: 0.10.0
libtpu: 0.0.40
codegen_flags: <defaults>
</compile_context>

<pallas_src>
import numpy as np

import jax
import jax.numpy as jnp
from jax.experimental import pallas as pl
from jax.experimental.pallas import tpu as pltpu


# ---------------------------------------------------------------------------
# Pallas kernels (all operands are whole arrays resident in VMEM)
# ---------------------------------------------------------------------------
def _conv_taps(x_bf16, w_ref, g_ref):
    """KxK conv as per-tap MXU matmuls: sum_t W[t] @ (X @ G[t]).

    x_bf16: (Cin, Mi) bf16 activation, flattened spatial on lanes.
    w_ref : (T, Cout, Cin) bf16 per-tap weights.
    g_ref : (T, Mi, Mo) bf16 constant 0/1 shift/gather matrices.  Stride,
            zero padding and image boundaries are encoded in G (padded taps
            select all-zero columns, matching zero padding).
    Returns (Cout, Mo) f32.
    """
    taps, cout, _ = w_ref.shape
    mo = g_ref.shape[2]
    acc = jnp.zeros((cout, mo), jnp.float32)
    for t in range(taps):
        xs = jnp.dot(x_bf16, g_ref[t], preferred_element_type=jnp.float32)
        acc = acc + jnp.dot(w_ref[t], xs.astype(jnp.bfloat16),
                            preferred_element_type=jnp.float32)
    return acc


def _stem_kernel(a_ref, w_ref, s_ref, b_ref, gp_ref, o_ref):
    # conv1 as one lane-dense matmul (Cout, K) @ (K, M) with fused BN + ReLU,
    # then maxpool(3x3, s2, p1) fused into the epilogue via 9 gather matrices
    # (conv1 output never leaves VMEM).
    h = jnp.dot(w_ref[...], a_ref[...], preferred_element_type=jnp.float32)
    h = jnp.maximum(h * s_ref[...] + b_ref[...], 0.0)
    hb = h.astype(jnp.bfloat16)
    # h >= 0 (post-ReLU), so the 0 produced by all-zero (padded) gather
    # columns is neutral under max.
    pooled = jnp.dot(hb, gp_ref[0], preferred_element_type=jnp.float32)
    for t in range(1, gp_ref.shape[0]):
        pooled = jnp.maximum(
            pooled, jnp.dot(hb, gp_ref[t], preferred_element_type=jnp.float32))
    o_ref[...] = pooled.astype(o_ref.dtype)


def _block_kernel(x_ref, w1_ref, s1_ref, b1_ref, w2_ref, s2_ref, b2_ref,
                  smat_ref, o_ref):
    # Stride-1 BasicBlock fused in one launch: conv-bn-relu, conv-bn, +x, relu.
    x = x_ref[...]
    h1 = _conv_taps(x, w1_ref, smat_ref)
    h1 = jnp.maximum(h1 * s1_ref[...] + b1_ref[...], 0.0).astype(jnp.bfloat16)
    h2 = _conv_taps(h1, w2_ref, smat_ref)
    out = h2 * s2_ref[...] + b2_ref[...] + x.astype(jnp.float32)
    o_ref[...] = jnp.maximum(out, 0.0).astype(o_ref.dtype)


def _block_down_kernel(x_ref, w1_ref, s1_ref, b1_ref, w2_ref, s2_ref, b2_ref,
                       wd_ref, sd_ref, bd_ref, g1_ref, gd_ref, smat_ref, o_ref):
    # BasicBlock with stride-2 conv1 and 1x1/s2 downsample on the skip path.
    x = x_ref[...]
    # skip path: strided 1x1 conv (single gather matrix) + BN (no ReLU)
    xd = jnp.dot(x, gd_ref[...], preferred_element_type=jnp.float32)
    idn = jnp.dot(wd_ref[...], xd.astype(jnp.bfloat16),
                  preferred_element_type=jnp.float32)
    idn = idn * sd_ref[...] + bd_ref[...]
    # main path
    h1 = _conv_taps(x, w1_ref, g1_ref)
    h1 = jnp.maximum(h1 * s1_ref[...] + b1_ref[...], 0.0).astype(jnp.bfloat16)
    h2 = _conv_taps(h1, w2_ref, smat_ref)
    out = h2 * s2_ref[...] + b2_ref[...] + idn
    o_ref[...] = jnp.maximum(out, 0.0).astype(o_ref.dtype)


# ---------------------------------------------------------------------------
# pallas_call wrapper
# ---------------------------------------------------------------------------
def _vmem_call(kernel, args, out_shape):
    vmem = pltpu.MemorySpace.VMEM
    return pl.pallas_call(
        kernel,
        in_specs=[pl.BlockSpec(memory_space=vmem) for _ in args],
        out_specs=pl.BlockSpec(memory_space=vmem),
        out_shape=jax.ShapeDtypeStruct(out_shape, jnp.bfloat16),
    )(*args)


# ---------------------------------------------------------------------------
# Host-side (trace-time) helpers: constants, im2col, weight/BN packing
# ---------------------------------------------------------------------------
def _round_up(x, m):
    return ((x + m - 1) // m) * m


def _out_size(size, k, stride, pad):
    return (size + 2 * pad - k) // stride + 1


def _gather_mats(n, hi, wi, ho, wo, kh, kw, stride, pad):
    """G[t][a, b] = 1 iff flat input position a feeds window tap t of flat
    output position b (flat index = (img*H + row)*W + col).  Out-of-bounds
    (zero-padding) taps give all-zero columns.  Built once per geometry with
    numpy -> baked as constants."""
    mi, mo = n * hi * wi, n * ho * wo
    g = np.zeros((kh * kw, mi, mo), np.float32)
    for di in range(kh):
        for dj in range(kw):
            t = di * kw + dj
            for im in range(n):
                for i in range(ho):
                    y = stride * i + di - pad
                    if not 0 <= y < hi:
                        continue
                    for j in range(wo):
                        x = stride * j + dj - pad
                        if 0 <= x < wi:
                            g[t, (im * hi + y) * wi + x,
                              (im * ho + i) * wo + j] = 1.0
    return jnp.asarray(g, jnp.bfloat16)


def _conv1_im2col(x, kh, kw, stride, pad, k_pad):
    """Transposed im2col for the stem: (K_pad, N*Ho*Wo), K ordered (tap, cin),
    spatial output flattened on the lane axis (lane-dense)."""
    n, c, h, w = x.shape
    ho, wo = _out_size(h, kh, stride, pad), _out_size(w, kw, stride, pad)
    xp = jnp.pad(x, ((0, 0), (0, 0), (pad, pad), (pad, pad)))
    cols = []
    for di in range(kh):
        for dj in range(kw):
            cols.append(xp[:, :, di:di + stride * ho:stride,
                           dj:dj + stride * wo:stride])
    a = jnp.stack(cols, 0)                                 # (T, N, C, Ho, Wo)
    a = jnp.transpose(a, (0, 2, 1, 3, 4)).reshape(kh * kw * c, n * ho * wo)
    a = jnp.pad(a, ((0, k_pad - kh * kw * c), (0, 0)))
    return a.astype(jnp.bfloat16), ho, wo


def _w_taps(w):
    """(Cout, Cin, KH, KW) -> (KH*KW, Cout, Cin) bf16, tap-major."""
    cout, cin, kh, kw = w.shape
    return (jnp.transpose(w, (2, 3, 0, 1))
            .reshape(kh * kw, cout, cin).astype(jnp.bfloat16))


def _bn_cols(bn):
    scale, bias = bn
    return (scale.reshape(-1, 1).astype(jnp.float32),
            bias.reshape(-1, 1).astype(jnp.float32))


# ---------------------------------------------------------------------------
# ResNet feature extractor (conv1 / bn1 / relu / maxpool / layer1 / layer2)
# ---------------------------------------------------------------------------
def resnet_feature_extractor(x_nchw, params):
    x = x_nchw.astype(jnp.float32)
    n, cin, h, w = x.shape
    base = params["conv1_w"].shape[0]

    # ---- stem: conv1(7x7/s2/p3) + bn + relu + maxpool(3x3/s2/p1), 1 kernel.
    k1 = cin * 49
    k1p = _round_up(k1, 128)           # 128-aligned K for unmasked MXU pushes
    a1, ho1, wo1 = _conv1_im2col(x, 7, 7, 2, 3, k1p)
    w1m = jnp.transpose(params["conv1_w"], (0, 2, 3, 1)).reshape(base, k1)
    w1m = jnp.pad(w1m, ((0, 0), (0, k1p - k1))).astype(jnp.bfloat16)
    hp, wp = _out_size(ho1, 3, 2, 1), _out_size(wo1, 3, 2, 1)
    gpool = _gather_mats(n, ho1, wo1, hp, wp, 3, 3, 2, 1)
    feat = _vmem_call(_stem_kernel,
                      [a1, w1m, *_bn_cols(params["bn1"]), gpool],
                      (base, n * hp * wp))

    # ---- layer1: two stride-1 BasicBlocks (shared shift matrices).
    s_l1 = _gather_mats(n, hp, wp, hp, wp, 3, 3, 1, 1)
    for blk in params["layer1"]:
        feat = _vmem_call(
            _block_kernel,
            [feat, _w_taps(blk["conv1_w"]), *_bn_cols(blk["bn1"]),
             _w_taps(blk["conv2_w"]), *_bn_cols(blk["bn2"]), s_l1],
            (base, n * hp * wp))

    # ---- layer2 block 0: stride-2 conv1 + 1x1/s2 downsample skip path.
    ho2, wo2 = _out_size(hp, 3, 2, 1), _out_size(wp, 3, 2, 1)
    g_s2 = _gather_mats(n, hp, wp, ho2, wo2, 3, 3, 2, 1)
    g_ds = _gather_mats(n, hp, wp, ho2, wo2, 1, 1, 2, 0)[0]
    s_l2 = _gather_mats(n, ho2, wo2, ho2, wo2, 3, 3, 1, 1)
    blk = params["layer2"][0]
    wd = blk["ds_w"][:, :, 0, 0].astype(jnp.bfloat16)
    feat = _vmem_call(
        _block_down_kernel,
        [feat, _w_taps(blk["conv1_w"]), *_bn_cols(blk["bn1"]),
         _w_taps(blk["conv2_w"]), *_bn_cols(blk["bn2"]),
         wd, *_bn_cols(blk["ds_bn"]), g_s2, g_ds, s_l2],
        (2 * base, n * ho2 * wo2))

    # ---- layer2 block 1: stride-1 BasicBlock.
    blk = params["layer2"][1]
    feat = _vmem_call(
        _block_kernel,
        [feat, _w_taps(blk["conv1_w"]), *_bn_cols(blk["bn1"]),
         _w_taps(blk["conv2_w"]), *_bn_cols(blk["bn2"]), s_l2],
        (2 * base, n * ho2 * wo2))

    # (C, N*H*W) -> NCHW.  Negligible at (2, 32, 4, 4); at larger sizes this
    # would be folded into the last kernel's output layout.
    out = feat.reshape(2 * base, n, ho2, wo2).astype(jnp.float32)
    return jnp.transpose(out, (1, 0, 2, 3))


# ---------------------------------------------------------------------------
# Parameter construction (BN folded to inference-mode affine)
# ---------------------------------------------------------------------------
def _fold_bn(gamma, beta, mean, var, eps=1e-5):
    scale = gamma / jnp.sqrt(var + eps)
    bias = beta - mean * scale
    return scale, bias


def init_params(key, in_ch=3, base=16):
    it = iter(jax.random.split(key, 100))

    def conv_w(cout, cin, k):
        return 0.05 * jax.random.normal(next(it), (cout, cin, k, k), jnp.float32)

    def bn(c):
        gamma = 1.0 + 0.1 * jax.random.normal(next(it), (c,), jnp.float32)
        beta = 0.1 * jax.random.normal(next(it), (c,), jnp.float32)
        mean = 0.1 * jax.random.normal(next(it), (c,), jnp.float32)
        var = 0.5 + 0.5 * jnp.abs(jax.random.normal(next(it), (c,), jnp.float32))
        return _fold_bn(gamma, beta, mean, var)

    def block(cin, cout, downsample):
        p = {
            "conv1_w": conv_w(cout, cin, 3),
            "bn1": bn(cout),
            "conv2_w": conv_w(cout, cout, 3),
            "bn2": bn(cout),
        }
        if downsample:
            p["ds_w"] = conv_w(cout, cin, 1)
            p["ds_bn"] = bn(cout)
        return p

    return {
        "conv1_w": conv_w(base, in_ch, 7),
        "bn1": bn(base),
        "layer1": [block(base, base, False), block(base, base, False)],
        "layer2": [block(base, base * 2, True), block(base * 2, base * 2, False)],
    }


if __name__ == "__main__":
    key = jax.random.PRNGKey(0)
    pkey, xkey = jax.random.split(key)
    params = init_params(pkey, in_ch=3, base=16)
    x = jax.random.normal(xkey, (2, 3, 32, 32), dtype=jnp.float32)  # NCHW

    out = jax.jit(resnet_feature_extractor)(x, params)
    out = jax.block_until_ready(out)

    assert out.shape == (2, 32, 4, 4), out.shape
    assert bool(jnp.all(jnp.isfinite(out)))
    print("KERNEL_OK")
</pallas_src>

<mosaic_0001>
module attributes {stable_mosaic.version = 11 : i64} {
  func.func @_stem_kernel(%arg0: memref<256x512xbf16, #tpu.memory_space<vmem>>, %arg1: memref<16x256xbf16, #tpu.memory_space<vmem>>, %arg2: memref<16x1xf32, #tpu.memory_space<vmem>>, %arg3: memref<16x1xf32, #tpu.memory_space<vmem>>, %arg4: memref<9x512x128xbf16, #tpu.memory_space<vmem>>, %arg5: memref<16x128xbf16, #tpu.memory_space<vmem>>) attributes {dimension_semantics = [], scalar_prefetch = 0 : i64, scratch_operands = 0 : i64, tpu.core_type = #tpu.core_type<tc>} {
    %c0 = arith.constant 0 : index
    %c0_0 = arith.constant 0 : index
    %0 = vector.load %arg1[%c0, %c0_0] : memref<16x256xbf16, #tpu.memory_space<vmem>>, vector<16x256xbf16>
    %c0_1 = arith.constant 0 : index
    %c0_2 = arith.constant 0 : index
    %1 = vector.load %arg0[%c0_1, %c0_2] : memref<256x512xbf16, #tpu.memory_space<vmem>>, vector<256x512xbf16>
    %cst = arith.constant dense<0.000000e+00> : vector<16x512xf32>
    %2 = tpu.matmul %0, %1, %cst {dimension_numbers = #tpu.dot_dimension_numbers<[1], [0], [0], [1], [0, 0, 1, 1], [], []>} : vector<16x256xbf16>, vector<256x512xbf16>, vector<16x512xf32> -> vector<16x512xf32>
    %c0_3 = arith.constant 0 : index
    %c0_4 = arith.constant 0 : index
    %3 = vector.load %arg2[%c0_3, %c0_4] : memref<16x1xf32, #tpu.memory_space<vmem>>, vector<16x1xf32>
    %4 = vector.broadcast %3 : vector<16x1xf32> to vector<16x512xf32>
    %5 = arith.mulf %2, %4 : vector<16x512xf32>
    %c0_5 = arith.constant 0 : index
    %c0_6 = arith.constant 0 : index
    %6 = vector.load %arg3[%c0_5, %c0_6] : memref<16x1xf32, #tpu.memory_space<vmem>>, vector<16x1xf32>
    %7 = vector.broadcast %6 : vector<16x1xf32> to vector<16x512xf32>
    %8 = arith.addf %5, %7 : vector<16x512xf32>
    %cst_7 = arith.constant 0.000000e+00 : f32
    %9 = vector.broadcast %cst_7 : f32 to vector<16x512xf32>
    %10 = arith.maximumf %8, %9 : vector<16x512xf32>
    %11 = arith.truncf %10 : vector<16x512xf32> to vector<16x512xbf16>
    %c0_8 = arith.constant 0 : index
    %c0_9 = arith.constant 0 : index
    %c0_10 = arith.constant 0 : index
    %12 = vector.load %arg4[%c0_8, %c0_9, %c0_10] : memref<9x512x128xbf16, #tpu.memory_space<vmem>>, vector<1x512x128xbf16>
    %13 = vector.shape_cast %12 : vector<1x512x128xbf16> to vector<512x128xbf16>
    %cst_11 = arith.constant dense<0.000000e+00> : vector<16x128xf32>
    %14 = tpu.matmul %11, %13, %cst_11 {dimension_numbers = #tpu.dot_dimension_numbers<[1], [0], [0], [1], [0, 0, 1, 1], [], []>} : vector<16x512xbf16>, vector<512x128xbf16>, vector<16x128xf32> -> vector<16x128xf32>
    %c1 = arith.constant 1 : index
    %c0_12 = arith.constant 0 : index
    %c0_13 = arith.constant 0 : index
    %15 = vector.load %arg4[%c1, %c0_12, %c0_13] : memref<9x512x128xbf16, #tpu.memory_space<vmem>>, vector<1x512x128xbf16>
    %16 = vector.shape_cast %15 : vector<1x512x128xbf16> to vector<512x128xbf16>
    %cst_14 = arith.constant dense<0.000000e+00> : vector<16x128xf32>
    %17 = tpu.matmul %11, %16, %cst_14 {dimension_numbers = #tpu.dot_dimension_numbers<[1], [0], [0], [1], [0, 0, 1, 1], [], []>} : vector<16x512xbf16>, vector<512x128xbf16>, vector<16x128xf32> -> vector<16x128xf32>
    %18 = arith.maximumf %14, %17 : vector<16x128xf32>
    %c2 = arith.constant 2 : index
    %c0_15 = arith.constant 0 : index
    %c0_16 = arith.constant 0 : index
    %19 = vector.load %arg4[%c2, %c0_15, %c0_16] : memref<9x512x128xbf16, #tpu.memory_space<vmem>>, vector<1x512x128xbf16>
    %20 = vector.shape_cast %19 : vector<1x512x128xbf16> to vector<512x128xbf16>
    %cst_17 = arith.constant dense<0.000000e+00> : vector<16x128xf32>
    %21 = tpu.matmul %11, %20, %cst_17 {dimension_numbers = #tpu.dot_dimension_numbers<[1], [0], [0], [1], [0, 0, 1, 1], [], []>} : vector<16x512xbf16>, vector<512x128xbf16>, vector<16x128xf32> -> vector<16x128xf32>
    %22 = arith.maximumf %18, %21 : vector<16x128xf32>
    %c3 = arith.constant 3 : index
    %c0_18 = arith.constant 0 : index
    %c0_19 = arith.constant 0 : index
    %23 = vector.load %arg4[%c3, %c0_18, %c0_19] : memref<9x512x128xbf16, #tpu.memory_space<vmem>>, vector<1x512x128xbf16>
    %24 = vector.shape_cast %23 : vector<1x512x128xbf16> to vector<512x128xbf16>
    %cst_20 = arith.constant dense<0.000000e+00> : vector<16x128xf32>
    %25 = tpu.matmul %11, %24, %cst_20 {dimension_numbers = #tpu.dot_dimension_numbers<[1], [0], [0], [1], [0, 0, 1, 1], [], []>} : vector<16x512xbf16>, vector<512x128xbf16>, vector<16x128xf32> -> vector<16x128xf32>
    %26 = arith.maximumf %22, %25 : vector<16x128xf32>
    %c4 = arith.constant 4 : index
    %c0_21 = arith.constant 0 : index
    %c0_22 = arith.constant 0 : index
    %27 = vector.load %arg4[%c4, %c0_21, %c0_22] : memref<9x512x128xbf16, #tpu.memory_space<vmem>>, vector<1x512x128xbf16>
    %28 = vector.shape_cast %27 : vector<1x512x128xbf16> to vector<512x128xbf16>
    %cst_23 = arith.constant dense<0.000000e+00> : vector<16x128xf32>
    %29 = tpu.matmul %11, %28, %cst_23 {dimension_numbers = #tpu.dot_dimension_numbers<[1], [0], [0], [1], [0, 0, 1, 1], [], []>} : vector<16x512xbf16>, vector<512x128xbf16>, vector<16x128xf32> -> vector<16x128xf32>
    %30 = arith.maximumf %26, %29 : vector<16x128xf32>
    %c5 = arith.constant 5 : index
    %c0_24 = arith.constant 0 : index
    %c0_25 = arith.constant 0 : index
    %31 = vector.load %arg4[%c5, %c0_24, %c0_25] : memref<9x512x128xbf16, #tpu.memory_space<vmem>>, vector<1x512x128xbf16>
    %32 = vector.shape_cast %31 : vector<1x512x128xbf16> to vector<512x128xbf16>
    %cst_26 = arith.constant dense<0.000000e+00> : vector<16x128xf32>
    %33 = tpu.matmul %11, %32, %cst_26 {dimension_numbers = #tpu.dot_dimension_numbers<[1], [0], [0], [1], [0, 0, 1, 1], [], []>} : vector<16x512xbf16>, vector<512x128xbf16>, vector<16x128xf32> -> vector<16x128xf32>
    %34 = arith.maximumf %30, %33 : vector<16x128xf32>
    %c6 = arith.constant 6 : index
    %c0_27 = arith.constant 0 : index
    %c0_28 = arith.constant 0 : index
    %35 = vector.load %arg4[%c6, %c0_27, %c0_28] : memref<9x512x128xbf16, #tpu.memory_space<vmem>>, vector<1x512x128xbf16>
    %36 = vector.shape_cast %35 : vector<1x512x128xbf16> to vector<512x128xbf16>
    %cst_29 = arith.constant dense<0.000000e+00> : vector<16x128xf32>
    %37 = tpu.matmul %11, %36, %cst_29 {dimension_numbers = #tpu.dot_dimension_numbers<[1], [0], [0], [1], [0, 0, 1, 1], [], []>} : vector<16x512xbf16>, vector<512x128xbf16>, vector<16x128xf32> -> vector<16x128xf32>
    %38 = arith.maximumf %34, %37 : vector<16x128xf32>
    %c7 = arith.constant 7 : index
    %c0_30 = arith.constant 0 : index
    %c0_31 = arith.constant 0 : index
    %39 = vector.load %arg4[%c7, %c0_30, %c0_31] : memref<9x512x128xbf16, #tpu.memory_space<vmem>>, vector<1x512x128xbf16>
    %40 = vector.shape_cast %39 : vector<1x512x128xbf16> to vector<512x128xbf16>
    %cst_32 = arith.constant dense<0.000000e+00> : vector<16x128xf32>
    %41 = tpu.matmul %11, %40, %cst_32 {dimension_numbers = #tpu.dot_dimension_numbers<[1], [0], [0], [1], [0, 0, 1, 1], [], []>} : vector<16x512xbf16>, vector<512x128xbf16>, vector<16x128xf32> -> vector<16x128xf32>
    %42 = arith.maximumf %38, %41 : vector<16x128xf32>
    %c8 = arith.constant 8 : index
    %c0_33 = arith.constant 0 : index
    %c0_34 = arith.constant 0 : index
    %43 = vector.load %arg4[%c8, %c0_33, %c0_34] : memref<9x512x128xbf16, #tpu.memory_space<vmem>>, vector<1x512x128xbf16>
    %44 = vector.shape_cast %43 : vector<1x512x128xbf16> to vector<512x128xbf16>
    %cst_35 = arith.constant dense<0.000000e+00> : vector<16x128xf32>
    %45 = tpu.matmul %11, %44, %cst_35 {dimension_numbers = #tpu.dot_dimension_numbers<[1], [0], [0], [1], [0, 0, 1, 1], [], []>} : vector<16x512xbf16>, vector<512x128xbf16>, vector<16x128xf32> -> vector<16x128xf32>
    %46 = arith.maximumf %42, %45 : vector<16x128xf32>
    %47 = arith.truncf %46 : vector<16x128xf32> to vector<16x128xbf16>
    %c0_36 = arith.constant 0 : index
    %c0_37 = arith.constant 0 : index
    %48 = vector.load %arg5[%c0_36, %c0_37] : memref<16x128xbf16, #tpu.memory_space<vmem>>, vector<16x128xbf16>
    tpu.vector_store %arg5[%c0_36, %c0_37], %47 {strides = array<i32>} : memref<16x128xbf16, #tpu.memory_space<vmem>>, vector<16x128xbf16>,
    return
  }
}

module attributes {stable_mosaic.version = 11 : i64} {
  func.func @_block_kernel(%arg0: memref<16x128xbf16, #tpu.memory_space<vmem>>, %arg1: memref<9x16x16xbf16, #tpu.memory_space<vmem>>, %arg2: memref<16x1xf32, #tpu.memory_space<vmem>>, %arg3: memref<16x1xf32, #tpu.memory_space<vmem>>, %arg4: memref<9x16x16xbf16, #tpu.memory_space<vmem>>, %arg5: memref<16x1xf32, #tpu.memory_space<vmem>>, %arg6: memref<16x1xf32, #tpu.memory_space<vmem>>, %arg7: memref<9x128x128xbf16, #tpu.memory_space<vmem>>, %arg8: memref<16x128xbf16, #tpu.memory_space<vmem>>) attributes {dimension_semantics = [], scalar_prefetch = 0 : i64, scratch_operands = 0 : i64, tpu.core_type = #tpu.core_type<tc>} {
    %c0 = arith.constant 0 : index
    %c0_0 = arith.constant 0 : index
    %0 = vector.load %arg0[%c0, %c0_0] : memref<16x128xbf16, #tpu.memory_space<vmem>>, vector<16x128xbf16>
    %cst = arith.constant 0.000000e+00 : f32
    %1 = vector.broadcast %cst : f32 to vector<16x128xf32>
    %c0_1 = arith.constant 0 : index
    %c0_2 = arith.constant 0 : index
    %c0_3 = arith.constant 0 : index
    %2 = vector.load %arg7[%c0_1, %c0_2, %c0_3] : memref<9x128x128xbf16, #tpu.memory_space<vmem>>, vector<1x128x128xbf16>
    %3 = vector.shape_cast %2 : vector<1x128x128xbf16> to vector<128x128xbf16>
    %cst_4 = arith.constant dense<0.000000e+00> : vector<16x128xf32>
    %4 = tpu.matmul %0, %3, %cst_4 {dimension_numbers = #tpu.dot_dimension_numbers<[1], [0], [0], [1], [0, 0, 1, 1], [], []>} : vector<16x128xbf16>, vector<128x128xbf16>, vector<16x128xf32> -> vector<16x128xf32>
    %c0_5 = arith.constant 0 : index
    %c0_6 = arith.constant 0 : index
    %c0_7 = arith.constant 0 : index
    %5 = vector.load %arg1[%c0_5, %c0_6, %c0_7] : memref<9x16x16xbf16, #tpu.memory_space<vmem>>, vector<1x16x16xbf16>
    %6 = vector.shape_cast %5 : vector<1x16x16xbf16> to vector<16x16xbf16>
    %7 = arith.truncf %4 : vector<16x128xf32> to vector<16x128xbf16>
    %cst_8 = arith.constant dense<0.000000e+00> : vector<16x128xf32>
    %8 = tpu.matmul %6, %7, %cst_8 {dimension_numbers = #tpu.dot_dimension_numbers<[1], [0], [0], [1], [0, 0, 1, 1], [], []>} : vector<16x16xbf16>, vector<16x128xbf16>, vector<16x128xf32> -> vector<16x128xf32>
    %9 = arith.addf %1, %8 : vector<16x128xf32>
    %c1 = arith.constant 1 : index
    %c0_9 = arith.constant 0 : index
    %c0_10 = arith.constant 0 : index
    %10 = vector.load %arg7[%c1, %c0_9, %c0_10] : memref<9x128x128xbf16, #tpu.memory_space<vmem>>, vector<1x128x128xbf16>
    %11 = vector.shape_cast %10 : vector<1x128x128xbf16> to vector<128x128xbf16>
    %cst_11 = arith.constant dense<0.000000e+00> : vector<16x128xf32>
    %12 = tpu.matmul %0, %11, %cst_11 {dimension_numbers = #tpu.dot_dimension_numbers<[1], [0], [0], [1], [0, 0, 1, 1], [], []>} : vector<16x128xbf16>, vector<128x128xbf16>, vector<16x128xf32> -> vector<16x128xf32>
    %c1_12 = arith.constant 1 : index
    %c0_13 = arith.constant 0 : index
    %c0_14 = arith.constant 0 : index
    %13 = vector.load %arg1[%c1_12, %c0_13, %c0_14] : memref<9x16x16xbf16, #tpu.memory_space<vmem>>, vector<1x16x16xbf16>
    %14 = vector.shape_cast %13 : vector<1x16x16xbf16> to vector<16x16xbf16>
    %15 = arith.truncf %12 : vector<16x128xf32> to vector<16x128xbf16>
    %cst_15 = arith.constant dense<0.000000e+00> : vector<16x128xf32>
    %16 = tpu.matmul %14, %15, %cst_15 {dimension_numbers = #tpu.dot_dimension_numbers<[1], [0], [0], [1], [0, 0, 1, 1], [], []>} : vector<16x16xbf16>, vector<16x128xbf16>, vector<16x128xf32> -> vector<16x128xf32>
    %17 = arith.addf %9, %16 : vector<16x128xf32>
    %c2 = arith.constant 2 : index
    %c0_16 = arith.constant 0 : index
    %c0_17 = arith.constant 0 : index
    %18 = vector.load %arg7[%c2, %c0_16, %c0_17] : memref<9x128x128xbf16, #tpu.memory_space<vmem>>, vector<1x128x128xbf16>
    %19 = vector.shape_cast %18 : vector<1x128x128xbf16> to vector<128x128xbf16>
    %cst_18 = arith.constant dense<0.000000e+00> : vector<16x128xf32>
    %20 = tpu.matmul %0, %19, %cst_18 {dimension_numbers = #tpu.dot_dimension_numbers<[1], [0], [0], [1], [0, 0, 1, 1], [], []>} : vector<16x128xbf16>, vector<128x128xbf16>, vector<16x128xf32> -> vector<16x128xf32>
    %c2_19 = arith.constant 2 : index
    %c0_20 = arith.constant 0 : index
    %c0_21 = arith.constant 0 : index
    %21 = vector.load %arg1[%c2_19, %c0_20, %c0_21] : memref<9x16x16xbf16, #tpu.memory_space<vmem>>, vector<1x16x16xbf16>
    %22 = vector.shape_cast %21 : vector<1x16x16xbf16> to vector<16x16xbf16>
    %23 = arith.truncf %20 : vector<16x128xf32> to vector<16x128xbf16>
    %cst_22 = arith.constant dense<0.000000e+00> : vector<16x128xf32>
    %24 = tpu.matmul %22, %23, %cst_22 {dimension_numbers = #tpu.dot_dimension_numbers<[1], [0], [0], [1], [0, 0, 1, 1], [], []>} : vector<16x16xbf16>, vector<16x128xbf16>, vector<16x128xf32> -> vector<16x128xf32>
    %25 = arith.addf %17, %24 : vector<16x128xf32>
    %c3 = arith.constant 3 : index
    %c0_23 = arith.constant 0 : index
    %c0_24 = arith.constant 0 : index
    %26 = vector.load %arg7[%c3, %c0_23, %c0_24] : memref<9x128x128xbf16, #tpu.memory_space<vmem>>, vector<1x128x128xbf16>
    %27 = vector.shape_cast %26 : vector<1x128x128xbf16> to vector<128x128xbf16>
    %cst_25 = arith.constant dense<0.000000e+00> : vector<16x128xf32>
    %28 = tpu.matmul %0, %27, %cst_25 {dimension_numbers = #tpu.dot_dimension_numbers<[1], [0], [0], [1], [0, 0, 1, 1], [], []>} : vector<16x128xbf16>, vector<128x128xbf16>, vector<16x128xf32> -> vector<16x128xf32>
    %c3_26 = arith.constant 3 : index
    %c0_27 = arith.constant 0 : index
    %c0_28 = arith.constant 0 : index
    %29 = vector.load %arg1[%c3_26, %c0_27, %c0_28] : memref<9x16x16xbf16, #tpu.memory_space<vmem>>, vector<1x16x16xbf16>
    %30 = vector.shape_cast %29 : vector<1x16x16xbf16> to vector<16x16xbf16>
    %31 = arith.truncf %28 : vector<16x128xf32> to vector<16x128xbf16>
    %cst_29 = arith.constant dense<0.000000e+00> : vector<16x128xf32>
    %32 = tpu.matmul %30, %31, %cst_29 {dimension_numbers = #tpu.dot_dimension_numbers<[1], [0], [0], [1], [0, 0, 1, 1], [], []>} : vector<16x16xbf16>, vector<16x128xbf16>, vector<16x128xf32> -> vector<16x128xf32>
    %33 = arith.addf %25, %32 : vector<16x128xf32>
    %c4 = arith.constant 4 : index
    %c0_30 = arith.constant 0 : index
    %c0_31 = arith.constant 0 : index
    %34 = vector.load %arg7[%c4, %c0_30, %c0_31] : memref<9x128x128xbf16, #tpu.memory_space<vmem>>, vector<1x128x128xbf16>
    %35 = vector.shape_cast %34 : vector<1x128x128xbf16> to vector<128x128xbf16>
    %cst_32 = arith.constant dense<0.000000e+00> : vector<16x128xf32>
    %36 = tpu.matmul %0, %35, %cst_32 {dimension_numbers = #tpu.dot_dimension_numbers<[1], [0], [0], [1], [0, 0, 1, 1], [], []>} : vector<16x128xbf16>, vector<128x128xbf16>, vector<16x128xf32> -> vector<16x128xf32>
    %c4_33 = arith.constant 4 : index
    %c0_34 = arith.constant 0 : index
    %c0_35 = arith.constant 0 : index
    %37 = vector.load %arg1[%c4_33, %c0_34, %c0_35] : memref<9x16x16xbf16, #tpu.memory_space<vmem>>, vector<1x16x16xbf16>
    %38 = vector.shape_cast %37 : vector<1x16x16xbf16> to vector<16x16xbf16>
    %39 = arith.truncf %36 : vector<16x128xf32> to vector<16x128xbf16>
    %cst_36 = arith.constant dense<0.000000e+00> : vector<16x128xf32>
    %40 = tpu.matmul %38, %39, %cst_36 {dimension_numbers = #tpu.dot_dimension_numbers<[1], [0], [0], [1], [0, 0, 1, 1], [], []>} : vector<16x16xbf16>, vector<16x128xbf16>, vector<16x128xf32> -> vector<16x128xf32>
    %41 = arith.addf %33, %40 : vector<16x128xf32>
    %c5 = arith.constant 5 : index
    %c0_37 = arith.constant 0 : index
    %c0_38 = arith.constant 0 : index
    %42 = vector.load %arg7[%c5, %c0_37, %c0_38] : memref<9x128x128xbf16, #tpu.memory_space<vmem>>, vector<1x128x128xbf16>
    %43 = vector.shape_cast %42 : vector<1x128x128xbf16> to vector<128x128xbf16>
    %cst_39 = arith.constant dense<0.000000e+00> : vector<16x128xf32>
    %44 = tpu.matmul %0, %43, %cst_39 {dimension_numbers = #tpu.dot_dimension_numbers<[1], [0], [0], [1], [0, 0, 1, 1], [], []>} : vector<16x128xbf16>, vector<128x128xbf16>, vector<16x128xf32> -> vector<16x128xf32>
    %c5_40 = arith.constant 5 : index
    %c0_41 = arith.constant 0 : index
    %c0_42 = arith.constant 0 : index
    %45 = vector.load %arg1[%c5_40, %c0_41, %c0_42] : memref<9x16x16xbf16, #tpu.memory_space<vmem>>, vector<1x16x16xbf16>
    %46 = vector.shape_cast %45 : vector<1x16x16xbf16> to vector<16x16xbf16>
    %47 = arith.truncf %44 : vector<16x128xf32> to vector<16x128xbf16>
    %cst_43 = arith.constant dense<0.000000e+00> : vector<16x128xf32>
    %48 = tpu.matmul %46, %47, %cst_43 {dimension_numbers = #tpu.dot_dimension_numbers<[1], [0], [0], [1], [0, 0, 1, 1], [], []>} : vector<16x16xbf16>, vector<16x128xbf16>, vector<16x128xf32> -> vector<16x128xf32>
    %49 = arith.addf %41, %48 : vector<16x128xf32>
    %c6 = arith.constant 6 : index
    %c0_44 = arith.constant 0 : index
    %c0_45 = arith.constant 0 : index
    %50 = vector.load %arg7[%c6, %c0_44, %c0_45] : memref<9x128x128xbf16, #tpu.memory_space<vmem>>, vector<1x128x128xbf16>
    %51 = vector.shape_cast %50 : vector<1x128x128xbf16> to vector<128x128xbf16>
    %cst_46 = arith.constant dense<0.000000e+00> : vector<16x128xf32>
    %52 = tpu.matmul %0, %51, %cst_46 {dimension_numbers = #tpu.dot_dimension_numbers<[1], [0], [0], [1], [0, 0, 1, 1], [], []>} : vector<16x128xbf16>, vector<128x128xbf16>, vector<16x128xf32> -> vector<16x128xf32>
    %c6_47 = arith.constant 6 : index
    %c0_48 = arith.constant 0 : index
    %c0_49 = arith.constant 0 : index
    %53 = vector.load %arg1[%c6_47, %c0_48, %c0_49] : memref<9x16x16xbf16, #tpu.memory_space<vmem>>, vector<1x16x16xbf16>
    %54 = vector.shape_cast %53 : vector<1x16x16xbf16> to vector<16x16xbf16>
    %55 = arith.truncf %52 : vector<16x128xf32> to vector<16x128xbf16>
    %cst_50 = arith.constant dense<0.000000e+00> : vector<16x128xf32>
    %56 = tpu.matmul %54, %55, %cst_50 {dimension_numbers = #tpu.dot_dimension_numbers<[1], [0], [0], [1], [0, 0, 1, 1], [], []>} : vector<16x16xbf16>, vector<16x128xbf16>, vector<16x128xf32> -> vector<16x128xf32>
    %57 = arith.addf %49, %56 : vector<16x128xf32>
    %c7 = arith.constant 7 : index
    %c0_51 = arith.constant 0 : index
    %c0_52 = arith.constant 0 : index
    %58 = vector.load %arg7[%c7, %c0_51, %c0_52] : memref<9x128x128xbf16, #tpu.memory_space<vmem>>, vector<1x128x128xbf16>
    %59 = vector.shape_cast %58 : vector<1x128x128xbf16> to vector<128x128xbf16>
    %cst_53 = arith.constant dense<0.000000e+00> : vector<16x128xf32>
    %60 = tpu.matmul %0, %59, %cst_53 {dimension_numbers = #tpu.dot_dimension_numbers<[1], [0], [0], [1], [0, 0, 1, 1], [], []>} : vector<16x128xbf16>, vector<128x128xbf16>, vector<16x128xf32> -> vector<16x128xf32>
    %c7_54 = arith.constant 7 : index
    %c0_55 = arith.constant 0 : index
    %c0_56 = arith.constant 0 : index
    %61 = vector.load %arg1[%c7_54, %c0_55, %c0_56] : memref<9x16x16xbf16, #tpu.memory_space<vmem>>, vector<1x16x16xbf16>
    %62 = vector.shape_cast %61 : vector<1x16x16xbf16> to vector<16x16xbf16>
    %63 = arith.truncf %60 : vector<16x128xf32> to vector<16x128xbf16>
    %cst_57 = arith.constant dense<0.000000e+00> : vector<16x128xf32>
    %64 = tpu.matmul %62, %63, %cst_57 {dimension_numbers = #tpu.dot_dimension_numbers<[1], [0], [0], [1], [0, 0, 1, 1], [], []>} : vector<16x16xbf16>, vector<16x128xbf16>, vector<16x128xf32> -> vector<16x128xf32>
    %65 = arith.addf %57, %64 : vector<16x128xf32>
    %c8 = arith.constant 8 : index
    %c0_58 = arith.constant 0 : index
    %c0_59 = arith.constant 0 : index
    %66 = vector.load %arg7[%c8, %c0_58, %c0_59] : memref<9x128x128xbf16, #tpu.memory_space<vmem>>, vector<1x128x128xbf16>
    %67 = vector.shape_cast %66 : vector<1x128x128xbf16> to vector<128x128xbf16>
    %cst_60 = arith.constant dense<0.000000e+00> : vector<16x128xf32>
    %68 = tpu.matmul %0, %67, %cst_60 {dimension_numbers = #tpu.dot_dimension_numbers<[1], [0], [0], [1], [0, 0, 1, 1], [], []>} : vector<16x128xbf16>, vector<128x128xbf16>, vector<16x128xf32> -> vector<16x128xf32>
    %c8_61 = arith.constant 8 : index
    %c0_62 = arith.constant 0 : index
    %c0_63 = arith.constant 0 : index
    %69 = vector.load %arg1[%c8_61, %c0_62, %c0_63] : memref<9x16x16xbf16, #tpu.memory_space<vmem>>, vector<1x16x16xbf16>
    %70 = vector.shape_cast %69 : vector<1x16x16xbf16> to vector<16x16xbf16>
    %71 = arith.truncf %68 : vector<16x128xf32> to vector<16x128xbf16>
    %cst_64 = arith.constant dense<0.000000e+00> : vector<16x128xf32>
    %72 = tpu.matmul %70, %71, %cst_64 {dimension_numbers = #tpu.dot_dimension_numbers<[1], [0], [0], [1], [0, 0, 1, 1], [], []>} : vector<16x16xbf16>, vector<16x128xbf16>, vector<16x128xf32> -> vector<16x128xf32>
    %73 = arith.addf %65, %72 : vector<16x128xf32>
    %c0_65 = arith.constant 0 : index
    %c0_66 = arith.constant 0 : index
    %74 = vector.load %arg2[%c0_65, %c0_66] : memref<16x1xf32, #tpu.memory_space<vmem>>, vector<16x1xf32>
    %75 = vector.broadcast %74 : vector<16x1xf32> to vector<16x128xf32>
    %76 = arith.mulf %73, %75 : vector<16x128xf32>
    %c0_67 = arith.constant 0 : index
    %c0_68 = arith.constant 0 : index
    %77 = vector.load %arg3[%c0_67, %c0_68] : memref<16x1xf32, #tpu.memory_space<vmem>>, vector<16x1xf32>
    %78 = vector.broadcast %77 : vector<16x1xf32> to vector<16x128xf32>
    %79 = arith.addf %76, %78 : vector<16x128xf32>
    %cst_69 = arith.constant 0.000000e+00 : f32
    %80 = vector.broadcast %cst_69 : f32 to vector<16x128xf32>
    %81 = arith.maximumf %79, %80 : vector<16x128xf32>
    %82 = arith.truncf %81 : vector<16x128xf32> to vector<16x128xbf16>
    %cst_70 = arith.constant 0.000000e+00 : f32
    %83 = vector.broadcast %cst_70 : f32 to vector<16x128xf32>
    %c0_71 = arith.constant 0 : index
    %c0_72 = arith.constant 0 : index
    %c0_73 = arith.constant 0 : index
    %84 = vector.load %arg7[%c0_71, %c0_72, %c0_73] : memref<9x128x128xbf16, #tpu.memory_space<vmem>>, vector<1x128x128xbf16>
    %85 = vector.shape_cast %84 : vector<1x128x128xbf16> to vector<128x128xbf16>
    %cst_74 = arith.constant dense<0.000000e+00> : vector<16x128xf32>
    %86 = tpu.matmul %82, %85, %cst_74 {dimension_numbers = #tpu.dot_dimension_numbers<[1], [0], [0], [1], [0, 0, 1, 1], [], []>} : vector<16x128xbf16>, vector<128x128xbf16>, vector<16x128xf32> -> vector<16x128xf32>
    %c0_75 = arith.constant 0 : index
    %c0_76 = arith.constant 0 : index
    %c0_77 = arith.constant 0 : index
    %87 = vector.load %arg4[%c0_75, %c0_76, %c0_77] : memref<9x16x16xbf16, #tpu.memory_space<vmem>>, vector<1x16x16xbf16>
    %88 = vector.shape_cast %87 : vector<1x16x16xbf16> to vector<16x16xbf16>
    %89 = arith.truncf %86 : vector<16x128xf32> to vector<16x128xbf16>
    %cst_78 = arith.constant dense<0.000000e+00> : vector<16x128xf32>
    %90 = tpu.matmul %88, %89, %cst_78 {dimension_numbers = #tpu.dot_dimension_numbers<[1], [0], [0], [1], [0, 0, 1, 1], [], []>} : vector<16x16xbf16>, vector<16x128xbf16>, vector<16x128xf32> -> vector<16x128xf32>
    %91 = arith.addf %83, %90 : vector<16x128xf32>
    %c1_79 = arith.constant 1 : index
    %c0_80 = arith.constant 0 : index
    %c0_81 = arith.constant 0 : index
    %92 = vector.load %arg7[%c1_79, %c0_80, %c0_81] : memref<9x128x128xbf16, #tpu.memory_space<vmem>>, vector<1x128x128xbf16>
    %93 = vector.shape_cast %92 : vector<1x128x128xbf16> to vector<128x128xbf16>
    %cst_82 = arith.constant dense<0.000000e+00> : vector<16x128xf32>
    %94 = tpu.matmul %82, %93, %cst_82 {dimension_numbers = #tpu.dot_dimension_numbers<[1], [0], [0], [1], [0, 0, 1, 1], [], []>} : vector<16x128xbf16>, vector<128x128xbf16>, vector<16x128xf32> -> vector<16x128xf32>
    %c1_83 = arith.constant 1 : index
    %c0_84 = arith.constant 0 : index
    %c0_85 = arith.constant 0 : index
    %95 = vector.load %arg4[%c1_83, %c0_84, %c0_85] : memref<9x16x16xbf16, #tpu.memory_space<vmem>>, vector<1x16x16xbf16>
    %96 = vector.shape_cast %95 : vector<1x16x16xbf16> to vector<16x16xbf16>
    %97 = arith.truncf %94 : vector<16x128xf32> to vector<16x128xbf16>
    %cst_86 = arith.constant dense<0.000000e+00> : vector<16x128xf32>
    %98 = tpu.matmul %96, %97, %cst_86 {dimension_numbers = #tpu.dot_dimension_numbers<[1], [0], [0], [1], [0, 0, 1, 1], [], []>} : vector<16x16xbf16>, vector<16x128xbf16>, vector<16x128xf32> -> vector<16x128xf32>
    %99 = arith.addf %91, %98 : vector<16x128xf32>
    %c2_87 = arith.constant 2 : index
    %c0_88 = arith.constant 0 : index
    %c0_89 = arith.constant 0 : index
    %100 = vector.load %arg7[%c2_87, %c0_88, %c0_89] : memref<9x128x128xbf16, #tpu.memory_space<vmem>>, vector<1x128x128xbf16>
    %101 = vector.shape_cast %100 : vector<1x128x128xbf16> to vector<128x128xbf16>
    %cst_90 = arith.constant dense<0.000000e+00> : vector<16x128xf32>
    %102 = tpu.matmul %82, %101, %cst_90 {dimension_numbers = #tpu.dot_dimension_numbers<[1], [0], [0], [1], [0, 0, 1, 1], [], []>} : vector<16x128xbf16>, vector<128x128xbf16>, vector<16x128xf32> -> vector<16x128xf32>
    %c2_91 = arith.constant 2 : index
    %c0_92 = arith.constant 0 : index
    %c0_93 = arith.constant 0 : index
    %103 = vector.load %arg4[%c2_91, %c0_92, %c0_93] : memref<9x16x16xbf16, #tpu.memory_space<vmem>>, vector<1x16x16xbf16>
    %104 = vector.shape_cast %103 : vector<1x16x16xbf16> to vector<16x16xbf16>
    %105 = arith.truncf %102 : vector<16x128xf32> to vector<16x128xbf16>
    %cst_94 = arith.constant dense<0.000000e+00> : vector<16x128xf32>
    %106 = tpu.matmul %104, %105, %cst_94 {dimension_numbers = #tpu.dot_dimension_numbers<[1], [0], [0], [1], [0, 0, 1, 1], [], []>} : vector<16x16xbf16>, vector<16x128xbf16>, vector<16x128xf32> -> vector<16x128xf32>
    %107 = arith.addf %99, %106 : vector<16x128xf32>
    %c3_95 = arith.constant 3 : index
    %c0_96 = arith.constant 0 : index
    %c0_97 = arith.constant 0 : index
    %108 = vector.load %arg7[%c3_95, %c0_96, %c0_97] : memref<9x128x128xbf16, #tpu.memory_space<vmem>>, vector<1x128x128xbf16>
    %109 = vector.shape_cast %108 : vector<1x128x128xbf16> to vector<128x128xbf16>
    %cst_98 = arith.constant dense<0.000000e+00> : vector<16x128xf32>
    %110 = tpu.matmul %82, %109, %cst_98 {dimension_numbers = #tpu.dot_dimension_numbers<[1], [0], [0], [1], [0, 0, 1, 1], [], []>} : vector<16x128xbf16>, vector<128x128xbf16>, vector<16x128xf32> -> vector<16x128xf32>
    %c3_99 = arith.constant 3 : index
    %c0_100 = arith.constant 0 : index
    %c0_101 = arith.constant 0 : index
    %111 = vector.load %arg4[%c3_99, %c0_100, %c0_101] : memref<9x16x16xbf16, #tpu.memory_space<vmem>>, vector<1x16x16xbf16>
    %112 = vector.shape_cast %111 : vector<1x16x16xbf16> to vector<16x16xbf16>
    %113 = arith.truncf %110 : vector<16x128xf32> to vector<16x128xbf16>
    %cst_102 = arith.constant dense<0.000000e+00> : vector<16x128xf32>
    %114 = tpu.matmul %112, %113, %cst_102 {dimension_numbers = #tpu.dot_dimension_numbers<[1], [0], [0], [1], [0, 0, 1, 1], [], []>} : vector<16x16xbf16>, vector<16x128xbf16>, vector<16x128xf32> -> vector<16x128xf32>
    %115 = arith.addf %107, %114 : vector<16x128xf32>
    %c4_103 = arith.constant 4 : index
    %c0_104 = arith.constant 0 : index
    %c0_105 = arith.constant 0 : index
    %116 = vector.load %arg7[%c4_103, %c0_104, %c0_105] : memref<9x128x128xbf16, #tpu.memory_space<vmem>>, vector<1x128x128xbf16>
    %117 = vector.shape_cast %116 : vector<1x128x128xbf16> to vector<128x128xbf16>
    %cst_106 = arith.constant dense<0.000000e+00> : vector<16x128xf32>
    %118 = tpu.matmul %82, %117, %cst_106 {dimension_numbers = #tpu.dot_dimension_numbers<[1], [0], [0], [1], [0, 0, 1, 1], [], []>} : vector<16x128xbf16>, vector<128x128xbf16>, vector<16x128xf32> -> vector<16x128xf32>
    %c4_107 = arith.constant 4 : index
    %c0_108 = arith.constant 0 : index
    %c0_109 = arith.constant 0 : index
    %119 = vector.load %arg4[%c4_107, %c0_108, %c0_109] : memref<9x16x16xbf16, #tpu.memory_space<vmem>>, vector<1x16x16xbf16>
    %120 = vector.shape_cast %119 : vector<1x16x16xbf16> to vector<16x16xbf16>
    %121 = arith.truncf %118 : vector<16x128xf32> to vector<16x128xbf16>
    %cst_110 = arith.constant dense<0.000000e+00> : vector<16x128xf32>
    %122 = tpu.matmul %120, %121, %cst_110 {dimension_numbers = #tpu.dot_dimension_numbers<[1], [0], [0], [1], [0, 0, 1, 1], [], []>} : vector<16x16xbf16>, vector<16x128xbf16>, vector<16x128xf32> -> vector<16x128xf32>
    %123 = arith.addf %115, %122 : vector<16x128xf32>
    %c5_111 = arith.constant 5 : index
    %c0_112 = arith.constant 0 : index
    %c0_113 = arith.constant 0 : index
    %124 = vector.load %arg7[%c5_111, %c0_112, %c0_113] : memref<9x128x128xbf16, #tpu.memory_space<vmem>>, vector<1x128x128xbf16>
    %125 = vector.shape_cast %124 : vector<1x128x128xbf16> to vector<128x128xbf16>
    %cst_114 = arith.constant dense<0.000000e+00> : vector<16x128xf32>
    %126 = tpu.matmul %82, %125, %cst_114 {dimension_numbers = #tpu.dot_dimension_numbers<[1], [0], [0], [1], [0, 0, 1, 1], [], []>} : vector<16x128xbf16>, vector<128x128xbf16>, vector<16x128xf32> -> vector<16x128xf32>
    %c5_115 = arith.constant 5 : index
    %c0_116 = arith.constant 0 : index
    %c0_117 = arith.constant 0 : index
    %127 = vector.load %arg4[%c5_115, %c0_116, %c0_117] : memref<9x16x16xbf16, #tpu.memory_space<vmem>>, vector<1x16x16xbf16>
    %128 = vector.shape_cast %127 : vector<1x16x16xbf16> to vector<16x16xbf16>
    %129 = arith.truncf %126 : vector<16x128xf32> to vector<16x128xbf16>
    %cst_118 = arith.constant dense<0.000000e+00> : vector<16x128xf32>
    %130 = tpu.matmul %128, %129, %cst_118 {dimension_numbers = #tpu.dot_dimension_numbers<[1], [0], [0], [1], [0, 0, 1, 1], [], []>} : vector<16x16xbf16>, vector<16x128xbf16>, vector<16x128xf32> -> vector<16x128xf32>
    %131 = arith.addf %123, %130 : vector<16x128xf32>
    %c6_119 = arith.constant 6 : index
    %c0_120 = arith.constant 0 : index
    %c0_121 = arith.constant 0 : index
    %132 = vector.load %arg7[%c6_119, %c0_120, %c0_121] : memref<9x128x128xbf16, #tpu.memory_space<vmem>>, vector<1x128x128xbf16>
    %133 = vector.shape_cast %132 : vector<1x128x128xbf16> to vector<128x128xbf16>
    %cst_122 = arith.constant dense<0.000000e+00> : vector<16x128xf32>
    %134 = tpu.matmul %82, %133, %cst_122 {dimension_numbers = #tpu.dot_dimension_numbers<[1], [0], [0], [1], [0, 0, 1, 1], [], []>} : vector<16x128xbf16>, vector<128x128xbf16>, vector<16x128xf32> -> vector<16x128xf32>
    %c6_123 = arith.constant 6 : index
    %c0_124 = arith.constant 0 : index
    %c0_125 = arith.constant 0 : index
    %135 = vector.load %arg4[%c6_123, %c0_124, %c0_125] : memref<9x16x16xbf16, #tpu.memory_space<vmem>>, vector<1x16x16xbf16>
    %136 = vector.shape_cast %135 : vector<1x16x16xbf16> to vector<16x16xbf16>
    %137 = arith.truncf %134 : vector<16x128xf32> to vector<16x128xbf16>
    %cst_126 = arith.constant dense<0.000000e+00> : vector<16x128xf32>
    %138 = tpu.matmul %136, %137, %cst_126 {dimension_numbers = #tpu.dot_dimension_numbers<[1], [0], [0], [1], [0, 0, 1, 1], [], []>} : vector<16x16xbf16>, vector<16x128xbf16>, vector<16x128xf32> -> vector<16x128xf32>
    %139 = arith.addf %131, %138 : vector<16x128xf32>
    %c7_127 = arith.constant 7 : index
    %c0_128 = arith.constant 0 : index
    %c0_129 = arith.constant 0 : index
    %140 = vector.load %arg7[%c7_127, %c0_128, %c0_129] : memref<9x128x128xbf16, #tpu.memory_space<vmem>>, vector<1x128x128xbf16>
    %141 = vector.shape_cast %140 : vector<1x128x128xbf16> to vector<128x128xbf16>
    %cst_130 = arith.constant dense<0.000000e+00> : vector<16x128xf32>
    %142 = tpu.matmul %82, %141, %cst_130 {dimension_numbers = #tpu.dot_dimension_numbers<[1], [0], [0], [1], [0, 0, 1, 1], [], []>} : vector<16x128xbf16>, vector<128x128xbf16>, vector<16x128xf32> -> vector<16x128xf32>
    %c7_131 = arith.constant 7 : index
    %c0_132 = arith.constant 0 : index
    %c0_133 = arith.constant 0 : index
    %143 = vector.load %arg4[%c7_131, %c0_132, %c0_133] : memref<9x16x16xbf16, #tpu.memory_space<vmem>>, vector<1x16x16xbf16>
    %144 = vector.shape_cast %143 : vector<1x16x16xbf16> to vector<16x16xbf16>
    %145 = arith.truncf %142 : vector<16x128xf32> to vector<16x128xbf16>
    %cst_134 = arith.constant dense<0.000000e+00> : vector<16x128xf32>
    %146 = tpu.matmul %144, %145, %cst_134 {dimension_numbers = #tpu.dot_dimension_numbers<[1], [0], [0], [1], [0, 0, 1, 1], [], []>} : vector<16x16xbf16>, vector<16x128xbf16>, vector<16x128xf32> -> vector<16x128xf32>
    %147 = arith.addf %139, %146 : vector<16x128xf32>
    %c8_135 = arith.constant 8 : index
    %c0_136 = arith.constant 0 : index
    %c0_137 = arith.constant 0 : index
    %148 = vector.load %arg7[%c8_135, %c0_136, %c0_137] : memref<9x128x128xbf16, #tpu.memory_space<vmem>>, vector<1x128x128xbf16>
    %149 = vector.shape_cast %148 : vector<1x128x128xbf16> to vector<128x128xbf16>
    %cst_138 = arith.constant dense<0.000000e+00> : vector<16x128xf32>
    %150 = tpu.matmul %82, %149, %cst_138 {dimension_numbers = #tpu.dot_dimension_numbers<[1], [0], [0], [1], [0, 0, 1, 1], [], []>} : vector<16x128xbf16>, vector<128x128xbf16>, vector<16x128xf32> -> vector<16x128xf32>
    %c8_139 = arith.constant 8 : index
    %c0_140 = arith.constant 0 : index
    %c0_141 = arith.constant 0 : index
    %151 = vector.load %arg4[%c8_139, %c0_140, %c0_141] : memref<9x16x16xbf16, #tpu.memory_space<vmem>>, vector<1x16x16xbf16>
    %152 = vector.shape_cast %151 : vector<1x16x16xbf16> to vector<16x16xbf16>
    %153 = arith.truncf %150 : vector<16x128xf32> to vector<16x128xbf16>
    %cst_142 = arith.constant dense<0.000000e+00> : vector<16x128xf32>
    %154 = tpu.matmul %152, %153, %cst_142 {dimension_numbers = #tpu.dot_dimension_numbers<[1], [0], [0], [1], [0, 0, 1, 1], [], []>} : vector<16x16xbf16>, vector<16x128xbf16>, vector<16x128xf32> -> vector<16x128xf32>
    %155 = arith.addf %147, %154 : vector<16x128xf32>
    %c0_143 = arith.constant 0 : index
    %c0_144 = arith.constant 0 : index
    %156 = vector.load %arg5[%c0_143, %c0_144] : memref<16x1xf32, #tpu.memory_space<vmem>>, vector<16x1xf32>
    %157 = vector.broadcast %156 : vector<16x1xf32> to vector<16x128xf32>
    %158 = arith.mulf %155, %157 : vector<16x128xf32>
    %c0_145 = arith.constant 0 : index
    %c0_146 = arith.constant 0 : index
    %159 = vector.load %arg6[%c0_145, %c0_146] : memref<16x1xf32, #tpu.memory_space<vmem>>, vector<16x1xf32>
    %160 = vector.broadcast %159 : vector<16x1xf32> to vector<16x128xf32>
    %161 = arith.addf %158, %160 : vector<16x128xf32>
    %162 = arith.extf %0 : vector<16x128xbf16> to vector<16x128xf32>
    %163 = arith.addf %161, %162 : vector<16x128xf32>
    %cst_147 = arith.constant 0.000000e+00 : f32
    %164 = vector.broadcast %cst_147 : f32 to vector<16x128xf32>
    %165 = arith.maximumf %163, %164 : vector<16x128xf32>
    %166 = arith.truncf %165 : vector<16x128xf32> to vector<16x128xbf16>
    %c0_148 = arith.constant 0 : index
    %c0_149 = arith.constant 0 : index
    %167 = vector.load %arg8[%c0_148, %c0_149] : memref<16x128xbf16, #tpu.memory_space<vmem>>, vector<16x128xbf16>
    tpu.vector_store %arg8[%c0_148, %c0_149], %166 {strides = array<i32>} : memref<16x128xbf16, #tpu.memory_space<vmem>>, vector<16x128xbf16>,
    return
  }
}

module attributes {stable_mosaic.version = 11 : i64} {
  func.func @_block_down_kernel(%arg0: memref<16x128xbf16, #tpu.memory_space<vmem>>, %arg1: memref<9x32x16xbf16, #tpu.memory_space<vmem>>, %arg2: memref<32x1xf32, #tpu.memory_space<vmem>>, %arg3: memref<32x1xf32, #tpu.memory_space<vmem>>, %arg4: memref<9x32x32xbf16, #tpu.memory_space<vmem>>, %arg5: memref<32x1xf32, #tpu.memory_space<vmem>>, %arg6: memref<32x1xf32, #tpu.memory_space<vmem>>, %arg7: memref<32x16xbf16, #tpu.memory_space<vmem>>, %arg8: memref<32x1xf32, #tpu.memory_space<vmem>>, %arg9: memref<32x1xf32, #tpu.memory_space<vmem>>, %arg10: memref<9x128x32xbf16, #tpu.memory_space<vmem>>, %arg11: memref<128x32xbf16, #tpu.memory_space<vmem>>, %arg12: memref<9x32x32xbf16, #tpu.memory_space<vmem>>, %arg13: memref<32x32xbf16, #tpu.memory_space<vmem>>) attributes {dimension_semantics = [], scalar_prefetch = 0 : i64, scratch_operands = 0 : i64, tpu.core_type = #tpu.core_type<tc>} {
    %c0 = arith.constant 0 : index
    %c0_0 = arith.constant 0 : index
    %0 = vector.load %arg0[%c0, %c0_0] : memref<16x128xbf16, #tpu.memory_space<vmem>>, vector<16x128xbf16>
    %c0_1 = arith.constant 0 : index
    %c0_2 = arith.constant 0 : index
    %1 = vector.load %arg11[%c0_1, %c0_2] : memref<128x32xbf16, #tpu.memory_space<vmem>>, vector<128x32xbf16>
    %cst = arith.constant dense<0.000000e+00> : vector<16x32xf32>
    %2 = tpu.matmul %0, %1, %cst {dimension_numbers = #tpu.dot_dimension_numbers<[1], [0], [0], [1], [0, 0, 1, 1], [], []>} : vector<16x128xbf16>, vector<128x32xbf16>, vector<16x32xf32> -> vector<16x32xf32>
    %c0_3 = arith.constant 0 : index
    %c0_4 = arith.constant 0 : index
    %3 = vector.load %arg7[%c0_3, %c0_4] : memref<32x16xbf16, #tpu.memory_space<vmem>>, vector<32x16xbf16>
    %4 = arith.truncf %2 : vector<16x32xf32> to vector<16x32xbf16>
    %cst_5 = arith.constant dense<0.000000e+00> : vector<32x32xf32>
    %5 = tpu.matmul %3, %4, %cst_5 {dimension_numbers = #tpu.dot_dimension_numbers<[1], [0], [0], [1], [0, 0, 1, 1], [], []>} : vector<32x16xbf16>, vector<16x32xbf16>, vector<32x32xf32> -> vector<32x32xf32>
    %c0_6 = arith.constant 0 : index
    %c0_7 = arith.constant 0 : index
    %6 = vector.load %arg8[%c0_6, %c0_7] : memref<32x1xf32, #tpu.memory_space<vmem>>, vector<32x1xf32>
    %7 = vector.broadcast %6 : vector<32x1xf32> to vector<32x32xf32>
    %8 = arith.mulf %5, %7 : vector<32x32xf32>
    %c0_8 = arith.constant 0 : index
    %c0_9 = arith.constant 0 : index
    %9 = vector.load %arg9[%c0_8, %c0_9] : memref<32x1xf32, #tpu.memory_space<vmem>>, vector<32x1xf32>
    %10 = vector.broadcast %9 : vector<32x1xf32> to vector<32x32xf32>
    %11 = arith.addf %8, %10 : vector<32x32xf32>
    %cst_10 = arith.constant 0.000000e+00 : f32
    %12 = vector.broadcast %cst_10 : f32 to vector<32x32xf32>
    %c0_11 = arith.constant 0 : index
    %c0_12 = arith.constant 0 : index
    %c0_13 = arith.constant 0 : index
    %13 = vector.load %arg10[%c0_11, %c0_12, %c0_13] : memref<9x128x32xbf16, #tpu.memory_space<vmem>>, vector<1x128x32xbf16>
    %14 = vector.shape_cast %13 : vector<1x128x32xbf16> to vector<128x32xbf16>
    %cst_14 = arith.constant dense<0.000000e+00> : vector<16x32xf32>
    %15 = tpu.matmul %0, %14, %cst_14 {dimension_numbers = #tpu.dot_dimension_numbers<[1], [0], [0], [1], [0, 0, 1, 1], [], []>} : vector<16x128xbf16>, vector<128x32xbf16>, vector<16x32xf32> -> vector<16x32xf32>
    %c0_15 = arith.constant 0 : index
    %c0_16 = arith.constant 0 : index
    %c0_17 = arith.constant 0 : index
    %16 = vector.load %arg1[%c0_15, %c0_16, %c0_17] : memref<9x32x16xbf16, #tpu.memory_space<vmem>>, vector<1x32x16xbf16>
    %17 = vector.shape_cast %16 : vector<1x32x16xbf16> to vector<32x16xbf16>
    %18 = arith.truncf %15 : vector<16x32xf32> to vector<16x32xbf16>
    %cst_18 = arith.constant dense<0.000000e+00> : vector<32x32xf32>
    %19 = tpu.matmul %17, %18, %cst_18 {dimension_numbers = #tpu.dot_dimension_numbers<[1], [0], [0], [1], [0, 0, 1, 1], [], []>} : vector<32x16xbf16>, vector<16x32xbf16>, vector<32x32xf32> -> vector<32x32xf32>
    %20 = arith.addf %12, %19 : vector<32x32xf32>
    %c1 = arith.constant 1 : index
    %c0_19 = arith.constant 0 : index
    %c0_20 = arith.constant 0 : index
    %21 = vector.load %arg10[%c1, %c0_19, %c0_20] : memref<9x128x32xbf16, #tpu.memory_space<vmem>>, vector<1x128x32xbf16>
    %22 = vector.shape_cast %21 : vector<1x128x32xbf16> to vector<128x32xbf16>
    %cst_21 = arith.constant dense<0.000000e+00> : vector<16x32xf32>
    %23 = tpu.matmul %0, %22, %cst_21 {dimension_numbers = #tpu.dot_dimension_numbers<[1], [0], [0], [1], [0, 0, 1, 1], [], []>} : vector<16x128xbf16>, vector<128x32xbf16>, vector<16x32xf32> -> vector<16x32xf32>
    %c1_22 = arith.constant 1 : index
    %c0_23 = arith.constant 0 : index
    %c0_24 = arith.constant 0 : index
    %24 = vector.load %arg1[%c1_22, %c0_23, %c0_24] : memref<9x32x16xbf16, #tpu.memory_space<vmem>>, vector<1x32x16xbf16>
    %25 = vector.shape_cast %24 : vector<1x32x16xbf16> to vector<32x16xbf16>
    %26 = arith.truncf %23 : vector<16x32xf32> to vector<16x32xbf16>
    %cst_25 = arith.constant dense<0.000000e+00> : vector<32x32xf32>
    %27 = tpu.matmul %25, %26, %cst_25 {dimension_numbers = #tpu.dot_dimension_numbers<[1], [0], [0], [1], [0, 0, 1, 1], [], []>} : vector<32x16xbf16>, vector<16x32xbf16>, vector<32x32xf32> -> vector<32x32xf32>
    %28 = arith.addf %20, %27 : vector<32x32xf32>
    %c2 = arith.constant 2 : index
    %c0_26 = arith.constant 0 : index
    %c0_27 = arith.constant 0 : index
    %29 = vector.load %arg10[%c2, %c0_26, %c0_27] : memref<9x128x32xbf16, #tpu.memory_space<vmem>>, vector<1x128x32xbf16>
    %30 = vector.shape_cast %29 : vector<1x128x32xbf16> to vector<128x32xbf16>
    %cst_28 = arith.constant dense<0.000000e+00> : vector<16x32xf32>
    %31 = tpu.matmul %0, %30, %cst_28 {dimension_numbers = #tpu.dot_dimension_numbers<[1], [0], [0], [1], [0, 0, 1, 1], [], []>} : vector<16x128xbf16>, vector<128x32xbf16>, vector<16x32xf32> -> vector<16x32xf32>
    %c2_29 = arith.constant 2 : index
    %c0_30 = arith.constant 0 : index
    %c0_31 = arith.constant 0 : index
    %32 = vector.load %arg1[%c2_29, %c0_30, %c0_31] : memref<9x32x16xbf16, #tpu.memory_space<vmem>>, vector<1x32x16xbf16>
    %33 = vector.shape_cast %32 : vector<1x32x16xbf16> to vector<32x16xbf16>
    %34 = arith.truncf %31 : vector<16x32xf32> to vector<16x32xbf16>
    %cst_32 = arith.constant dense<0.000000e+00> : vector<32x32xf32>
    %35 = tpu.matmul %33, %34, %cst_32 {dimension_numbers = #tpu.dot_dimension_numbers<[1], [0], [0], [1], [0, 0, 1, 1], [], []>} : vector<32x16xbf16>, vector<16x32xbf16>, vector<32x32xf32> -> vector<32x32xf32>
    %36 = arith.addf %28, %35 : vector<32x32xf32>
    %c3 = arith.constant 3 : index
    %c0_33 = arith.constant 0 : index
    %c0_34 = arith.constant 0 : index
    %37 = vector.load %arg10[%c3, %c0_33, %c0_34] : memref<9x128x32xbf16, #tpu.memory_space<vmem>>, vector<1x128x32xbf16>
    %38 = vector.shape_cast %37 : vector<1x128x32xbf16> to vector<128x32xbf16>
    %cst_35 = arith.constant dense<0.000000e+00> : vector<16x32xf32>
    %39 = tpu.matmul %0, %38, %cst_35 {dimension_numbers = #tpu.dot_dimension_numbers<[1], [0], [0], [1], [0, 0, 1, 1], [], []>} : vector<16x128xbf16>, vector<128x32xbf16>, vector<16x32xf32> -> vector<16x32xf32>
    %c3_36 = arith.constant 3 : index
    %c0_37 = arith.constant 0 : index
    %c0_38 = arith.constant 0 : index
    %40 = vector.load %arg1[%c3_36, %c0_37, %c0_38] : memref<9x32x16xbf16, #tpu.memory_space<vmem>>, vector<1x32x16xbf16>
    %41 = vector.shape_cast %40 : vector<1x32x16xbf16> to vector<32x16xbf16>
    %42 = arith.truncf %39 : vector<16x32xf32> to vector<16x32xbf16>
    %cst_39 = arith.constant dense<0.000000e+00> : vector<32x32xf32>
    %43 = tpu.matmul %41, %42, %cst_39 {dimension_numbers = #tpu.dot_dimension_numbers<[1], [0], [0], [1], [0, 0, 1, 1], [], []>} : vector<32x16xbf16>, vector<16x32xbf16>, vector<32x32xf32> -> vector<32x32xf32>
    %44 = arith.addf %36, %43 : vector<32x32xf32>
    %c4 = arith.constant 4 : index
    %c0_40 = arith.constant 0 : index
    %c0_41 = arith.constant 0 : index
    %45 = vector.load %arg10[%c4, %c0_40, %c0_41] : memref<9x128x32xbf16, #tpu.memory_space<vmem>>, vector<1x128x32xbf16>
    %46 = vector.shape_cast %45 : vector<1x128x32xbf16> to vector<128x32xbf16>
    %cst_42 = arith.constant dense<0.000000e+00> : vector<16x32xf32>
    %47 = tpu.matmul %0, %46, %cst_42 {dimension_numbers = #tpu.dot_dimension_numbers<[1], [0], [0], [1], [0, 0, 1, 1], [], []>} : vector<16x128xbf16>, vector<128x32xbf16>, vector<16x32xf32> -> vector<16x32xf32>
    %c4_43 = arith.constant 4 : index
    %c0_44 = arith.constant 0 : index
    %c0_45 = arith.constant 0 : index
    %48 = vector.load %arg1[%c4_43, %c0_44, %c0_45] : memref<9x32x16xbf16, #tpu.memory_space<vmem>>, vector<1x32x16xbf16>
    %49 = vector.shape_cast %48 : vector<1x32x16xbf16> to vector<32x16xbf16>
    %50 = arith.truncf %47 : vector<16x32xf32> to vector<16x32xbf16>
    %cst_46 = arith.constant dense<0.000000e+00> : vector<32x32xf32>
    %51 = tpu.matmul %49, %50, %cst_46 {dimension_numbers = #tpu.dot_dimension_numbers<[1], [0], [0], [1], [0, 0, 1, 1], [], []>} : vector<32x16xbf16>, vector<16x32xbf16>, vector<32x32xf32> -> vector<32x32xf32>
    %52 = arith.addf %44, %51 : vector<32x32xf32>
    %c5 = arith.constant 5 : index
    %c0_47 = arith.constant 0 : index
    %c0_48 = arith.constant 0 : index
    %53 = vector.load %arg10[%c5, %c0_47, %c0_48] : memref<9x128x32xbf16, #tpu.memory_space<vmem>>, vector<1x128x32xbf16>
    %54 = vector.shape_cast %53 : vector<1x128x32xbf16> to vector<128x32xbf16>
    %cst_49 = arith.constant dense<0.000000e+00> : vector<16x32xf32>
    %55 = tpu.matmul %0, %54, %cst_49 {dimension_numbers = #tpu.dot_dimension_numbers<[1], [0], [0], [1], [0, 0, 1, 1], [], []>} : vector<16x128xbf16>, vector<128x32xbf16>, vector<16x32xf32> -> vector<16x32xf32>
    %c5_50 = arith.constant 5 : index
    %c0_51 = arith.constant 0 : index
    %c0_52 = arith.constant 0 : index
    %56 = vector.load %arg1[%c5_50, %c0_51, %c0_52] : memref<9x32x16xbf16, #tpu.memory_space<vmem>>, vector<1x32x16xbf16>
    %57 = vector.shape_cast %56 : vector<1x32x16xbf16> to vector<32x16xbf16>
    %58 = arith.truncf %55 : vector<16x32xf32> to vector<16x32xbf16>
    %cst_53 = arith.constant dense<0.000000e+00> : vector<32x32xf32>
    %59 = tpu.matmul %57, %58, %cst_53 {dimension_numbers = #tpu.dot_dimension_numbers<[1], [0], [0], [1], [0, 0, 1, 1], [], []>} : vector<32x16xbf16>, vector<16x32xbf16>, vector<32x32xf32> -> vector<32x32xf32>
    %60 = arith.addf %52, %59 : vector<32x32xf32>
    %c6 = arith.constant 6 : index
    %c0_54 = arith.constant 0 : index
    %c0_55 = arith.constant 0 : index
    %61 = vector.load %arg10[%c6, %c0_54, %c0_55] : memref<9x128x32xbf16, #tpu.memory_space<vmem>>, vector<1x128x32xbf16>
    %62 = vector.shape_cast %61 : vector<1x128x32xbf16> to vector<128x32xbf16>
    %cst_56 = arith.constant dense<0.000000e+00> : vector<16x32xf32>
    %63 = tpu.matmul %0, %62, %cst_56 {dimension_numbers = #tpu.dot_dimension_numbers<[1], [0], [0], [1], [0, 0, 1, 1], [], []>} : vector<16x128xbf16>, vector<128x32xbf16>, vector<16x32xf32> -> vector<16x32xf32>
    %c6_57 = arith.constant 6 : index
    %c0_58 = arith.constant 0 : index
    %c0_59 = arith.constant 0 : index
    %64 = vector.load %arg1[%c6_57, %c0_58, %c0_59] : memref<9x32x16xbf16, #tpu.memory_space<vmem>>, vector<1x32x16xbf16>
    %65 = vector.shape_cast %64 : vector<1x32x16xbf16> to vector<32x16xbf16>
    %66 = arith.truncf %63 : vector<16x32xf32> to vector<16x32xbf16>
    %cst_60 = arith.constant dense<0.000000e+00> : vector<32x32xf32>
    %67 = tpu.matmul %65, %66, %cst_60 {dimension_numbers = #tpu.dot_dimension_numbers<[1], [0], [0], [1], [0, 0, 1, 1], [], []>} : vector<32x16xbf16>, vector<16x32xbf16>, vector<32x32xf32> -> vector<32x32xf32>
    %68 = arith.addf %60, %67 : vector<32x32xf32>
    %c7 = arith.constant 7 : index
    %c0_61 = arith.constant 0 : index
    %c0_62 = arith.constant 0 : index
    %69 = vector.load %arg10[%c7, %c0_61, %c0_62] : memref<9x128x32xbf16, #tpu.memory_space<vmem>>, vector<1x128x32xbf16>
    %70 = vector.shape_cast %69 : vector<1x128x32xbf16> to vector<128x32xbf16>
    %cst_63 = arith.constant dense<0.000000e+00> : vector<16x32xf32>
    %71 = tpu.matmul %0, %70, %cst_63 {dimension_numbers = #tpu.dot_dimension_numbers<[1], [0], [0], [1], [0, 0, 1, 1], [], []>} : vector<16x128xbf16>, vector<128x32xbf16>, vector<16x32xf32> -> vector<16x32xf32>
    %c7_64 = arith.constant 7 : index
    %c0_65 = arith.constant 0 : index
    %c0_66 = arith.constant 0 : index
    %72 = vector.load %arg1[%c7_64, %c0_65, %c0_66] : memref<9x32x16xbf16, #tpu.memory_space<vmem>>, vector<1x32x16xbf16>
    %73 = vector.shape_cast %72 : vector<1x32x16xbf16> to vector<32x16xbf16>
    %74 = arith.truncf %71 : vector<16x32xf32> to vector<16x32xbf16>
    %cst_67 = arith.constant dense<0.000000e+00> : vector<32x32xf32>
    %75 = tpu.matmul %73, %74, %cst_67 {dimension_numbers = #tpu.dot_dimension_numbers<[1], [0], [0], [1], [0, 0, 1, 1], [], []>} : vector<32x16xbf16>, vector<16x32xbf16>, vector<32x32xf32> -> vector<32x32xf32>
    %76 = arith.addf %68, %75 : vector<32x32xf32>
    %c8 = arith.constant 8 : index
    %c0_68 = arith.constant 0 : index
    %c0_69 = arith.constant 0 : index
    %77 = vector.load %arg10[%c8, %c0_68, %c0_69] : memref<9x128x32xbf16, #tpu.memory_space<vmem>>, vector<1x128x32xbf16>
    %78 = vector.shape_cast %77 : vector<1x128x32xbf16> to vector<128x32xbf16>
    %cst_70 = arith.constant dense<0.000000e+00> : vector<16x32xf32>
    %79 = tpu.matmul %0, %78, %cst_70 {dimension_numbers = #tpu.dot_dimension_numbers<[1], [0], [0], [1], [0, 0, 1, 1], [], []>} : vector<16x128xbf16>, vector<128x32xbf16>, vector<16x32xf32> -> vector<16x32xf32>
    %c8_71 = arith.constant 8 : index
    %c0_72 = arith.constant 0 : index
    %c0_73 = arith.constant 0 : index
    %80 = vector.load %arg1[%c8_71, %c0_72, %c0_73] : memref<9x32x16xbf16, #tpu.memory_space<vmem>>, vector<1x32x16xbf16>
    %81 = vector.shape_cast %80 : vector<1x32x16xbf16> to vector<32x16xbf16>
    %82 = arith.truncf %79 : vector<16x32xf32> to vector<16x32xbf16>
    %cst_74 = arith.constant dense<0.000000e+00> : vector<32x32xf32>
    %83 = tpu.matmul %81, %82, %cst_74 {dimension_numbers = #tpu.dot_dimension_numbers<[1], [0], [0], [1], [0, 0, 1, 1], [], []>} : vector<32x16xbf16>, vector<16x32xbf16>, vector<32x32xf32> -> vector<32x32xf32>
    %84 = arith.addf %76, %83 : vector<32x32xf32>
    %c0_75 = arith.constant 0 : index
    %c0_76 = arith.constant 0 : index
    %85 = vector.load %arg2[%c0_75, %c0_76] : memref<32x1xf32, #tpu.memory_space<vmem>>, vector<32x1xf32>
    %86 = vector.broadcast %85 : vector<32x1xf32> to vector<32x32xf32>
    %87 = arith.mulf %84, %86 : vector<32x32xf32>
    %c0_77 = arith.constant 0 : index
    %c0_78 = arith.constant 0 : index
    %88 = vector.load %arg3[%c0_77, %c0_78] : memref<32x1xf32, #tpu.memory_space<vmem>>, vector<32x1xf32>
    %89 = vector.broadcast %88 : vector<32x1xf32> to vector<32x32xf32>
    %90 = arith.addf %87, %89 : vector<32x32xf32>
    %cst_79 = arith.constant 0.000000e+00 : f32
    %91 = vector.broadcast %cst_79 : f32 to vector<32x32xf32>
    %92 = arith.maximumf %90, %91 : vector<32x32xf32>
    %93 = arith.truncf %92 : vector<32x32xf32> to vector<32x32xbf16>
    %cst_80 = arith.constant 0.000000e+00 : f32
    %94 = vector.broadcast %cst_80 : f32 to vector<32x32xf32>
    %c0_81 = arith.constant 0 : index
    %c0_82 = arith.constant 0 : index
    %c0_83 = arith.constant 0 : index
    %95 = vector.load %arg12[%c0_81, %c0_82, %c0_83] : memref<9x32x32xbf16, #tpu.memory_space<vmem>>, vector<1x32x32xbf16>
    %96 = vector.shape_cast %95 : vector<1x32x32xbf16> to vector<32x32xbf16>
    %cst_84 = arith.constant dense<0.000000e+00> : vector<32x32xf32>
    %97 = tpu.matmul %93, %96, %cst_84 {dimension_numbers = #tpu.dot_dimension_numbers<[1], [0], [0], [1], [0, 0, 1, 1], [], []>} : vector<32x32xbf16>, vector<32x32xbf16>, vector<32x32xf32> -> vector<32x32xf32>
    %c0_85 = arith.constant 0 : index
    %c0_86 = arith.constant 0 : index
    %c0_87 = arith.constant 0 : index
    %98 = vector.load %arg4[%c0_85, %c0_86, %c0_87] : memref<9x32x32xbf16, #tpu.memory_space<vmem>>, vector<1x32x32xbf16>
    %99 = vector.shape_cast %98 : vector<1x32x32xbf16> to vector<32x32xbf16>
    %100 = arith.truncf %97 : vector<32x32xf32> to vector<32x32xbf16>
    %cst_88 = arith.constant dense<0.000000e+00> : vector<32x32xf32>
    %101 = tpu.matmul %99, %100, %cst_88 {dimension_numbers = #tpu.dot_dimension_numbers<[1], [0], [0], [1], [0, 0, 1, 1], [], []>} : vector<32x32xbf16>, vector<32x32xbf16>, vector<32x32xf32> -> vector<32x32xf32>
    %102 = arith.addf %94, %101 : vector<32x32xf32>
    %c1_89 = arith.constant 1 : index
    %c0_90 = arith.constant 0 : index
    %c0_91 = arith.constant 0 : index
    %103 = vector.load %arg12[%c1_89, %c0_90, %c0_91] : memref<9x32x32xbf16, #tpu.memory_space<vmem>>, vector<1x32x32xbf16>
    %104 = vector.shape_cast %103 : vector<1x32x32xbf16> to vector<32x32xbf16>
    %cst_92 = arith.constant dense<0.000000e+00> : vector<32x32xf32>
    %105 = tpu.matmul %93, %104, %cst_92 {dimension_numbers = #tpu.dot_dimension_numbers<[1], [0], [0], [1], [0, 0, 1, 1], [], []>} : vector<32x32xbf16>, vector<32x32xbf16>, vector<32x32xf32> -> vector<32x32xf32>
    %c1_93 = arith.constant 1 : index
    %c0_94 = arith.constant 0 : index
    %c0_95 = arith.constant 0 : index
    %106 = vector.load %arg4[%c1_93, %c0_94, %c0_95] : memref<9x32x32xbf16, #tpu.memory_space<vmem>>, vector<1x32x32xbf16>
    %107 = vector.shape_cast %106 : vector<1x32x32xbf16> to vector<32x32xbf16>
    %108 = arith.truncf %105 : vector<32x32xf32> to vector<32x32xbf16>
    %cst_96 = arith.constant dense<0.000000e+00> : vector<32x32xf32>
    %109 = tpu.matmul %107, %108, %cst_96 {dimension_numbers = #tpu.dot_dimension_numbers<[1], [0], [0], [1], [0, 0, 1, 1], [], []>} : vector<32x32xbf16>, vector<32x32xbf16>, vector<32x32xf32> -> vector<32x32xf32>
    %110 = arith.addf %102, %109 : vector<32x32xf32>
    %c2_97 = arith.constant 2 : index
    %c0_98 = arith.constant 0 : index
    %c0_99 = arith.constant 0 : index
    %111 = vector.load %arg12[%c2_97, %c0_98, %c0_99] : memref<9x32x32xbf16, #tpu.memory_space<vmem>>, vector<1x32x32xbf16>
    %112 = vector.shape_cast %111 : vector<1x32x32xbf16> to vector<32x32xbf16>
    %cst_100 = arith.constant dense<0.000000e+00> : vector<32x32xf32>
    %113 = tpu.matmul %93, %112, %cst_100 {dimension_numbers = #tpu.dot_dimension_numbers<[1], [0], [0], [1], [0, 0, 1, 1], [], []>} : vector<32x32xbf16>, vector<32x32xbf16>, vector<32x32xf32> -> vector<32x32xf32>
    %c2_101 = arith.constant 2 : index
    %c0_102 = arith.constant 0 : index
    %c0_103 = arith.constant 0 : index
    %114 = vector.load %arg4[%c2_101, %c0_102, %c0_103] : memref<9x32x32xbf16, #tpu.memory_space<vmem>>, vector<1x32x32xbf16>
    %115 = vector.shape_cast %114 : vector<1x32x32xbf16> to vector<32x32xbf16>
    %116 = arith.truncf %113 : vector<32x32xf32> to vector<32x32xbf16>
    %cst_104 = arith.constant dense<0.000000e+00> : vector<32x32xf32>
    %117 = tpu.matmul %115, %116, %cst_104 {dimension_numbers = #tpu.dot_dimension_numbers<[1], [0], [0], [1], [0, 0, 1, 1], [], []>} : vector<32x32xbf16>, vector<32x32xbf16>, vector<32x32xf32> -> vector<32x32xf32>
    %118 = arith.addf %110, %117 : vector<32x32xf32>
    %c3_105 = arith.constant 3 : index
    %c0_106 = arith.constant 0 : index
    %c0_107 = arith.constant 0 : index
    %119 = vector.load %arg12[%c3_105, %c0_106, %c0_107] : memref<9x32x32xbf16, #tpu.memory_space<vmem>>, vector<1x32x32xbf16>
    %120 = vector.shape_cast %119 : vector<1x32x32xbf16> to vector<32x32xbf16>
    %cst_108 = arith.constant dense<0.000000e+00> : vector<32x32xf32>
    %121 = tpu.matmul %93, %120, %cst_108 {dimension_numbers = #tpu.dot_dimension_numbers<[1], [0], [0], [1], [0, 0, 1, 1], [], []>} : vector<32x32xbf16>, vector<32x32xbf16>, vector<32x32xf32> -> vector<32x32xf32>
    %c3_109 = arith.constant 3 : index
    %c0_110 = arith.constant 0 : index
    %c0_111 = arith.constant 0 : index
    %122 = vector.load %arg4[%c3_109, %c0_110, %c0_111] : memref<9x32x32xbf16, #tpu.memory_space<vmem>>, vector<1x32x32xbf16>
    %123 = vector.shape_cast %122 : vector<1x32x32xbf16> to vector<32x32xbf16>
    %124 = arith.truncf %121 : vector<32x32xf32> to vector<32x32xbf16>
    %cst_112 = arith.constant dense<0.000000e+00> : vector<32x32xf32>
    %125 = tpu.matmul %123, %124, %cst_112 {dimension_numbers = #tpu.dot_dimension_numbers<[1], [0], [0], [1], [0, 0, 1, 1], [], []>} : vector<32x32xbf16>, vector<32x32xbf16>, vector<32x32xf32> -> vector<32x32xf32>
    %126 = arith.addf %118, %125 : vector<32x32xf32>
    %c4_113 = arith.constant 4 : index
    %c0_114 = arith.constant 0 : index
    %c0_115 = arith.constant 0 : index
    %127 = vector.load %arg12[%c4_113, %c0_114, %c0_115] : memref<9x32x32xbf16, #tpu.memory_space<vmem>>, vector<1x32x32xbf16>
    %128 = vector.shape_cast %127 : vector<1x32x32xbf16> to vector<32x32xbf16>
    %cst_116 = arith.constant dense<0.000000e+00> : vector<32x32xf32>
    %129 = tpu.matmul %93, %128, %cst_116 {dimension_numbers = #tpu.dot_dimension_numbers<[1], [0], [0], [1], [0, 0, 1, 1], [], []>} : vector<32x32xbf16>, vector<32x32xbf16>, vector<32x32xf32> -> vector<32x32xf32>
    %c4_117 = arith.constant 4 : index
    %c0_118 = arith.constant 0 : index
    %c0_119 = arith.constant 0 : index
    %130 = vector.load %arg4[%c4_117, %c0_118, %c0_119] : memref<9x32x32xbf16, #tpu.memory_space<vmem>>, vector<1x32x32xbf16>
    %131 = vector.shape_cast %130 : vector<1x32x32xbf16> to vector<32x32xbf16>
    %132 = arith.truncf %129 : vector<32x32xf32> to vector<32x32xbf16>
    %cst_120 = arith.constant dense<0.000000e+00> : vector<32x32xf32>
    %133 = tpu.matmul %131, %132, %cst_120 {dimension_numbers = #tpu.dot_dimension_numbers<[1], [0], [0], [1], [0, 0, 1, 1], [], []>} : vector<32x32xbf16>, vector<32x32xbf16>, vector<32x32xf32> -> vector<32x32xf32>
    %134 = arith.addf %126, %133 : vector<32x32xf32>
    %c5_121 = arith.constant 5 : index
    %c0_122 = arith.constant 0 : index
    %c0_123 = arith.constant 0 : index
    %135 = vector.load %arg12[%c5_121, %c0_122, %c0_123] : memref<9x32x32xbf16, #tpu.memory_space<vmem>>, vector<1x32x32xbf16>
    %136 = vector.shape_cast %135 : vector<1x32x32xbf16> to vector<32x32xbf16>
    %cst_124 = arith.constant dense<0.000000e+00> : vector<32x32xf32>
    %137 = tpu.matmul %93, %136, %cst_124 {dimension_numbers = #tpu.dot_dimension_numbers<[1], [0], [0], [1], [0, 0, 1, 1], [], []>} : vector<32x32xbf16>, vector<32x32xbf16>, vector<32x32xf32> -> vector<32x32xf32>
    %c5_125 = arith.constant 5 : index
    %c0_126 = arith.constant 0 : index
    %c0_127 = arith.constant 0 : index
    %138 = vector.load %arg4[%c5_125, %c0_126, %c0_127] : memref<9x32x32xbf16, #tpu.memory_space<vmem>>, vector<1x32x32xbf16>
    %139 = vector.shape_cast %138 : vector<1x32x32xbf16> to vector<32x32xbf16>
    %140 = arith.truncf %137 : vector<32x32xf32> to vector<32x32xbf16>
    %cst_128 = arith.constant dense<0.000000e+00> : vector<32x32xf32>
    %141 = tpu.matmul %139, %140, %cst_128 {dimension_numbers = #tpu.dot_dimension_numbers<[1], [0], [0], [1], [0, 0, 1, 1], [], []>} : vector<32x32xbf16>, vector<32x32xbf16>, vector<32x32xf32> -> vector<32x32xf32>
    %142 = arith.addf %134, %141 : vector<32x32xf32>
    %c6_129 = arith.constant 6 : index
    %c0_130 = arith.constant 0 : index
    %c0_131 = arith.constant 0 : index
    %143 = vector.load %arg12[%c6_129, %c0_130, %c0_131] : memref<9x32x32xbf16, #tpu.memory_space<vmem>>, vector<1x32x32xbf16>
    %144 = vector.shape_cast %143 : vector<1x32x32xbf16> to vector<32x32xbf16>
    %cst_132 = arith.constant dense<0.000000e+00> : vector<32x32xf32>
    %145 = tpu.matmul %93, %144, %cst_132 {dimension_numbers = #tpu.dot_dimension_numbers<[1], [0], [0], [1], [0, 0, 1, 1], [], []>} : vector<32x32xbf16>, vector<32x32xbf16>, vector<32x32xf32> -> vector<32x32xf32>
    %c6_133 = arith.constant 6 : index
    %c0_134 = arith.constant 0 : index
    %c0_135 = arith.constant 0 : index
    %146 = vector.load %arg4[%c6_133, %c0_134, %c0_135] : memref<9x32x32xbf16, #tpu.memory_space<vmem>>, vector<1x32x32xbf16>
    %147 = vector.shape_cast %146 : vector<1x32x32xbf16> to vector<32x32xbf16>
    %148 = arith.truncf %145 : vector<32x32xf32> to vector<32x32xbf16>
    %cst_136 = arith.constant dense<0.000000e+00> : vector<32x32xf32>
    %149 = tpu.matmul %147, %148, %cst_136 {dimension_numbers = #tpu.dot_dimension_numbers<[1], [0], [0], [1], [0, 0, 1, 1], [], []>} : vector<32x32xbf16>, vector<32x32xbf16>, vector<32x32xf32> -> vector<32x32xf32>
    %150 = arith.addf %142, %149 : vector<32x32xf32>
    %c7_137 = arith.constant 7 : index
    %c0_138 = arith.constant 0 : index
    %c0_139 = arith.constant 0 : index
    %151 = vector.load %arg12[%c7_137, %c0_138, %c0_139] : memref<9x32x32xbf16, #tpu.memory_space<vmem>>, vector<1x32x32xbf16>
    %152 = vector.shape_cast %151 : vector<1x32x32xbf16> to vector<32x32xbf16>
    %cst_140 = arith.constant dense<0.000000e+00> : vector<32x32xf32>
    %153 = tpu.matmul %93, %152, %cst_140 {dimension_numbers = #tpu.dot_dimension_numbers<[1], [0], [0], [1], [0, 0, 1, 1], [], []>} : vector<32x32xbf16>, vector<32x32xbf16>, vector<32x32xf32> -> vector<32x32xf32>
    %c7_141 = arith.constant 7 : index
    %c0_142 = arith.constant 0 : index
    %c0_143 = arith.constant 0 : index
    %154 = vector.load %arg4[%c7_141, %c0_142, %c0_143] : memref<9x32x32xbf16, #tpu.memory_space<vmem>>, vector<1x32x32xbf16>
    %155 = vector.shape_cast %154 : vector<1x32x32xbf16> to vector<32x32xbf16>
    %156 = arith.truncf %153 : vector<32x32xf32> to vector<32x32xbf16>
    %cst_144 = arith.constant dense<0.000000e+00> : vector<32x32xf32>
    %157 = tpu.matmul %155, %156, %cst_144 {dimension_numbers = #tpu.dot_dimension_numbers<[1], [0], [0], [1], [0, 0, 1, 1], [], []>} : vector<32x32xbf16>, vector<32x32xbf16>, vector<32x32xf32> -> vector<32x32xf32>
    %158 = arith.addf %150, %157 : vector<32x32xf32>
    %c8_145 = arith.constant 8 : index
    %c0_146 = arith.constant 0 : index
    %c0_147 = arith.constant 0 : index
    %159 = vector.load %arg12[%c8_145, %c0_146, %c0_147] : memref<9x32x32xbf16, #tpu.memory_space<vmem>>, vector<1x32x32xbf16>
    %160 = vector.shape_cast %159 : vector<1x32x32xbf16> to vector<32x32xbf16>
    %cst_148 = arith.constant dense<0.000000e+00> : vector<32x32xf32>
    %161 = tpu.matmul %93, %160, %cst_148 {dimension_numbers = #tpu.dot_dimension_numbers<[1], [0], [0], [1], [0, 0, 1, 1], [], []>} : vector<32x32xbf16>, vector<32x32xbf16>, vector<32x32xf32> -> vector<32x32xf32>
    %c8_149 = arith.constant 8 : index
    %c0_150 = arith.constant 0 : index
    %c0_151 = arith.constant 0 : index
    %162 = vector.load %arg4[%c8_149, %c0_150, %c0_151] : memref<9x32x32xbf16, #tpu.memory_space<vmem>>, vector<1x32x32xbf16>
    %163 = vector.shape_cast %162 : vector<1x32x32xbf16> to vector<32x32xbf16>
    %164 = arith.truncf %161 : vector<32x32xf32> to vector<32x32xbf16>
    %cst_152 = arith.constant dense<0.000000e+00> : vector<32x32xf32>
    %165 = tpu.matmul %163, %164, %cst_152 {dimension_numbers = #tpu.dot_dimension_numbers<[1], [0], [0], [1], [0, 0, 1, 1], [], []>} : vector<32x32xbf16>, vector<32x32xbf16>, vector<32x32xf32> -> vector<32x32xf32>
    %166 = arith.addf %158, %165 : vector<32x32xf32>
    %c0_153 = arith.constant 0 : index
    %c0_154 = arith.constant 0 : index
    %167 = vector.load %arg5[%c0_153, %c0_154] : memref<32x1xf32, #tpu.memory_space<vmem>>, vector<32x1xf32>
    %168 = vector.broadcast %167 : vector<32x1xf32> to vector<32x32xf32>
    %169 = arith.mulf %166, %168 : vector<32x32xf32>
    %c0_155 = arith.constant 0 : index
    %c0_156 = arith.constant 0 : index
    %170 = vector.load %arg6[%c0_155, %c0_156] : memref<32x1xf32, #tpu.memory_space<vmem>>, vector<32x1xf32>
    %171 = vector.broadcast %170 : vector<32x1xf32> to vector<32x32xf32>
    %172 = arith.addf %169, %171 : vector<32x32xf32>
    %173 = arith.addf %172, %11 : vector<32x32xf32>
    %cst_157 = arith.constant 0.000000e+00 : f32
    %174 = vector.broadcast %cst_157 : f32 to vector<32x32xf32>
    %175 = arith.maximumf %173, %174 : vector<32x32xf32>
    %176 = arith.truncf %175 : vector<32x32xf32> to vector<32x32xbf16>
    %c0_158 = arith.constant 0 : index
    %c0_159 = arith.constant 0 : index
    %177 = vector.load %arg13[%c0_158, %c0_159] : memref<32x32xbf16, #tpu.memory_space<vmem>>, vector<32x32xbf16>
    tpu.vector_store %arg13[%c0_158, %c0_159], %176 {strides = array<i32>} : memref<32x32xbf16, #tpu.memory_space<vmem>>, vector<32x32xbf16>,
    return
  }
}

module attributes {stable_mosaic.version = 11 : i64} {
  func.func @_block_kernel(%arg0: memref<32x32xbf16, #tpu.memory_space<vmem>>, %arg1: memref<9x32x32xbf16, #tpu.memory_space<vmem>>, %arg2: memref<32x1xf32, #tpu.memory_space<vmem>>, %arg3: memref<32x1xf32, #tpu.memory_space<vmem>>, %arg4: memref<9x32x32xbf16, #tpu.memory_space<vmem>>, %arg5: memref<32x1xf32, #tpu.memory_space<vmem>>, %arg6: memref<32x1xf32, #tpu.memory_space<vmem>>, %arg7: memref<9x32x32xbf16, #tpu.memory_space<vmem>>, %arg8: memref<32x32xbf16, #tpu.memory_space<vmem>>) attributes {dimension_semantics = [], scalar_prefetch = 0 : i64, scratch_operands = 0 : i64, tpu.core_type = #tpu.core_type<tc>} {
    %c0 = arith.constant 0 : index
    %c0_0 = arith.constant 0 : index
    %0 = vector.load %arg0[%c0, %c0_0] : memref<32x32xbf16, #tpu.memory_space<vmem>>, vector<32x32xbf16>
    %cst = arith.constant 0.000000e+00 : f32
    %1 = vector.broadcast %cst : f32 to vector<32x32xf32>
    %c0_1 = arith.constant 0 : index
    %c0_2 = arith.constant 0 : index
    %c0_3 = arith.constant 0 : index
    %2 = vector.load %arg7[%c0_1, %c0_2, %c0_3] : memref<9x32x32xbf16, #tpu.memory_space<vmem>>, vector<1x32x32xbf16>
    %3 = vector.shape_cast %2 : vector<1x32x32xbf16> to vector<32x32xbf16>
    %cst_4 = arith.constant dense<0.000000e+00> : vector<32x32xf32>
    %4 = tpu.matmul %0, %3, %cst_4 {dimension_numbers = #tpu.dot_dimension_numbers<[1], [0], [0], [1], [0, 0, 1, 1], [], []>} : vector<32x32xbf16>, vector<32x32xbf16>, vector<32x32xf32> -> vector<32x32xf32>
    %c0_5 = arith.constant 0 : index
    %c0_6 = arith.constant 0 : index
    %c0_7 = arith.constant 0 : index
    %5 = vector.load %arg1[%c0_5, %c0_6, %c0_7] : memref<9x32x32xbf16, #tpu.memory_space<vmem>>, vector<1x32x32xbf16>
    %6 = vector.shape_cast %5 : vector<1x32x32xbf16> to vector<32x32xbf16>
    %7 = arith.truncf %4 : vector<32x32xf32> to vector<32x32xbf16>
    %cst_8 = arith.constant dense<0.000000e+00> : vector<32x32xf32>
    %8 = tpu.matmul %6, %7, %cst_8 {dimension_numbers = #tpu.dot_dimension_numbers<[1], [0], [0], [1], [0, 0, 1, 1], [], []>} : vector<32x32xbf16>, vector<32x32xbf16>, vector<32x32xf32> -> vector<32x32xf32>
    %9 = arith.addf %1, %8 : vector<32x32xf32>
    %c1 = arith.constant 1 : index
    %c0_9 = arith.constant 0 : index
    %c0_10 = arith.constant 0 : index
    %10 = vector.load %arg7[%c1, %c0_9, %c0_10] : memref<9x32x32xbf16, #tpu.memory_space<vmem>>, vector<1x32x32xbf16>
    %11 = vector.shape_cast %10 : vector<1x32x32xbf16> to vector<32x32xbf16>
    %cst_11 = arith.constant dense<0.000000e+00> : vector<32x32xf32>
    %12 = tpu.matmul %0, %11, %cst_11 {dimension_numbers = #tpu.dot_dimension_numbers<[1], [0], [0], [1], [0, 0, 1, 1], [], []>} : vector<32x32xbf16>, vector<32x32xbf16>, vector<32x32xf32> -> vector<32x32xf32>
    %c1_12 = arith.constant 1 : index
    %c0_13 = arith.constant 0 : index
    %c0_14 = arith.constant 0 : index
    %13 = vector.load %arg1[%c1_12, %c0_13, %c0_14] : memref<9x32x32xbf16, #tpu.memory_space<vmem>>, vector<1x32x32xbf16>
    %14 = vector.shape_cast %13 : vector<1x32x32xbf16> to vector<32x32xbf16>
    %15 = arith.truncf %12 : vector<32x32xf32> to vector<32x32xbf16>
    %cst_15 = arith.constant dense<0.000000e+00> : vector<32x32xf32>
    %16 = tpu.matmul %14, %15, %cst_15 {dimension_numbers = #tpu.dot_dimension_numbers<[1], [0], [0], [1], [0, 0, 1, 1], [], []>} : vector<32x32xbf16>, vector<32x32xbf16>, vector<32x32xf32> -> vector<32x32xf32>
    %17 = arith.addf %9, %16 : vector<32x32xf32>
    %c2 = arith.constant 2 : index
    %c0_16 = arith.constant 0 : index
    %c0_17 = arith.constant 0 : index
    %18 = vector.load %arg7[%c2, %c0_16, %c0_17] : memref<9x32x32xbf16, #tpu.memory_space<vmem>>, vector<1x32x32xbf16>
    %19 = vector.shape_cast %18 : vector<1x32x32xbf16> to vector<32x32xbf16>
    %cst_18 = arith.constant dense<0.000000e+00> : vector<32x32xf32>
    %20 = tpu.matmul %0, %19, %cst_18 {dimension_numbers = #tpu.dot_dimension_numbers<[1], [0], [0], [1], [0, 0, 1, 1], [], []>} : vector<32x32xbf16>, vector<32x32xbf16>, vector<32x32xf32> -> vector<32x32xf32>
    %c2_19 = arith.constant 2 : index
    %c0_20 = arith.constant 0 : index
    %c0_21 = arith.constant 0 : index
    %21 = vector.load %arg1[%c2_19, %c0_20, %c0_21] : memref<9x32x32xbf16, #tpu.memory_space<vmem>>, vector<1x32x32xbf16>
    %22 = vector.shape_cast %21 : vector<1x32x32xbf16> to vector<32x32xbf16>
    %23 = arith.truncf %20 : vector<32x32xf32> to vector<32x32xbf16>
    %cst_22 = arith.constant dense<0.000000e+00> : vector<32x32xf32>
    %24 = tpu.matmul %22, %23, %cst_22 {dimension_numbers = #tpu.dot_dimension_numbers<[1], [0], [0], [1], [0, 0, 1, 1], [], []>} : vector<32x32xbf16>, vector<32x32xbf16>, vector<32x32xf32> -> vector<32x32xf32>
    %25 = arith.addf %17, %24 : vector<32x32xf32>
    %c3 = arith.constant 3 : index
    %c0_23 = arith.constant 0 : index
    %c0_24 = arith.constant 0 : index
    %26 = vector.load %arg7[%c3, %c0_23, %c0_24] : memref<9x32x32xbf16, #tpu.memory_space<vmem>>, vector<1x32x32xbf16>
    %27 = vector.shape_cast %26 : vector<1x32x32xbf16> to vector<32x32xbf16>
    %cst_25 = arith.constant dense<0.000000e+00> : vector<32x32xf32>
    %28 = tpu.matmul %0, %27, %cst_25 {dimension_numbers = #tpu.dot_dimension_numbers<[1], [0], [0], [1], [0, 0, 1, 1], [], []>} : vector<32x32xbf16>, vector<32x32xbf16>, vector<32x32xf32> -> vector<32x32xf32>
    %c3_26 = arith.constant 3 : index
    %c0_27 = arith.constant 0 : index
    %c0_28 = arith.constant 0 : index
    %29 = vector.load %arg1[%c3_26, %c0_27, %c0_28] : memref<9x32x32xbf16, #tpu.memory_space<vmem>>, vector<1x32x32xbf16>
    %30 = vector.shape_cast %29 : vector<1x32x32xbf16> to vector<32x32xbf16>
    %31 = arith.truncf %28 : vector<32x32xf32> to vector<32x32xbf16>
    %cst_29 = arith.constant dense<0.000000e+00> : vector<32x32xf32>
    %32 = tpu.matmul %30, %31, %cst_29 {dimension_numbers = #tpu.dot_dimension_numbers<[1], [0], [0], [1], [0, 0, 1, 1], [], []>} : vector<32x32xbf16>, vector<32x32xbf16>, vector<32x32xf32> -> vector<32x32xf32>
    %33 = arith.addf %25, %32 : vector<32x32xf32>
    %c4 = arith.constant 4 : index
    %c0_30 = arith.constant 0 : index
    %c0_31 = arith.constant 0 : index
    %34 = vector.load %arg7[%c4, %c0_30, %c0_31] : memref<9x32x32xbf16, #tpu.memory_space<vmem>>, vector<1x32x32xbf16>
    %35 = vector.shape_cast %34 : vector<1x32x32xbf16> to vector<32x32xbf16>
    %cst_32 = arith.constant dense<0.000000e+00> : vector<32x32xf32>
    %36 = tpu.matmul %0, %35, %cst_32 {dimension_numbers = #tpu.dot_dimension_numbers<[1], [0], [0], [1], [0, 0, 1, 1], [], []>} : vector<32x32xbf16>, vector<32x32xbf16>, vector<32x32xf32> -> vector<32x32xf32>
    %c4_33 = arith.constant 4 : index
    %c0_34 = arith.constant 0 : index
    %c0_35 = arith.constant 0 : index
    %37 = vector.load %arg1[%c4_33, %c0_34, %c0_35] : memref<9x32x32xbf16, #tpu.memory_space<vmem>>, vector<1x32x32xbf16>
    %38 = vector.shape_cast %37 : vector<1x32x32xbf16> to vector<32x32xbf16>
    %39 = arith.truncf %36 : vector<32x32xf32> to vector<32x32xbf16>
    %cst_36 = arith.constant dense<0.000000e+00> : vector<32x32xf32>
    %40 = tpu.matmul %38, %39, %cst_36 {dimension_numbers = #tpu.dot_dimension_numbers<[1], [0], [0], [1], [0, 0, 1, 1], [], []>} : vector<32x32xbf16>, vector<32x32xbf16>, vector<32x32xf32> -> vector<32x32xf32>
    %41 = arith.addf %33, %40 : vector<32x32xf32>
    %c5 = arith.constant 5 : index
    %c0_37 = arith.constant 0 : index
    %c0_38 = arith.constant 0 : index
    %42 = vector.load %arg7[%c5, %c0_37, %c0_38] : memref<9x32x32xbf16, #tpu.memory_space<vmem>>, vector<1x32x32xbf16>
    %43 = vector.shape_cast %42 : vector<1x32x32xbf16> to vector<32x32xbf16>
    %cst_39 = arith.constant dense<0.000000e+00> : vector<32x32xf32>
    %44 = tpu.matmul %0, %43, %cst_39 {dimension_numbers = #tpu.dot_dimension_numbers<[1], [0], [0], [1], [0, 0, 1, 1], [], []>} : vector<32x32xbf16>, vector<32x32xbf16>, vector<32x32xf32> -> vector<32x32xf32>
    %c5_40 = arith.constant 5 : index
    %c0_41 = arith.constant 0 : index
    %c0_42 = arith.constant 0 : index
    %45 = vector.load %arg1[%c5_40, %c0_41, %c0_42] : memref<9x32x32xbf16, #tpu.memory_space<vmem>>, vector<1x32x32xbf16>
    %46 = vector.shape_cast %45 : vector<1x32x32xbf16> to vector<32x32xbf16>
    %47 = arith.truncf %44 : vector<32x32xf32> to vector<32x32xbf16>
    %cst_43 = arith.constant dense<0.000000e+00> : vector<32x32xf32>
    %48 = tpu.matmul %46, %47, %cst_43 {dimension_numbers = #tpu.dot_dimension_numbers<[1], [0], [0], [1], [0, 0, 1, 1], [], []>} : vector<32x32xbf16>, vector<32x32xbf16>, vector<32x32xf32> -> vector<32x32xf32>
    %49 = arith.addf %41, %48 : vector<32x32xf32>
    %c6 = arith.constant 6 : index
    %c0_44 = arith.constant 0 : index
    %c0_45 = arith.constant 0 : index
    %50 = vector.load %arg7[%c6, %c0_44, %c0_45] : memref<9x32x32xbf16, #tpu.memory_space<vmem>>, vector<1x32x32xbf16>
    %51 = vector.shape_cast %50 : vector<1x32x32xbf16> to vector<32x32xbf16>
    %cst_46 = arith.constant dense<0.000000e+00> : vector<32x32xf32>
    %52 = tpu.matmul %0, %51, %cst_46 {dimension_numbers = #tpu.dot_dimension_numbers<[1], [0], [0], [1], [0, 0, 1, 1], [], []>} : vector<32x32xbf16>, vector<32x32xbf16>, vector<32x32xf32> -> vector<32x32xf32>
    %c6_47 = arith.constant 6 : index
    %c0_48 = arith.constant 0 : index
    %c0_49 = arith.constant 0 : index
    %53 = vector.load %arg1[%c6_47, %c0_48, %c0_49] : memref<9x32x32xbf16, #tpu.memory_space<vmem>>, vector<1x32x32xbf16>
    %54 = vector.shape_cast %53 : vector<1x32x32xbf16> to vector<32x32xbf16>
    %55 = arith.truncf %52 : vector<32x32xf32> to vector<32x32xbf16>
    %cst_50 = arith.constant dense<0.000000e+00> : vector<32x32xf32>
    %56 = tpu.matmul %54, %55, %cst_50 {dimension_numbers = #tpu.dot_dimension_numbers<[1], [0], [0], [1], [0, 0, 1, 1], [], []>} : vector<32x32xbf16>, vector<32x32xbf16>, vector<32x32xf32> -> vector<32x32xf32>
    %57 = arith.addf %49, %56 : vector<32x32xf32>
    %c7 = arith.constant 7 : index
    %c0_51 = arith.constant 0 : index
    %c0_52 = arith.constant 0 : index
    %58 = vector.load %arg7[%c7, %c0_51, %c0_52] : memref<9x32x32xbf16, #tpu.memory_space<vmem>>, vector<1x32x32xbf16>
    %59 = vector.shape_cast %58 : vector<1x32x32xbf16> to vector<32x32xbf16>
    %cst_53 = arith.constant dense<0.000000e+00> : vector<32x32xf32>
    %60 = tpu.matmul %0, %59, %cst_53 {dimension_numbers = #tpu.dot_dimension_numbers<[1], [0], [0], [1], [0, 0, 1, 1], [], []>} : vector<32x32xbf16>, vector<32x32xbf16>, vector<32x32xf32> -> vector<32x32xf32>
    %c7_54 = arith.constant 7 : index
    %c0_55 = arith.constant 0 : index
    %c0_56 = arith.constant 0 : index
    %61 = vector.load %arg1[%c7_54, %c0_55, %c0_56] : memref<9x32x32xbf16, #tpu.memory_space<vmem>>, vector<1x32x32xbf16>
    %62 = vector.shape_cast %61 : vector<1x32x32xbf16> to vector<32x32xbf16>
    %63 = arith.truncf %60 : vector<32x32xf32> to vector<32x32xbf16>
    %cst_57 = arith.constant dense<0.000000e+00> : vector<32x32xf32>
    %64 = tpu.matmul %62, %63, %cst_57 {dimension_numbers = #tpu.dot_dimension_numbers<[1], [0], [0], [1], [0, 0, 1, 1], [], []>} : vector<32x32xbf16>, vector<32x32xbf16>, vector<32x32xf32> -> vector<32x32xf32>
    %65 = arith.addf %57, %64 : vector<32x32xf32>
    %c8 = arith.constant 8 : index
    %c0_58 = arith.constant 0 : index
    %c0_59 = arith.constant 0 : index
    %66 = vector.load %arg7[%c8, %c0_58, %c0_59] : memref<9x32x32xbf16, #tpu.memory_space<vmem>>, vector<1x32x32xbf16>
    %67 = vector.shape_cast %66 : vector<1x32x32xbf16> to vector<32x32xbf16>
    %cst_60 = arith.constant dense<0.000000e+00> : vector<32x32xf32>
    %68 = tpu.matmul %0, %67, %cst_60 {dimension_numbers = #tpu.dot_dimension_numbers<[1], [0], [0], [1], [0, 0, 1, 1], [], []>} : vector<32x32xbf16>, vector<32x32xbf16>, vector<32x32xf32> -> vector<32x32xf32>
    %c8_61 = arith.constant 8 : index
    %c0_62 = arith.constant 0 : index
    %c0_63 = arith.constant 0 : index
    %69 = vector.load %arg1[%c8_61, %c0_62, %c0_63] : memref<9x32x32xbf16, #tpu.memory_space<vmem>>, vector<1x32x32xbf16>
    %70 = vector.shape_cast %69 : vector<1x32x32xbf16> to vector<32x32xbf16>
    %71 = arith.truncf %68 : vector<32x32xf32> to vector<32x32xbf16>
    %cst_64 = arith.constant dense<0.000000e+00> : vector<32x32xf32>
    %72 = tpu.matmul %70, %71, %cst_64 {dimension_numbers = #tpu.dot_dimension_numbers<[1], [0], [0], [1], [0, 0, 1, 1], [], []>} : vector<32x32xbf16>, vector<32x32xbf16>, vector<32x32xf32> -> vector<32x32xf32>
    %73 = arith.addf %65, %72 : vector<32x32xf32>
    %c0_65 = arith.constant 0 : index
    %c0_66 = arith.constant 0 : index
    %74 = vector.load %arg2[%c0_65, %c0_66] : memref<32x1xf32, #tpu.memory_space<vmem>>, vector<32x1xf32>
    %75 = vector.broadcast %74 : vector<32x1xf32> to vector<32x32xf32>
    %76 = arith.mulf %73, %75 : vector<32x32xf32>
    %c0_67 = arith.constant 0 : index
    %c0_68 = arith.constant 0 : index
    %77 = vector.load %arg3[%c0_67, %c0_68] : memref<32x1xf32, #tpu.memory_space<vmem>>, vector<32x1xf32>
    %78 = vector.broadcast %77 : vector<32x1xf32> to vector<32x32xf32>
    %79 = arith.addf %76, %78 : vector<32x32xf32>
    %cst_69 = arith.constant 0.000000e+00 : f32
    %80 = vector.broadcast %cst_69 : f32 to vector<32x32xf32>
    %81 = arith.maximumf %79, %80 : vector<32x32xf32>
    %82 = arith.truncf %81 : vector<32x32xf32> to vector<32x32xbf16>
    %cst_70 = arith.constant 0.000000e+00 : f32
    %83 = vector.broadcast %cst_70 : f32 to vector<32x32xf32>
    %c0_71 = arith.constant 0 : index
    %c0_72 = arith.constant 0 : index
    %c0_73 = arith.constant 0 : index
    %84 = vector.load %arg7[%c0_71, %c0_72, %c0_73] : memref<9x32x32xbf16, #tpu.memory_space<vmem>>, vector<1x32x32xbf16>
    %85 = vector.shape_cast %84 : vector<1x32x32xbf16> to vector<32x32xbf16>
    %cst_74 = arith.constant dense<0.000000e+00> : vector<32x32xf32>
    %86 = tpu.matmul %82, %85, %cst_74 {dimension_numbers = #tpu.dot_dimension_numbers<[1], [0], [0], [1], [0, 0, 1, 1], [], []>} : vector<32x32xbf16>, vector<32x32xbf16>, vector<32x32xf32> -> vector<32x32xf32>
    %c0_75 = arith.constant 0 : index
    %c0_76 = arith.constant 0 : index
    %c0_77 = arith.constant 0 : index
    %87 = vector.load %arg4[%c0_75, %c0_76, %c0_77] : memref<9x32x32xbf16, #tpu.memory_space<vmem>>, vector<1x32x32xbf16>
    %88 = vector.shape_cast %87 : vector<1x32x32xbf16> to vector<32x32xbf16>
    %89 = arith.truncf %86 : vector<32x32xf32> to vector<32x32xbf16>
    %cst_78 = arith.constant dense<0.000000e+00> : vector<32x32xf32>
    %90 = tpu.matmul %88, %89, %cst_78 {dimension_numbers = #tpu.dot_dimension_numbers<[1], [0], [0], [1], [0, 0, 1, 1], [], []>} : vector<32x32xbf16>, vector<32x32xbf16>, vector<32x32xf32> -> vector<32x32xf32>
    %91 = arith.addf %83, %90 : vector<32x32xf32>
    %c1_79 = arith.constant 1 : index
    %c0_80 = arith.constant 0 : index
    %c0_81 = arith.constant 0 : index
    %92 = vector.load %arg7[%c1_79, %c0_80, %c0_81] : memref<9x32x32xbf16, #tpu.memory_space<vmem>>, vector<1x32x32xbf16>
    %93 = vector.shape_cast %92 : vector<1x32x32xbf16> to vector<32x32xbf16>
    %cst_82 = arith.constant dense<0.000000e+00> : vector<32x32xf32>
    %94 = tpu.matmul %82, %93, %cst_82 {dimension_numbers = #tpu.dot_dimension_numbers<[1], [0], [0], [1], [0, 0, 1, 1], [], []>} : vector<32x32xbf16>, vector<32x32xbf16>, vector<32x32xf32> -> vector<32x32xf32>
    %c1_83 = arith.constant 1 : index
    %c0_84 = arith.constant 0 : index
    %c0_85 = arith.constant 0 : index
    %95 = vector.load %arg4[%c1_83, %c0_84, %c0_85] : memref<9x32x32xbf16, #tpu.memory_space<vmem>>, vector<1x32x32xbf16>
    %96 = vector.shape_cast %95 : vector<1x32x32xbf16> to vector<32x32xbf16>
    %97 = arith.truncf %94 : vector<32x32xf32> to vector<32x32xbf16>
    %cst_86 = arith.constant dense<0.000000e+00> : vector<32x32xf32>
    %98 = tpu.matmul %96, %97, %cst_86 {dimension_numbers = #tpu.dot_dimension_numbers<[1], [0], [0], [1], [0, 0, 1, 1], [], []>} : vector<32x32xbf16>, vector<32x32xbf16>, vector<32x32xf32> -> vector<32x32xf32>
    %99 = arith.addf %91, %98 : vector<32x32xf32>
    %c2_87 = arith.constant 2 : index
    %c0_88 = arith.constant 0 : index
    %c0_89 = arith.constant 0 : index
    %100 = vector.load %arg7[%c2_87, %c0_88, %c0_89] : memref<9x32x32xbf16, #tpu.memory_space<vmem>>, vector<1x32x32xbf16>
    %101 = vector.shape_cast %100 : vector<1x32x32xbf16> to vector<32x32xbf16>
    %cst_90 = arith.constant dense<0.000000e+00> : vector<32x32xf32>
    %102 = tpu.matmul %82, %101, %cst_90 {dimension_numbers = #tpu.dot_dimension_numbers<[1], [0], [0], [1], [0, 0, 1, 1], [], []>} : vector<32x32xbf16>, vector<32x32xbf16>, vector<32x32xf32> -> vector<32x32xf32>
    %c2_91 = arith.constant 2 : index
    %c0_92 = arith.constant 0 : index
    %c0_93 = arith.constant 0 : index
    %103 = vector.load %arg4[%c2_91, %c0_92, %c0_93] : memref<9x32x32xbf16, #tpu.memory_space<vmem>>, vector<1x32x32xbf16>
    %104 = vector.shape_cast %103 : vector<1x32x32xbf16> to vector<32x32xbf16>
    %105 = arith.truncf %102 : vector<32x32xf32> to vector<32x32xbf16>
    %cst_94 = arith.constant dense<0.000000e+00> : vector<32x32xf32>
    %106 = tpu.matmul %104, %105, %cst_94 {dimension_numbers = #tpu.dot_dimension_numbers<[1], [0], [0], [1], [0, 0, 1, 1], [], []>} : vector<32x32xbf16>, vector<32x32xbf16>, vector<32x32xf32> -> vector<32x32xf32>
    %107 = arith.addf %99, %106 : vector<32x32xf32>
    %c3_95 = arith.constant 3 : index
    %c0_96 = arith.constant 0 : index
    %c0_97 = arith.constant 0 : index
    %108 = vector.load %arg7[%c3_95, %c0_96, %c0_97] : memref<9x32x32xbf16, #tpu.memory_space<vmem>>, vector<1x32x32xbf16>
    %109 = vector.shape_cast %108 : vector<1x32x32xbf16> to vector<32x32xbf16>
    %cst_98 = arith.constant dense<0.000000e+00> : vector<32x32xf32>
    %110 = tpu.matmul %82, %109, %cst_98 {dimension_numbers = #tpu.dot_dimension_numbers<[1], [0], [0], [1], [0, 0, 1, 1], [], []>} : vector<32x32xbf16>, vector<32x32xbf16>, vector<32x32xf32> -> vector<32x32xf32>
    %c3_99 = arith.constant 3 : index
    %c0_100 = arith.constant 0 : index
    %c0_101 = arith.constant 0 : index
    %111 = vector.load %arg4[%c3_99, %c0_100, %c0_101] : memref<9x32x32xbf16, #tpu.memory_space<vmem>>, vector<1x32x32xbf16>
    %112 = vector.shape_cast %111 : vector<1x32x32xbf16> to vector<32x32xbf16>
    %113 = arith.truncf %110 : vector<32x32xf32> to vector<32x32xbf16>
    %cst_102 = arith.constant dense<0.000000e+00> : vector<32x32xf32>
    %114 = tpu.matmul %112, %113, %cst_102 {dimension_numbers = #tpu.dot_dimension_numbers<[1], [0], [0], [1], [0, 0, 1, 1], [], []>} : vector<32x32xbf16>, vector<32x32xbf16>, vector<32x32xf32> -> vector<32x32xf32>
    %115 = arith.addf %107, %114 : vector<32x32xf32>
    %c4_103 = arith.constant 4 : index
    %c0_104 = arith.constant 0 : index
    %c0_105 = arith.constant 0 : index
    %116 = vector.load %arg7[%c4_103, %c0_104, %c0_105] : memref<9x32x32xbf16, #tpu.memory_space<vmem>>, vector<1x32x32xbf16>
    %117 = vector.shape_cast %116 : vector<1x32x32xbf16> to vector<32x32xbf16>
    %cst_106 = arith.constant dense<0.000000e+00> : vector<32x32xf32>
    %118 = tpu.matmul %82, %117, %cst_106 {dimension_numbers = #tpu.dot_dimension_numbers<[1], [0], [0], [1], [0, 0, 1, 1], [], []>} : vector<32x32xbf16>, vector<32x32xbf16>, vector<32x32xf32> -> vector<32x32xf32>
    %c4_107 = arith.constant 4 : index
    %c0_108 = arith.constant 0 : index
    %c0_109 = arith.constant 0 : index
    %119 = vector.load %arg4[%c4_107, %c0_108, %c0_109] : memref<9x32x32xbf16, #tpu.memory_space<vmem>>, vector<1x32x32xbf16>
    %120 = vector.shape_cast %119 : vector<1x32x32xbf16> to vector<32x32xbf16>
    %121 = arith.truncf %118 : vector<32x32xf32> to vector<32x32xbf16>
    %cst_110 = arith.constant dense<0.000000e+00> : vector<32x32xf32>
    %122 = tpu.matmul %120, %121, %cst_110 {dimension_numbers = #tpu.dot_dimension_numbers<[1], [0], [0], [1], [0, 0, 1, 1], [], []>} : vector<32x32xbf16>, vector<32x32xbf16>, vector<32x32xf32> -> vector<32x32xf32>
    %123 = arith.addf %115, %122 : vector<32x32xf32>
    %c5_111 = arith.constant 5 : index
    %c0_112 = arith.constant 0 : index
    %c0_113 = arith.constant 0 : index
    %124 = vector.load %arg7[%c5_111, %c0_112, %c0_113] : memref<9x32x32xbf16, #tpu.memory_space<vmem>>, vector<1x32x32xbf16>
    %125 = vector.shape_cast %124 : vector<1x32x32xbf16> to vector<32x32xbf16>
    %cst_114 = arith.constant dense<0.000000e+00> : vector<32x32xf32>
    %126 = tpu.matmul %82, %125, %cst_114 {dimension_numbers = #tpu.dot_dimension_numbers<[1], [0], [0], [1], [0, 0, 1, 1], [], []>} : vector<32x32xbf16>, vector<32x32xbf16>, vector<32x32xf32> -> vector<32x32xf32>
    %c5_115 = arith.constant 5 : index
    %c0_116 = arith.constant 0 : index
    %c0_117 = arith.constant 0 : index
    %127 = vector.load %arg4[%c5_115, %c0_116, %c0_117] : memref<9x32x32xbf16, #tpu.memory_space<vmem>>, vector<1x32x32xbf16>
    %128 = vector.shape_cast %127 : vector<1x32x32xbf16> to vector<32x32xbf16>
    %129 = arith.truncf %126 : vector<32x32xf32> to vector<32x32xbf16>
    %cst_118 = arith.constant dense<0.000000e+00> : vector<32x32xf32>
    %130 = tpu.matmul %128, %129, %cst_118 {dimension_numbers = #tpu.dot_dimension_numbers<[1], [0], [0], [1], [0, 0, 1, 1], [], []>} : vector<32x32xbf16>, vector<32x32xbf16>, vector<32x32xf32> -> vector<32x32xf32>
    %131 = arith.addf %123, %130 : vector<32x32xf32>
    %c6_119 = arith.constant 6 : index
    %c0_120 = arith.constant 0 : index
    %c0_121 = arith.constant 0 : index
    %132 = vector.load %arg7[%c6_119, %c0_120, %c0_121] : memref<9x32x32xbf16, #tpu.memory_space<vmem>>, vector<1x32x32xbf16>
    %133 = vector.shape_cast %132 : vector<1x32x32xbf16> to vector<32x32xbf16>
    %cst_122 = arith.constant dense<0.000000e+00> : vector<32x32xf32>
    %134 = tpu.matmul %82, %133, %cst_122 {dimension_numbers = #tpu.dot_dimension_numbers<[1], [0], [0], [1], [0, 0, 1, 1], [], []>} : vector<32x32xbf16>, vector<32x32xbf16>, vector<32x32xf32> -> vector<32x32xf32>
    %c6_123 = arith.constant 6 : index
    %c0_124 = arith.constant 0 : index
    %c0_125 = arith.constant 0 : index
    %135 = vector.load %arg4[%c6_123, %c0_124, %c0_125] : memref<9x32x32xbf16, #tpu.memory_space<vmem>>, vector<1x32x32xbf16>
    %136 = vector.shape_cast %135 : vector<1x32x32xbf16> to vector<32x32xbf16>
    %137 = arith.truncf %134 : vector<32x32xf32> to vector<32x32xbf16>
    %cst_126 = arith.constant dense<0.000000e+00> : vector<32x32xf32>
    %138 = tpu.matmul %136, %137, %cst_126 {dimension_numbers = #tpu.dot_dimension_numbers<[1], [0], [0], [1], [0, 0, 1, 1], [], []>} : vector<32x32xbf16>, vector<32x32xbf16>, vector<32x32xf32> -> vector<32x32xf32>
    %139 = arith.addf %131, %138 : vector<32x32xf32>
    %c7_127 = arith.constant 7 : index
    %c0_128 = arith.constant 0 : index
    %c0_129 = arith.constant 0 : index
    %140 = vector.load %arg7[%c7_127, %c0_128, %c0_129] : memref<9x32x32xbf16, #tpu.memory_space<vmem>>, vector<1x32x32xbf16>
    %141 = vector.shape_cast %140 : vector<1x32x32xbf16> to vector<32x32xbf16>
    %cst_130 = arith.constant dense<0.000000e+00> : vector<32x32xf32>
    %142 = tpu.matmul %82, %141, %cst_130 {dimension_numbers = #tpu.dot_dimension_numbers<[1], [0], [0], [1], [0, 0, 1, 1], [], []>} : vector<32x32xbf16>, vector<32x32xbf16>, vector<32x32xf32> -> vector<32x32xf32>
    %c7_131 = arith.constant 7 : index
    %c0_132 = arith.constant 0 : index
    %c0_133 = arith.constant 0 : index
    %143 = vector.load %arg4[%c7_131, %c0_132, %c0_133] : memref<9x32x32xbf16, #tpu.memory_space<vmem>>, vector<1x32x32xbf16>
    %144 = vector.shape_cast %143 : vector<1x32x32xbf16> to vector<32x32xbf16>
    %145 = arith.truncf %142 : vector<32x32xf32> to vector<32x32xbf16>
    %cst_134 = arith.constant dense<0.000000e+00> : vector<32x32xf32>
    %146 = tpu.matmul %144, %145, %cst_134 {dimension_numbers = #tpu.dot_dimension_numbers<[1], [0], [0], [1], [0, 0, 1, 1], [], []>} : vector<32x32xbf16>, vector<32x32xbf16>, vector<32x32xf32> -> vector<32x32xf32>
    %147 = arith.addf %139, %146 : vector<32x32xf32>
    %c8_135 = arith.constant 8 : index
    %c0_136 = arith.constant 0 : index
    %c0_137 = arith.constant 0 : index
    %148 = vector.load %arg7[%c8_135, %c0_136, %c0_137] : memref<9x32x32xbf16, #tpu.memory_space<vmem>>, vector<1x32x32xbf16>
    %149 = vector.shape_cast %148 : vector<1x32x32xbf16> to vector<32x32xbf16>
    %cst_138 = arith.constant dense<0.000000e+00> : vector<32x32xf32>
    %150 = tpu.matmul %82, %149, %cst_138 {dimension_numbers = #tpu.dot_dimension_numbers<[1], [0], [0], [1], [0, 0, 1, 1], [], []>} : vector<32x32xbf16>, vector<32x32xbf16>, vector<32x32xf32> -> vector<32x32xf32>
    %c8_139 = arith.constant 8 : index
    %c0_140 = arith.constant 0 : index
    %c0_141 = arith.constant 0 : index
    %151 = vector.load %arg4[%c8_139, %c0_140, %c0_141] : memref<9x32x32xbf16, #tpu.memory_space<vmem>>, vector<1x32x32xbf16>
    %152 = vector.shape_cast %151 : vector<1x32x32xbf16> to vector<32x32xbf16>
    %153 = arith.truncf %150 : vector<32x32xf32> to vector<32x32xbf16>
    %cst_142 = arith.constant dense<0.000000e+00> : vector<32x32xf32>
    %154 = tpu.matmul %152, %153, %cst_142 {dimension_numbers = #tpu.dot_dimension_numbers<[1], [0], [0], [1], [0, 0, 1, 1], [], []>} : vector<32x32xbf16>, vector<32x32xbf16>, vector<32x32xf32> -> vector<32x32xf32>
    %155 = arith.addf %147, %154 : vector<32x32xf32>
    %c0_143 = arith.constant 0 : index
    %c0_144 = arith.constant 0 : index
    %156 = vector.load %arg5[%c0_143, %c0_144] : memref<32x1xf32, #tpu.memory_space<vmem>>, vector<32x1xf32>
    %157 = vector.broadcast %156 : vector<32x1xf32> to vector<32x32xf32>
    %158 = arith.mulf %155, %157 : vector<32x32xf32>
    %c0_145 = arith.constant 0 : index
    %c0_146 = arith.constant 0 : index
    %159 = vector.load %arg6[%c0_145, %c0_146] : memref<32x1xf32, #tpu.memory_space<vmem>>, vector<32x1xf32>
    %160 = vector.broadcast %159 : vector<32x1xf32> to vector<32x32xf32>
    %161 = arith.addf %158, %160 : vector<32x32xf32>
    %162 = arith.extf %0 : vector<32x32xbf16> to vector<32x32xf32>
    %163 = arith.addf %161, %162 : vector<32x32xf32>
    %cst_147 = arith.constant 0.000000e+00 : f32
    %164 = vector.broadcast %cst_147 : f32 to vector<32x32xf32>
    %165 = arith.maximumf %163, %164 : vector<32x32xf32>
    %166 = arith.truncf %165 : vector<32x32xf32> to vector<32x32xbf16>
    %c0_148 = arith.constant 0 : index
    %c0_149 = arith.constant 0 : index
    %167 = vector.load %arg8[%c0_148, %c0_149] : memref<32x32xbf16, #tpu.memory_space<vmem>>, vector<32x32xbf16>
    tpu.vector_store %arg8[%c0_148, %c0_149], %166 {strides = array<i32>} : memref<32x32xbf16, #tpu.memory_space<vmem>>, vector<32x32xbf16>,
    return
  }
}

</mosaic_0001>

<bundles_post_ra>
// kernel: resnet_feature_extractor.6
= control target key start
LH: loop header
LB: loop body
LE: loop exit
PB: predicated region body
PF: predicated region fallthrough
CT: control target
= control target key end

     0   :  { %v4390_v0 = vmov 0.0   ;;  %vm3471_vm0 = vmmov 0   ;;  %vm261_vm1 = vcmask 130048   ;;  %s4381_s7 = inlined_call_operand.vmem [shape: bf16[9,128,128], index: 7, kind: input, shape index: {}]   ;;  %s4382_s0 = inlined_call_operand.vmem [shape: bf16[16,128], index: 0, kind: input, shape index: {}]   ;;  %s4383_s1 = inlined_call_operand.vmem [shape: bf16[9,16,16], index: 1, kind: input, shape index: {}]   ;;  %s4384_s2 = inlined_call_operand.vmem [shape: f32[16,1], index: 2, kind: input, shape index: {}]   ;;  %s4385_s3 = inlined_call_operand.vmem [shape: f32[16,1], index: 3, kind: input, shape index: {}]   ;;  %s4386_s5 = inlined_call_operand.vmem [shape: f32[16,1], index: 5, kind: input, shape index: {}]   ;;  %s4387_s6 = inlined_call_operand.vmem [shape: f32[16,1], index: 6, kind: input, shape index: {}]   ;;  %s4388_s4 = inlined_call_operand.vmem [shape: bf16[9,16,16], index: 4, kind: input, shape index: {}]   ;;  %s4389_s8 = inlined_call_operand.vmem [shape: bf16[16,128], index: 8, kind: output, shape index: {}]  }
   0x1   :  { %2916 = vmatprep.subr.bf16.mxu1 %v4390_v0  ;;  %2896 = vmatprep.subr.bf16.mxu0 %v4390_v0  ;;  %v3369_v1 = vld [vmem:[%s4381_s7 + $0x78] sm:$0xff]   ;;  %v3371_v3 = vld [vmem:[%s4381_s7 + $0x70] sm:$0xff]   ;;  %v3541_v5 = vld [vmem:[%s4381_s7 + $0x68] sm:$0xff]  }
   0x2   :  { %v3370_v2 = vld [vmem:[%s4381_s7 + $0x38] sm:$0xff]   ;;  %2932 = vmatprep.mubr.msk.bf16.mxu1 %vm3471_vm0, %v4390_v0  ;;  %2912 = vmatprep.mubr.msk.bf16.mxu0 %vm3471_vm0, %v4390_v0  ;;  %v3372_v4 = vld [vmem:[%s4381_s7 + $0x30] sm:$0xff]   ;;  %v3374_v6 = vld [vmem:[%s4381_s7 + $0x28] sm:$0xff]  }
   0x3   :  { %2917 = vmatpush3.bf16.msra.mxu1 %v3369_v1  ;;  %2897 = vmatpush3.bf16.msra.mxu0 %v3370_v2  ;;  %v3552_v7 = vld [vmem:[%s4381_s7 + $0x60] sm:$0xff]   ;;  %v3563_v9 = vld [vmem:[%s4381_s7 + $0x58] sm:$0xff]   ;;  %v3573_v11 = vld [vmem:[%s4381_s7 + $0x50] sm:$0xff]  }
   0x4   :  { %2918 = vmatprep.subr.bf16.mxu1 %v4390_v0  ;;  %2898 = vmatprep.subr.bf16.mxu0 %v4390_v0  ;;  %v3376_v8 = vld [vmem:[%s4381_s7 + $0x20] sm:$0xff]   ;;  %v3378_v10 = vld [vmem:[%s4381_s7 + $0x18] sm:$0xff]   ;;  %v3380_v12 = vld [vmem:[%s4381_s7 + $0x10] sm:$0xff]  }
   0x5   :  { %v3584_v13 = vld [vmem:[%s4381_s7 + $0x48] sm:$0xff]   ;;  %v3597_v15 = vld [vmem:[%s4381_s7 + $0x40] sm:$0xff]   ;;  %v3637_v30 = vld [vmem:[%s4381_s7 + $0xb8] sm:$0xff]  }
   0x6   :  { %v3589_v14 = vld [vmem:[%s4381_s7 + $0x8] sm:$0xff]   ;;  %v3602_v16 = vld [vmem:[%s4382_s0] sm:$0xff]   ;;  %v3644_v31 = vld [vmem:[%s4381_s7 + $0xb0] sm:$0xff]  }
   0x7   :  { %2919 = vmatpush3.bf16.msra.mxu1 %v3371_v3  ;;  %2899 = vmatpush3.bf16.msra.mxu0 %v3372_v4  ;;  %v3607_v17 = vld [vmem:[%s4381_s7] sm:$0xff]   ;;  %v3386_v26 = vld [vmem:[%s4383_s1 + $0x8] sm:$0xff]   ;;  %v3667_v34 = vld [vmem:[%s4381_s7 + $0x98] sm:$0xff]  }
   0x8   :  { %2920 = vmatprep.subr.bf16.mxu1 %v4390_v0  ;;  %2900 = vmatprep.subr.bf16.mxu0 %v4390_v0  ;;  %v3387_v29 = vld [vmem:[%s4383_s1] sm:$0xff]   ;;  %v3653_v32 = vld [vmem:[%s4381_s7 + $0xa8] sm:$0xff]   ;;  %v3674_v35 = vld [vmem:[%s4381_s7 + $0x90] sm:$0xff]  }
   0x9   :  { %v3660_v33 = vld [vmem:[%s4381_s7 + $0xa0] sm:$0xff]   ;;  %v3681_v36 = vld [vmem:[%s4381_s7 + $0x88] sm:$0xff]   ;;  %v3396_v53 = vld [vmem:[%s4383_s1 + $0x10] sm:$0xff]  }
   0xa   :  { %v3688_v37 = vld [vmem:[%s4381_s7 + $0x80] sm:$0xff]   ;;  %v3702_v54 = vld [vmem:[%s4381_s7 + $0xf8] sm:$0xff]   ;;  %v3710_v55 = vld [vmem:[%s4381_s7 + $0xf0] sm:$0xff]  }
   0xb   :  { %2921 = vmatpush3.bf16.msra.mxu1 %v3541_v5  ;;  %2901 = vmatpush3.bf16.msra.mxu0 %v3374_v6  ;;  %v3719_v56 = vld [vmem:[%s4381_s7 + $0xe8] sm:$0xff]   ;;  %v3726_v57 = vld [vmem:[%s4381_s7 + $0xe0] sm:$0xff]   ;;  %v3733_v58 = vld [vmem:[%s4381_s7 + $0xd8] sm:$0xff]  }
   0xc   :  { %2922 = vmatprep.subr.bf16.mxu1 %v4390_v0  ;;  %2902 = vmatprep.subr.bf16.mxu0 %v4390_v0  ;;  %v3740_v59 = vld [vmem:[%s4381_s7 + $0xd0] sm:$0xff]   ;;  %v3747_v60 = vld [vmem:[%s4381_s7 + $0xc8] sm:$0xff]   ;;  %v3754_v61 = vld [vmem:[%s4381_s7 + $0xc0] sm:$0xff]  }
   0xf   :  { %2923 = vmatpush3.bf16.msra.mxu1 %v3552_v7  ;;  %2903 = vmatpush3.bf16.msra.mxu0 %v3376_v8 }
  0x10   :  { %2924 = vmatprep.subr.bf16.mxu1 %v4390_v0  ;;  %2904 = vmatprep.subr.bf16.mxu0 %v4390_v0 }
  0x13   :  { %2925 = vmatpush3.bf16.msra.mxu1 %v3563_v9  ;;  %2905 = vmatpush3.bf16.msra.mxu0 %v3378_v10 }
  0x14   :  { %2926 = vmatprep.subr.bf16.mxu1 %v4390_v0  ;;  %2906 = vmatprep.subr.bf16.mxu0 %v4390_v0 }
  0x17   :  { %2927 = vmatpush3.bf16.msra.mxu1 %v3573_v11  ;;  %2907 = vmatpush3.bf16.msra.mxu0 %v3380_v12 }
  0x18   :  { %2928 = vmatprep.subr.bf16.mxu1 %v4390_v0  ;;  %2908 = vmatprep.subr.bf16.mxu0 %v4390_v0 }
  0x1b   :  { %2929 = vmatpush3.bf16.msra.mxu1 %v3584_v13  ;;  %2909 = vmatpush3.bf16.msra.mxu0 %v3589_v14 }
  0x1c   :  { %2930 = vmatprep.subr.bf16.mxu1 %v4390_v0  ;;  %2910 = vmatprep.subr.bf16.mxu0 %v4390_v0 }
  0x1f   :  { %2931 = vmatpush3.bf16.msra.mxu1 %v3597_v15  ;;  %2911 = vmatpush3.bf16.msra.mxu0 %v3607_v17 }
  0x20   :  { %2968 = vmatprep.subr.bf16.mxu1 %v4390_v0  ;;  %2936 = vmatprep.subr.bf16.mxu0 %v4390_v0 }
  0x22   :  { %2933 = vmatmul.mubr.bf16.vlgmr.msra.gmra.mxu1 %v3602_v16  ;;  %2913 = vmatmul.mubr.bf16.vlgmr.msra.gmra.mxu0 %v3602_v16 }
  0x23   :  { %2970 = vmatprep.mubr.msk.bf16.mxu1 %vm3471_vm0, %v4390_v0  ;;  %2938 = vmatprep.mubr.msk.bf16.mxu0 %vm3471_vm0, %v4390_v0 }
  0xe2   :  { %v245_v18 = vpop.f32.mrf.mxu1  ;;  %v136_v19 = vpop.f32.mrf.mxu0 }
  0xe4   :  { %v2934_v20 = vpop.f32.mrf.mxu1  ;;  %v2914_v21 = vpop.f32.mrf.mxu0 }
  0xe5   :  { %v3768_v20 = vld [vmem:[%s4381_s7 + $0x138] sm:$0xff]   ;;  %v3776_v21 = vld [vmem:[%s4381_s7 + $0x130] sm:$0xff]  }
  0xe6   :  { %v248_v22 = vpop.f32.mrf.mxu1  ;;  %v139_v24 = vpop.f32.mrf.mxu0 }
  0xe7   :  { %v255_v23 = vpack.c.bf16 %v248_v22, %v245_v18  ;;  %v145_v27 = vpack.c.bf16 %v139_v24, %v136_v19  ;;  %v3405_v19 = vld [vmem:[%s4383_s1 + $0x18] sm:$0xff]   ;;  %v3785_v22 = vld [vmem:[%s4381_s7 + $0x128] sm:$0xff]  }
  0xe8   :  { %v2935_v25 = vpop.f32.mrf.mxu1  ;;  %v2915_v28 = vpop.f32.mrf.mxu0  ;;  %v3799_v24 = vld [vmem:[%s4381_s7 + $0x118] sm:$0xff]  }
  0xe9   :  { %2937 = vmatpush3.bf16.msra.mxu0 %v255_v23  ;;  %v3792_v23 = vld [vmem:[%s4381_s7 + $0x120] sm:$0xff]   ;;  %v3806_v25 = vld [vmem:[%s4381_s7 + $0x110] sm:$0xff]  }
  0xea   :  { %2942 = vmatprep.subr.bf16.mxu0 %v4390_v0 }
  0xec   :  { %2939 = vmatmul.mubr.msk.bf16.vlgmr.msra.gmra.mxu0 %vm261_vm1, %v3386_v26  ;;  %v3813_v26 = vld [vmem:[%s4381_s7 + $0x108] sm:$0xff]  }
  0xed   :  { %2943 = vmatpush3.bf16.msra.mxu0 %v145_v27  ;;  %2944 = vmatprep.mubr.msk.bf16.mxu0 %vm3471_vm0, %v4390_v0  ;;  %v3820_v27 = vld [vmem:[%s4381_s7 + $0x100] sm:$0xff]  }
  0xee   :  { %2948 = vmatprep.subr.bf16.mxu0 %v4390_v0 }
  0xf4   :  { %2945 = vmatmul.mubr.msk.bf16.vlgmr.msra.gmra.mxu0 %vm261_vm1, %v3387_v29 }
  0xf5   :  { %2949 = vmatpush3.bf16.msra.mxu0 %v3637_v30  ;;  %2964 = vmatprep.mubr.msk.bf16.mxu0 %vm3471_vm0, %v4390_v0 }
  0xf6   :  { %2950 = vmatprep.subr.bf16.mxu0 %v4390_v0 }
  0xf9   :  { %2951 = vmatpush3.bf16.msra.mxu0 %v3644_v31 }
  0xfa   :  { %2952 = vmatprep.subr.bf16.mxu0 %v4390_v0 }
  0xfd   :  { %2953 = vmatpush3.bf16.msra.mxu0 %v3653_v32 }
  0xfe   :  { %2954 = vmatprep.subr.bf16.mxu0 %v4390_v0 }
 0x101   :  { %2955 = vmatpush3.bf16.msra.mxu0 %v3660_v33 }
 0x102   :  { %2956 = vmatprep.subr.bf16.mxu0 %v4390_v0 }
 0x105   :  { %2957 = vmatpush3.bf16.msra.mxu0 %v3667_v34 }
 0x106   :  { %2958 = vmatprep.subr.bf16.mxu0 %v4390_v0 }
 0x109   :  { %2959 = vmatpush3.bf16.msra.mxu0 %v3674_v35 }
 0x10a   :  { %2960 = vmatprep.subr.bf16.mxu0 %v4390_v0 }
 0x10d   :  { %2961 = vmatpush3.bf16.msra.mxu0 %v3681_v36 }
 0x10e   :  { %2962 = vmatprep.subr.bf16.mxu0 %v4390_v0 }
 0x111   :  { %2963 = vmatpush3.bf16.msra.mxu0 %v3688_v37 }
 0x112   :  { %2994 = vmatprep.subr.bf16.mxu0 %v4390_v0 }
 0x114   :  { %2965 = vmatmul.mubr.bf16.vlgmr.msra.gmra.mxu0 %v3602_v16 }
 0x115   :  { %2996 = vmatprep.mubr.msk.bf16.mxu0 %vm3471_vm0, %v4390_v0 }
 0x1ac   :  { %v299_v38 = vpop.f32.mrf.mxu0 }
 0x1ae   :  { %v2940_v39 = vpop.f32.mrf.mxu0 }
 0x1b0   :  { %v302_v40 = vpop.f32.mrf.mxu0 }
 0x1b2   :  { %v2941_v41 = vpop.f32.mrf.mxu0 }
 0x1b4   :  { %v348_v42 = vpop.f32.mrf.mxu0 }
 0x1b5   :  { %v349_v43 = vadd.f32 %v348_v42, %v299_v38 }
 0x1b6   :  { %v2946_v44 = vpop.f32.mrf.mxu0 }
 0x1b8   :  { %v351_v45 = vpop.f32.mrf.mxu0 }
 0x1b9   :  { %v352_v46 = vadd.f32 %v351_v45, %v302_v40 }
 0x1ba   :  { %v2947_v47 = vpop.f32.mrf.mxu0 }
 0x1bb   :  { %v3414_v47 = vld [vmem:[%s4383_s1 + $0x20] sm:$0xff]  }
 0x1d4   :  { %v454_v48 = vpop.f32.mrf.mxu0 }
 0x1d6   :  { %v2966_v49 = vpop.f32.mrf.mxu0 }
 0x1d7   :  { %v3842_v49 = vld [vmem:[%s4381_s7 + $0x170] sm:$0xff]  }
 0x1d8   :  { %v457_v50 = vpop.f32.mrf.mxu0 }
 0x1d9   :  { %v464_v51 = vpack.c.bf16 %v457_v50, %v454_v48  ;;  %v3834_v48 = vld [vmem:[%s4381_s7 + $0x178] sm:$0xff]   ;;  %v3851_v50 = vld [vmem:[%s4381_s7 + $0x168] sm:$0xff]  }
 0x1da   :  { %v2967_v52 = vpop.f32.mrf.mxu0 }
 0x1db   :  { %2969 = vmatpush3.bf16.msra.mxu1 %v464_v51  ;;  %v3858_v51 = vld [vmem:[%s4381_s7 + $0x160] sm:$0xff]   ;;  %v3865_v52 = vld [vmem:[%s4381_s7 + $0x158] sm:$0xff]  }
 0x1dc   :  { %2974 = vmatprep.subr.bf16.mxu1 %v4390_v0 }
 0x1de   :  { %2971 = vmatmul.mubr.msk.bf16.vlgmr.msra.gmra.mxu1 %vm261_vm1, %v3396_v53  ;;  %v3872_v53 = vld [vmem:[%s4381_s7 + $0x150] sm:$0xff]  }
 0x1df   :  { %2975 = vmatpush3.bf16.msra.mxu1 %v3702_v54  ;;  %2990 = vmatprep.mubr.msk.bf16.mxu1 %vm3471_vm0, %v4390_v0 }
 0x1e0   :  { %2976 = vmatprep.subr.bf16.mxu1 %v4390_v0 }
 0x1e3   :  { %2977 = vmatpush3.bf16.msra.mxu1 %v3710_v55 }
 0x1e4   :  { %2978 = vmatprep.subr.bf16.mxu1 %v4390_v0 }
 0x1e7   :  { %2979 = vmatpush3.bf16.msra.mxu1 %v3719_v56 }
 0x1e8   :  { %2980 = vmatprep.subr.bf16.mxu1 %v4390_v0 }
 0x1eb   :  { %2981 = vmatpush3.bf16.msra.mxu1 %v3726_v57 }
 0x1ec   :  { %2982 = vmatprep.subr.bf16.mxu1 %v4390_v0 }
 0x1ef   :  { %2983 = vmatpush3.bf16.msra.mxu1 %v3733_v58 }
 0x1f0   :  { %2984 = vmatprep.subr.bf16.mxu1 %v4390_v0 }
 0x1f3   :  { %2985 = vmatpush3.bf16.msra.mxu1 %v3740_v59 }
 0x1f4   :  { %2986 = vmatprep.subr.bf16.mxu1 %v4390_v0 }
 0x1f7   :  { %2987 = vmatpush3.bf16.msra.mxu1 %v3747_v60 }
 0x1f8   :  { %2988 = vmatprep.subr.bf16.mxu1 %v4390_v0 }
 0x1fb   :  { %2989 = vmatpush3.bf16.msra.mxu1 %v3754_v61 }
 0x1fc   :  { %3020 = vmatprep.subr.bf16.mxu1 %v4390_v0 }
 0x1fe   :  { %2991 = vmatmul.mubr.bf16.vlgmr.msra.gmra.mxu1 %v3602_v16 }
 0x1ff   :  { %3022 = vmatprep.mubr.msk.bf16.mxu1 %vm3471_vm0, %v4390_v0 }
 0x29e   :  { %v507_v62 = vpop.f32.mrf.mxu1 }
 0x29f   :  { %v514_v63 = vadd.f32 %v507_v62, %v349_v43  ;;  %v3879_v62 = vld [vmem:[%s4381_s7 + $0x148] sm:$0xff]  }
 0x2a0   :  { %v2972_v1 = vpop.f32.mrf.mxu1 }
 0x2a2   :  { %v510_v2 = vpop.f32.mrf.mxu1 }
 0x2a3   :  { %v515_v3 = vadd.f32 %v510_v2, %v352_v46 }
 0x2a4   :  { %v2973_v4 = vpop.f32.mrf.mxu1 }
 0x2be   :  { %v615_v6 = vpop.f32.mrf.mxu1 }
 0x2c0   :  { %v2992_v8 = vpop.f32.mrf.mxu1 }
 0x2c2   :  { %v618_v10 = vpop.f32.mrf.mxu1 }
 0x2c3   :  { %v625_v12 = vpack.c.bf16 %v618_v10, %v615_v6 }
 0x2c4   :  { %v2993_v18 = vpop.f32.mrf.mxu1 }
 0x2c5   :  { %2995 = vmatpush3.bf16.msra.mxu0 %v625_v12 }
 0x2c6   :  { %3000 = vmatprep.subr.bf16.mxu0 %v4390_v0 }
 0x2c8   :  { %2997 = vmatmul.mubr.msk.bf16.vlgmr.msra.gmra.mxu0 %vm261_vm1, %v3405_v19 }
 0x2c9   :  { %3001 = vmatpush3.bf16.msra.mxu0 %v3768_v20  ;;  %3016 = vmatprep.mubr.msk.bf16.mxu0 %vm3471_vm0, %v4390_v0 }
 0x2ca   :  { %3002 = vmatprep.subr.bf16.mxu0 %v4390_v0 }
 0x2cd   :  { %3003 = vmatpush3.bf16.msra.mxu0 %v3776_v21 }
 0x2ce   :  { %3004 = vmatprep.subr.bf16.mxu0 %v4390_v0 }
 0x2d1   :  { %3005 = vmatpush3.bf16.msra.mxu0 %v3785_v22 }
 0x2d2   :  { %3006 = vmatprep.subr.bf16.mxu0 %v4390_v0 }
 0x2d5   :  { %3007 = vmatpush3.bf16.msra.mxu0 %v3792_v23 }
 0x2d6   :  { %3008 = vmatprep.subr.bf16.mxu0 %v4390_v0 }
 0x2d9   :  { %3009 = vmatpush3.bf16.msra.mxu0 %v3799_v24 }
 0x2da   :  { %3010 = vmatprep.subr.bf16.mxu0 %v4390_v0 }
 0x2dd   :  { %3011 = vmatpush3.bf16.msra.mxu0 %v3806_v25 }
 0x2de   :  { %3012 = vmatprep.subr.bf16.mxu0 %v4390_v0 }
 0x2e1   :  { %3013 = vmatpush3.bf16.msra.mxu0 %v3813_v26 }
 0x2e2   :  { %3014 = vmatprep.subr.bf16.mxu0 %v4390_v0 }
 0x2e5   :  { %3015 = vmatpush3.bf16.msra.mxu0 %v3820_v27 }
 0x2e6   :  { %3046 = vmatprep.subr.bf16.mxu0 %v4390_v0 }
 0x2e8   :  { %3017 = vmatmul.mubr.bf16.vlgmr.msra.gmra.mxu0 %v3602_v16 }
 0x2e9   :  { %3048 = vmatprep.mubr.msk.bf16.mxu0 %vm3471_vm0, %v4390_v0 }
 0x388   :  { %v668_v28 = vpop.f32.mrf.mxu0 }
 0x389   :  { %v675_v29 = vadd.f32 %v668_v28, %v514_v63  ;;  %v3886_v63 = vld [vmem:[%s4381_s7 + $0x140] sm:$0xff]  }
 0x38a   :  { %v2998_v38 = vpop.f32.mrf.mxu0 }
 0x38b   :  { %v3423_v38 = vld [vmem:[%s4383_s1 + $0x28] sm:$0xff]  }
 0x38c   :  { %v671_v39 = vpop.f32.mrf.mxu0 }
 0x38d   :  { %v676_v40 = vadd.f32 %v671_v39, %v515_v3  ;;  %v3900_v39 = vld [vmem:[%s4381_s7 + $0x1b8] sm:$0xff]  }
 0x38e   :  { %v2999_v41 = vpop.f32.mrf.mxu0 }
 0x38f   :  { %v3924_v41 = vld [vmem:[%s4381_s7 + $0x1a0] sm:$0xff]  }
 0x3a8   :  { %v776_v42 = vpop.f32.mrf.mxu0 }
 0x3aa   :  { %v3018_v43 = vpop.f32.mrf.mxu0 }
 0x3ab   :  { %v3938_v43 = vld [vmem:[%s4381_s7 + $0x190] sm:$0xff]  }
 0x3ac   :  { %v779_v44 = vpop.f32.mrf.mxu0 }
 0x3ad   :  { %v786_v45 = vpack.c.bf16 %v779_v44, %v776_v42  ;;  %v3931_v42 = vld [vmem:[%s4381_s7 + $0x198] sm:$0xff]   ;;  %v3945_v44 = vld [vmem:[%s4381_s7 + $0x188] sm:$0xff]  }
 0x3ae   :  { %v3019_v46 = vpop.f32.mrf.mxu0 }
 0x3af   :  { %3021 = vmatpush3.bf16.msra.mxu1 %v786_v45  ;;  %v3952_v45 = vld [vmem:[%s4381_s7 + $0x180] sm:$0xff]  }
 0x3b0   :  { %3026 = vmatprep.subr.bf16.mxu1 %v4390_v0 }
 0x3b2   :  { %3023 = vmatmul.mubr.msk.bf16.vlgmr.msra.gmra.mxu1 %vm261_vm1, %v3414_v47 }
 0x3b3   :  { %3027 = vmatpush3.bf16.msra.mxu1 %v3834_v48  ;;  %3042 = vmatprep.mubr.msk.bf16.mxu1 %vm3471_vm0, %v4390_v0 }
 0x3b4   :  { %3028 = vmatprep.subr.bf16.mxu1 %v4390_v0 }
 0x3b7   :  { %3029 = vmatpush3.bf16.msra.mxu1 %v3842_v49 }
 0x3b8   :  { %3030 = vmatprep.subr.bf16.mxu1 %v4390_v0 }
 0x3bb   :  { %3031 = vmatpush3.bf16.msra.mxu1 %v3851_v50 }
 0x3bc   :  { %3032 = vmatprep.subr.bf16.mxu1 %v4390_v0 }
 0x3bf   :  { %3033 = vmatpush3.bf16.msra.mxu1 %v3858_v51 }
 0x3c0   :  { %3034 = vmatprep.subr.bf16.mxu1 %v4390_v0 }
 0x3c3   :  { %3035 = vmatpush3.bf16.msra.mxu1 %v3865_v52 }
 0x3c4   :  { %3036 = vmatprep.subr.bf16.mxu1 %v4390_v0 }
 0x3c7   :  { %3037 = vmatpush3.bf16.msra.mxu1 %v3872_v53 }
 0x3c8   :  { %3038 = vmatprep.subr.bf16.mxu1 %v4390_v0 }
 0x3cb   :  { %3039 = vmatpush3.bf16.msra.mxu1 %v3879_v62 }
 0x3cc   :  { %3040 = vmatprep.subr.bf16.mxu1 %v4390_v0 }
 0x3cf   :  { %3041 = vmatpush3.bf16.msra.mxu1 %v3886_v63 }
 0x3d0   :  { %3072 = vmatprep.subr.bf16.mxu1 %v4390_v0 }
 0x3d2   :  { %3043 = vmatmul.mubr.bf16.vlgmr.msra.gmra.mxu1 %v3602_v16 }
 0x3d3   :  { %3074 = vmatprep.mubr.msk.bf16.mxu1 %vm3471_vm0, %v4390_v0 }
 0x472   :  { %v829_v1 = vpop.f32.mrf.mxu1 }
 0x473   :  { %v836_v2 = vadd.f32 %v829_v1, %v675_v29  ;;  %v3908_v29 = vld [vmem:[%s4381_s7 + $0x1b0] sm:$0xff]  }
 0x474   :  { %v3024_v3 = vpop.f32.mrf.mxu1 }
 0x476   :  { %v832_v4 = vpop.f32.mrf.mxu1 }
 0x477   :  { %v837_v6 = vadd.f32 %v832_v4, %v676_v40  ;;  %v3917_v40 = vld [vmem:[%s4381_s7 + $0x1a8] sm:$0xff]  }
 0x478   :  { %v3025_v8 = vpop.f32.mrf.mxu1 }
 0x492   :  { %v937_v10 = vpop.f32.mrf.mxu1 }
 0x494   :  { %v3044_v12 = vpop.f32.mrf.mxu1 }
 0x496   :  { %v940_v18 = vpop.f32.mrf.mxu1 }
 0x497   :  { %v947_v19 = vpack.c.bf16 %v940_v18, %v937_v10 }
 0x498   :  { %v3045_v28 = vpop.f32.mrf.mxu1 }
 0x499   :  { %3047 = vmatpush3.bf16.msra.mxu0 %v947_v19 }
 0x49a   :  { %3052 = vmatprep.subr.bf16.mxu0 %v4390_v0 }
 0x49c   :  { %3049 = vmatmul.mubr.msk.bf16.vlgmr.msra.gmra.mxu0 %vm261_vm1, %v3423_v38  ;;  %v3432_v38 = vld [vmem:[%s4383_s1 + $0x30] sm:$0xff]  }
 0x49d   :  { %3053 = vmatpush3.bf16.msra.mxu0 %v3900_v39  ;;  %3068 = vmatprep.mubr.msk.bf16.mxu0 %vm3471_vm0, %v4390_v0 }
 0x49e   :  { %3054 = vmatprep.subr.bf16.mxu0 %v4390_v0 }
 0x4a1   :  { %3055 = vmatpush3.bf16.msra.mxu0 %v3908_v29 }
 0x4a2   :  { %3056 = vmatprep.subr.bf16.mxu0 %v4390_v0 }
 0x4a5   :  { %3057 = vmatpush3.bf16.msra.mxu0 %v3917_v40 }
 0x4a6   :  { %3058 = vmatprep.subr.bf16.mxu0 %v4390_v0 }
 0x4a9   :  { %3059 = vmatpush3.bf16.msra.mxu0 %v3924_v41 }
 0x4aa   :  { %3060 = vmatprep.subr.bf16.mxu0 %v4390_v0 }
 0x4ad   :  { %3061 = vmatpush3.bf16.msra.mxu0 %v3931_v42 }
 0x4ae   :  { %3062 = vmatprep.subr.bf16.mxu0 %v4390_v0 }
 0x4b1   :  { %3063 = vmatpush3.bf16.msra.mxu0 %v3938_v43 }
 0x4b2   :  { %3064 = vmatprep.subr.bf16.mxu0 %v4390_v0 }
 0x4b5   :  { %3065 = vmatpush3.bf16.msra.mxu0 %v3945_v44 }
 0x4b6   :  { %3066 = vmatprep.subr.bf16.mxu0 %v4390_v0 }
 0x4b9   :  { %3067 = vmatpush3.bf16.msra.mxu0 %v3952_v45 }
 0x4ba   :  { %3098 = vmatprep.subr.bf16.mxu0 %v4390_v0 }
 0x4bc   :  { %3069 = vmatmul.mubr.bf16.vlgmr.msra.gmra.mxu0 %v3602_v16 }
 0x4bd   :  { %3100 = vmatprep.mubr.msk.bf16.mxu0 %vm3471_vm0, %v4390_v0  ;;  %v3966_v0 = vld [vmem:[%s4381_s7 + $0x1f8] sm:$0xff]  }
 0x4be   :  { %4405 = vst [vmem:[#allocation2_spill] sm:$0xff] %v3966_v0 }
 0x55c   :  { %v990_v46 = vpop.f32.mrf.mxu0 }
 0x55d   :  { %v997_v47 = vadd.f32 %v990_v46, %v836_v2  ;;  %v4406_v2 = vmov 0.0   ;;  %v3983_v46 = vld [vmem:[%s4381_s7 + $0x1e8] sm:$0xff]  }
 0x55e   :  { %v3050_v1 = vpop.f32.mrf.mxu0  ;;  %4408 = vst [vmem:[#allocation4_spill] sm:$0xff] %v3983_v46 }
 0x55f   :  { %v3990_v1 = vld [vmem:[%s4381_s7 + $0x1e0] sm:$0xff]  }
 0x560   :  { %v993_v3 = vpop.f32.mrf.mxu0  ;;  %4409 = vst [vmem:[#allocation5_spill] sm:$0xff] %v3990_v1 }
 0x561   :  { %v998_v4 = vadd.f32 %v993_v3, %v837_v6  ;;  %v3974_v6 = vld [vmem:[%s4381_s7 + $0x1f0] sm:$0xff]   ;;  %v3997_v3 = vld [vmem:[%s4381_s7 + $0x1d8] sm:$0xff]  }
 0x562   :  { %v3051_v8 = vpop.f32.mrf.mxu0  ;;  %4407 = vst [vmem:[#allocation3_spill] sm:$0xff] %v3974_v6  ;;  %4410 = vst [vmem:[#allocation6_spill] sm:$0xff] %v3997_v3 }
 0x563   :  { %v4004_v8 = vld [vmem:[%s4381_s7 + $0x1d0] sm:$0xff]  }
 0x564   :  { %4411 = vst [vmem:[#allocation7_spill] sm:$0xff] %v4004_v8 }
 0x57c   :  { %v1098_v10 = vpop.f32.mrf.mxu0 }
 0x57e   :  { %v3070_v12 = vpop.f32.mrf.mxu0 }
 0x57f   :  { %v4018_v12 = vld [vmem:[%s4381_s7 + $0x1c0] sm:$0xff]  }
 0x580   :  { %v1101_v18 = vpop.f32.mrf.mxu0  ;;  %4413 = vst [vmem:[#allocation9_spill] sm:$0xff] %v4018_v12 }
 0x581   :  { %v1108_v19 = vpack.c.bf16 %v1101_v18, %v1098_v10  ;;  %v4011_v10 = vld [vmem:[%s4381_s7 + $0x1c8] sm:$0xff]  }
 0x582   :  { %v3071_v28 = vpop.f32.mrf.mxu0  ;;  %4412 = vst [vmem:[#allocation8_spill] sm:$0xff] %v4011_v10 }
 0x583   :  { %3073 = vmatpush3.bf16.msra.mxu1 %v1108_v19 }
 0x584   :  { %3078 = vmatprep.subr.bf16.mxu1 %v4406_v2 }
 0x586   :  { %3075 = vmatmul.mubr.msk.bf16.vlgmr.msra.gmra.mxu1 %vm261_vm1, %v3432_v38 }
 0x587   :  { %3079 = vmatpush3.bf16.msra.mxu1 %v3966_v0  ;;  %3094 = vmatprep.mubr.msk.bf16.mxu1 %vm3471_vm0, %v4406_v2  ;;  %v3441_v0 = vld [vmem:[%s4383_s1 + $0x38] sm:$0xff]  }
 0x588   :  { %3080 = vmatprep.subr.bf16.mxu1 %v4406_v2 }
 0x58b   :  { %3081 = vmatpush3.bf16.msra.mxu1 %v3974_v6 }
 0x58c   :  { %3082 = vmatprep.subr.bf16.mxu1 %v4406_v2 }
 0x58f   :  { %3083 = vmatpush3.bf16.msra.mxu1 %v3983_v46 }
 0x590   :  { %3084 = vmatprep.subr.bf16.mxu1 %v4406_v2 }
 0x593   :  { %3085 = vmatpush3.bf16.msra.mxu1 %v3990_v1 }
 0x594   :  { %3086 = vmatprep.subr.bf16.mxu1 %v4406_v2 }
 0x597   :  { %3087 = vmatpush3.bf16.msra.mxu1 %v3997_v3 }
 0x598   :  { %3088 = vmatprep.subr.bf16.mxu1 %v4406_v2 }
 0x59b   :  { %3089 = vmatpush3.bf16.msra.mxu1 %v4004_v8 }
 0x59c   :  { %3090 = vmatprep.subr.bf16.mxu1 %v4406_v2 }
 0x59f   :  { %3091 = vmatpush3.bf16.msra.mxu1 %v4011_v10 }
 0x5a0   :  { %3092 = vmatprep.subr.bf16.mxu1 %v4406_v2 }
 0x5a3   :  { %3093 = vmatpush3.bf16.msra.mxu1 %v4018_v12 }
 0x5a4   :  { %3124 = vmatprep.subr.bf16.mxu1 %v4406_v2 }
 0x5a6   :  { %3095 = vmatmul.mubr.bf16.vlgmr.msra.gmra.mxu1 %v3602_v16 }
 0x5a7   :  { %3126 = vmatprep.mubr.msk.bf16.mxu1 %vm3471_vm0, %v4406_v2 }
 0x646   :  { %v1151_v18 = vpop.f32.mrf.mxu1 }
 0x647   :  { %v4026_v19 = vadd.f32 %v1151_v18, %v997_v47  ;;  %v4036_v47 = vld [vmem:[%s4381_s7 + $0x238] sm:$0xff]   ;;  %v3462_v18 = vld [vmem:[%s4381_s7 + $0x70] sm:$0xff]  }
 0x648   :  { %v3076_v28 = vpop.f32.mrf.mxu1 }
 0x649   :  { %v2386_v28 = vld [vmem:[%s4387_s6] sm:$0xff] }
 0x64a   :  { %v1154_v38 = vpop.f32.mrf.mxu1 }
 0x64b   :  { %v4028_v10 = vadd.f32 %v1154_v38, %v998_v4  ;;  %v4044_v4 = vld [vmem:[%s4381_s7 + $0x230] sm:$0xff]   ;;  %v2387_v38 = vld [vmem:[%s4387_s6 + $0x8] sm:$0xff] }
 0x64c   :  { %v3077_v8 = vpop.f32.mrf.mxu1 }
 0x64d   :  { %v4088_v8 = vld [vmem:[%s4381_s7 + $0x200] sm:$0xff]  }
 0x64e   :  { %4418 = vst [vmem:[#allocation14_spill] sm:$0xff] %v4088_v8 }
 0x666   :  { %v1259_v3 = vpop.f32.mrf.mxu1 }
 0x668   :  { %v3096_v1 = vpop.f32.mrf.mxu1 }
 0x669   :  { %v4074_v1 = vld [vmem:[%s4381_s7 + $0x210] sm:$0xff]  }
 0x66a   :  { %v1262_v46 = vpop.f32.mrf.mxu1  ;;  %4416 = vst [vmem:[#allocation12_spill] sm:$0xff] %v4074_v1 }
 0x66b   :  { %v1269_v6 = vpack.c.bf16 %v1262_v46, %v1259_v3  ;;  %v4067_v46 = vld [vmem:[%s4381_s7 + $0x218] sm:$0xff]   ;;  %v4081_v3 = vld [vmem:[%s4381_s7 + $0x208] sm:$0xff]  }
 0x66c   :  { %v3097_v12 = vpop.f32.mrf.mxu1  ;;  %4415 = vst [vmem:[#allocation11_spill] sm:$0xff] %v4067_v46  ;;  %4417 = vst [vmem:[#allocation13_spill] sm:$0xff] %v4081_v3 }
 0x66d   :  { %3099 = vmatpush3.bf16.msra.mxu0 %v1269_v6  ;;  %v4053_v6 = vld [vmem:[%s4381_s7 + $0x228] sm:$0xff]   ;;  %v3461_v12 = vld [vmem:[%s4381_s7 + $0x78] sm:$0xff]  }
 0x66e   :  { %3104 = vmatprep.subr.bf16.mxu0 %v4406_v2 }
 0x670   :  { %3101 = vmatmul.mubr.msk.bf16.vlgmr.msra.gmra.mxu0 %vm261_vm1, %v3441_v0  ;;  %v4060_v0 = vld [vmem:[%s4381_s7 + $0x220] sm:$0xff]  }
 0x671   :  { %3105 = vmatpush3.bf16.msra.mxu0 %v4036_v47  ;;  %3120 = vmatprep.mubr.msk.bf16.mxu0 %vm3471_vm0, %v4406_v2  ;;  %4414 = vst [vmem:[#allocation10_spill] sm:$0xff] %v4060_v0 }
 0x672   :  { %3106 = vmatprep.subr.bf16.mxu0 %v4406_v2 }
 0x675   :  { %3107 = vmatpush3.bf16.msra.mxu0 %v4044_v4 }
 0x676   :  { %3108 = vmatprep.subr.bf16.mxu0 %v4406_v2 }
 0x679   :  { %3109 = vmatpush3.bf16.msra.mxu0 %v4053_v6 }
 0x67a   :  { %3110 = vmatprep.subr.bf16.mxu0 %v4406_v2 }
 0x67d   :  { %3111 = vmatpush3.bf16.msra.mxu0 %v4060_v0 }
 0x67e   :  { %3112 = vmatprep.subr.bf16.mxu0 %v4406_v2 }
 0x681   :  { %3113 = vmatpush3.bf16.msra.mxu0 %v4067_v46 }
 0x682   :  { %3114 = vmatprep.subr.bf16.mxu0 %v4406_v2 }
 0x685   :  { %3115 = vmatpush3.bf16.msra.mxu0 %v4074_v1  ;;  %v3450_v1 = vld [vmem:[%s4383_s1 + $0x40] sm:$0xff]  }
 0x686   :  { %3116 = vmatprep.subr.bf16.mxu0 %v4406_v2 }
 0x689   :  { %3117 = vmatpush3.bf16.msra.mxu0 %v4081_v3 }
 0x68a   :  { %3118 = vmatprep.subr.bf16.mxu0 %v4406_v2 }
 0x68d   :  { %3119 = vmatpush3.bf16.msra.mxu0 %v4088_v8 }
 0x68e   :  { %3150 = vmatprep.subr.bf16.mxu0 %v4406_v2 }
 0x690   :  { %3121 = vmatmul.mubr.bf16.vlgmr.msra.gmra.mxu0 %v3602_v16  ;;  %v2373_v16 = vld [vmem:[%s4386_s5 + $0x8] sm:$0xff] }
 0x691   :  { %3151 = vmatpush3.bf16.msra.mxu0 %v3461_v12  ;;  %3166 = vmatprep.mubr.msk.bf16.mxu0 %vm3471_vm0, %v4406_v2 }
 0x692   :  { %3152 = vmatprep.subr.bf16.mxu0 %v4406_v2 }
 0x695   :  { %3153 = vmatpush3.bf16.msra.mxu0 %v3462_v18 }
 0x696   :  { %3154 = vmatprep.subr.bf16.mxu0 %v4406_v2 }
 0x699   :  { %3155 = vmatpush3.bf16.msra.mxu0 %v3541_v5  ;;  %v3472_v5 = vmov 0  }
 0x69a   :  { %3156 = vmatprep.subr.bf16.mxu0 %v4406_v2  ;;  %3367 = vset.pattern.permute.xlu0 %v3472_v5 }
 0x69b   :  { %3368 = vset.pattern.permute.xlu1 %v3472_v5 }
 0x69d   :  { %3157 = vmatpush3.bf16.msra.mxu0 %v3552_v7  ;;  %v1482_v7 = vld [vmem:[%s4384_s2] sm:$0xff] }
 0x69e   :  { %3158 = vmatprep.subr.bf16.mxu0 %v4406_v2  ;;  %1486 = vperm.xlu0 %3367, %v1482_v7  }
 0x6a1   :  { %3159 = vmatpush3.bf16.msra.mxu0 %v3563_v9  ;;  %v1496_v9 = vld [vmem:[%s4385_s3] sm:$0xff] }
 0x6a2   :  { %3160 = vmatprep.subr.bf16.mxu0 %v4406_v2  ;;  %1500 = vperm.xlu1 %3368, %v1496_v9  }
 0x6a5   :  { %3161 = vmatpush3.bf16.msra.mxu0 %v3573_v11  ;;  %v1483_v11 = vld [vmem:[%s4384_s2 + $0x8] sm:$0xff] }
 0x6a6   :  { %3162 = vmatprep.subr.bf16.mxu0 %v4406_v2  ;;  %1491 = vperm.xlu0 %3367, %v1483_v11  }
 0x6a9   :  { %3163 = vmatpush3.bf16.msra.mxu0 %v3584_v13  ;;  %v1497_v13 = vld [vmem:[%s4385_s3 + $0x8] sm:$0xff] }
 0x6aa   :  { %3164 = vmatprep.subr.bf16.mxu0 %v4406_v2  ;;  %1505 = vperm.xlu1 %3368, %v1497_v13  }
 0x6ad   :  { %3165 = vmatpush3.bf16.msra.mxu0 %v3597_v15  ;;  %v2372_v15 = vld [vmem:[%s4386_s5] sm:$0xff] }
 0x6ae   :  { %3202 = vmatprep.subr.bf16.mxu0 %v4406_v2  ;;  %2376 = vperm.xlu0 %3367, %v2372_v15  }
 0x6af   :  { %2381 = vperm.xlu1 %3368, %v2373_v16  }
 0x6b2   :  { %2390 = vperm.xlu0 %3367, %v2386_v28   ;;  %v3468_v28 = vld [vmem:[%s4381_s7 + $0x10] sm:$0xff]  }
 0x6b3   :  { %2395 = vperm.xlu1 %3368, %v2387_v38  }
 0x719   :  { %v1487_v38 = vpop.permute.xlu0 %1486 }
 0x730   :  { %v1312_v12 = vpop.f32.mrf.mxu0 }
 0x731   :  { %v1319_v18 = vadd.f32 %v1312_v12, %v4026_v19  ;;  %v3463_v19 = vld [vmem:[%s4381_s7 + $0x38] sm:$0xff]  }
 0x732   :  { %v3102_v5 = vpop.f32.mrf.mxu0 }
 0x734   :  { %v1315_v7 = vpop.f32.mrf.mxu0 }
 0x735   :  { %v1320_v9 = vadd.f32 %v1315_v7, %v4028_v10  ;;  %v3464_v10 = vld [vmem:[%s4381_s7 + $0x30] sm:$0xff]   ;;  %v1501_v7 = vpop.permute.xlu1 %1500 }
 0x736   :  { %v3103_v11 = vpop.f32.mrf.mxu0 }
 0x750   :  { %v1420_v13 = vpop.f32.mrf.mxu0 }
 0x752   :  { %v3122_v15 = vpop.f32.mrf.mxu0 }
 0x754   :  { %v1423_v16 = vpop.f32.mrf.mxu0 }
 0x755   :  { %v1430_v8 = vpack.c.bf16 %v1423_v16, %v1420_v13 }
 0x756   :  { %v3123_v3 = vpop.f32.mrf.mxu0 }
 0x757   :  { %3125 = vmatpush3.bf16.msra.mxu1 %v1430_v8  ;;  %v3466_v3 = vld [vmem:[%s4381_s7 + $0x20] sm:$0xff]   ;;  %v3467_v8 = vld [vmem:[%s4381_s7 + $0x18] sm:$0xff]  }
 0x758   :  { %3130 = vmatprep.subr.bf16.mxu1 %v4406_v2 }
 0x75a   :  { %3127 = vmatmul.mubr.msk.bf16.vlgmr.msra.gmra.mxu1 %vm261_vm1, %v3450_v1  ;;  %v3465_v1 = vld [vmem:[%s4381_s7 + $0x28] sm:$0xff]  }
 0x75b   :  { %3131 = vmatpush3.bf16.msra.mxu1 %v3463_v19  ;;  %3146 = vmatprep.mubr.msk.bf16.mxu1 %vm3471_vm0, %v4406_v2  ;;  %v1492_v19 = vpop.permute.xlu0 %1491 }
 0x75c   :  { %3132 = vmatprep.subr.bf16.mxu1 %v4406_v2 }
 0x75f   :  { %3133 = vmatpush3.bf16.msra.mxu1 %v3464_v10 }
 0x760   :  { %3134 = vmatprep.subr.bf16.mxu1 %v4406_v2 }
 0x763   :  { %3135 = vmatpush3.bf16.msra.mxu1 %v3465_v1 }
 0x764   :  { %3136 = vmatprep.subr.bf16.mxu1 %v4406_v2 }
 0x767   :  { %3137 = vmatpush3.bf16.msra.mxu1 %v3466_v3 }
 0x768   :  { %3138 = vmatprep.subr.bf16.mxu1 %v4406_v2 }
 0x76b   :  { %3139 = vmatpush3.bf16.msra.mxu1 %v3467_v8  ;;  %v1506_v8 = vpop.permute.xlu1 %1505 }
 0x76c   :  { %3140 = vmatprep.subr.bf16.mxu1 %v4406_v2 }
 0x76f   :  { %3141 = vmatpush3.bf16.msra.mxu1 %v3468_v28 }
 0x770   :  { %3142 = vmatprep.subr.bf16.mxu1 %v4406_v2 }
 0x773   :  { %3143 = vmatpush3.bf16.msra.mxu1 %v3589_v14 }
 0x774   :  { %3144 = vmatprep.subr.bf16.mxu1 %v4406_v2 }
 0x777   :  { %3145 = vmatpush3.bf16.msra.mxu1 %v3607_v17 }
 0x778   :  { %3170 = vmatprep.subr.bf16.mxu1 %v4406_v2 }
 0x81a   :  { %v1473_v12 = vpop.f32.mrf.mxu1 }
 0x81b   :  { %v1480_v5 = vadd.f32 %v1473_v12, %v1319_v18 }
 0x81c   :  { %v3128_v11 = vpop.f32.mrf.mxu1 }
 0x81d   :  { %v1494_v13 = vmul.f32 %v1487_v38, %v1480_v5 }
 0x81e   :  { %v1476_v15 = vpop.f32.mrf.mxu1 }
 0x81f   :  { %v1481_v16 = vadd.f32 %v1476_v15, %v1320_v9  ;;  %v1508_v1 = vadd.f32 %v1501_v7, %v1494_v13  ;;  %v3451_v13 = vld [vmem:[%s4388_s4 + $0x8] sm:$0xff]  }
 0x820   :  { %v3129_v10 = vpop.f32.mrf.mxu1 }
 0x821   :  { %v1495_v3 = vmul.f32 %v1492_v19, %v1481_v16  ;;  %v1510_v28 = vmax.f32 %v1508_v1, 0.0  ;;  %v3452_v16 = vld [vmem:[%s4388_s4] sm:$0xff]  }
 0x823   :  { %v1509_v14 = vadd.f32 %v1506_v8, %v1495_v3 }
 0x825   :  { %v1511_v46 = vmax.f32 %v1509_v14, 0.0 }
 0x827   :  { %v4177_v0 = vpack.c.bf16 %v1511_v46, %v1510_v28 }
 0x829   :  { %3147 = vmatmul.mubr.bf16.vlgmr.msra.gmra.mxu1 %v4177_v0  ;;  %3167 = vmatmul.mubr.bf16.vlgmr.msra.gmra.mxu0 %v4177_v0 }
 0x82a   :  { %3172 = vmatprep.mubr.msk.bf16.mxu1 %vm3471_vm0, %v4406_v2  ;;  %3204 = vmatprep.mubr.msk.bf16.mxu0 %vm3471_vm0, %v4406_v2 }
 0x8e9   :  { %v1547_v17 = vpop.f32.mrf.mxu1  ;;  %v1591_v18 = vpop.f32.mrf.mxu0 }
 0x8eb   :  { %v3148_v9 = vpop.f32.mrf.mxu1  ;;  %v3168_v38 = vpop.f32.mrf.mxu0 }
 0x8ed   :  { %v1550_v12 = vpop.f32.mrf.mxu1  ;;  %v1594_v5 = vpop.f32.mrf.mxu0 }
 0x8ee   :  { %v1601_v7 = vpack.c.bf16 %v1594_v5, %v1591_v18  ;;  %v1556_v15 = vpack.c.bf16 %v1550_v12, %v1547_v17  ;;  %v3453_v17 = vld [vmem:[%s4388_s4 + $0x10] sm:$0xff]  }
 0x8ef   :  { %v3149_v11 = vpop.f32.mrf.mxu1  ;;  %v3169_v46 = vpop.f32.mrf.mxu0 }
 0x8f0   :  { %3171 = vmatpush3.bf16.msra.mxu1 %v1601_v7 }
 0x8f1   :  { %3176 = vmatprep.subr.bf16.mxu1 %v4406_v2 }
 0x8f3   :  { %3173 = vmatmul.mubr.msk.bf16.vlgmr.msra.gmra.mxu1 %vm261_vm1, %v3451_v13 }
 0x8f4   :  { %3177 = vmatpush3.bf16.msra.mxu1 %v1556_v15  ;;  %3178 = vmatprep.mubr.msk.bf16.mxu1 %vm3471_vm0, %v4406_v2 }
 0x8f5   :  { %3182 = vmatprep.subr.bf16.mxu1 %v4406_v2 }
 0x8fb   :  { %3179 = vmatmul.mubr.msk.bf16.vlgmr.msra.gmra.mxu1 %vm261_vm1, %v3452_v16 }
 0x8fc   :  { %3183 = vmatpush3.bf16.msra.mxu1 %v3637_v30  ;;  %3198 = vmatprep.mubr.msk.bf16.mxu1 %vm3471_vm0, %v4406_v2 }
 0x8fd   :  { %3184 = vmatprep.subr.bf16.mxu1 %v4406_v2 }
 0x900   :  { %3185 = vmatpush3.bf16.msra.mxu1 %v3644_v31 }
 0x901   :  { %3186 = vmatprep.subr.bf16.mxu1 %v4406_v2 }
 0x904   :  { %3187 = vmatpush3.bf16.msra.mxu1 %v3653_v32 }
 0x905   :  { %3188 = vmatprep.subr.bf16.mxu1 %v4406_v2 }
 0x908   :  { %3189 = vmatpush3.bf16.msra.mxu1 %v3660_v33 }
 0x909   :  { %3190 = vmatprep.subr.bf16.mxu1 %v4406_v2 }
 0x90c   :  { %3191 = vmatpush3.bf16.msra.mxu1 %v3667_v34 }
 0x90d   :  { %3192 = vmatprep.subr.bf16.mxu1 %v4406_v2 }
 0x910   :  { %3193 = vmatpush3.bf16.msra.mxu1 %v3674_v35 }
 0x911   :  { %3194 = vmatprep.subr.bf16.mxu1 %v4406_v2 }
 0x914   :  { %3195 = vmatpush3.bf16.msra.mxu1 %v3681_v36 }
 0x915   :  { %3196 = vmatprep.subr.bf16.mxu1 %v4406_v2 }
 0x918   :  { %3197 = vmatpush3.bf16.msra.mxu1 %v3688_v37 }
 0x919   :  { %3228 = vmatprep.subr.bf16.mxu1 %v4406_v2 }
 0x91b   :  { %3199 = vmatmul.mubr.bf16.vlgmr.msra.gmra.mxu1 %v4177_v0 }
 0x91c   :  { %3230 = vmatprep.mubr.msk.bf16.mxu1 %vm3471_vm0, %v4406_v2 }
 0x9b3   :  { %v1644_v30 = vpop.f32.mrf.mxu1 }
 0x9b5   :  { %v3174_v31 = vpop.f32.mrf.mxu1 }
 0x9b7   :  { %v1647_v32 = vpop.f32.mrf.mxu1 }
 0x9b9   :  { %v3175_v33 = vpop.f32.mrf.mxu1 }
 0x9bb   :  { %v1693_v34 = vpop.f32.mrf.mxu1 }
 0x9bc   :  { %v1694_v35 = vadd.f32 %v1693_v34, %v1644_v30 }
 0x9bd   :  { %v3180_v19 = vpop.f32.mrf.mxu1 }
 0x9be   :  { %v4420_v19 = vld [vmem:[#allocation3_spill] sm:$0xff] }
 0x9bf   :  { %v1696_v10 = vpop.f32.mrf.mxu1 }
 0x9c0   :  { %v1697_v36 = vadd.f32 %v1696_v10, %v1647_v32  ;;  %v4421_v10 = vld [vmem:[#allocation4_spill] sm:$0xff] }
 0x9c1   :  { %v3181_v1 = vpop.f32.mrf.mxu1 }
 0x9c2   :  { %v4423_v1 = vld [vmem:[#allocation6_spill] sm:$0xff] }
 0x9db   :  { %v1734_v3 = vpop.f32.mrf.mxu1 }
 0x9dd   :  { %v3200_v8 = vpop.f32.mrf.mxu1 }
 0x9de   :  { %v4425_v8 = vld [vmem:[#allocation8_spill] sm:$0xff] }
 0x9df   :  { %v1737_v37 = vpop.f32.mrf.mxu1 }
 0x9e0   :  { %v1744_v14 = vpack.c.bf16 %v1737_v37, %v1734_v3  ;;  %v4424_v3 = vld [vmem:[#allocation7_spill] sm:$0xff]  ;;  %v4426_v37 = vld [vmem:[#allocation9_spill] sm:$0xff] }
 0x9e1   :  { %v3201_v28 = vpop.f32.mrf.mxu1 }
 0x9e2   :  { %3203 = vmatpush3.bf16.msra.mxu0 %v1744_v14 }
 0x9e3   :  { %3208 = vmatprep.subr.bf16.mxu0 %v4406_v2 }
 0x9e5   :  { %3205 = vmatmul.mubr.msk.bf16.vlgmr.msra.gmra.mxu0 %vm261_vm1, %v3453_v17 }
 0x9e6   :  { %3209 = vmatpush3.bf16.msra.mxu0 %v3702_v54  ;;  %3224 = vmatprep.mubr.msk.bf16.mxu0 %vm3471_vm0, %v4406_v2 }
 0x9e7   :  { %3210 = vmatprep.subr.bf16.mxu0 %v4406_v2 }
 0x9ea   :  { %3211 = vmatpush3.bf16.msra.mxu0 %v3710_v55 }
 0x9eb   :  { %3212 = vmatprep.subr.bf16.mxu0 %v4406_v2 }
 0x9ee   :  { %3213 = vmatpush3.bf16.msra.mxu0 %v3719_v56 }
 0x9ef   :  { %3214 = vmatprep.subr.bf16.mxu0 %v4406_v2 }
 0x9f2   :  { %3215 = vmatpush3.bf16.msra.mxu0 %v3726_v57 }
 0x9f3   :  { %3216 = vmatprep.subr.bf16.mxu0 %v4406_v2 }
 0x9f6   :  { %3217 = vmatpush3.bf16.msra.mxu0 %v3733_v58 }
 0x9f7   :  { %3218 = vmatprep.subr.bf16.mxu0 %v4406_v2 }
 0x9fa   :  { %3219 = vmatpush3.bf16.msra.mxu0 %v3740_v59 }
 0x9fb   :  { %3220 = vmatprep.subr.bf16.mxu0 %v4406_v2 }
 0x9fe   :  { %3221 = vmatpush3.bf16.msra.mxu0 %v3747_v60 }
 0x9ff   :  { %3222 = vmatprep.subr.bf16.mxu0 %v4406_v2 }
 0xa02   :  { %3223 = vmatpush3.bf16.msra.mxu0 %v3754_v61  ;;  %v3454_v61 = vld [vmem:[%s4388_s4 + $0x18] sm:$0xff]  }
 0xa03   :  { %3254 = vmatprep.subr.bf16.mxu0 %v4406_v2 }
 0xa05   :  { %3225 = vmatmul.mubr.bf16.vlgmr.msra.gmra.mxu0 %v4177_v0 }
 0xa06   :  { %3256 = vmatprep.mubr.msk.bf16.mxu0 %vm3471_vm0, %v4406_v2 }
 0xaa5   :  { %v1787_v54 = vpop.f32.mrf.mxu0 }
 0xaa6   :  { %v1794_v55 = vadd.f32 %v1787_v54, %v1694_v35  ;;  %v4419_v35 = vld [vmem:[#allocation2_spill] sm:$0xff] }
 0xaa7   :  { %v3206_v56 = vpop.f32.mrf.mxu0 }
 0xaa9   :  { %v1790_v57 = vpop.f32.mrf.mxu0 }
 0xaaa   :  { %v1795_v58 = vadd.f32 %v1790_v57, %v1697_v36  ;;  %v4422_v36 = vld [vmem:[#allocation5_spill] sm:$0xff] }
 0xaab   :  { %v3207_v59 = vpop.f32.mrf.mxu0 }
 0xac5   :  { %v1830_v18 = vpop.f32.mrf.mxu0 }
 0xac7   :  { %v3226_v9 = vpop.f32.mrf.mxu0 }
 0xac9   :  { %v1833_v60 = vpop.f32.mrf.mxu0 }
 0xaca   :  { %v1840_v38 = vpack.c.bf16 %v1833_v60, %v1830_v18  ;;  %v3458_v60 = vld [vmem:[%s4388_s4 + $0x38] sm:$0xff]  }
 0xacb   :  { %v3227_v12 = vpop.f32.mrf.mxu0 }
 0xacc   :  { %3229 = vmatpush3.bf16.msra.mxu1 %v1840_v38  ;;  %v4427_v38 = vld [vmem:[#allocation10_spill] sm:$0xff]  ;;  %v4428_v12 = vld [vmem:[#allocation11_spill] sm:$0xff] }
 0xacd   :  { %3234 = vmatprep.subr.bf16.mxu1 %v4406_v2 }
 0xacf   :  { %3231 = vmatmul.mubr.msk.bf16.vlgmr.msra.gmra.mxu1 %vm261_vm1, %v3454_v61  ;;  %v4430_v61 = vld [vmem:[#allocation13_spill] sm:$0xff] }
 0xad0   :  { %3235 = vmatpush3.bf16.msra.mxu1 %v3768_v20  ;;  %3250 = vmatprep.mubr.msk.bf16.mxu1 %vm3471_vm0, %v4406_v2 }
 0xad1   :  { %3236 = vmatprep.subr.bf16.mxu1 %v4406_v2 }
 0xad4   :  { %3237 = vmatpush3.bf16.msra.mxu1 %v3776_v21 }
 0xad5   :  { %3238 = vmatprep.subr.bf16.mxu1 %v4406_v2 }
 0xad8   :  { %3239 = vmatpush3.bf16.msra.mxu1 %v3785_v22 }
 0xad9   :  { %3240 = vmatprep.subr.bf16.mxu1 %v4406_v2 }
 0xadc   :  { %3241 = vmatpush3.bf16.msra.mxu1 %v3792_v23 }
 0xadd   :  { %3242 = vmatprep.subr.bf16.mxu1 %v4406_v2 }
 0xae0   :  { %3243 = vmatpush3.bf16.msra.mxu1 %v3799_v24 }
 0xae1   :  { %3244 = vmatprep.subr.bf16.mxu1 %v4406_v2 }
 0xae4   :  { %3245 = vmatpush3.bf16.msra.mxu1 %v3806_v25 }
 0xae5   :  { %3246 = vmatprep.subr.bf16.mxu1 %v4406_v2 }
 0xae8   :  { %3247 = vmatpush3.bf16.msra.mxu1 %v3813_v26 }
 0xae9   :  { %3248 = vmatprep.subr.bf16.mxu1 %v4406_v2 }
 0xaec   :  { %3249 = vmatpush3.bf16.msra.mxu1 %v3820_v27  ;;  %v3455_v27 = vld [vmem:[%s4388_s4 + $0x20] sm:$0xff]  }
 0xaed   :  { %3280 = vmatprep.subr.bf16.mxu1 %v4406_v2 }
 0xaef   :  { %3251 = vmatmul.mubr.bf16.vlgmr.msra.gmra.mxu1 %v4177_v0 }
 0xaf0   :  { %3282 = vmatprep.mubr.msk.bf16.mxu1 %vm3471_vm0, %v4406_v2 }
 0xb8f   :  { %v1883_v20 = vpop.f32.mrf.mxu1 }
 0xb90   :  { %v1890_v21 = vadd.f32 %v1883_v20, %v1794_v55 }
 0xb91   :  { %v3232_v22 = vpop.f32.mrf.mxu1 }
 0xb93   :  { %v1886_v23 = vpop.f32.mrf.mxu1 }
 0xb94   :  { %v1891_v24 = vadd.f32 %v1886_v23, %v1795_v58 }
 0xb95   :  { %v3233_v25 = vpop.f32.mrf.mxu1 }
 0xbaf   :  { %v1926_v5 = vpop.f32.mrf.mxu1 }
 0xbb1   :  { %v3252_v7 = vpop.f32.mrf.mxu1 }
 0xbb3   :  { %v1929_v26 = vpop.f32.mrf.mxu1 }
 0xbb4   :  { %v1936_v11 = vpack.c.bf16 %v1929_v26, %v1926_v5 }
 0xbb5   :  { %v3253_v46 = vpop.f32.mrf.mxu1 }
 0xbb6   :  { %3255 = vmatpush3.bf16.msra.mxu0 %v1936_v11  ;;  %v3459_v46 = vld [vmem:[%s4388_s4 + $0x40] sm:$0xff]  }
 0xbb7   :  { %3260 = vmatprep.subr.bf16.mxu0 %v4406_v2 }
 0xbb9   :  { %3257 = vmatmul.mubr.msk.bf16.vlgmr.msra.gmra.mxu0 %vm261_vm1, %v3455_v27 }
 0xbba   :  { %3261 = vmatpush3.bf16.msra.mxu0 %v3834_v48  ;;  %3276 = vmatprep.mubr.msk.bf16.mxu0 %vm3471_vm0, %v4406_v2 }
 0xbbb   :  { %3262 = vmatprep.subr.bf16.mxu0 %v4406_v2 }
 0xbbe   :  { %3263 = vmatpush3.bf16.msra.mxu0 %v3842_v49 }
 0xbbf   :  { %3264 = vmatprep.subr.bf16.mxu0 %v4406_v2 }
 0xbc2   :  { %3265 = vmatpush3.bf16.msra.mxu0 %v3851_v50 }
 0xbc3   :  { %3266 = vmatprep.subr.bf16.mxu0 %v4406_v2 }
 0xbc6   :  { %3267 = vmatpush3.bf16.msra.mxu0 %v3858_v51 }
 0xbc7   :  { %3268 = vmatprep.subr.bf16.mxu0 %v4406_v2 }
 0xbca   :  { %3269 = vmatpush3.bf16.msra.mxu0 %v3865_v52 }
 0xbcb   :  { %3270 = vmatprep.subr.bf16.mxu0 %v4406_v2 }
 0xbce   :  { %3271 = vmatpush3.bf16.msra.mxu0 %v3872_v53 }
 0xbcf   :  { %3272 = vmatprep.subr.bf16.mxu0 %v4406_v2 }
 0xbd2   :  { %3273 = vmatpush3.bf16.msra.mxu0 %v3879_v62 }
 0xbd3   :  { %3274 = vmatprep.subr.bf16.mxu0 %v4406_v2 }
 0xbd6   :  { %3275 = vmatpush3.bf16.msra.mxu0 %v3886_v63  ;;  %v3456_v63 = vld [vmem:[%s4388_s4 + $0x28] sm:$0xff]  }
 0xbd7   :  { %3306 = vmatprep.subr.bf16.mxu0 %v4406_v2 }
 0xbd9   :  { %3277 = vmatmul.mubr.bf16.vlgmr.msra.gmra.mxu0 %v4177_v0 }
 0xbda   :  { %3308 = vmatprep.mubr.msk.bf16.mxu0 %vm3471_vm0, %v4406_v2 }
 0xc79   :  { %v1979_v48 = vpop.f32.mrf.mxu0 }
 0xc7a   :  { %v1986_v49 = vadd.f32 %v1979_v48, %v1890_v21  ;;  %v2382_v48 = vpop.permute.xlu1 %2381 }
 0xc7b   :  { %v3258_v50 = vpop.f32.mrf.mxu0 }
 0xc7d   :  { %v1982_v51 = vpop.f32.mrf.mxu0 }
 0xc7e   :  { %v1987_v52 = vadd.f32 %v1982_v51, %v1891_v24 }
 0xc7f   :  { %v3259_v53 = vpop.f32.mrf.mxu0 }
 0xc99   :  { %v2022_v13 = vpop.f32.mrf.mxu0 }
 0xc9b   :  { %v3278_v15 = vpop.f32.mrf.mxu0 }
 0xc9d   :  { %v2025_v62 = vpop.f32.mrf.mxu0 }
 0xc9e   :  { %v2032_v16 = vpack.c.bf16 %v2025_v62, %v2022_v13  ;;  %v3469_v13 = vld [vmem:[%s4382_s0] sm:$0xff]  }
 0xc9f   :  { %v3279_v30 = vpop.f32.mrf.mxu0  ;;  %v2400_v15 = vunpack.c.l.bf16 %v3469_v13 }
 0xca0   :  { %3281 = vmatpush3.bf16.msra.mxu1 %v2032_v16 }
 0xca1   :  { %3286 = vmatprep.subr.bf16.mxu1 %v4406_v2 }
 0xca3   :  { %3283 = vmatmul.mubr.msk.bf16.vlgmr.msra.gmra.mxu1 %vm261_vm1, %v3456_v63  ;;  %v2401_v63 = vunpack.c.h.bf16 %v3469_v13 }
 0xca4   :  { %3287 = vmatpush3.bf16.msra.mxu1 %v3900_v39  ;;  %3302 = vmatprep.mubr.msk.bf16.mxu1 %vm3471_vm0, %v4406_v2 }
 0xca5   :  { %3288 = vmatprep.subr.bf16.mxu1 %v4406_v2 }
 0xca8   :  { %3289 = vmatpush3.bf16.msra.mxu1 %v3908_v29 }
 0xca9   :  { %3290 = vmatprep.subr.bf16.mxu1 %v4406_v2 }
 0xcac   :  { %3291 = vmatpush3.bf16.msra.mxu1 %v3917_v40 }
 0xcad   :  { %3292 = vmatprep.subr.bf16.mxu1 %v4406_v2 }
 0xcb0   :  { %3293 = vmatpush3.bf16.msra.mxu1 %v3924_v41 }
 0xcb1   :  { %3294 = vmatprep.subr.bf16.mxu1 %v4406_v2 }
 0xcb4   :  { %3295 = vmatpush3.bf16.msra.mxu1 %v3931_v42 }
 0xcb5   :  { %3296 = vmatprep.subr.bf16.mxu1 %v4406_v2 }
 0xcb8   :  { %3297 = vmatpush3.bf16.msra.mxu1 %v3938_v43 }
 0xcb9   :  { %3298 = vmatprep.subr.bf16.mxu1 %v4406_v2 }
 0xcbc   :  { %3299 = vmatpush3.bf16.msra.mxu1 %v3945_v44 }
 0xcbd   :  { %3300 = vmatprep.subr.bf16.mxu1 %v4406_v2 }
 0xcc0   :  { %3301 = vmatpush3.bf16.msra.mxu1 %v3952_v45  ;;  %v3457_v45 = vld [vmem:[%s4388_s4 + $0x30] sm:$0xff]  }
 0xcc1   :  { %3332 = vmatprep.subr.bf16.mxu1 %v4406_v2 }
 0xcc3   :  { %3303 = vmatmul.mubr.bf16.vlgmr.msra.gmra.mxu1 %v4177_v0 }
 0xcc4   :  { %3334 = vmatprep.mubr.msk.bf16.mxu1 %vm3471_vm0, %v4406_v2 }
 0xd63   :  { %v2075_v39 = vpop.f32.mrf.mxu1 }
 0xd64   :  { %v2082_v29 = vadd.f32 %v2075_v39, %v1986_v49  ;;  %v2396_v39 = vpop.permute.xlu1 %2395 }
 0xd65   :  { %v3284_v40 = vpop.f32.mrf.mxu1 }
 0xd67   :  { %v2078_v41 = vpop.f32.mrf.mxu1 }
 0xd68   :  { %v2083_v42 = vadd.f32 %v2078_v41, %v1987_v52 }
 0xd69   :  { %v3285_v43 = vpop.f32.mrf.mxu1 }
 0xd83   :  { %v2118_v31 = vpop.f32.mrf.mxu1 }
 0xd85   :  { %v3304_v32 = vpop.f32.mrf.mxu1 }
 0xd87   :  { %v2121_v44 = vpop.f32.mrf.mxu1 }
 0xd88   :  { %v2128_v33 = vpack.c.bf16 %v2121_v44, %v2118_v31 }
 0xd89   :  { %v3305_v34 = vpop.f32.mrf.mxu1 }
 0xd8a   :  { %3307 = vmatpush3.bf16.msra.mxu0 %v2128_v33 }
 0xd8b   :  { %3312 = vmatprep.subr.bf16.mxu0 %v4406_v2 }
 0xd8d   :  { %3309 = vmatmul.mubr.msk.bf16.vlgmr.msra.gmra.mxu0 %vm261_vm1, %v3457_v45 }
 0xd8e   :  { %3313 = vmatpush3.bf16.msra.mxu0 %v4419_v35  ;;  %3328 = vmatprep.mubr.msk.bf16.mxu0 %vm3471_vm0, %v4406_v2 }
 0xd8f   :  { %3314 = vmatprep.subr.bf16.mxu0 %v4406_v2 }
 0xd92   :  { %3315 = vmatpush3.bf16.msra.mxu0 %v4420_v19 }
 0xd93   :  { %3316 = vmatprep.subr.bf16.mxu0 %v4406_v2 }
 0xd96   :  { %3317 = vmatpush3.bf16.msra.mxu0 %v4421_v10 }
 0xd97   :  { %3318 = vmatprep.subr.bf16.mxu0 %v4406_v2 }
 0xd9a   :  { %3319 = vmatpush3.bf16.msra.mxu0 %v4422_v36 }
 0xd9b   :  { %3320 = vmatprep.subr.bf16.mxu0 %v4406_v2 }
 0xd9e   :  { %3321 = vmatpush3.bf16.msra.mxu0 %v4423_v1 }
 0xd9f   :  { %3322 = vmatprep.subr.bf16.mxu0 %v4406_v2 }
 0xda2   :  { %3323 = vmatpush3.bf16.msra.mxu0 %v4424_v3 }
 0xda3   :  { %3324 = vmatprep.subr.bf16.mxu0 %v4406_v2 }
 0xda6   :  { %3325 = vmatpush3.bf16.msra.mxu0 %v4425_v8 }
 0xda7   :  { %3326 = vmatprep.subr.bf16.mxu0 %v4406_v2 }
 0xdaa   :  { %3327 = vmatpush3.bf16.msra.mxu0 %v4426_v37 }
 0xdab   :  { %3358 = vmatprep.subr.bf16.mxu0 %v4406_v2 }
 0xdad   :  { %3329 = vmatmul.mubr.bf16.vlgmr.msra.gmra.mxu0 %v4177_v0 }
 0xdae   :  { %3360 = vmatprep.mubr.msk.bf16.mxu0 %vm3471_vm0, %v4406_v2 }
 0xe4d   :  { %v2171_v14 = vpop.f32.mrf.mxu0 }
 0xe4e   :  { %v2178_v28 = vadd.f32 %v2171_v14, %v2082_v29 }
 0xe4f   :  { %v3310_v17 = vpop.f32.mrf.mxu0 }
 0xe51   :  { %v2174_v54 = vpop.f32.mrf.mxu0 }
 0xe52   :  { %v2179_v55 = vadd.f32 %v2174_v54, %v2083_v42 }
 0xe53   :  { %v3311_v56 = vpop.f32.mrf.mxu0 }
 0xe6d   :  { %v2214_v57 = vpop.f32.mrf.mxu0 }
 0xe6f   :  { %v3330_v58 = vpop.f32.mrf.mxu0 }
 0xe71   :  { %v2217_v59 = vpop.f32.mrf.mxu0 }
 0xe72   :  { %v2224_v18 = vpack.c.bf16 %v2217_v59, %v2214_v57 }
 0xe73   :  { %v3331_v9 = vpop.f32.mrf.mxu0 }
 0xe74   :  { %3333 = vmatpush3.bf16.msra.mxu1 %v2224_v18 }
 0xe75   :  { %3338 = vmatprep.subr.bf16.mxu1 %v4406_v2 }
 0xe77   :  { %3335 = vmatmul.mubr.msk.bf16.vlgmr.msra.gmra.mxu1 %vm261_vm1, %v3458_v60 }
 0xe78   :  { %3339 = vmatpush3.bf16.msra.mxu1 %v4036_v47  ;;  %3354 = vmatprep.mubr.msk.bf16.mxu1 %vm3471_vm0, %v4406_v2  ;;  %v4429_v47 = vld [vmem:[#allocation12_spill] sm:$0xff] }
 0xe79   :  { %3340 = vmatprep.subr.bf16.mxu1 %v4406_v2 }
 0xe7c   :  { %3341 = vmatpush3.bf16.msra.mxu1 %v4044_v4  ;;  %v4431_v4 = vld [vmem:[#allocation14_spill] sm:$0xff] }
 0xe7d   :  { %3342 = vmatprep.subr.bf16.mxu1 %v4406_v2 }
 0xe80   :  { %3343 = vmatpush3.bf16.msra.mxu1 %v4053_v6 }
 0xe81   :  { %3344 = vmatprep.subr.bf16.mxu1 %v4406_v2 }
 0xe84   :  { %3345 = vmatpush3.bf16.msra.mxu1 %v4427_v38 }
 0xe85   :  { %3346 = vmatprep.subr.bf16.mxu1 %v4406_v2 }
 0xe88   :  { %3347 = vmatpush3.bf16.msra.mxu1 %v4428_v12 }
 0xe89   :  { %3348 = vmatprep.subr.bf16.mxu1 %v4406_v2 }
 0xe8c   :  { %3349 = vmatpush3.bf16.msra.mxu1 %v4429_v47 }
 0xe8d   :  { %3350 = vmatprep.subr.bf16.mxu1 %v4406_v2 }
 0xe90   :  { %3351 = vmatpush3.bf16.msra.mxu1 %v4430_v61 }
 0xe91   :  { %3352 = vmatprep.subr.bf16.mxu1 %v4406_v2  ;;  %v2377_v2 = vpop.permute.xlu0 %2376 }
 0xe94   :  { %3353 = vmatpush3.bf16.msra.mxu1 %v4431_v4 }
 0xe95   :  { %v2391_v51 = vpop.permute.xlu0 %2390 }
 0xe97   :  { %3355 = vmatmul.mubr.bf16.vlgmr.msra.gmra.mxu1 %v4177_v0 }
 0xf37   :  { %v2267_v6 = vpop.f32.mrf.mxu1 }
 0xf38   :  { %v2274_v20 = vadd.f32 %v2267_v6, %v2178_v28 }
 0xf39   :  { %v3336_v21 = vpop.f32.mrf.mxu1 }
 0xf3b   :  { %v2270_v22 = vpop.f32.mrf.mxu1 }
 0xf3c   :  { %v2275_v23 = vadd.f32 %v2270_v22, %v2179_v55 }
 0xf3d   :  { %v3337_v24 = vpop.f32.mrf.mxu1 }
 0xf57   :  { %v2310_v25 = vpop.f32.mrf.mxu1 }
 0xf59   :  { %v3356_v5 = vpop.f32.mrf.mxu1 }
 0xf5b   :  { %v2313_v7 = vpop.f32.mrf.mxu1 }
 0xf5c   :  { %v2320_v26 = vpack.c.bf16 %v2313_v7, %v2310_v25 }
 0xf5d   :  { %v3357_v11 = vpop.f32.mrf.mxu1 }
 0xf5e   :  { %3359 = vmatpush3.bf16.msra.mxu0 %v2320_v26 }
 0xf61   :  { %3361 = vmatmul.mubr.msk.bf16.vlgmr.msra.gmra.mxu0 %vm261_vm1, %v3459_v46 }
0x1021   :  { %v2363_v0 = vpop.f32.mrf.mxu0 }
0x1022   :  { %v2370_v27 = vadd.f32 %v2363_v0, %v2274_v20 }
0x1023   :  { %v3362_v49 = vpop.f32.mrf.mxu0 }
0x1024   :  { %v2384_v50 = vmul.f32 %v2377_v2, %v2370_v27 }
0x1025   :  { %v2366_v52 = vpop.f32.mrf.mxu0 }
0x1026   :  { %v2398_v53 = vadd.f32 %v2391_v51, %v2384_v50  ;;  %v2371_v62 = vadd.f32 %v2366_v52, %v2275_v23 }
0x1027   :  { %v3363_v16 = vpop.f32.mrf.mxu0 }
0x1028   :  { %v2385_v30 = vmul.f32 %v2382_v48, %v2371_v62  ;;  %v2402_v29 = vadd.f32 %v2400_v15, %v2398_v53 }
0x102a   :  { %v2399_v40 = vadd.f32 %v2396_v39, %v2385_v30  ;;  %v2404_v42 = vmax.f32 %v2402_v29, 0.0 }
0x102c   :  { %v2403_v41 = vadd.f32 %v2401_v63, %v2399_v40 }
0x102e   :  { %v2405_v43 = vmax.f32 %v2403_v41, 0.0 }
0x1030   :  { %v2696_v31 = vpack.c.bf16 %v2405_v43, %v2404_v42 }
0x1032   :  { %2697 = vst [vmem:[%s4389_s8] sm:$0xff] %v2696_v31  }

// kernel: resnet_feature_extractor.5
= control target key start
LH: loop header
LB: loop body
LE: loop exit
PB: predicated region body
PF: predicated region fallthrough
CT: control target
= control target key end

     0   :  { %v5296_v1 = vmov 0   ;;  %s6448_s0 = inlined_call_operand.vmem [shape: bf16[256,512], index: 0, kind: input, shape index: {}]   ;;  %s6449_s1 = inlined_call_operand.vmem [shape: bf16[16,256], index: 1, kind: input, shape index: {}]   ;;  %s6450_s2 = inlined_call_operand.vmem [shape: f32[16,1], index: 2, kind: input, shape index: {}]   ;;  %s6451_s3 = inlined_call_operand.vmem [shape: f32[16,1], index: 3, kind: input, shape index: {}]   ;;  %s6452_s4 = inlined_call_operand.vmem [shape: bf16[9,512,128], index: 4, kind: input, shape index: {}]   ;;  %s6453_s5 = inlined_call_operand.vmem [shape: bf16[16,128], index: 5, kind: output, shape index: {}]  }
   0x1   :  { %v4909_v0 = vld [vmem:[%s6448_s0 + $0xe4] ss:$16 sps:$4 sm:$0xff]   ;;  %4907 = vset.pattern.permute.xlu0 %v5296_v1  ;;  %4908 = vset.pattern.permute.xlu1 %v5296_v1  ;;  %v4911_v2 = vld [vmem:[%s6448_s0 + $0xec] ss:$16 sps:$4 sm:$0xff]   ;;  %v4913_v3 = vld [vmem:[%s6448_s0 + $0xe0] ss:$16 sps:$4 sm:$0xff]  }
   0x2   :  { %417 = vmatprep.subr.bf16.mxu0 %v4909_v0  ;;  %v4914_v4 = vld [vmem:[%s6448_s0 + $0xe8] ss:$16 sps:$4 sm:$0xff]   ;;  %460 = vmatprep.subr.bf16.mxu1 %v4911_v2  ;;  %v4915_v5 = vld [vmem:[%s6448_s0 + $0xc4] ss:$16 sps:$4 sm:$0xff]   ;;  %v4917_v6 = vld [vmem:[%s6448_s0 + $0xcc] ss:$16 sps:$4 sm:$0xff]  }
   0x3   :  { %418 = vmatpush1.bf16.msra.mxu0 %v4913_v3  ;;  %461 = vmatpush1.bf16.msra.mxu1 %v4914_v4  ;;  %v4919_v7 = vld [vmem:[%s6448_s0 + $0xc0] ss:$16 sps:$4 sm:$0xff]   ;;  %v4920_v8 = vld [vmem:[%s6448_s0 + $0xc8] ss:$16 sps:$4 sm:$0xff]   ;;  %v4921_v9 = vld [vmem:[%s6448_s0 + $0xa4] ss:$16 sps:$4 sm:$0xff]  }
   0x4   :  { %419 = vmatprep.subr.bf16.mxu0 %v4915_v5  ;;  %462 = vmatprep.subr.bf16.mxu1 %v4917_v6  ;;  %v4923_v10 = vld [vmem:[%s6448_s0 + $0xac] ss:$16 sps:$4 sm:$0xff]   ;;  %v4925_v11 = vld [vmem:[%s6448_s0 + $0xa0] ss:$16 sps:$4 sm:$0xff]   ;;  %v4926_v12 = vld [vmem:[%s6448_s0 + $0xa8] ss:$16 sps:$4 sm:$0xff]  }
   0x5   :  { %v4927_v13 = vld [vmem:[%s6448_s0 + $0x84] ss:$16 sps:$4 sm:$0xff]   ;;  %v4929_v14 = vld [vmem:[%s6448_s0 + $0x8c] ss:$16 sps:$4 sm:$0xff]   ;;  %v4931_v15 = vld [vmem:[%s6448_s0 + $0x80] ss:$16 sps:$4 sm:$0xff]  }
   0x6   :  { %v4932_v16 = vld [vmem:[%s6448_s0 + $0x88] ss:$16 sps:$4 sm:$0xff]   ;;  %v4933_v17 = vld [vmem:[%s6448_s0 + $0x64] ss:$16 sps:$4 sm:$0xff]   ;;  %v4935_v18 = vld [vmem:[%s6448_s0 + $0x6c] ss:$16 sps:$4 sm:$0xff]  }
   0x7   :  { %420 = vmatpush1.bf16.msra.mxu0 %v4919_v7  ;;  %463 = vmatpush1.bf16.msra.mxu1 %v4920_v8  ;;  %v4937_v19 = vld [vmem:[%s6448_s0 + $0x60] ss:$16 sps:$4 sm:$0xff]   ;;  %v4938_v20 = vld [vmem:[%s6448_s0 + $0x68] ss:$16 sps:$4 sm:$0xff]   ;;  %v4939_v21 = vld [vmem:[%s6448_s0 + $0x44] ss:$16 sps:$4 sm:$0xff]  }
   0x8   :  { %421 = vmatprep.subr.bf16.mxu0 %v4921_v9  ;;  %464 = vmatprep.subr.bf16.mxu1 %v4923_v10  ;;  %v4941_v22 = vld [vmem:[%s6448_s0 + $0x4c] ss:$16 sps:$4 sm:$0xff]   ;;  %v4943_v23 = vld [vmem:[%s6448_s0 + $0x40] ss:$16 sps:$4 sm:$0xff]   ;;  %v4944_v24 = vld [vmem:[%s6448_s0 + $0x48] ss:$16 sps:$4 sm:$0xff]  }
   0x9   :  { %v4945_v25 = vld [vmem:[%s6448_s0 + $0x24] ss:$16 sps:$4 sm:$0xff]   ;;  %v4947_v26 = vld [vmem:[%s6448_s0 + $0x2c] ss:$16 sps:$4 sm:$0xff]   ;;  %v4949_v27 = vld [vmem:[%s6448_s0 + $0x20] ss:$16 sps:$4 sm:$0xff]  }
   0xa   :  { %v4950_v28 = vld [vmem:[%s6448_s0 + $0x28] ss:$16 sps:$4 sm:$0xff]   ;;  %v4951_v29 = vld [vmem:[%s6448_s0 + $0x4] ss:$16 sps:$4 sm:$0xff]   ;;  %v4953_v30 = vld [vmem:[%s6448_s0 + $0xc] ss:$16 sps:$4 sm:$0xff]  }
   0xb   :  { %422 = vmatpush1.bf16.msra.mxu0 %v4925_v11  ;;  %465 = vmatpush1.bf16.msra.mxu1 %v4926_v12  ;;  %v4955_v31 = vld [vmem:[%s6448_s0] ss:$16 sps:$4 sm:$0xff]   ;;  %v4956_v32 = vld [vmem:[%s6448_s0 + $0x8] ss:$16 sps:$4 sm:$0xff]   ;;  %v4957_v33 = vld [vmem:[%s6448_s0 + $0x1e4] ss:$16 sps:$4 sm:$0xff]  }
   0xc   :  { %423 = vmatprep.subr.bf16.mxu0 %v4927_v13  ;;  %466 = vmatprep.subr.bf16.mxu1 %v4929_v14  ;;  %v4959_v34 = vld [vmem:[%s6448_s0 + $0x1ec] ss:$16 sps:$4 sm:$0xff]   ;;  %v4961_v35 = vld [vmem:[%s6448_s0 + $0x1e0] ss:$16 sps:$4 sm:$0xff]   ;;  %v4962_v36 = vld [vmem:[%s6448_s0 + $0x1e8] ss:$16 sps:$4 sm:$0xff]  }
   0xd   :  { %v4963_v37 = vld [vmem:[%s6448_s0 + $0x1c4] ss:$16 sps:$4 sm:$0xff]   ;;  %v4965_v38 = vld [vmem:[%s6448_s0 + $0x1cc] ss:$16 sps:$4 sm:$0xff]   ;;  %v4967_v39 = vld [vmem:[%s6448_s0 + $0x1c0] ss:$16 sps:$4 sm:$0xff]  }
   0xe   :  { %v4968_v40 = vld [vmem:[%s6448_s0 + $0x1c8] ss:$16 sps:$4 sm:$0xff]   ;;  %v4969_v41 = vld [vmem:[%s6448_s0 + $0x1a4] ss:$16 sps:$4 sm:$0xff]   ;;  %v4971_v42 = vld [vmem:[%s6448_s0 + $0x1ac] ss:$16 sps:$4 sm:$0xff]  }
   0xf   :  { %424 = vmatpush1.bf16.msra.mxu0 %v4931_v15  ;;  %467 = vmatpush1.bf16.msra.mxu1 %v4932_v16  ;;  %v4973_v43 = vld [vmem:[%s6448_s0 + $0x1a0] ss:$16 sps:$4 sm:$0xff]   ;;  %v4974_v44 = vld [vmem:[%s6448_s0 + $0x1a8] ss:$16 sps:$4 sm:$0xff]   ;;  %v4975_v45 = vld [vmem:[%s6448_s0 + $0x184] ss:$16 sps:$4 sm:$0xff]  }
  0x10   :  { %425 = vmatprep.subr.bf16.mxu0 %v4933_v17  ;;  %468 = vmatprep.subr.bf16.mxu1 %v4935_v18  ;;  %v4977_v46 = vld [vmem:[%s6448_s0 + $0x18c] ss:$16 sps:$4 sm:$0xff]   ;;  %v4979_v47 = vld [vmem:[%s6448_s0 + $0x180] ss:$16 sps:$4 sm:$0xff]   ;;  %v4980_v48 = vld [vmem:[%s6448_s0 + $0x188] ss:$16 sps:$4 sm:$0xff]  }
  0x11   :  { %v5007_v49 = vld [vmem:[%s6449_s1 + $0x4] ss:$8 sps:$4 sm:$0xff]   ;;  %v4985_v54 = vld [vmem:[%s6448_s0 + $0x160] ss:$16 sps:$4 sm:$0xff]   ;;  %v4986_v55 = vld [vmem:[%s6448_s0 + $0x168] ss:$16 sps:$4 sm:$0xff]  }
  0x12   :  { %v4981_v50 = vld [vmem:[%s6448_s0 + $0x164] ss:$16 sps:$4 sm:$0xff]   ;;  %v4983_v53 = vld [vmem:[%s6448_s0 + $0x16c] ss:$16 sps:$4 sm:$0xff]   ;;  %449 = vmatprep.mubr.bf16.mxu0 %v5007_v49  ;;  %492 = vmatprep.mubr.bf16.mxu1 %v5007_v49  ;;  %v4991_v60 = vld [vmem:[%s6448_s0 + $0x140] ss:$16 sps:$4 sm:$0xff]  }
  0x13   :  { %426 = vmatpush1.bf16.msra.mxu0 %v4937_v19  ;;  %469 = vmatpush1.bf16.msra.mxu1 %v4938_v20  ;;  %v503_v51 = vld [vmem:[%s6450_s2] sm:$0xff]  ;;  %v504_v57 = vld [vmem:[%s6450_s2 + $0x8] sm:$0xff]  ;;  %v5008_v6 = vld [vmem:[%s6452_s4 + $0x78] sm:$0xff]  }
  0x14   :  { %427 = vmatprep.subr.bf16.mxu0 %v4939_v21  ;;  %470 = vmatprep.subr.bf16.mxu1 %v4941_v22  ;;  %v523_v52 = vld [vmem:[%s6451_s3] sm:$0xff]  ;;  %v524_v58 = vld [vmem:[%s6451_s3 + $0x8] sm:$0xff]  ;;  %v5009_v8 = vld [vmem:[%s6452_s4 + $0xf8] sm:$0xff]  }
  0x15   :  { %v4987_v56 = vld [vmem:[%s6448_s0 + $0x144] ss:$16 sps:$4 sm:$0xff]   ;;  %507 = vperm.xlu0 %4907, %v503_v51   ;;  %527 = vperm.xlu1 %4908, %v523_v52   ;;  %v4989_v59 = vld [vmem:[%s6448_s0 + $0x14c] ss:$16 sps:$4 sm:$0xff]   ;;  %v4992_v61 = vld [vmem:[%s6448_s0 + $0x148] ss:$16 sps:$4 sm:$0xff]  }
  0x16   :  { %v4993_v62 = vld [vmem:[%s6448_s0 + $0x124] ss:$16 sps:$4 sm:$0xff]   ;;  %v4995_v63 = vld [vmem:[%s6448_s0 + $0x12c] ss:$16 sps:$4 sm:$0xff]   ;;  %v4997_v0 = vld [vmem:[%s6448_s0 + $0x120] ss:$16 sps:$4 sm:$0xff]  }
  0x17   :  { %428 = vmatpush1.bf16.msra.mxu0 %v4943_v23  ;;  %471 = vmatpush1.bf16.msra.mxu1 %v4944_v24  ;;  %v4998_v1 = vld [vmem:[%s6448_s0 + $0x128] ss:$16 sps:$4 sm:$0xff]   ;;  %v4999_v2 = vld [vmem:[%s6448_s0 + $0x104] ss:$16 sps:$4 sm:$0xff]   ;;  %v5001_v3 = vld [vmem:[%s6448_s0 + $0x10c] ss:$16 sps:$4 sm:$0xff]  }
  0x18   :  { %429 = vmatprep.subr.bf16.mxu0 %v4945_v25  ;;  %472 = vmatprep.subr.bf16.mxu1 %v4947_v26  ;;  %v5003_v4 = vld [vmem:[%s6448_s0 + $0x100] ss:$16 sps:$4 sm:$0xff]   ;;  %v5004_v5 = vld [vmem:[%s6448_s0 + $0x108] ss:$16 sps:$4 sm:$0xff]  }
  0x19   :  { %512 = vperm.xlu0 %4907, %v504_v57   ;;  %532 = vperm.xlu1 %4908, %v524_v58   ;;  %v5005_v7 = vld [vmem:[%s6449_s1] ss:$8 sps:$4 sm:$0xff]   ;;  %v5010_v9 = vld [vmem:[%s6452_s4 + $0x38] sm:$0xff]   ;;  %v5012_v11 = vld [vmem:[%s6452_s4 + $0x70] sm:$0xff]  }
  0x1a   :  { %v5011_v10 = vld [vmem:[%s6452_s4 + $0xb8] sm:$0xff]   ;;  %v5013_v12 = vld [vmem:[%s6452_s4 + $0xf0] sm:$0xff]   ;;  %v5016_v15 = vld [vmem:[%s6452_s4 + $0x68] sm:$0xff]  }
  0x1b   :  { %430 = vmatpush1.bf16.msra.mxu0 %v4949_v27  ;;  %473 = vmatpush1.bf16.msra.mxu1 %v4950_v28  ;;  %v5014_v13 = vld [vmem:[%s6452_s4 + $0x30] sm:$0xff]   ;;  %v5017_v16 = vld [vmem:[%s6452_s4 + $0xe8] sm:$0xff]   ;;  %v5020_v19 = vld [vmem:[%s6452_s4 + $0x60] sm:$0xff]  }
  0x1c   :  { %431 = vmatprep.subr.bf16.mxu0 %v4951_v29  ;;  %474 = vmatprep.subr.bf16.mxu1 %v4953_v30  ;;  %v5015_v14 = vld [vmem:[%s6452_s4 + $0xb0] sm:$0xff]   ;;  %v5018_v17 = vld [vmem:[%s6452_s4 + $0x28] sm:$0xff]   ;;  %v5021_v20 = vld [vmem:[%s6452_s4 + $0xe0] sm:$0xff]  }
  0x1d   :  { %v5019_v18 = vld [vmem:[%s6452_s4 + $0xa8] sm:$0xff]   ;;  %v5022_v21 = vld [vmem:[%s6452_s4 + $0x20] sm:$0xff]   ;;  %v5024_v23 = vld [vmem:[%s6452_s4 + $0x58] sm:$0xff]  }
  0x1e   :  { %v5023_v22 = vld [vmem:[%s6452_s4 + $0xa0] sm:$0xff]   ;;  %v5025_v24 = vld [vmem:[%s6452_s4 + $0xd8] sm:$0xff]   ;;  %v5028_v27 = vld [vmem:[%s6452_s4 + $0x50] sm:$0xff]  }
  0x1f   :  { %432 = vmatpush1.bf16.msra.mxu0 %v4955_v31  ;;  %475 = vmatpush1.bf16.msra.mxu1 %v4956_v32  ;;  %v5026_v25 = vld [vmem:[%s6452_s4 + $0x18] sm:$0xff]   ;;  %v5029_v28 = vld [vmem:[%s6452_s4 + $0xd0] sm:$0xff]   ;;  %v5032_v31 = vld [vmem:[%s6452_s4 + $0x48] sm:$0xff]  }
  0x20   :  { %433 = vmatprep.subr.bf16.mxu0 %v4957_v33  ;;  %476 = vmatprep.subr.bf16.mxu1 %v4959_v34  ;;  %v5027_v26 = vld [vmem:[%s6452_s4 + $0x98] sm:$0xff]   ;;  %v5030_v29 = vld [vmem:[%s6452_s4 + $0x10] sm:$0xff]   ;;  %v5033_v32 = vld [vmem:[%s6452_s4 + $0xc8] sm:$0xff]  }
  0x21   :  { %v5031_v30 = vld [vmem:[%s6452_s4 + $0x90] sm:$0xff]   ;;  %v5034_v33 = vld [vmem:[%s6452_s4 + $0x8] sm:$0xff]  }
  0x22   :  { %v5035_v34 = vld [vmem:[%s6452_s4 + $0x88] sm:$0xff]  }
  0x23   :  { %434 = vmatpush2.bf16.msra.mxu0 %v4961_v35  ;;  %477 = vmatpush2.bf16.msra.mxu1 %v4962_v36  ;;  %v5036_v35 = vld [vmem:[%s6452_s4 + $0x40] sm:$0xff]  }
  0x24   :  { %435 = vmatprep.subr.bf16.mxu0 %v4963_v37  ;;  %478 = vmatprep.subr.bf16.mxu1 %v4965_v38  ;;  %v5037_v36 = vld [vmem:[%s6452_s4 + $0xc0] sm:$0xff]  }
  0x25   :  { %v5038_v37 = vld [vmem:[%s6452_s4] sm:$0xff]  }
  0x26   :  { %v5039_v38 = vld [vmem:[%s6452_s4 + $0x80] sm:$0xff]  }
  0x27   :  { %436 = vmatpush2.bf16.msra.mxu0 %v4967_v39  ;;  %479 = vmatpush2.bf16.msra.mxu1 %v4968_v40  ;;  %v5040_v39 = vld [vmem:[%s6452_s4 + $0x178] sm:$0xff]  }
  0x28   :  { %437 = vmatprep.subr.bf16.mxu0 %v4969_v41  ;;  %480 = vmatprep.subr.bf16.mxu1 %v4971_v42  ;;  %v5041_v40 = vld [vmem:[%s6452_s4 + $0x1f8] sm:$0xff]  }
  0x2b   :  { %438 = vmatpush2.bf16.msra.mxu0 %v4973_v43  ;;  %481 = vmatpush2.bf16.msra.mxu1 %v4974_v44 }
  0x2c   :  { %439 = vmatprep.subr.bf16.mxu0 %v4975_v45  ;;  %482 = vmatprep.subr.bf16.mxu1 %v4977_v46 }
  0x2f   :  { %440 = vmatpush2.bf16.msra.mxu0 %v4979_v47  ;;  %483 = vmatpush2.bf16.msra.mxu1 %v4980_v48 }
  0x30   :  { %441 = vmatprep.subr.bf16.mxu0 %v4981_v50  ;;  %484 = vmatprep.subr.bf16.mxu1 %v4983_v53 }
  0x33   :  { %442 = vmatpush2.bf16.msra.mxu0 %v4985_v54  ;;  %485 = vmatpush2.bf16.msra.mxu1 %v4986_v55 }
  0x34   :  { %443 = vmatprep.subr.bf16.mxu0 %v4987_v56  ;;  %486 = vmatprep.subr.bf16.mxu1 %v4989_v59 }
  0x37   :  { %444 = vmatpush2.bf16.msra.mxu0 %v4991_v60  ;;  %487 = vmatpush2.bf16.msra.mxu1 %v4992_v61 }
  0x38   :  { %445 = vmatprep.subr.bf16.mxu0 %v4993_v62  ;;  %488 = vmatprep.subr.bf16.mxu1 %v4995_v63 }
  0x3b   :  { %446 = vmatpush2.bf16.msra.mxu0 %v4997_v0  ;;  %489 = vmatpush2.bf16.msra.mxu1 %v4998_v1 }
  0x3c   :  { %447 = vmatprep.subr.bf16.mxu0 %v4999_v2  ;;  %490 = vmatprep.subr.bf16.mxu1 %v5001_v3 }
  0x3f   :  { %448 = vmatpush2.bf16.msra.mxu0 %v5003_v4  ;;  %491 = vmatpush2.bf16.msra.mxu1 %v5004_v5 }
  0x40   :  { %4510 = vmatprep.subr.bf16.mxu0 %v5008_v6  ;;  %4532 = vmatprep.subr.bf16.mxu1 %v5009_v8 }
  0x42   :  { %450 = vmatmul.mubr.bf16.vlgmr.msra.gmra.mxu0 %v5005_v7  ;;  %493 = vmatmul.mubr.bf16.vlgmr.msra.gmra.mxu1 %v5005_v7 }
  0x43   :  { %4511 = vmatpush3.bf16.msra.mxu0 %v5010_v9  ;;  %4533 = vmatpush3.bf16.msra.mxu1 %v5011_v10 }
  0x44   :  { %4512 = vmatprep.subr.bf16.mxu0 %v5012_v11  ;;  %4534 = vmatprep.subr.bf16.mxu1 %v5013_v12 }
  0x47   :  { %4513 = vmatpush3.bf16.msra.mxu0 %v5014_v13  ;;  %4535 = vmatpush3.bf16.msra.mxu1 %v5015_v14  ;;  %v5042_v13 = vld [vmem:[%s6452_s4 + $0x138] sm:$0xff]  }
  0x48   :  { %4514 = vmatprep.subr.bf16.mxu0 %v5016_v15  ;;  %4536 = vmatprep.subr.bf16.mxu1 %v5017_v16  ;;  %v5043_v14 = vld [vmem:[%s6452_s4 + $0x1b8] sm:$0xff]  }
  0x4b   :  { %4515 = vmatpush3.bf16.msra.mxu0 %v5018_v17  ;;  %4537 = vmatpush3.bf16.msra.mxu1 %v5019_v18  ;;  %v5044_v17 = vld [vmem:[%s6452_s4 + $0x170] sm:$0xff]  }
  0x4c   :  { %4516 = vmatprep.subr.bf16.mxu0 %v5020_v19  ;;  %4538 = vmatprep.subr.bf16.mxu1 %v5021_v20  ;;  %v5045_v18 = vld [vmem:[%s6452_s4 + $0x1f0] sm:$0xff]  }
  0x4f   :  { %4517 = vmatpush3.bf16.msra.mxu0 %v5022_v21  ;;  %4539 = vmatpush3.bf16.msra.mxu1 %v5023_v22  ;;  %v5046_v21 = vld [vmem:[%s6452_s4 + $0x130] sm:$0xff]  }
  0x50   :  { %4518 = vmatprep.subr.bf16.mxu0 %v5024_v23  ;;  %4540 = vmatprep.subr.bf16.mxu1 %v5025_v24  ;;  %v5047_v22 = vld [vmem:[%s6452_s4 + $0x1b0] sm:$0xff]   ;;  %v5048_v23 = vld [vmem:[%s6452_s4 + $0x168] sm:$0xff]  }
  0x51   :  { %v5049_v24 = vld [vmem:[%s6452_s4 + $0x1e8] sm:$0xff]  }
  0x53   :  { %4519 = vmatpush3.bf16.msra.mxu0 %v5026_v25  ;;  %4541 = vmatpush3.bf16.msra.mxu1 %v5027_v26  ;;  %v5050_v25 = vld [vmem:[%s6452_s4 + $0x128] sm:$0xff]  }
  0x54   :  { %4520 = vmatprep.subr.bf16.mxu0 %v5028_v27  ;;  %4542 = vmatprep.subr.bf16.mxu1 %v5029_v28  ;;  %v5051_v26 = vld [vmem:[%s6452_s4 + $0x1a8] sm:$0xff]   ;;  %v5052_v27 = vld [vmem:[%s6452_s4 + $0x160] sm:$0xff]  }
  0x55   :  { %v5053_v28 = vld [vmem:[%s6452_s4 + $0x1e0] sm:$0xff]  }
  0x57   :  { %4521 = vmatpush3.bf16.msra.mxu0 %v5030_v29  ;;  %4543 = vmatpush3.bf16.msra.mxu1 %v5031_v30  ;;  %v5054_v29 = vld [vmem:[%s6452_s4 + $0x120] sm:$0xff]  }
  0x58   :  { %4522 = vmatprep.subr.bf16.mxu0 %v5032_v31  ;;  %4544 = vmatprep.subr.bf16.mxu1 %v5033_v32  ;;  %v5055_v30 = vld [vmem:[%s6452_s4 + $0x1a0] sm:$0xff]   ;;  %v5056_v31 = vld [vmem:[%s6452_s4 + $0x158] sm:$0xff]  }
  0x59   :  { %v5057_v32 = vld [vmem:[%s6452_s4 + $0x1d8] sm:$0xff]  }
  0x5b   :  { %4523 = vmatpush3.bf16.msra.mxu0 %v5034_v33  ;;  %4545 = vmatpush3.bf16.msra.mxu1 %v5035_v34  ;;  %v5058_v33 = vld [vmem:[%s6452_s4 + $0x118] sm:$0xff]  }
  0x5c   :  { %4524 = vmatprep.subr.bf16.mxu0 %v5036_v35  ;;  %4546 = vmatprep.subr.bf16.mxu1 %v5037_v36  ;;  %v5059_v34 = vld [vmem:[%s6452_s4 + $0x198] sm:$0xff]   ;;  %v5060_v35 = vld [vmem:[%s6452_s4 + $0x150] sm:$0xff]  }
  0x5d   :  { %v5061_v36 = vld [vmem:[%s6452_s4 + $0x1d0] sm:$0xff]  }
  0x5f   :  { %4525 = vmatpush3.bf16.msra.mxu0 %v5038_v37  ;;  %4547 = vmatpush3.bf16.msra.mxu1 %v5039_v38  ;;  %v5062_v37 = vld [vmem:[%s6452_s4 + $0x110] sm:$0xff]  }
  0x60   :  { %4554 = vmatprep.subr.bf16.mxu0 %v5040_v39  ;;  %4576 = vmatprep.subr.bf16.mxu1 %v5041_v40  ;;  %v5063_v38 = vld [vmem:[%s6452_s4 + $0x190] sm:$0xff]   ;;  %v5064_v39 = vld [vmem:[%s6452_s4 + $0x148] sm:$0xff]  }
  0x61   :  { %v5065_v40 = vld [vmem:[%s6452_s4 + $0x1c8] sm:$0xff]  }
  0x90   :  { %v508_v41 = vpop.permute.xlu0 %507  ;;  %v528_v44 = vpop.permute.xlu1 %527 }
  0x94   :  { %v513_v53 = vpop.permute.xlu0 %512  ;;  %v533_v62 = vpop.permute.xlu1 %532 }
 0x102   :  { %v451_v42 = vpop.f32.mrf.mxu0  ;;  %v494_v43 = vpop.f32.mrf.mxu1 }
 0x103   :  { %v515_v45 = vmul.f32 %v508_v41, %v451_v42  ;;  %v517_v46 = vmul.f32 %v508_v41, %v494_v43  ;;  %v5067_v42 = vld [vmem:[%s6452_s4 + $0x188] sm:$0xff]   ;;  %v5068_v43 = vld [vmem:[%s6452_s4 + $0x140] sm:$0xff]  }
 0x104   :  { %v453_v47 = vpop.f32.mrf.mxu0  ;;  %v496_v48 = vpop.f32.mrf.mxu1 }
 0x105   :  { %v516_v49 = vmul.f32 %v508_v41, %v453_v47  ;;  %v518_v50 = vmul.f32 %v508_v41, %v496_v48  ;;  %v535_v54 = vadd.f32 %v528_v44, %v515_v45  ;;  %v537_v55 = vadd.f32 %v528_v44, %v517_v46  ;;  %v5066_v41 = vld [vmem:[%s6452_s4 + $0x108] sm:$0xff]   ;;  %v5070_v45 = vld [vmem:[%s6452_s4 + $0x100] sm:$0xff]   ;;  %v5072_v47 = vld [vmem:[%s6452_s4 + $0x278] sm:$0xff]  }
 0x106   :  { %v455_v51 = vpop.f32.mrf.mxu0  ;;  %v498_v52 = vpop.f32.mrf.mxu1  ;;  %v5071_v46 = vld [vmem:[%s6452_s4 + $0x180] sm:$0xff]   ;;  %v5073_v48 = vld [vmem:[%s6452_s4 + $0x2f8] sm:$0xff]  }
 0x107   :  { %v519_v56 = vmul.f32 %v513_v53, %v455_v51  ;;  %v521_v57 = vmul.f32 %v513_v53, %v498_v52  ;;  %v536_v60 = vadd.f32 %v528_v44, %v516_v49  ;;  %v538_v61 = vadd.f32 %v528_v44, %v518_v50  ;;  %v5069_v44 = vld [vmem:[%s6452_s4 + $0x1c0] sm:$0xff]   ;;  %v5074_v49 = vld [vmem:[%s6452_s4 + $0x238] sm:$0xff]   ;;  %v5076_v51 = vld [vmem:[%s6452_s4 + $0x270] sm:$0xff]  }
 0x108   :  { %v457_v58 = vpop.f32.mrf.mxu0  ;;  %v500_v59 = vpop.f32.mrf.mxu1  ;;  %v543_v5 = vmax.f32 %v535_v54, 0.0  ;;  %v545_v6 = vmax.f32 %v537_v55, 0.0  ;;  %v5075_v50 = vld [vmem:[%s6452_s4 + $0x2b8] sm:$0xff]   ;;  %v5077_v52 = vld [vmem:[%s6452_s4 + $0x2f0] sm:$0xff]   ;;  %v5080_v55 = vld [vmem:[%s6452_s4 + $0x268] sm:$0xff]  }
 0x109   :  { %v520_v63 = vmul.f32 %v513_v53, %v457_v58  ;;  %v522_v0 = vmul.f32 %v513_v53, %v500_v59  ;;  %v539_v1 = vadd.f32 %v533_v62, %v519_v56  ;;  %v541_v2 = vadd.f32 %v533_v62, %v521_v57  ;;  %v5078_v53 = vld [vmem:[%s6452_s4 + $0x230] sm:$0xff]   ;;  %v5081_v56 = vld [vmem:[%s6452_s4 + $0x2e8] sm:$0xff]   ;;  %v5084_v59 = vld [vmem:[%s6452_s4 + $0x260] sm:$0xff]  }
 0x10a   :  { %v544_v9 = vmax.f32 %v536_v60, 0.0  ;;  %v546_v10 = vmax.f32 %v538_v61, 0.0  ;;  %v5079_v54 = vld [vmem:[%s6452_s4 + $0x2b0] sm:$0xff]   ;;  %v5082_v57 = vld [vmem:[%s6452_s4 + $0x228] sm:$0xff]   ;;  %v5085_v60 = vld [vmem:[%s6452_s4 + $0x2e0] sm:$0xff]  }
 0x10b   :  { %v540_v3 = vadd.f32 %v533_v62, %v520_v63  ;;  %v542_v4 = vadd.f32 %v533_v62, %v522_v0  ;;  %v547_v7 = vmax.f32 %v539_v1, 0.0  ;;  %v549_v8 = vmax.f32 %v541_v2, 0.0  ;;  %v5083_v58 = vld [vmem:[%s6452_s4 + $0x2a8] sm:$0xff]   ;;  %v5086_v61 = vld [vmem:[%s6452_s4 + $0x220] sm:$0xff]   ;;  %v5088_v63 = vld [vmem:[%s6452_s4 + $0x258] sm:$0xff]  }
 0x10c   :  { %v5087_v62 = vld [vmem:[%s6452_s4 + $0x2a0] sm:$0xff]   ;;  %v5089_v0 = vld [vmem:[%s6452_s4 + $0x2d8] sm:$0xff]  }
 0x10d   :  { %v548_v11 = vmax.f32 %v540_v3, 0.0  ;;  %v550_v12 = vmax.f32 %v542_v4, 0.0  ;;  %v5655_v19 = vpack.c.bf16 %v547_v7, %v543_v5  ;;  %v5657_v20 = vpack.c.bf16 %v549_v8, %v545_v6  ;;  %v5090_v1 = vld [vmem:[%s6452_s4 + $0x218] sm:$0xff]   ;;  %v5092_v3 = vld [vmem:[%s6452_s4 + $0x250] sm:$0xff]   ;;  %v5096_v7 = vld [vmem:[%s6452_s4 + $0x248] sm:$0xff]  }
 0x10e   :  { %v5091_v2 = vld [vmem:[%s6452_s4 + $0x298] sm:$0xff]   ;;  %v5093_v4 = vld [vmem:[%s6452_s4 + $0x2d0] sm:$0xff]   ;;  %v5097_v8 = vld [vmem:[%s6452_s4 + $0x2c8] sm:$0xff]  }
 0x10f   :  { %v5645_v15 = vpack.c.bf16 %v548_v11, %v544_v9  ;;  %v5647_v16 = vpack.c.bf16 %v550_v12, %v546_v10  ;;  %v5094_v5 = vld [vmem:[%s6452_s4 + $0x210] sm:$0xff]   ;;  %v5098_v9 = vld [vmem:[%s6452_s4 + $0x208] sm:$0xff]   ;;  %v5100_v11 = vld [vmem:[%s6452_s4 + $0x240] sm:$0xff]  }
 0x110   :  { %v5095_v6 = vld [vmem:[%s6452_s4 + $0x290] sm:$0xff]   ;;  %v5099_v10 = vld [vmem:[%s6452_s4 + $0x288] sm:$0xff]   ;;  %v5101_v12 = vld [vmem:[%s6452_s4 + $0x2c0] sm:$0xff]  }
 0x111   :  { %843 = vmatprep.mubr.bf16.mxu0 %v5645_v15  ;;  %884 = vmatprep.mubr.bf16.mxu1 %v5647_v16 }
 0x112   :  { %844 = vmatmul.mubr.bf16.vlgmr.msra.gmra.mxu0 %v5655_v19  ;;  %885 = vmatmul.mubr.bf16.vlgmr.msra.gmra.mxu1 %v5657_v20 }
 0x113   :  { %4555 = vmatpush3.bf16.msra.mxu0 %v5042_v13  ;;  %4577 = vmatpush3.bf16.msra.mxu1 %v5043_v14  ;;  %v5102_v13 = vld [vmem:[%s6452_s4 + $0x200] sm:$0xff]  }
 0x114   :  { %1182 = vmatprep.mubr.bf16.mxu0 %v5645_v15  ;;  %1223 = vmatprep.mubr.bf16.mxu1 %v5647_v16  ;;  %v5103_v14 = vld [vmem:[%s6452_s4 + $0x280] sm:$0xff]  }
 0x115   :  { %4556 = vmatprep.subr.bf16.mxu0 %v5044_v17  ;;  %4578 = vmatprep.subr.bf16.mxu1 %v5045_v18  ;;  %v5104_v17 = vld [vmem:[%s6452_s4 + $0x378] sm:$0xff]  }
 0x116   :  { %v5105_v18 = vld [vmem:[%s6452_s4 + $0x3f8] sm:$0xff]  }
 0x117   :  { %4557 = vmatpush3.bf16.msra.mxu0 %v5046_v21  ;;  %4579 = vmatpush3.bf16.msra.mxu1 %v5047_v22  ;;  %v5106_v21 = vld [vmem:[%s6452_s4 + $0x338] sm:$0xff]  }
 0x118   :  { %4558 = vmatprep.subr.bf16.mxu0 %v5048_v23  ;;  %4580 = vmatprep.subr.bf16.mxu1 %v5049_v24  ;;  %v5107_v22 = vld [vmem:[%s6452_s4 + $0x3b8] sm:$0xff]   ;;  %v5108_v23 = vld [vmem:[%s6452_s4 + $0x370] sm:$0xff]  }
 0x119   :  { %v5109_v24 = vld [vmem:[%s6452_s4 + $0x3f0] sm:$0xff]  }
 0x11b   :  { %4559 = vmatpush3.bf16.msra.mxu0 %v5050_v25  ;;  %4581 = vmatpush3.bf16.msra.mxu1 %v5051_v26  ;;  %v5110_v25 = vld [vmem:[%s6452_s4 + $0x330] sm:$0xff]  }
 0x11c   :  { %4560 = vmatprep.subr.bf16.mxu0 %v5052_v27  ;;  %4582 = vmatprep.subr.bf16.mxu1 %v5053_v28  ;;  %v5111_v26 = vld [vmem:[%s6452_s4 + $0x3b0] sm:$0xff]   ;;  %v5112_v27 = vld [vmem:[%s6452_s4 + $0x368] sm:$0xff]  }
 0x11d   :  { %v5113_v28 = vld [vmem:[%s6452_s4 + $0x3e8] sm:$0xff]  }
 0x11f   :  { %4561 = vmatpush3.bf16.msra.mxu0 %v5054_v29  ;;  %4583 = vmatpush3.bf16.msra.mxu1 %v5055_v30  ;;  %v5114_v29 = vld [vmem:[%s6452_s4 + $0x328] sm:$0xff]  }
 0x120   :  { %4562 = vmatprep.subr.bf16.mxu0 %v5056_v31  ;;  %4584 = vmatprep.subr.bf16.mxu1 %v5057_v32  ;;  %v5115_v30 = vld [vmem:[%s6452_s4 + $0x3a8] sm:$0xff]   ;;  %v5116_v31 = vld [vmem:[%s6452_s4 + $0x360] sm:$0xff]  }
 0x121   :  { %v5117_v32 = vld [vmem:[%s6452_s4 + $0x3e0] sm:$0xff]  }
 0x123   :  { %4563 = vmatpush3.bf16.msra.mxu0 %v5058_v33  ;;  %4585 = vmatpush3.bf16.msra.mxu1 %v5059_v34  ;;  %v5118_v33 = vld [vmem:[%s6452_s4 + $0x320] sm:$0xff]  }
 0x124   :  { %4564 = vmatprep.subr.bf16.mxu0 %v5060_v35  ;;  %4586 = vmatprep.subr.bf16.mxu1 %v5061_v36  ;;  %v5119_v34 = vld [vmem:[%s6452_s4 + $0x3a0] sm:$0xff]   ;;  %v5120_v35 = vld [vmem:[%s6452_s4 + $0x358] sm:$0xff]  }
 0x125   :  { %v5121_v36 = vld [vmem:[%s6452_s4 + $0x3d8] sm:$0xff]  }
 0x127   :  { %4565 = vmatpush3.bf16.msra.mxu0 %v5062_v37  ;;  %4587 = vmatpush3.bf16.msra.mxu1 %v5063_v38  ;;  %v5122_v37 = vld [vmem:[%s6452_s4 + $0x318] sm:$0xff]  }
 0x128   :  { %4566 = vmatprep.subr.bf16.mxu0 %v5064_v39  ;;  %4588 = vmatprep.subr.bf16.mxu1 %v5065_v40  ;;  %v5123_v38 = vld [vmem:[%s6452_s4 + $0x398] sm:$0xff]   ;;  %v5124_v39 = vld [vmem:[%s6452_s4 + $0x350] sm:$0xff]  }
 0x129   :  { %v5125_v40 = vld [vmem:[%s6452_s4 + $0x3d0] sm:$0xff]  }
 0x12b   :  { %4567 = vmatpush3.bf16.msra.mxu0 %v5066_v41  ;;  %4589 = vmatpush3.bf16.msra.mxu1 %v5067_v42  ;;  %v5126_v41 = vld [vmem:[%s6452_s4 + $0x310] sm:$0xff]  }
 0x12c   :  { %4568 = vmatprep.subr.bf16.mxu0 %v5068_v43  ;;  %4590 = vmatprep.subr.bf16.mxu1 %v5069_v44  ;;  %v5127_v42 = vld [vmem:[%s6452_s4 + $0x390] sm:$0xff]   ;;  %v5128_v43 = vld [vmem:[%s6452_s4 + $0x348] sm:$0xff]  }
 0x12d   :  { %v5129_v44 = vld [vmem:[%s6452_s4 + $0x3c8] sm:$0xff]  }
 0x12f   :  { %4569 = vmatpush3.bf16.msra.mxu0 %v5070_v45  ;;  %4591 = vmatpush3.bf16.msra.mxu1 %v5071_v46  ;;  %v5130_v45 = vld [vmem:[%s6452_s4 + $0x308] sm:$0xff]  }
 0x130   :  { %4598 = vmatprep.subr.bf16.mxu0 %v5072_v47  ;;  %4620 = vmatprep.subr.bf16.mxu1 %v5073_v48  ;;  %v5131_v46 = vld [vmem:[%s6452_s4 + $0x388] sm:$0xff]   ;;  %v5132_v47 = vld [vmem:[%s6452_s4 + $0x340] sm:$0xff]  }
 0x131   :  { %v5133_v48 = vld [vmem:[%s6452_s4 + $0x3c0] sm:$0xff]  }
 0x132   :  { %1183 = vmatmul.mubr.bf16.vlgmr.msra.gmra.mxu0 %v5655_v19  ;;  %1224 = vmatmul.mubr.bf16.vlgmr.msra.gmra.mxu1 %v5657_v20 }
 0x133   :  { %4599 = vmatpush3.bf16.msra.mxu0 %v5074_v49  ;;  %1523 = vmatprep.mubr.bf16.mxu0 %v5645_v15  ;;  %v5134_v49 = vld [vmem:[%s6452_s4 + $0x300] sm:$0xff]  }
 0x134   :  { %4621 = vmatpush3.bf16.msra.mxu1 %v5075_v50  ;;  %1564 = vmatprep.mubr.bf16.mxu1 %v5647_v16  ;;  %v5135_v50 = vld [vmem:[%s6452_s4 + $0x380] sm:$0xff]  }
 0x135   :  { %4600 = vmatprep.subr.bf16.mxu0 %v5076_v51  ;;  %4622 = vmatprep.subr.bf16.mxu1 %v5077_v52  ;;  %v5136_v51 = vld [vmem:[%s6452_s4 + $0x478] sm:$0xff]  }
 0x136   :  { %v5137_v52 = vld [vmem:[%s6452_s4 + $0x4f8] sm:$0xff]  }
 0x137   :  { %4601 = vmatpush3.bf16.msra.mxu0 %v5078_v53  ;;  %v5138_v53 = vld [vmem:[%s6452_s4 + $0x438] sm:$0xff]  }
 0x138   :  { %4623 = vmatpush3.bf16.msra.mxu1 %v5079_v54  ;;  %4602 = vmatprep.subr.bf16.mxu0 %v5080_v55  ;;  %v5139_v54 = vld [vmem:[%s6452_s4 + $0x4b8] sm:$0xff]   ;;  %v5140_v55 = vld [vmem:[%s6452_s4 + $0x470] sm:$0xff]  }
 0x139   :  { %4624 = vmatprep.subr.bf16.mxu1 %v5081_v56  ;;  %v5141_v56 = vld [vmem:[%s6452_s4 + $0x4f0] sm:$0xff]  }
 0x13b   :  { %4603 = vmatpush3.bf16.msra.mxu0 %v5082_v57  ;;  %v5142_v57 = vld [vmem:[%s6452_s4 + $0x430] sm:$0xff]  }
 0x13c   :  { %4625 = vmatpush3.bf16.msra.mxu1 %v5083_v58  ;;  %4604 = vmatprep.subr.bf16.mxu0 %v5084_v59  ;;  %v5143_v58 = vld [vmem:[%s6452_s4 + $0x4b0] sm:$0xff]   ;;  %v5144_v59 = vld [vmem:[%s6452_s4 + $0x468] sm:$0xff]  }
 0x13d   :  { %4626 = vmatprep.subr.bf16.mxu1 %v5085_v60  ;;  %v5145_v60 = vld [vmem:[%s6452_s4 + $0x4e8] sm:$0xff]  }
 0x13f   :  { %4605 = vmatpush3.bf16.msra.mxu0 %v5086_v61  ;;  %v5146_v61 = vld [vmem:[%s6452_s4 + $0x428] sm:$0xff]  }
 0x140   :  { %4627 = vmatpush3.bf16.msra.mxu1 %v5087_v62  ;;  %4606 = vmatprep.subr.bf16.mxu0 %v5088_v63  ;;  %v5147_v62 = vld [vmem:[%s6452_s4 + $0x4a8] sm:$0xff]   ;;  %v5148_v63 = vld [vmem:[%s6452_s4 + $0x460] sm:$0xff]  }
 0x141   :  { %4628 = vmatprep.subr.bf16.mxu1 %v5089_v0  ;;  %v5149_v0 = vld [vmem:[%s6452_s4 + $0x4e0] sm:$0xff]  }
 0x143   :  { %4607 = vmatpush3.bf16.msra.mxu0 %v5090_v1  ;;  %v5150_v1 = vld [vmem:[%s6452_s4 + $0x420] sm:$0xff]  }
 0x144   :  { %4629 = vmatpush3.bf16.msra.mxu1 %v5091_v2  ;;  %4608 = vmatprep.subr.bf16.mxu0 %v5092_v3  ;;  %v5151_v2 = vld [vmem:[%s6452_s4 + $0x4a0] sm:$0xff]   ;;  %v5152_v3 = vld [vmem:[%s6452_s4 + $0x458] sm:$0xff]  }
 0x145   :  { %4630 = vmatprep.subr.bf16.mxu1 %v5093_v4  ;;  %v5153_v4 = vld [vmem:[%s6452_s4 + $0x4d8] sm:$0xff]  }
 0x147   :  { %4609 = vmatpush3.bf16.msra.mxu0 %v5094_v5  ;;  %v5154_v5 = vld [vmem:[%s6452_s4 + $0x418] sm:$0xff]  }
 0x148   :  { %4631 = vmatpush3.bf16.msra.mxu1 %v5095_v6  ;;  %4610 = vmatprep.subr.bf16.mxu0 %v5096_v7  ;;  %v5155_v6 = vld [vmem:[%s6452_s4 + $0x498] sm:$0xff]   ;;  %v5156_v7 = vld [vmem:[%s6452_s4 + $0x450] sm:$0xff]  }
 0x149   :  { %4632 = vmatprep.subr.bf16.mxu1 %v5097_v8  ;;  %v5157_v8 = vld [vmem:[%s6452_s4 + $0x4d0] sm:$0xff]  }
 0x14b   :  { %4611 = vmatpush3.bf16.msra.mxu0 %v5098_v9  ;;  %v5158_v9 = vld [vmem:[%s6452_s4 + $0x410] sm:$0xff]  }
 0x14c   :  { %4633 = vmatpush3.bf16.msra.mxu1 %v5099_v10  ;;  %4612 = vmatprep.subr.bf16.mxu0 %v5100_v11  ;;  %v5159_v10 = vld [vmem:[%s6452_s4 + $0x490] sm:$0xff]   ;;  %v5160_v11 = vld [vmem:[%s6452_s4 + $0x448] sm:$0xff]  }
 0x14d   :  { %4634 = vmatprep.subr.bf16.mxu1 %v5101_v12  ;;  %v5161_v12 = vld [vmem:[%s6452_s4 + $0x4c8] sm:$0xff]  }
 0x14f   :  { %4613 = vmatpush3.bf16.msra.mxu0 %v5102_v13  ;;  %v5162_v13 = vld [vmem:[%s6452_s4 + $0x408] sm:$0xff]  }
 0x150   :  { %4635 = vmatpush3.bf16.msra.mxu1 %v5103_v14  ;;  %4642 = vmatprep.subr.bf16.mxu0 %v5104_v17  ;;  %v5163_v14 = vld [vmem:[%s6452_s4 + $0x488] sm:$0xff]   ;;  %v5164_v17 = vld [vmem:[%s6452_s4 + $0x440] sm:$0xff]  }
 0x151   :  { %4664 = vmatprep.subr.bf16.mxu1 %v5105_v18  ;;  %v5165_v18 = vld [vmem:[%s6452_s4 + $0x4c0] sm:$0xff]  }
 0x152   :  { %1524 = vmatmul.mubr.bf16.vlgmr.msra.gmra.mxu0 %v5655_v19 }
 0x153   :  { %1565 = vmatmul.mubr.bf16.vlgmr.msra.gmra.mxu1 %v5657_v20  ;;  %4643 = vmatpush3.bf16.msra.mxu0 %v5106_v21  ;;  %v5166_v21 = vld [vmem:[%s6452_s4 + $0x400] sm:$0xff]  }
 0x154   :  { %1864 = vmatprep.mubr.bf16.mxu0 %v5645_v15  ;;  %4665 = vmatpush3.bf16.msra.mxu1 %v5107_v22  ;;  %v5167_v22 = vld [vmem:[%s6452_s4 + $0x480] sm:$0xff]  }
 0x155   :  { %1905 = vmatprep.mubr.bf16.mxu1 %v5647_v16  ;;  %4644 = vmatprep.subr.bf16.mxu0 %v5108_v23  ;;  %v5168_v23 = vld [vmem:[%s6452_s4 + $0x578] sm:$0xff]  }
 0x156   :  { %4666 = vmatprep.subr.bf16.mxu1 %v5109_v24  ;;  %v5169_v24 = vld [vmem:[%s6452_s4 + $0x5f8] sm:$0xff]  }
 0x157   :  { %4645 = vmatpush3.bf16.msra.mxu0 %v5110_v25  ;;  %v5170_v25 = vld [vmem:[%s6452_s4 + $0x538] sm:$0xff]  }
 0x158   :  { %4667 = vmatpush3.bf16.msra.mxu1 %v5111_v26  ;;  %4646 = vmatprep.subr.bf16.mxu0 %v5112_v27  ;;  %v5171_v26 = vld [vmem:[%s6452_s4 + $0x5b8] sm:$0xff]   ;;  %v5172_v27 = vld [vmem:[%s6452_s4 + $0x570] sm:$0xff]  }
 0x159   :  { %4668 = vmatprep.subr.bf16.mxu1 %v5113_v28  ;;  %v5173_v28 = vld [vmem:[%s6452_s4 + $0x5f0] sm:$0xff]  }
 0x15b   :  { %4647 = vmatpush3.bf16.msra.mxu0 %v5114_v29  ;;  %v5174_v29 = vld [vmem:[%s6452_s4 + $0x530] sm:$0xff]  }
 0x15c   :  { %4669 = vmatpush3.bf16.msra.mxu1 %v5115_v30  ;;  %4648 = vmatprep.subr.bf16.mxu0 %v5116_v31  ;;  %v5175_v30 = vld [vmem:[%s6452_s4 + $0x5b0] sm:$0xff]   ;;  %v5176_v31 = vld [vmem:[%s6452_s4 + $0x568] sm:$0xff]  }
 0x15d   :  { %4670 = vmatprep.subr.bf16.mxu1 %v5117_v32  ;;  %v5177_v32 = vld [vmem:[%s6452_s4 + $0x5e8] sm:$0xff]  }
 0x15f   :  { %4649 = vmatpush3.bf16.msra.mxu0 %v5118_v33  ;;  %v5178_v33 = vld [vmem:[%s6452_s4 + $0x528] sm:$0xff]  }
 0x160   :  { %4671 = vmatpush3.bf16.msra.mxu1 %v5119_v34  ;;  %4650 = vmatprep.subr.bf16.mxu0 %v5120_v35  ;;  %v5179_v34 = vld [vmem:[%s6452_s4 + $0x5a8] sm:$0xff]   ;;  %v5180_v35 = vld [vmem:[%s6452_s4 + $0x560] sm:$0xff]  }
 0x161   :  { %4672 = vmatprep.subr.bf16.mxu1 %v5121_v36  ;;  %v5181_v36 = vld [vmem:[%s6452_s4 + $0x5e0] sm:$0xff]  }
 0x163   :  { %4651 = vmatpush3.bf16.msra.mxu0 %v5122_v37  ;;  %v5182_v37 = vld [vmem:[%s6452_s4 + $0x520] sm:$0xff]  }
 0x164   :  { %4673 = vmatpush3.bf16.msra.mxu1 %v5123_v38  ;;  %4652 = vmatprep.subr.bf16.mxu0 %v5124_v39  ;;  %v5183_v38 = vld [vmem:[%s6452_s4 + $0x5a0] sm:$0xff]   ;;  %v5184_v39 = vld [vmem:[%s6452_s4 + $0x558] sm:$0xff]  }
 0x165   :  { %4674 = vmatprep.subr.bf16.mxu1 %v5125_v40  ;;  %v5185_v40 = vld [vmem:[%s6452_s4 + $0x5d8] sm:$0xff]  }
 0x167   :  { %4653 = vmatpush3.bf16.msra.mxu0 %v5126_v41  ;;  %v5186_v41 = vld [vmem:[%s6452_s4 + $0x518] sm:$0xff]  }
 0x168   :  { %4675 = vmatpush3.bf16.msra.mxu1 %v5127_v42  ;;  %4654 = vmatprep.subr.bf16.mxu0 %v5128_v43  ;;  %v5187_v42 = vld [vmem:[%s6452_s4 + $0x598] sm:$0xff]   ;;  %v5188_v43 = vld [vmem:[%s6452_s4 + $0x550] sm:$0xff]  }
 0x169   :  { %4676 = vmatprep.subr.bf16.mxu1 %v5129_v44  ;;  %v5189_v44 = vld [vmem:[%s6452_s4 + $0x5d0] sm:$0xff]  }
 0x16b   :  { %4655 = vmatpush3.bf16.msra.mxu0 %v5130_v45  ;;  %v5190_v45 = vld [vmem:[%s6452_s4 + $0x510] sm:$0xff]  }
 0x16c   :  { %4677 = vmatpush3.bf16.msra.mxu1 %v5131_v46  ;;  %4656 = vmatprep.subr.bf16.mxu0 %v5132_v47  ;;  %v5191_v46 = vld [vmem:[%s6452_s4 + $0x590] sm:$0xff]   ;;  %v5192_v47 = vld [vmem:[%s6452_s4 + $0x548] sm:$0xff]  }
 0x16d   :  { %4678 = vmatprep.subr.bf16.mxu1 %v5133_v48  ;;  %v5193_v48 = vld [vmem:[%s6452_s4 + $0x5c8] sm:$0xff]  }
 0x16f   :  { %4657 = vmatpush3.bf16.msra.mxu0 %v5134_v49  ;;  %v5194_v49 = vld [vmem:[%s6452_s4 + $0x508] sm:$0xff]  }
 0x170   :  { %4679 = vmatpush3.bf16.msra.mxu1 %v5135_v50  ;;  %4686 = vmatprep.subr.bf16.mxu0 %v5136_v51  ;;  %v5195_v50 = vld [vmem:[%s6452_s4 + $0x588] sm:$0xff]   ;;  %v5196_v51 = vld [vmem:[%s6452_s4 + $0x540] sm:$0xff]  }
 0x171   :  { %4708 = vmatprep.subr.bf16.mxu1 %v5137_v52  ;;  %v5197_v52 = vld [vmem:[%s6452_s4 + $0x5c0] sm:$0xff]  }
 0x172   :  { %1865 = vmatmul.mubr.bf16.vlgmr.msra.gmra.mxu0 %v5655_v19 }
 0x173   :  { %1906 = vmatmul.mubr.bf16.vlgmr.msra.gmra.mxu1 %v5657_v20  ;;  %4687 = vmatpush3.bf16.msra.mxu0 %v5138_v53  ;;  %v5198_v53 = vld [vmem:[%s6452_s4 + $0x500] sm:$0xff]  }
 0x174   :  { %2205 = vmatprep.mubr.bf16.mxu0 %v5645_v15  ;;  %4709 = vmatpush3.bf16.msra.mxu1 %v5139_v54  ;;  %v5199_v54 = vld [vmem:[%s6452_s4 + $0x580] sm:$0xff]  }
 0x175   :  { %2246 = vmatprep.mubr.bf16.mxu1 %v5647_v16  ;;  %4688 = vmatprep.subr.bf16.mxu0 %v5140_v55  ;;  %v5200_v55 = vld [vmem:[%s6452_s4 + $0x678] sm:$0xff]  }
 0x176   :  { %4710 = vmatprep.subr.bf16.mxu1 %v5141_v56  ;;  %v5201_v56 = vld [vmem:[%s6452_s4 + $0x6f8] sm:$0xff]  }
 0x177   :  { %4689 = vmatpush3.bf16.msra.mxu0 %v5142_v57  ;;  %v5202_v57 = vld [vmem:[%s6452_s4 + $0x638] sm:$0xff]  }
 0x178   :  { %4711 = vmatpush3.bf16.msra.mxu1 %v5143_v58  ;;  %4690 = vmatprep.subr.bf16.mxu0 %v5144_v59  ;;  %v5203_v58 = vld [vmem:[%s6452_s4 + $0x6b8] sm:$0xff]   ;;  %v5204_v59 = vld [vmem:[%s6452_s4 + $0x670] sm:$0xff]  }
 0x179   :  { %4712 = vmatprep.subr.bf16.mxu1 %v5145_v60  ;;  %v5205_v60 = vld [vmem:[%s6452_s4 + $0x6f0] sm:$0xff]  }
 0x17b   :  { %4691 = vmatpush3.bf16.msra.mxu0 %v5146_v61  ;;  %v5206_v61 = vld [vmem:[%s6452_s4 + $0x630] sm:$0xff]  }
 0x17c   :  { %4713 = vmatpush3.bf16.msra.mxu1 %v5147_v62  ;;  %4692 = vmatprep.subr.bf16.mxu0 %v5148_v63  ;;  %v5207_v62 = vld [vmem:[%s6452_s4 + $0x6b0] sm:$0xff]   ;;  %v5208_v63 = vld [vmem:[%s6452_s4 + $0x668] sm:$0xff]  }
 0x17d   :  { %4714 = vmatprep.subr.bf16.mxu1 %v5149_v0  ;;  %v5209_v0 = vld [vmem:[%s6452_s4 + $0x6e8] sm:$0xff]  }
 0x17f   :  { %4693 = vmatpush3.bf16.msra.mxu0 %v5150_v1  ;;  %v5210_v1 = vld [vmem:[%s6452_s4 + $0x628] sm:$0xff]  }
 0x180   :  { %4715 = vmatpush3.bf16.msra.mxu1 %v5151_v2  ;;  %4694 = vmatprep.subr.bf16.mxu0 %v5152_v3  ;;  %v5211_v2 = vld [vmem:[%s6452_s4 + $0x6a8] sm:$0xff]   ;;  %v5212_v3 = vld [vmem:[%s6452_s4 + $0x660] sm:$0xff]  }
 0x181   :  { %4716 = vmatprep.subr.bf16.mxu1 %v5153_v4  ;;  %v5213_v4 = vld [vmem:[%s6452_s4 + $0x6e0] sm:$0xff]  }
 0x183   :  { %4695 = vmatpush3.bf16.msra.mxu0 %v5154_v5  ;;  %v5214_v5 = vld [vmem:[%s6452_s4 + $0x620] sm:$0xff]  }
 0x184   :  { %4717 = vmatpush3.bf16.msra.mxu1 %v5155_v6  ;;  %4696 = vmatprep.subr.bf16.mxu0 %v5156_v7  ;;  %v5215_v6 = vld [vmem:[%s6452_s4 + $0x6a0] sm:$0xff]   ;;  %v5216_v7 = vld [vmem:[%s6452_s4 + $0x658] sm:$0xff]  }
 0x185   :  { %4718 = vmatprep.subr.bf16.mxu1 %v5157_v8  ;;  %v5217_v8 = vld [vmem:[%s6452_s4 + $0x6d8] sm:$0xff]  }
 0x187   :  { %4697 = vmatpush3.bf16.msra.mxu0 %v5158_v9  ;;  %v5218_v9 = vld [vmem:[%s6452_s4 + $0x618] sm:$0xff]  }
 0x188   :  { %4719 = vmatpush3.bf16.msra.mxu1 %v5159_v10  ;;  %4698 = vmatprep.subr.bf16.mxu0 %v5160_v11  ;;  %v5219_v10 = vld [vmem:[%s6452_s4 + $0x698] sm:$0xff]   ;;  %v5220_v11 = vld [vmem:[%s6452_s4 + $0x650] sm:$0xff]  }
 0x189   :  { %4720 = vmatprep.subr.bf16.mxu1 %v5161_v12  ;;  %v5221_v12 = vld [vmem:[%s6452_s4 + $0x6d0] sm:$0xff]  }
 0x18b   :  { %4699 = vmatpush3.bf16.msra.mxu0 %v5162_v13  ;;  %v5222_v13 = vld [vmem:[%s6452_s4 + $0x610] sm:$0xff]  }
 0x18c   :  { %4721 = vmatpush3.bf16.msra.mxu1 %v5163_v14  ;;  %4700 = vmatprep.subr.bf16.mxu0 %v5164_v17  ;;  %v5223_v14 = vld [vmem:[%s6452_s4 + $0x690] sm:$0xff]   ;;  %v5224_v17 = vld [vmem:[%s6452_s4 + $0x648] sm:$0xff]  }
 0x18d   :  { %4722 = vmatprep.subr.bf16.mxu1 %v5165_v18  ;;  %v5225_v18 = vld [vmem:[%s6452_s4 + $0x6c8] sm:$0xff]  }
 0x18f   :  { %4701 = vmatpush3.bf16.msra.mxu0 %v5166_v21  ;;  %v5226_v21 = vld [vmem:[%s6452_s4 + $0x608] sm:$0xff]  }
 0x190   :  { %4723 = vmatpush3.bf16.msra.mxu1 %v5167_v22  ;;  %4730 = vmatprep.subr.bf16.mxu0 %v5168_v23  ;;  %v5227_v22 = vld [vmem:[%s6452_s4 + $0x688] sm:$0xff]   ;;  %v5228_v23 = vld [vmem:[%s6452_s4 + $0x640] sm:$0xff]  }
 0x191   :  { %4752 = vmatprep.subr.bf16.mxu1 %v5169_v24  ;;  %v5229_v24 = vld [vmem:[%s6452_s4 + $0x6c0] sm:$0xff]  }
 0x192   :  { %2206 = vmatmul.mubr.bf16.vlgmr.msra.gmra.mxu0 %v5655_v19 }
 0x193   :  { %2247 = vmatmul.mubr.bf16.vlgmr.msra.gmra.mxu1 %v5657_v20  ;;  %4731 = vmatpush3.bf16.msra.mxu0 %v5170_v25  ;;  %v5230_v25 = vld [vmem:[%s6452_s4 + $0x600] sm:$0xff]  }
 0x194   :  { %2546 = vmatprep.mubr.bf16.mxu0 %v5645_v15  ;;  %4753 = vmatpush3.bf16.msra.mxu1 %v5171_v26  ;;  %v5231_v26 = vld [vmem:[%s6452_s4 + $0x680] sm:$0xff]  }
 0x195   :  { %2587 = vmatprep.mubr.bf16.mxu1 %v5647_v16  ;;  %4732 = vmatprep.subr.bf16.mxu0 %v5172_v27  ;;  %v5232_v27 = vld [vmem:[%s6452_s4 + $0x778] sm:$0xff]  }
 0x196   :  { %4754 = vmatprep.subr.bf16.mxu1 %v5173_v28  ;;  %v5233_v28 = vld [vmem:[%s6452_s4 + $0x7f8] sm:$0xff]  }
 0x197   :  { %4733 = vmatpush3.bf16.msra.mxu0 %v5174_v29  ;;  %v5234_v29 = vld [vmem:[%s6452_s4 + $0x738] sm:$0xff]  }
 0x198   :  { %4755 = vmatpush3.bf16.msra.mxu1 %v5175_v30  ;;  %4734 = vmatprep.subr.bf16.mxu0 %v5176_v31  ;;  %v5235_v30 = vld [vmem:[%s6452_s4 + $0x7b8] sm:$0xff]   ;;  %v5236_v31 = vld [vmem:[%s6452_s4 + $0x770] sm:$0xff]  }
 0x199   :  { %4756 = vmatprep.subr.bf16.mxu1 %v5177_v32  ;;  %v5237_v32 = vld [vmem:[%s6452_s4 + $0x7f0] sm:$0xff]  }
 0x19b   :  { %4735 = vmatpush3.bf16.msra.mxu0 %v5178_v33  ;;  %v5238_v33 = vld [vmem:[%s6452_s4 + $0x730] sm:$0xff]  }
 0x19c   :  { %4757 = vmatpush3.bf16.msra.mxu1 %v5179_v34  ;;  %4736 = vmatprep.subr.bf16.mxu0 %v5180_v35  ;;  %v5239_v34 = vld [vmem:[%s6452_s4 + $0x7b0] sm:$0xff]   ;;  %v5240_v35 = vld [vmem:[%s6452_s4 + $0x768] sm:$0xff]  }
 0x19d   :  { %4758 = vmatprep.subr.bf16.mxu1 %v5181_v36  ;;  %v5241_v36 = vld [vmem:[%s6452_s4 + $0x7e8] sm:$0xff]  }
 0x19f   :  { %4737 = vmatpush3.bf16.msra.mxu0 %v5182_v37  ;;  %v5242_v37 = vld [vmem:[%s6452_s4 + $0x728] sm:$0xff]  }
 0x1a0   :  { %4759 = vmatpush3.bf16.msra.mxu1 %v5183_v38  ;;  %4738 = vmatprep.subr.bf16.mxu0 %v5184_v39  ;;  %v5243_v38 = vld [vmem:[%s6452_s4 + $0x7a8] sm:$0xff]   ;;  %v5244_v39 = vld [vmem:[%s6452_s4 + $0x760] sm:$0xff]  }
 0x1a1   :  { %4760 = vmatprep.subr.bf16.mxu1 %v5185_v40  ;;  %v5245_v40 = vld [vmem:[%s6452_s4 + $0x7e0] sm:$0xff]  }
 0x1a3   :  { %4739 = vmatpush3.bf16.msra.mxu0 %v5186_v41  ;;  %v5246_v41 = vld [vmem:[%s6452_s4 + $0x720] sm:$0xff]  }
 0x1a4   :  { %4761 = vmatpush3.bf16.msra.mxu1 %v5187_v42  ;;  %4740 = vmatprep.subr.bf16.mxu0 %v5188_v43  ;;  %v5247_v42 = vld [vmem:[%s6452_s4 + $0x7a0] sm:$0xff]   ;;  %v5248_v43 = vld [vmem:[%s6452_s4 + $0x758] sm:$0xff]  }
 0x1a5   :  { %4762 = vmatprep.subr.bf16.mxu1 %v5189_v44  ;;  %v5249_v44 = vld [vmem:[%s6452_s4 + $0x7d8] sm:$0xff]  }
 0x1a7   :  { %4741 = vmatpush3.bf16.msra.mxu0 %v5190_v45  ;;  %v5250_v45 = vld [vmem:[%s6452_s4 + $0x718] sm:$0xff]  }
 0x1a8   :  { %4763 = vmatpush3.bf16.msra.mxu1 %v5191_v46  ;;  %4742 = vmatprep.subr.bf16.mxu0 %v5192_v47  ;;  %v5251_v46 = vld [vmem:[%s6452_s4 + $0x798] sm:$0xff]   ;;  %v5252_v47 = vld [vmem:[%s6452_s4 + $0x750] sm:$0xff]  }
 0x1a9   :  { %4764 = vmatprep.subr.bf16.mxu1 %v5193_v48  ;;  %v5253_v48 = vld [vmem:[%s6452_s4 + $0x7d0] sm:$0xff]  }
 0x1ab   :  { %4743 = vmatpush3.bf16.msra.mxu0 %v5194_v49  ;;  %v5254_v49 = vld [vmem:[%s6452_s4 + $0x710] sm:$0xff]  }
 0x1ac   :  { %4765 = vmatpush3.bf16.msra.mxu1 %v5195_v50  ;;  %4744 = vmatprep.subr.bf16.mxu0 %v5196_v51  ;;  %v5255_v50 = vld [vmem:[%s6452_s4 + $0x790] sm:$0xff]   ;;  %v5256_v51 = vld [vmem:[%s6452_s4 + $0x748] sm:$0xff]  }
 0x1ad   :  { %4766 = vmatprep.subr.bf16.mxu1 %v5197_v52  ;;  %v5257_v52 = vld [vmem:[%s6452_s4 + $0x7c8] sm:$0xff]  }
 0x1af   :  { %4745 = vmatpush3.bf16.msra.mxu0 %v5198_v53  ;;  %v5258_v53 = vld [vmem:[%s6452_s4 + $0x708] sm:$0xff]  }
 0x1b0   :  { %4767 = vmatpush3.bf16.msra.mxu1 %v5199_v54  ;;  %4774 = vmatprep.subr.bf16.mxu0 %v5200_v55  ;;  %v5259_v54 = vld [vmem:[%s6452_s4 + $0x788] sm:$0xff]   ;;  %v5260_v55 = vld [vmem:[%s6452_s4 + $0x740] sm:$0xff]  }
 0x1b1   :  { %4796 = vmatprep.subr.bf16.mxu1 %v5201_v56  ;;  %v5261_v56 = vld [vmem:[%s6452_s4 + $0x7c0] sm:$0xff]  }
 0x1b2   :  { %2547 = vmatmul.mubr.bf16.vlgmr.msra.gmra.mxu0 %v5655_v19 }
 0x1b3   :  { %2588 = vmatmul.mubr.bf16.vlgmr.msra.gmra.mxu1 %v5657_v20  ;;  %4775 = vmatpush3.bf16.msra.mxu0 %v5202_v57  ;;  %v5262_v57 = vld [vmem:[%s6452_s4 + $0x700] sm:$0xff]  }
 0x1b4   :  { %2887 = vmatprep.mubr.bf16.mxu0 %v5645_v15  ;;  %4797 = vmatpush3.bf16.msra.mxu1 %v5203_v58  ;;  %v5263_v58 = vld [vmem:[%s6452_s4 + $0x780] sm:$0xff]  }
 0x1b5   :  { %2928 = vmatprep.mubr.bf16.mxu1 %v5647_v16  ;;  %4776 = vmatprep.subr.bf16.mxu0 %v5204_v59  ;;  %v5264_v59 = vld [vmem:[%s6452_s4 + $0x878] sm:$0xff]  }
 0x1b6   :  { %4798 = vmatprep.subr.bf16.mxu1 %v5205_v60  ;;  %v5265_v60 = vld [vmem:[%s6452_s4 + $0x8f8] sm:$0xff]  }
 0x1b7   :  { %4777 = vmatpush3.bf16.msra.mxu0 %v5206_v61  ;;  %v5266_v61 = vld [vmem:[%s6452_s4 + $0x838] sm:$0xff]  }
 0x1b8   :  { %4799 = vmatpush3.bf16.msra.mxu1 %v5207_v62  ;;  %4778 = vmatprep.subr.bf16.mxu0 %v5208_v63  ;;  %v5267_v62 = vld [vmem:[%s6452_s4 + $0x8b8] sm:$0xff]   ;;  %v5268_v63 = vld [vmem:[%s6452_s4 + $0x870] sm:$0xff]  }
 0x1b9   :  { %4800 = vmatprep.subr.bf16.mxu1 %v5209_v0  ;;  %v5269_v0 = vld [vmem:[%s6452_s4 + $0x8f0] sm:$0xff]  }
 0x1bb   :  { %4779 = vmatpush3.bf16.msra.mxu0 %v5210_v1  ;;  %v5270_v1 = vld [vmem:[%s6452_s4 + $0x830] sm:$0xff]  }
 0x1bc   :  { %4801 = vmatpush3.bf16.msra.mxu1 %v5211_v2  ;;  %4780 = vmatprep.subr.bf16.mxu0 %v5212_v3  ;;  %v5271_v2 = vld [vmem:[%s6452_s4 + $0x8b0] sm:$0xff]   ;;  %v5272_v3 = vld [vmem:[%s6452_s4 + $0x868] sm:$0xff]  }
 0x1bd   :  { %4802 = vmatprep.subr.bf16.mxu1 %v5213_v4  ;;  %v5273_v4 = vld [vmem:[%s6452_s4 + $0x8e8] sm:$0xff]  }
 0x1bf   :  { %4781 = vmatpush3.bf16.msra.mxu0 %v5214_v5  ;;  %v5275_v5 = vld [vmem:[%s6452_s4 + $0x8a8] sm:$0xff]  }
 0x1c0   :  { %4803 = vmatpush3.bf16.msra.mxu1 %v5215_v6  ;;  %4782 = vmatprep.subr.bf16.mxu0 %v5216_v7  ;;  %v5277_v6 = vld [vmem:[%s6452_s4 + $0x8e0] sm:$0xff]  }
 0x1c1   :  { %4804 = vmatprep.subr.bf16.mxu1 %v5217_v8  ;;  %v5278_v7 = vld [vmem:[%s6452_s4 + $0x820] sm:$0xff]  }
 0x1c2   :  { %v5279_v8 = vld [vmem:[%s6452_s4 + $0x8a0] sm:$0xff]  }
 0x1c3   :  { %4783 = vmatpush3.bf16.msra.mxu0 %v5218_v9  ;;  %v5280_v9 = vld [vmem:[%s6452_s4 + $0x858] sm:$0xff]  }
 0x1c4   :  { %4805 = vmatpush3.bf16.msra.mxu1 %v5219_v10  ;;  %4784 = vmatprep.subr.bf16.mxu0 %v5220_v11  ;;  %v5281_v10 = vld [vmem:[%s6452_s4 + $0x8d8] sm:$0xff]  }
 0x1c5   :  { %4806 = vmatprep.subr.bf16.mxu1 %v5221_v12  ;;  %v5282_v11 = vld [vmem:[%s6452_s4 + $0x818] sm:$0xff]  }
 0x1c6   :  { %v5283_v12 = vld [vmem:[%s6452_s4 + $0x898] sm:$0xff]  }
 0x1c7   :  { %4785 = vmatpush3.bf16.msra.mxu0 %v5222_v13  ;;  %v5284_v13 = vld [vmem:[%s6452_s4 + $0x850] sm:$0xff]  }
 0x1c8   :  { %4807 = vmatpush3.bf16.msra.mxu1 %v5223_v14  ;;  %4786 = vmatprep.subr.bf16.mxu0 %v5224_v17  ;;  %v5285_v14 = vld [vmem:[%s6452_s4 + $0x8d0] sm:$0xff]  }
 0x1c9   :  { %4808 = vmatprep.subr.bf16.mxu1 %v5225_v18  ;;  %v5286_v17 = vld [vmem:[%s6452_s4 + $0x810] sm:$0xff]  }
 0x1ca   :  { %v5287_v18 = vld [vmem:[%s6452_s4 + $0x890] sm:$0xff]  }
 0x1cb   :  { %4787 = vmatpush3.bf16.msra.mxu0 %v5226_v21  ;;  %v5288_v21 = vld [vmem:[%s6452_s4 + $0x848] sm:$0xff]  }
 0x1cc   :  { %4809 = vmatpush3.bf16.msra.mxu1 %v5227_v22  ;;  %4788 = vmatprep.subr.bf16.mxu0 %v5228_v23  ;;  %v5289_v22 = vld [vmem:[%s6452_s4 + $0x8c8] sm:$0xff]  }
 0x1cd   :  { %4810 = vmatprep.subr.bf16.mxu1 %v5229_v24  ;;  %v5290_v23 = vld [vmem:[%s6452_s4 + $0x808] sm:$0xff]  }
 0x1ce   :  { %v5291_v24 = vld [vmem:[%s6452_s4 + $0x888] sm:$0xff]  }
 0x1cf   :  { %4789 = vmatpush3.bf16.msra.mxu0 %v5230_v25  ;;  %v5292_v25 = vld [vmem:[%s6452_s4 + $0x840] sm:$0xff]  }
 0x1d0   :  { %4811 = vmatpush3.bf16.msra.mxu1 %v5231_v26  ;;  %4818 = vmatprep.subr.bf16.mxu0 %v5232_v27  ;;  %v5293_v26 = vld [vmem:[%s6452_s4 + $0x8c0] sm:$0xff]  }
 0x1d1   :  { %4840 = vmatprep.subr.bf16.mxu1 %v5233_v28  ;;  %v5294_v27 = vld [vmem:[%s6452_s4 + $0x800] sm:$0xff]  }
 0x1d2   :  { %2888 = vmatmul.mubr.bf16.vlgmr.msra.gmra.mxu0 %v5655_v19  ;;  %v5295_v28 = vld [vmem:[%s6452_s4 + $0x880] sm:$0xff]  }
 0x1d3   :  { %2929 = vmatmul.mubr.bf16.vlgmr.msra.gmra.mxu1 %v5657_v20  ;;  %4819 = vmatpush3.bf16.msra.mxu0 %v5234_v29  ;;  %v4526_v29 = vpop.f32.mrf.mxu0 }
 0x1d4   :  { %3228 = vmatprep.mubr.bf16.mxu0 %v5645_v15  ;;  %4841 = vmatpush3.bf16.msra.mxu1 %v5235_v30  ;;  %v4548_v30 = vpop.f32.mrf.mxu1 }
 0x1d5   :  { %3269 = vmatprep.mubr.bf16.mxu1 %v5647_v16  ;;  %4820 = vmatprep.subr.bf16.mxu0 %v5236_v31  ;;  %v4527_v31 = vpop.f32.mrf.mxu0 }
 0x1d6   :  { %4842 = vmatprep.subr.bf16.mxu1 %v5237_v32  ;;  %v4549_v32 = vpop.f32.mrf.mxu1 }
 0x1d7   :  { %4821 = vmatpush3.bf16.msra.mxu0 %v5238_v33  ;;  %v4529_v33 = vpop.f32.mrf.mxu0 }
 0x1d8   :  { %4843 = vmatpush3.bf16.msra.mxu1 %v5239_v34  ;;  %4822 = vmatprep.subr.bf16.mxu0 %v5240_v35  ;;  %v4551_v34 = vpop.f32.mrf.mxu1 }
 0x1d9   :  { %4844 = vmatprep.subr.bf16.mxu1 %v5241_v36  ;;  %v4530_v35 = vpop.f32.mrf.mxu0 }
 0x1da   :  { %v4552_v36 = vpop.f32.mrf.mxu1 }
 0x1db   :  { %4823 = vmatpush3.bf16.msra.mxu0 %v5242_v37 }
 0x1dc   :  { %4845 = vmatpush3.bf16.msra.mxu1 %v5243_v38  ;;  %4824 = vmatprep.subr.bf16.mxu0 %v5244_v39 }
 0x1dd   :  { %4846 = vmatprep.subr.bf16.mxu1 %v5245_v40 }
 0x1df   :  { %4825 = vmatpush3.bf16.msra.mxu0 %v5246_v41 }
 0x1e0   :  { %4847 = vmatpush3.bf16.msra.mxu1 %v5247_v42  ;;  %4826 = vmatprep.subr.bf16.mxu0 %v5248_v43 }
 0x1e1   :  { %4848 = vmatprep.subr.bf16.mxu1 %v5249_v44 }
 0x1e3   :  { %4827 = vmatpush3.bf16.msra.mxu0 %v5250_v45 }
 0x1e4   :  { %4849 = vmatpush3.bf16.msra.mxu1 %v5251_v46  ;;  %4828 = vmatprep.subr.bf16.mxu0 %v5252_v47 }
 0x1e5   :  { %4850 = vmatprep.subr.bf16.mxu1 %v5253_v48 }
 0x1e7   :  { %4829 = vmatpush3.bf16.msra.mxu0 %v5254_v49 }
 0x1e8   :  { %4851 = vmatpush3.bf16.msra.mxu1 %v5255_v50  ;;  %4830 = vmatprep.subr.bf16.mxu0 %v5256_v51 }
 0x1e9   :  { %4852 = vmatprep.subr.bf16.mxu1 %v5257_v52 }
 0x1eb   :  { %4831 = vmatpush3.bf16.msra.mxu0 %v5258_v53 }
 0x1ec   :  { %4853 = vmatpush3.bf16.msra.mxu1 %v5259_v54  ;;  %4832 = vmatprep.subr.bf16.mxu0 %v5260_v55 }
 0x1ed   :  { %4854 = vmatprep.subr.bf16.mxu1 %v5261_v56 }
 0x1ef   :  { %4833 = vmatpush3.bf16.msra.mxu0 %v5262_v57 }
 0x1f0   :  { %4855 = vmatpush3.bf16.msra.mxu1 %v5263_v58  ;;  %4862 = vmatprep.subr.bf16.mxu0 %v5264_v59 }
 0x1f1   :  { %4884 = vmatprep.subr.bf16.mxu1 %v5265_v60 }
 0x1f2   :  { %3229 = vmatmul.mubr.bf16.vlgmr.msra.gmra.mxu0 %v5655_v19  ;;  %v4570_v37 = vpop.f32.mrf.mxu0  ;;  %v4592_v38 = vpop.f32.mrf.mxu1 }
 0x1f3   :  { %3270 = vmatmul.mubr.bf16.vlgmr.msra.gmra.mxu1 %v5657_v20  ;;  %4863 = vmatpush3.bf16.msra.mxu0 %v5266_v61 }
 0x1f4   :  { %3569 = vmatprep.mubr.bf16.mxu0 %v5645_v15  ;;  %4885 = vmatpush3.bf16.msra.mxu1 %v5267_v62  ;;  %v5274_v15 = vld [vmem:[%s6452_s4 + $0x828] sm:$0xff]   ;;  %v4571_v39 = vpop.f32.mrf.mxu0  ;;  %v4593_v40 = vpop.f32.mrf.mxu1 }
 0x1f5   :  { %3610 = vmatprep.mubr.bf16.mxu1 %v5647_v16  ;;  %4864 = vmatprep.subr.bf16.mxu0 %v5268_v63  ;;  %v5276_v16 = vld [vmem:[%s6452_s4 + $0x860] sm:$0xff]  }
 0x1f6   :  { %4886 = vmatprep.subr.bf16.mxu1 %v5269_v0  ;;  %v4573_v41 = vpop.f32.mrf.mxu0  ;;  %v4595_v42 = vpop.f32.mrf.mxu1 }
 0x1f7   :  { %4865 = vmatpush3.bf16.msra.mxu0 %v5270_v1 }
 0x1f8   :  { %4887 = vmatpush3.bf16.msra.mxu1 %v5271_v2  ;;  %4866 = vmatprep.subr.bf16.mxu0 %v5272_v3  ;;  %v4574_v43 = vpop.f32.mrf.mxu0  ;;  %v4596_v44 = vpop.f32.mrf.mxu1 }
 0x1f9   :  { %4888 = vmatprep.subr.bf16.mxu1 %v5273_v4 }
 0x1fb   :  { %4867 = vmatpush3.bf16.msra.mxu0 %v5274_v15 }
 0x1fc   :  { %4889 = vmatpush3.bf16.msra.mxu1 %v5275_v5  ;;  %4868 = vmatprep.subr.bf16.mxu0 %v5276_v16 }
 0x1fd   :  { %4890 = vmatprep.subr.bf16.mxu1 %v5277_v6 }
 0x1ff   :  { %4869 = vmatpush3.bf16.msra.mxu0 %v5278_v7 }
 0x200   :  { %4891 = vmatpush3.bf16.msra.mxu1 %v5279_v8  ;;  %4870 = vmatprep.subr.bf16.mxu0 %v5280_v9 }
 0x201   :  { %4892 = vmatprep.subr.bf16.mxu1 %v5281_v10 }
 0x203   :  { %4871 = vmatpush3.bf16.msra.mxu0 %v5282_v11 }
 0x204   :  { %4893 = vmatpush3.bf16.msra.mxu1 %v5283_v12  ;;  %4872 = vmatprep.subr.bf16.mxu0 %v5284_v13 }
 0x205   :  { %4894 = vmatprep.subr.bf16.mxu1 %v5285_v14 }
 0x207   :  { %4873 = vmatpush3.bf16.msra.mxu0 %v5286_v17 }
 0x208   :  { %4895 = vmatpush3.bf16.msra.mxu1 %v5287_v18  ;;  %4874 = vmatprep.subr.bf16.mxu0 %v5288_v21 }
 0x209   :  { %4896 = vmatprep.subr.bf16.mxu1 %v5289_v22  ;;  %v4572_v22 = vadd.f32 %v4571_v39, %v4570_v37  ;;  %v4531_v37 = vadd.f32 %v4530_v35, %v4529_v33  ;;  %v4553_v39 = vadd.f32 %v4552_v36, %v4551_v34 }
 0x20b   :  { %4875 = vmatpush3.bf16.msra.mxu0 %v5290_v23  ;;  %v4594_v23 = vadd.f32 %v4593_v40, %v4592_v38  ;;  %v890_v36 = vadd.f32 %v4553_v39, %v4531_v37 }
 0x20c   :  { %4897 = vmatpush3.bf16.msra.mxu1 %v5291_v24  ;;  %4876 = vmatprep.subr.bf16.mxu0 %v5292_v25  ;;  %v4575_v24 = vadd.f32 %v4574_v43, %v4573_v41  ;;  %v4597_v25 = vadd.f32 %v4596_v44, %v4595_v42 }
 0x20d   :  { %4898 = vmatprep.subr.bf16.mxu1 %v5293_v26  ;;  %v1226_v44 = vadd.f32 %v4594_v23, %v4572_v22 }
 0x20f   :  { %4877 = vmatpush3.bf16.msra.mxu0 %v5294_v27  ;;  %v4528_v27 = vadd.f32 %v4527_v31, %v4526_v29  ;;  %v1229_v29 = vadd.f32 %v4597_v25, %v4575_v24 }
 0x210   :  { %4899 = vmatpush3.bf16.msra.mxu1 %v5295_v28  ;;  %v4550_v28 = vadd.f32 %v4549_v32, %v4548_v30 }
 0x211   :  { %v1233_v23 = vmax.f32 %v890_v36, %v1229_v29 }
 0x212   :  { %3570 = vmatmul.mubr.bf16.vlgmr.msra.gmra.mxu0 %v5655_v19  ;;  %v4614_v45 = vpop.f32.mrf.mxu0  ;;  %v887_v34 = vadd.f32 %v4550_v28, %v4528_v27 }
 0x213   :  { %3611 = vmatmul.mubr.bf16.vlgmr.msra.gmra.mxu1 %v5657_v20  ;;  %v4636_v19 = vpop.f32.mrf.mxu1 }
 0x214   :  { %v4615_v46 = vpop.f32.mrf.mxu0  ;;  %v1232_v22 = vmax.f32 %v887_v34, %v1226_v44 }
 0x215   :  { %v4637_v20 = vpop.f32.mrf.mxu1  ;;  %v4616_v38 = vadd.f32 %v4615_v46, %v4614_v45 }
 0x216   :  { %v4617_v47 = vpop.f32.mrf.mxu0  ;;  %v4638_v40 = vadd.f32 %v4637_v20, %v4636_v19 }
 0x217   :  { %v4639_v48 = vpop.f32.mrf.mxu1 }
 0x218   :  { %v4618_v49 = vpop.f32.mrf.mxu0  ;;  %v1567_v45 = vadd.f32 %v4638_v40, %v4616_v38 }
 0x219   :  { %v4640_v50 = vpop.f32.mrf.mxu1  ;;  %v4619_v41 = vadd.f32 %v4618_v49, %v4617_v47 }
 0x21a   :  { %v4641_v43 = vadd.f32 %v4640_v50, %v4639_v48 }
 0x21c   :  { %v1570_v46 = vadd.f32 %v4641_v43, %v4619_v41 }
 0x232   :  { %v4658_v51 = vpop.f32.mrf.mxu0 }
 0x233   :  { %v4680_v52 = vpop.f32.mrf.mxu1 }
 0x234   :  { %v4659_v53 = vpop.f32.mrf.mxu0 }
 0x235   :  { %v4681_v54 = vpop.f32.mrf.mxu1  ;;  %v4660_v30 = vadd.f32 %v4659_v53, %v4658_v51 }
 0x236   :  { %v4661_v55 = vpop.f32.mrf.mxu0  ;;  %v4682_v32 = vadd.f32 %v4681_v54, %v4680_v52 }
 0x237   :  { %v4683_v56 = vpop.f32.mrf.mxu1 }
 0x238   :  { %v4662_v57 = vpop.f32.mrf.mxu0  ;;  %v1908_v24 = vadd.f32 %v4682_v32, %v4660_v30 }
 0x239   :  { %v4684_v58 = vpop.f32.mrf.mxu1  ;;  %v4663_v33 = vadd.f32 %v4662_v57, %v4661_v55  ;;  %v1574_v57 = vmax.f32 %v1233_v23, %v1570_v46 }
 0x23a   :  { %v4685_v35 = vadd.f32 %v4684_v58, %v4683_v56  ;;  %v1573_v56 = vmax.f32 %v1232_v22, %v1567_v45 }
 0x23c   :  { %v1911_v25 = vadd.f32 %v4685_v35, %v4663_v33 }
 0x252   :  { %v4702_v59 = vpop.f32.mrf.mxu0 }
 0x253   :  { %v4724_v60 = vpop.f32.mrf.mxu1 }
 0x254   :  { %v4703_v61 = vpop.f32.mrf.mxu0 }
 0x255   :  { %v4725_v62 = vpop.f32.mrf.mxu1  ;;  %v4704_v20 = vadd.f32 %v4703_v61, %v4702_v59 }
 0x256   :  { %v4705_v63 = vpop.f32.mrf.mxu0  ;;  %v4726_v47 = vadd.f32 %v4725_v62, %v4724_v60 }
 0x257   :  { %v4727_v0 = vpop.f32.mrf.mxu1 }
 0x258   :  { %v4706_v1 = vpop.f32.mrf.mxu0  ;;  %v2249_v58 = vadd.f32 %v4726_v47, %v4704_v20 }
 0x259   :  { %v4728_v2 = vpop.f32.mrf.mxu1  ;;  %v4707_v49 = vadd.f32 %v4706_v1, %v4705_v63  ;;  %v1914_v63 = vmax.f32 %v1573_v56, %v1908_v24 }
 0x25a   :  { %v4729_v48 = vadd.f32 %v4728_v2, %v4727_v0  ;;  %v1915_v0 = vmax.f32 %v1574_v57, %v1911_v25 }
 0x25c   :  { %v2252_v27 = vadd.f32 %v4729_v48, %v4707_v49 }
 0x272   :  { %v4746_v3 = vpop.f32.mrf.mxu0 }
 0x273   :  { %v4768_v4 = vpop.f32.mrf.mxu1 }
 0x274   :  { %v4747_v15 = vpop.f32.mrf.mxu0 }
 0x275   :  { %v4769_v5 = vpop.f32.mrf.mxu1  ;;  %v4748_v51 = vadd.f32 %v4747_v15, %v4746_v3 }
 0x276   :  { %v4749_v16 = vpop.f32.mrf.mxu0  ;;  %v4770_v53 = vadd.f32 %v4769_v5, %v4768_v4 }
 0x277   :  { %v4771_v6 = vpop.f32.mrf.mxu1 }
 0x278   :  { %v4750_v7 = vpop.f32.mrf.mxu0  ;;  %v2590_v1 = vadd.f32 %v4770_v53, %v4748_v51 }
 0x279   :  { %v4772_v8 = vpop.f32.mrf.mxu1  ;;  %v4751_v52 = vadd.f32 %v4750_v7, %v4749_v16  ;;  %v2256_v7 = vmax.f32 %v1915_v0, %v2252_v27 }
 0x27a   :  { %v4773_v54 = vadd.f32 %v4772_v8, %v4771_v6  ;;  %v2255_v6 = vmax.f32 %v1914_v63, %v2249_v58 }
 0x27c   :  { %v2593_v2 = vadd.f32 %v4773_v54, %v4751_v52 }
 0x292   :  { %v4790_v9 = vpop.f32.mrf.mxu0 }
 0x293   :  { %v4812_v10 = vpop.f32.mrf.mxu1 }
 0x294   :  { %v4791_v11 = vpop.f32.mrf.mxu0 }
 0x295   :  { %v4813_v12 = vpop.f32.mrf.mxu1  ;;  %v4792_v37 = vadd.f32 %v4791_v11, %v4790_v9 }
 0x296   :  { %v4793_v13 = vpop.f32.mrf.mxu0  ;;  %v4814_v59 = vadd.f32 %v4813_v12, %v4812_v10 }
 0x297   :  { %v4815_v14 = vpop.f32.mrf.mxu1 }
 0x298   :  { %v4794_v17 = vpop.f32.mrf.mxu0  ;;  %v2931_v38 = vadd.f32 %v4814_v59, %v4792_v37 }
 0x299   :  { %v4816_v18 = vpop.f32.mrf.mxu1  ;;  %v4795_v60 = vadd.f32 %v4794_v17, %v4793_v13  ;;  %v2596_v13 = vmax.f32 %v2255_v6, %v2590_v1 }
 0x29a   :  { %v4817_v61 = vadd.f32 %v4816_v18, %v4815_v14  ;;  %v2597_v14 = vmax.f32 %v2256_v7, %v2593_v2 }
 0x29c   :  { %v2934_v40 = vadd.f32 %v4817_v61, %v4795_v60 }
 0x2b2   :  { %v4834_v21 = vpop.f32.mrf.mxu0 }
 0x2b3   :  { %v4856_v26 = vpop.f32.mrf.mxu1 }
 0x2b4   :  { %v4835_v42 = vpop.f32.mrf.mxu0 }
 0x2b5   :  { %v4857_v31 = vpop.f32.mrf.mxu1  ;;  %v4836_v3 = vadd.f32 %v4835_v42, %v4834_v21  ;;  %v2938_v42 = vmax.f32 %v2597_v14, %v2934_v40 }
 0x2b6   :  { %v4837_v19 = vpop.f32.mrf.mxu0  ;;  %v4858_v4 = vadd.f32 %v4857_v31, %v4856_v26  ;;  %v2937_v26 = vmax.f32 %v2596_v13, %v2931_v38 }
 0x2b7   :  { %v4859_v50 = vpop.f32.mrf.mxu1 }
 0x2b8   :  { %v4838_v55 = vpop.f32.mrf.mxu0  ;;  %v3272_v17 = vadd.f32 %v4858_v4, %v4836_v3 }
 0x2b9   :  { %v4860_v28 = vpop.f32.mrf.mxu1  ;;  %v4839_v15 = vadd.f32 %v4838_v55, %v4837_v19 }
 0x2ba   :  { %v4861_v5 = vadd.f32 %v4860_v28, %v4859_v50  ;;  %v3278_v31 = vmax.f32 %v2937_v26, %v3272_v17 }
 0x2bc   :  { %v3275_v18 = vadd.f32 %v4861_v5, %v4839_v15 }
 0x2be   :  { %v3279_v30 = vmax.f32 %v2938_v42, %v3275_v18 }
 0x2d2   :  { %v4878_v62 = vpop.f32.mrf.mxu0 }
 0x2d3   :  { %v4900_v39 = vpop.f32.mrf.mxu1 }
 0x2d4   :  { %v4879_v16 = vpop.f32.mrf.mxu0 }
 0x2d5   :  { %v4901_v8 = vpop.f32.mrf.mxu1  ;;  %v4880_v9 = vadd.f32 %v4879_v16, %v4878_v62 }
 0x2d6   :  { %v4902_v10 = vadd.f32 %v4901_v8, %v4900_v39  ;;  %v4881_v11 = vpop.f32.mrf.mxu0 }
 0x2d7   :  { %v4903_v12 = vpop.f32.mrf.mxu1 }
 0x2d8   :  { %v4882_v41 = vpop.f32.mrf.mxu0  ;;  %v3613_v44 = vadd.f32 %v4902_v10, %v4880_v9 }
 0x2d9   :  { %v4883_v43 = vadd.f32 %v4882_v41, %v4881_v11  ;;  %v4904_v21 = vpop.f32.mrf.mxu1 }
 0x2da   :  { %v4905_v29 = vadd.f32 %v4904_v21, %v4903_v12  ;;  %v3619_v33 = vmax.f32 %v3278_v31, %v3613_v44 }
 0x2dc   :  { %v3616_v32 = vadd.f32 %v4905_v29, %v4883_v43 }
 0x2de   :  { %v3620_v35 = vmax.f32 %v3279_v30, %v3616_v32 }
 0x2e0   :  { %v4508_v34 = vpack.c.bf16 %v3620_v35, %v3619_v33 }
 0x2e2   :  { %4509 = vst [vmem:[%s6453_s5] sm:$0xff] %v4508_v34  }

// kernel: resnet_feature_extractor.9
= control target key start
LH: loop header
LB: loop body
LE: loop exit
PB: predicated region body
PF: predicated region fallthrough
CT: control target
= control target key end

     0   :  { %vm60_vm0 = vcmask 261120   ;;  %v3323_v37 = vmov 0   ;;  %vm2587_vm1 = vcmask 257024   ;;  %s3851_s7 = inlined_call_operand.vmem [shape: bf16[9,32,32], index: 7, kind: input, shape index: {}]   ;;  %s3852_s0 = inlined_call_operand.vmem [shape: bf16[32,32], index: 0, kind: input, shape index: {}]   ;;  %s3853_s1 = inlined_call_operand.vmem [shape: bf16[9,32,32], index: 1, kind: input, shape index: {}]   ;;  %s3854_s2 = inlined_call_operand.vmem [shape: f32[32,1], index: 2, kind: input, shape index: {}]   ;;  %s3855_s3 = inlined_call_operand.vmem [shape: f32[32,1], index: 3, kind: input, shape index: {}]   ;;  %s3856_s5 = inlined_call_operand.vmem [shape: f32[32,1], index: 5, kind: input, shape index: {}]   ;;  %s3857_s6 = inlined_call_operand.vmem [shape: f32[32,1], index: 6, kind: input, shape index: {}]   ;;  %s3858_s4 = inlined_call_operand.vmem [shape: bf16[9,32,32], index: 4, kind: input, shape index: {}]   ;;  %s3859_s8 = inlined_call_operand.vmem [shape: bf16[32,32], index: 8, kind: output, shape index: {}]  }
   0x1   :  { %v3372_v0 = vld [vmem:[%s3851_s7 + $0x8] sm:$0xff]   ;;  %v3377_v1 = vld [vmem:[%s3851_s7 + $0x18] sm:$0xff]   ;;  %v3383_v2 = vld [vmem:[%s3851_s7] sm:$0xff]   ;;  %3262 = vset.pattern.permute.xlu1 %v3323_v37  ;;  %3261 = vset.pattern.permute.xlu0 %v3323_v37 }
   0x2   :  { %2972 = vmatprep.subr.bf16.mxu0 %v3372_v0  ;;  %2980 = vmatprep.subr.bf16.mxu1 %v3377_v1  ;;  %v3390_v3 = vld [vmem:[%s3851_s7 + $0x10] sm:$0xff]   ;;  %v3397_v4 = vld [vmem:[%s3852_s0] sm:$0xff]   ;;  %v3402_v5 = vld [vmem:[%s3852_s0 + $0x8] sm:$0xff]  }
   0x3   :  { %2973 = vmatpush3.bf16.msra.mxu0 %v3372_v0  ;;  %2981 = vmatpush3.bf16.msra.mxu1 %v3377_v1  ;;  %v3269_v6 = vld [vmem:[%s3853_s1 + $0x10] sm:$0xff]   ;;  %v3270_v7 = vld [vmem:[%s3853_s1] sm:$0xff]   ;;  %v3426_v20 = vld [vmem:[%s3851_s7 + $0x28] sm:$0xff]  }
   0x4   :  { %2974 = vmatprep.subr.bf16.mxu0 %v3383_v2  ;;  %2982 = vmatprep.subr.bf16.mxu1 %v3390_v3  ;;  %v3272_v21 = vld [vmem:[%s3853_s1 + $0x8] sm:$0xff]   ;;  %v3271_v22 = vld [vmem:[%s3853_s1 + $0x18] sm:$0xff]   ;;  %v3438_v23 = vld [vmem:[%s3851_s7 + $0x20] sm:$0xff]  }
   0x5   :  { %2976 = vmatprep.mubr.msk.bf16.mxu0 %vm60_vm0, %v3397_v4  ;;  %2984 = vmatprep.mubr.msk.bf16.mxu1 %vm60_vm0, %v3397_v4  ;;  %v3449_v24 = vld [vmem:[%s3851_s7 + $0x38] sm:$0xff]   ;;  %v3456_v25 = vld [vmem:[%s3851_s7 + $0x30] sm:$0xff]   ;;  %v3467_v26 = vld [vmem:[%s3851_s7 + $0x48] sm:$0xff]  }
   0x6   :  { %v3474_v27 = vld [vmem:[%s3851_s7 + $0x40] sm:$0xff]   ;;  %v3485_v28 = vld [vmem:[%s3851_s7 + $0x58] sm:$0xff]   ;;  %v3492_v29 = vld [vmem:[%s3851_s7 + $0x50] sm:$0xff]  }
   0x7   :  { %2975 = vmatpush3.bf16.msra.mxu0 %v3383_v2  ;;  %2983 = vmatpush3.bf16.msra.mxu1 %v3390_v3  ;;  %v3503_v30 = vld [vmem:[%s3851_s7 + $0x68] sm:$0xff]   ;;  %v3510_v31 = vld [vmem:[%s3851_s7 + $0x60] sm:$0xff]   ;;  %v3521_v32 = vld [vmem:[%s3851_s7 + $0x78] sm:$0xff]  }
   0x8   :  { %v3528_v33 = vld [vmem:[%s3851_s7 + $0x70] sm:$0xff]   ;;  %v3539_v34 = vld [vmem:[%s3851_s7 + $0x88] sm:$0xff]   ;;  %v3546_v35 = vld [vmem:[%s3851_s7 + $0x80] sm:$0xff]  }
   0x9   :  { %v3287_v36 = vld [vmem:[%s3853_s1 + $0x20] sm:$0xff]   ;;  %v1321_v38 = vld [vmem:[%s3854_s2 + $0x10] sm:$0xff]  ;;  %v1322_v40 = vld [vmem:[%s3854_s2 + $0x18] sm:$0xff] }
   0xa   :  { %2977 = vmatmul.mubr.msk.bf16.vlgmr.msra.gmra.mxu0 %vm60_vm0, %v3402_v5  ;;  %2985 = vmatmul.mubr.msk.bf16.vlgmr.msra.gmra.mxu1 %vm60_vm0, %v3402_v5  ;;  %v1319_v39 = vld [vmem:[%s3854_s2] sm:$0xff]  ;;  %v1320_v41 = vld [vmem:[%s3854_s2 + $0x8] sm:$0xff]  ;;  %v1350_v44 = vld [vmem:[%s3855_s3 + $0x18] sm:$0xff] }
   0xb   :  { %2992 = vmatprep.mubr.msk.bf16.mxu0 %vm60_vm0, %v3269_v6  ;;  %3000 = vmatprep.mubr.msk.bf16.mxu1 %vm60_vm0, %v3270_v7  ;;  %v1348_v42 = vld [vmem:[%s3855_s3 + $0x8] sm:$0xff]  ;;  %v1347_v43 = vld [vmem:[%s3855_s3] sm:$0xff]  ;;  %v1349_v45 = vld [vmem:[%s3855_s3 + $0x10] sm:$0xff] }
   0xc   :  { %1335 = vperm.xlu1 %3262, %v1321_v38   ;;  %1325 = vperm.xlu0 %3261, %v1319_v39   ;;  %v2504_v46 = vld [vmem:[%s3856_s5 + $0x8] sm:$0xff]  ;;  %v2503_v47 = vld [vmem:[%s3856_s5] sm:$0xff]  ;;  %v2506_v48 = vld [vmem:[%s3856_s5 + $0x18] sm:$0xff] }
   0xd   :  { %v2505_v49 = vld [vmem:[%s3856_s5 + $0x10] sm:$0xff]  ;;  %v2532_v50 = vld [vmem:[%s3857_s6 + $0x8] sm:$0xff]  ;;  %v2531_v51 = vld [vmem:[%s3857_s6] sm:$0xff] }
   0xe   :  { %v2534_v52 = vld [vmem:[%s3857_s6 + $0x18] sm:$0xff]  ;;  %v2533_v53 = vld [vmem:[%s3857_s6 + $0x10] sm:$0xff] }
   0xf   :  { %v3289_v6 = vld [vmem:[%s3853_s1 + $0x30] sm:$0xff]  }
  0x10   :  { %1340 = vperm.xlu1 %3262, %v1322_v40   ;;  %1330 = vperm.xlu0 %3261, %v1320_v41  }
  0x14   :  { %1358 = vperm.xlu1 %3262, %v1348_v42   ;;  %1353 = vperm.xlu0 %3261, %v1347_v43   ;;  %v3294_v42 = vld [vmem:[%s3853_s1 + $0x58] sm:$0xff]  }
  0x18   :  { %1368 = vperm.xlu1 %3262, %v1350_v44   ;;  %1363 = vperm.xlu0 %3261, %v1349_v45   ;;  %v3295_v44 = vld [vmem:[%s3853_s1 + $0x60] sm:$0xff]  }
  0x1c   :  { %2514 = vperm.xlu1 %3262, %v2504_v46   ;;  %2509 = vperm.xlu0 %3261, %v2503_v47  }
  0x20   :  { %2524 = vperm.xlu1 %3262, %v2506_v48   ;;  %2519 = vperm.xlu0 %3261, %v2505_v49  }
  0x24   :  { %2542 = vperm.xlu1 %3262, %v2532_v50   ;;  %2537 = vperm.xlu0 %3261, %v2531_v51   ;;  %v3296_v50 = vld [vmem:[%s3853_s1 + $0x68] sm:$0xff]  }
  0x28   :  { %2552 = vperm.xlu1 %3262, %v2534_v52   ;;  %2547 = vperm.xlu0 %3261, %v2533_v53   ;;  %v3297_v52 = vld [vmem:[%s3853_s1 + $0x70] sm:$0xff]  }
  0xca   :  { %v2978_v8 = vpop.f32.mrf.mxu0  ;;  %v2986_v9 = vpop.f32.mrf.mxu1 }
  0xcc   :  { %v101_v10 = vpop.f32.mrf.mxu0  ;;  %v173_v11 = vpop.f32.mrf.mxu1 }
  0xce   :  { %v2979_v12 = vpop.f32.mrf.mxu0  ;;  %v2987_v14 = vpop.f32.mrf.mxu1 }
  0xcf   :  { %v121_v13 = vpack.c.bf16 %v2979_v12, %v2978_v8  ;;  %v194_v15 = vpack.c.bf16 %v2987_v14, %v2986_v9  ;;  %v3290_v12 = vld [vmem:[%s3853_s1 + $0x38] sm:$0xff]   ;;  %v3291_v14 = vld [vmem:[%s3853_s1 + $0x40] sm:$0xff]  }
  0xd0   :  { %v104_v16 = vpop.f32.mrf.mxu0  ;;  %v176_v17 = vpop.f32.mrf.mxu1 }
  0xd1   :  { %2996 = vmatprep.subr.bf16.mxu1 %v121_v13  ;;  %v120_v18 = vpack.c.bf16 %v104_v16, %v101_v10  ;;  %v193_v19 = vpack.c.bf16 %v176_v17, %v173_v11  ;;  %2988 = vmatprep.subr.bf16.mxu0 %v194_v15 }
  0xd2   :  { %2997 = vmatpush3.bf16.msra.mxu1 %v121_v13  ;;  %2989 = vmatpush3.bf16.msra.mxu0 %v194_v15 }
  0xd3   :  { %2998 = vmatprep.subr.bf16.mxu1 %v120_v18  ;;  %2990 = vmatprep.subr.bf16.mxu0 %v193_v19 }
  0xd6   :  { %2999 = vmatpush3.bf16.msra.mxu1 %v120_v18  ;;  %2991 = vmatpush3.bf16.msra.mxu0 %v193_v19 }
  0xd7   :  { %3004 = vmatprep.subr.bf16.mxu0 %v3426_v20 }
  0xd9   :  { %3001 = vmatmul.mubr.msk.bf16.vlgmr.msra.gmra.mxu1 %vm60_vm0, %v3272_v21  ;;  %2993 = vmatmul.mubr.msk.bf16.vlgmr.msra.gmra.mxu0 %vm60_vm0, %v3271_v22  ;;  %v3292_v21 = vld [vmem:[%s3853_s1 + $0x48] sm:$0xff]  }
  0xda   :  { %3005 = vmatpush3.bf16.msra.mxu0 %v3426_v20  ;;  %3008 = vmatprep.mubr.msk.bf16.mxu0 %vm60_vm0, %v3397_v4 }
  0xdb   :  { %3006 = vmatprep.subr.bf16.mxu0 %v3438_v23  ;;  %3016 = vmatprep.mubr.msk.bf16.mxu1 %vm60_vm0, %v3287_v36  ;;  %v3293_v36 = vld [vmem:[%s3853_s1 + $0x50] sm:$0xff]  }
  0xde   :  { %3007 = vmatpush3.bf16.msra.mxu0 %v3438_v23 }
  0xdf   :  { %3020 = vmatprep.subr.bf16.mxu0 %v3449_v24 }
  0xe1   :  { %3009 = vmatmul.mubr.msk.bf16.vlgmr.msra.gmra.mxu0 %vm60_vm0, %v3402_v5 }
  0xe2   :  { %3021 = vmatpush3.bf16.msra.mxu0 %v3449_v24  ;;  %3024 = vmatprep.mubr.msk.bf16.mxu0 %vm60_vm0, %v3397_v4 }
  0xe3   :  { %3022 = vmatprep.subr.bf16.mxu0 %v3456_v25 }
  0xe6   :  { %3023 = vmatpush3.bf16.msra.mxu0 %v3456_v25 }
  0xe7   :  { %3036 = vmatprep.subr.bf16.mxu0 %v3467_v26 }
  0xe9   :  { %3025 = vmatmul.mubr.msk.bf16.vlgmr.msra.gmra.mxu0 %vm60_vm0, %v3402_v5 }
  0xea   :  { %3037 = vmatpush3.bf16.msra.mxu0 %v3467_v26  ;;  %3040 = vmatprep.mubr.msk.bf16.mxu0 %vm60_vm0, %v3397_v4 }
  0xeb   :  { %3038 = vmatprep.subr.bf16.mxu0 %v3474_v27 }
  0xee   :  { %3039 = vmatpush3.bf16.msra.mxu0 %v3474_v27 }
  0xef   :  { %3052 = vmatprep.subr.bf16.mxu0 %v3485_v28 }
  0xf1   :  { %3041 = vmatmul.mubr.msk.bf16.vlgmr.msra.gmra.mxu0 %vm60_vm0, %v3402_v5 }
  0xf2   :  { %3053 = vmatpush3.bf16.msra.mxu0 %v3485_v28  ;;  %3056 = vmatprep.mubr.msk.bf16.mxu0 %vm60_vm0, %v3397_v4 }
  0xf3   :  { %3054 = vmatprep.subr.bf16.mxu0 %v3492_v29 }
  0xf6   :  { %3055 = vmatpush3.bf16.msra.mxu0 %v3492_v29 }
  0xf7   :  { %3068 = vmatprep.subr.bf16.mxu0 %v3503_v30 }
  0xf9   :  { %3057 = vmatmul.mubr.msk.bf16.vlgmr.msra.gmra.mxu0 %vm60_vm0, %v3402_v5 }
  0xfa   :  { %3069 = vmatpush3.bf16.msra.mxu0 %v3503_v30  ;;  %3072 = vmatprep.mubr.msk.bf16.mxu0 %vm60_vm0, %v3397_v4 }
  0xfb   :  { %3070 = vmatprep.subr.bf16.mxu0 %v3510_v31 }
  0xfe   :  { %3071 = vmatpush3.bf16.msra.mxu0 %v3510_v31 }
  0xff   :  { %3084 = vmatprep.subr.bf16.mxu0 %v3521_v32 }
 0x101   :  { %3073 = vmatmul.mubr.msk.bf16.vlgmr.msra.gmra.mxu0 %vm60_vm0, %v3402_v5 }
 0x102   :  { %3085 = vmatpush3.bf16.msra.mxu0 %v3521_v32  ;;  %3088 = vmatprep.mubr.msk.bf16.mxu0 %vm60_vm0, %v3397_v4 }
 0x103   :  { %3086 = vmatprep.subr.bf16.mxu0 %v3528_v33 }
 0x106   :  { %3087 = vmatpush3.bf16.msra.mxu0 %v3528_v33 }
 0x107   :  { %3100 = vmatprep.subr.bf16.mxu0 %v3539_v34 }
 0x109   :  { %3089 = vmatmul.mubr.msk.bf16.vlgmr.msra.gmra.mxu0 %vm60_vm0, %v3402_v5 }
 0x10a   :  { %3101 = vmatpush3.bf16.msra.mxu0 %v3539_v34  ;;  %3104 = vmatprep.mubr.msk.bf16.mxu0 %vm60_vm0, %v3397_v4  ;;  %v3288_v4 = vld [vmem:[%s3853_s1 + $0x28] sm:$0xff]  }
 0x10b   :  { %3102 = vmatprep.subr.bf16.mxu0 %v3546_v35 }
 0x10e   :  { %3103 = vmatpush3.bf16.msra.mxu0 %v3546_v35 }
 0x10f   :  { %3116 = vmatprep.subr.bf16.mxu0 %v3372_v0 }
 0x111   :  { %3105 = vmatmul.mubr.msk.bf16.vlgmr.msra.gmra.mxu0 %vm60_vm0, %v3402_v5 }
 0x112   :  { %3117 = vmatpush3.bf16.msra.mxu0 %v3372_v0 }
 0x113   :  { %3118 = vmatprep.subr.bf16.mxu0 %v3383_v2 }
 0x116   :  { %3119 = vmatpush3.bf16.msra.mxu0 %v3383_v2 }
 0x199   :  { %v3613_v54 = vpop.f32.mrf.mxu0 }
 0x19b   :  { %v3615_v55 = vpop.f32.mrf.mxu0 }
 0x19d   :  { %v3617_v56 = vpop.f32.mrf.mxu0 }
 0x19f   :  { %v3619_v57 = vpop.f32.mrf.mxu0 }
 0x1a1   :  { %v3010_v58 = vpop.f32.mrf.mxu0 }
 0x1a3   :  { %v376_v59 = vpop.f32.mrf.mxu0 }
 0x1a5   :  { %v3011_v60 = vpop.f32.mrf.mxu0 }
 0x1a6   :  { %v397_v61 = vpack.c.bf16 %v3011_v60, %v3010_v58 }
 0x1a7   :  { %v379_v62 = vpop.f32.mrf.mxu0 }
 0x1a8   :  { %v396_v63 = vpack.c.bf16 %v379_v62, %v376_v59  ;;  %3012 = vmatprep.subr.bf16.mxu1 %v397_v61  ;;  %v3298_v62 = vld [vmem:[%s3853_s1 + $0x78] sm:$0xff]  }
 0x1a9   :  { %3013 = vmatpush3.bf16.msra.mxu1 %v397_v61  ;;  %v3026_v0 = vpop.f32.mrf.mxu0 }
 0x1aa   :  { %3014 = vmatprep.subr.bf16.mxu1 %v396_v63 }
 0x1ab   :  { %v518_v2 = vpop.f32.mrf.mxu0 }
 0x1ad   :  { %3015 = vmatpush3.bf16.msra.mxu1 %v396_v63  ;;  %v3027_v5 = vpop.f32.mrf.mxu0 }
 0x1ae   :  { %v539_v7 = vpack.c.bf16 %v3027_v5, %v3026_v0  ;;  %v3299_v0 = vld [vmem:[%s3853_s1 + $0x80] sm:$0xff]  }
 0x1af   :  { %v521_v8 = vpop.f32.mrf.mxu0 }
 0x1b0   :  { %v538_v9 = vpack.c.bf16 %v521_v8, %v518_v2  ;;  %3017 = vmatmul.mubr.msk.bf16.vlgmr.msra.gmra.mxu1 %vm60_vm0, %v3288_v4  ;;  %3028 = vmatprep.subr.bf16.mxu1 %v539_v7 }
 0x1b1   :  { %3029 = vmatpush3.bf16.msra.mxu1 %v539_v7  ;;  %v3042_v10 = vpop.f32.mrf.mxu0  ;;  %3032 = vmatprep.mubr.msk.bf16.mxu1 %vm60_vm0, %v3289_v6  ;;  %v3300_v6 = vld [vmem:[%s3853_s1 + $0x88] sm:$0xff]   ;;  %v3002_v7 = vpop.f32.mrf.mxu1 }
 0x1b2   :  { %3030 = vmatprep.subr.bf16.mxu1 %v538_v9 }
 0x1b3   :  { %v660_v11 = vpop.f32.mrf.mxu0  ;;  %v310_v8 = vpop.f32.mrf.mxu1 }
 0x1b5   :  { %3031 = vmatpush3.bf16.msra.mxu1 %v538_v9  ;;  %v3043_v13 = vpop.f32.mrf.mxu0  ;;  %v3003_v9 = vpop.f32.mrf.mxu1 }
 0x1b6   :  { %v681_v15 = vpack.c.bf16 %v3043_v13, %v3042_v10 }
 0x1b7   :  { %v663_v16 = vpop.f32.mrf.mxu0  ;;  %v313_v10 = vpop.f32.mrf.mxu1 }
 0x1b8   :  { %v680_v17 = vpack.c.bf16 %v663_v16, %v660_v11  ;;  %3033 = vmatmul.mubr.msk.bf16.vlgmr.msra.gmra.mxu1 %vm60_vm0, %v3290_v12  ;;  %3044 = vmatprep.subr.bf16.mxu1 %v681_v15 }
 0x1b9   :  { %3045 = vmatpush3.bf16.msra.mxu1 %v681_v15  ;;  %v3058_v18 = vpop.f32.mrf.mxu0  ;;  %3048 = vmatprep.mubr.msk.bf16.mxu1 %vm60_vm0, %v3291_v14 }
 0x1ba   :  { %3046 = vmatprep.subr.bf16.mxu1 %v680_v17 }
 0x1bb   :  { %v802_v19 = vpop.f32.mrf.mxu0 }
 0x1bd   :  { %3047 = vmatpush3.bf16.msra.mxu1 %v680_v17  ;;  %v3059_v22 = vpop.f32.mrf.mxu0 }
 0x1be   :  { %v823_v37 = vpack.c.bf16 %v3059_v22, %v3058_v18 }
 0x1bf   :  { %v805_v38 = vpop.f32.mrf.mxu0 }
 0x1c0   :  { %v822_v39 = vpack.c.bf16 %v805_v38, %v802_v19  ;;  %3049 = vmatmul.mubr.msk.bf16.vlgmr.msra.gmra.mxu1 %vm60_vm0, %v3292_v21  ;;  %3060 = vmatprep.subr.bf16.mxu1 %v823_v37 }
 0x1c1   :  { %3061 = vmatpush3.bf16.msra.mxu1 %v823_v37  ;;  %v3074_v40 = vpop.f32.mrf.mxu0  ;;  %3064 = vmatprep.mubr.msk.bf16.mxu1 %vm60_vm0, %v3293_v36 }
 0x1c2   :  { %3062 = vmatprep.subr.bf16.mxu1 %v822_v39 }
 0x1c3   :  { %v944_v41 = vpop.f32.mrf.mxu0 }
 0x1c5   :  { %3063 = vmatpush3.bf16.msra.mxu1 %v822_v39  ;;  %v3075_v43 = vpop.f32.mrf.mxu0 }
 0x1c6   :  { %v965_v45 = vpack.c.bf16 %v3075_v43, %v3074_v40 }
 0x1c7   :  { %v947_v46 = vpop.f32.mrf.mxu0 }
 0x1c8   :  { %v964_v47 = vpack.c.bf16 %v947_v46, %v944_v41  ;;  %3065 = vmatmul.mubr.msk.bf16.vlgmr.msra.gmra.mxu1 %vm60_vm0, %v3294_v42  ;;  %3076 = vmatprep.subr.bf16.mxu1 %v965_v45  ;;  %v319_v41 = vadd.f32 %v3002_v7, %v3613_v54  ;;  %v1326_v42 = vpop.permute.xlu0 %1325  ;;  %v1336_v46 = vpop.permute.xlu1 %1335 }
 0x1c9   :  { %3077 = vmatpush3.bf16.msra.mxu1 %v965_v45  ;;  %v3090_v48 = vpop.f32.mrf.mxu0  ;;  %3080 = vmatprep.mubr.msk.bf16.mxu1 %vm60_vm0, %v3295_v44  ;;  %v311_v44 = vadd.f32 %v310_v8, %v3615_v55 }
 0x1ca   :  { %3078 = vmatprep.subr.bf16.mxu1 %v964_v47 }
 0x1cb   :  { %v1086_v49 = vpop.f32.mrf.mxu0 }
 0x1cc   :  { %v1341_v55 = vpop.permute.xlu1 %1340 }
 0x1cd   :  { %3079 = vmatpush3.bf16.msra.mxu1 %v964_v47  ;;  %v3091_v51 = vpop.f32.mrf.mxu0 }
 0x1ce   :  { %v1107_v53 = vpack.c.bf16 %v3091_v51, %v3090_v48  ;;  %v322_v48 = vadd.f32 %v3003_v9, %v3617_v56 }
 0x1cf   :  { %v1089_v58 = vpop.f32.mrf.mxu0 }
 0x1d0   :  { %v1106_v59 = vpack.c.bf16 %v1089_v58, %v1086_v49  ;;  %3081 = vmatmul.mubr.msk.bf16.vlgmr.msra.gmra.mxu1 %vm60_vm0, %v3296_v50  ;;  %3092 = vmatprep.subr.bf16.mxu1 %v1107_v53 }
 0x1d1   :  { %3093 = vmatpush3.bf16.msra.mxu1 %v1107_v53  ;;  %v3106_v60 = vpop.f32.mrf.mxu0  ;;  %3096 = vmatprep.mubr.msk.bf16.mxu1 %vm60_vm0, %v3297_v52  ;;  %v314_v52 = vadd.f32 %v313_v10, %v3619_v57 }
 0x1d2   :  { %3094 = vmatprep.subr.bf16.mxu1 %v1106_v59 }
 0x1d3   :  { %v1228_v61 = vpop.f32.mrf.mxu0 }
 0x1d5   :  { %3095 = vmatpush3.bf16.msra.mxu1 %v1106_v59  ;;  %v3107_v63 = vpop.f32.mrf.mxu0 }
 0x1d6   :  { %v1249_v2 = vpack.c.bf16 %v3107_v63, %v3106_v60  ;;  %v1331_v60 = vpop.permute.xlu0 %1330 }
 0x1d7   :  { %v1231_v4 = vpop.f32.mrf.mxu0 }
 0x1d8   :  { %v1248_v5 = vpack.c.bf16 %v1231_v4, %v1228_v61  ;;  %3097 = vmatmul.mubr.msk.bf16.vlgmr.msra.gmra.mxu1 %vm60_vm0, %v3298_v62  ;;  %3108 = vmatprep.subr.bf16.mxu1 %v1249_v2 }
 0x1d9   :  { %3109 = vmatpush3.bf16.msra.mxu1 %v1249_v2  ;;  %3112 = vmatprep.mubr.msk.bf16.mxu1 %vm60_vm0, %v3299_v0 }
 0x1da   :  { %3110 = vmatprep.subr.bf16.mxu1 %v1248_v5  ;;  %v1354_v10 = vpop.permute.xlu0 %1353 }
 0x1dd   :  { %3111 = vmatpush3.bf16.msra.mxu1 %v1248_v5 }
 0x1de   :  { %3124 = vmatprep.subr.bf16.mxu1 %v3377_v1 }
 0x1e0   :  { %3113 = vmatmul.mubr.msk.bf16.vlgmr.msra.gmra.mxu1 %vm60_vm0, %v3300_v6 }
 0x1e1   :  { %3125 = vmatpush3.bf16.msra.mxu1 %v3377_v1 }
 0x1e2   :  { %3126 = vmatprep.subr.bf16.mxu1 %v3390_v3 }
 0x1e5   :  { %3127 = vmatpush3.bf16.msra.mxu1 %v3390_v3 }
 0x270   :  { %v3018_v11 = vpop.f32.mrf.mxu1 }
 0x271   :  { %v465_v45 = vadd.f32 %v3018_v11, %v319_v41 }
 0x272   :  { %v448_v12 = vpop.f32.mrf.mxu1 }
 0x273   :  { %v463_v49 = vadd.f32 %v448_v12, %v311_v44 }
 0x274   :  { %v3019_v13 = vpop.f32.mrf.mxu1 }
 0x275   :  { %v466_v53 = vadd.f32 %v3019_v13, %v322_v48 }
 0x276   :  { %v451_v14 = vpop.f32.mrf.mxu1 }
 0x277   :  { %v464_v54 = vadd.f32 %v451_v14, %v314_v52 }
 0x278   :  { %v3034_v15 = vpop.f32.mrf.mxu1 }
 0x279   :  { %v607_v50 = vadd.f32 %v3034_v15, %v465_v45 }
 0x27a   :  { %v590_v16 = vpop.f32.mrf.mxu1 }
 0x27b   :  { %v605_v58 = vadd.f32 %v590_v16, %v463_v49 }
 0x27c   :  { %v3035_v17 = vpop.f32.mrf.mxu1 }
 0x27d   :  { %v608_v62 = vadd.f32 %v3035_v17, %v466_v53  ;;  %v1359_v17 = vpop.permute.xlu1 %1358 }
 0x27e   :  { %v593_v18 = vpop.f32.mrf.mxu1 }
 0x27f   :  { %v606_v4 = vadd.f32 %v593_v18, %v464_v54 }
 0x280   :  { %v3050_v19 = vpop.f32.mrf.mxu1 }
 0x281   :  { %v749_v59 = vadd.f32 %v3050_v19, %v607_v50  ;;  %v1369_v49 = vpop.permute.xlu1 %1368 }
 0x282   :  { %v732_v21 = vpop.f32.mrf.mxu1 }
 0x283   :  { %v747_v63 = vadd.f32 %v732_v21, %v605_v58 }
 0x284   :  { %v3051_v22 = vpop.f32.mrf.mxu1 }
 0x285   :  { %v750_v5 = vadd.f32 %v3051_v22, %v608_v62 }
 0x286   :  { %v735_v1 = vpop.f32.mrf.mxu1 }
 0x287   :  { %v748_v8 = vadd.f32 %v735_v1, %v606_v4  ;;  %v1364_v1 = vpop.permute.xlu0 %1363 }
 0x288   :  { %v3066_v36 = vpop.f32.mrf.mxu1 }
 0x289   :  { %v891_v0 = vadd.f32 %v3066_v36, %v749_v59 }
 0x28a   :  { %v874_v37 = vpop.f32.mrf.mxu1 }
 0x28b   :  { %v889_v6 = vadd.f32 %v874_v37, %v747_v63 }
 0x28c   :  { %v3067_v38 = vpop.f32.mrf.mxu1 }
 0x28d   :  { %v892_v9 = vadd.f32 %v3067_v38, %v750_v5 }
 0x28e   :  { %v877_v3 = vpop.f32.mrf.mxu1 }
 0x28f   :  { %v890_v13 = vadd.f32 %v877_v3, %v748_v8  ;;  %v3303_v8 = vld [vmem:[%s3858_s4 + $0x18] sm:$0xff]  }
 0x290   :  { %v3082_v39 = vpop.f32.mrf.mxu1 }
 0x291   :  { %v1033_v56 = vadd.f32 %v3082_v39, %v891_v0 }
 0x292   :  { %v1016_v40 = vpop.f32.mrf.mxu1 }
 0x293   :  { %v1031_v11 = vadd.f32 %v1016_v40, %v889_v6 }
 0x294   :  { %v3083_v43 = vpop.f32.mrf.mxu1 }
 0x295   :  { %v1034_v15 = vadd.f32 %v3083_v43, %v892_v9  ;;  %v3304_v9 = vld [vmem:[%s3858_s4 + $0x8] sm:$0xff]  }
 0x296   :  { %v1019_v47 = vpop.f32.mrf.mxu1 }
 0x297   :  { %v1032_v21 = vadd.f32 %v1019_v47, %v890_v13 }
 0x298   :  { %v3098_v51 = vpop.f32.mrf.mxu1 }
 0x299   :  { %v1175_v57 = vadd.f32 %v3098_v51, %v1033_v56 }
 0x29a   :  { %v1158_v61 = vpop.f32.mrf.mxu1 }
 0x29b   :  { %v1173_v16 = vadd.f32 %v1158_v61, %v1031_v11 }
 0x29c   :  { %v3099_v2 = vpop.f32.mrf.mxu1 }
 0x29d   :  { %v1176_v36 = vadd.f32 %v3099_v2, %v1034_v15 }
 0x29e   :  { %v1161_v7 = vpop.f32.mrf.mxu1 }
 0x29f   :  { %v1174_v37 = vadd.f32 %v1161_v7, %v1032_v21 }
 0x2a0   :  { %v3114_v12 = vpop.f32.mrf.mxu1 }
 0x2a1   :  { %v1317_v14 = vadd.f32 %v3114_v12, %v1175_v57  ;;  %v3307_v57 = vld [vmem:[%s3858_s4 + $0x30] sm:$0xff]  }
 0x2a2   :  { %v1300_v19 = vpop.f32.mrf.mxu1 }
 0x2a3   :  { %v1345_v41 = vmul.f32 %v1336_v46, %v1317_v14  ;;  %v1315_v18 = vadd.f32 %v1300_v19, %v1173_v16  ;;  %v3308_v14 = vld [vmem:[%s3858_s4 + $0x38] sm:$0xff]   ;;  %v3309_v19 = vld [vmem:[%s3858_s4 + $0x40] sm:$0xff]  }
 0x2a4   :  { %v3115_v22 = vpop.f32.mrf.mxu1 }
 0x2a5   :  { %v1343_v39 = vmul.f32 %v1326_v42, %v1315_v18  ;;  %v1318_v44 = vadd.f32 %v3115_v22, %v1176_v36  ;;  %v1373_v40 = vadd.f32 %v1364_v1, %v1345_v41  ;;  %v3301_v42 = vld [vmem:[%s3858_s4 + $0x10] sm:$0xff]  }
 0x2a6   :  { %v1303_v38 = vpop.f32.mrf.mxu1 }
 0x2a7   :  { %v1346_v45 = vmul.f32 %v1341_v55, %v1318_v44  ;;  %v1316_v48 = vadd.f32 %v1303_v38, %v1174_v37  ;;  %v1371_v3 = vadd.f32 %v1354_v10, %v1343_v39  ;;  %v1377_v51 = vmax.f32 %v1373_v40, 0.0  ;;  %v3310_v37 = vld [vmem:[%s3858_s4 + $0x48] sm:$0xff]   ;;  %v3311_v44 = vld [vmem:[%s3858_s4 + $0x50] sm:$0xff]  }
 0x2a9   :  { %v1374_v43 = vadd.f32 %v1369_v49, %v1346_v45  ;;  %v1344_v50 = vmul.f32 %v1331_v60, %v1316_v48  ;;  %v1375_v47 = vmax.f32 %v1371_v3, 0.0  ;;  %v3302_v60 = vld [vmem:[%s3858_s4] sm:$0xff]   ;;  %v3312_v49 = vld [vmem:[%s3858_s4 + $0x58] sm:$0xff]  }
 0x2ab   :  { %v1378_v52 = vmax.f32 %v1374_v43, 0.0  ;;  %v1372_v53 = vadd.f32 %v1359_v17, %v1344_v50  ;;  %v3313_v43 = vld [vmem:[%s3858_s4 + $0x60] sm:$0xff]  }
 0x2ad   :  { %v3681_v58 = vpack.c.bf16 %v1378_v52, %v1377_v51  ;;  %v1376_v46 = vmax.f32 %v1372_v53, 0.0 }
 0x2af   :  { %v3683_v59 = vpack.c.bf16 %v1376_v46, %v1375_v47 }
 0x2b1   :  { %3120 = vmatprep.mubr.msk.bf16.mxu0 %vm60_vm0, %v3683_v59  ;;  %3128 = vmatprep.mubr.msk.bf16.mxu1 %vm60_vm0, %v3683_v59 }
 0x2b2   :  { %3121 = vmatmul.mubr.msk.bf16.vlgmr.msra.gmra.mxu0 %vm60_vm0, %v3681_v58  ;;  %3129 = vmatmul.mubr.msk.bf16.vlgmr.msra.gmra.mxu1 %vm60_vm0, %v3681_v58 }
 0x2b3   :  { %3136 = vmatprep.mubr.msk.bf16.mxu0 %vm60_vm0, %v3301_v42  ;;  %3144 = vmatprep.mubr.msk.bf16.mxu1 %vm60_vm0, %v3302_v60 }
 0x372   :  { %v3122_v61 = vpop.f32.mrf.mxu0  ;;  %v3130_v54 = vpop.f32.mrf.mxu1 }
 0x374   :  { %v1421_v62 = vpop.f32.mrf.mxu0  ;;  %v1476_v63 = vpop.f32.mrf.mxu1 }
 0x376   :  { %v3123_v0 = vpop.f32.mrf.mxu0  ;;  %v3131_v55 = vpop.f32.mrf.mxu1 }
 0x377   :  { %v1441_v2 = vpack.c.bf16 %v3123_v0, %v3122_v61  ;;  %v1497_v4 = vpack.c.bf16 %v3131_v55, %v3130_v54  ;;  %v3317_v55 = vld [vmem:[%s3858_s4 + $0x80] sm:$0xff]  }
 0x378   :  { %v1424_v5 = vpop.f32.mrf.mxu0  ;;  %v1479_v6 = vpop.f32.mrf.mxu1 }
 0x379   :  { %v1440_v56 = vpack.c.bf16 %v1424_v5, %v1421_v62  ;;  %v1496_v7 = vpack.c.bf16 %v1479_v6, %v1476_v63  ;;  %3132 = vmatprep.subr.bf16.mxu0 %v1497_v4  ;;  %3140 = vmatprep.subr.bf16.mxu1 %v1441_v2  ;;  %v3316_v63 = vld [vmem:[%s3858_s4 + $0x78] sm:$0xff]   ;;  %v3318_v6 = vld [vmem:[%s3858_s4 + $0x88] sm:$0xff]  }
 0x37a   :  { %3133 = vmatpush3.bf16.msra.mxu0 %v1497_v4  ;;  %3141 = vmatpush3.bf16.msra.mxu1 %v1441_v2 }
 0x37b   :  { %3134 = vmatprep.subr.bf16.mxu0 %v1496_v7  ;;  %3142 = vmatprep.subr.bf16.mxu1 %v1440_v56 }
 0x37e   :  { %3135 = vmatpush3.bf16.msra.mxu0 %v1496_v7  ;;  %3143 = vmatpush3.bf16.msra.mxu1 %v1440_v56 }
 0x37f   :  { %3148 = vmatprep.subr.bf16.mxu0 %v3426_v20 }
 0x381   :  { %3137 = vmatmul.mubr.msk.bf16.vlgmr.msra.gmra.mxu0 %vm60_vm0, %v3303_v8  ;;  %3145 = vmatmul.mubr.msk.bf16.vlgmr.msra.gmra.mxu1 %vm60_vm0, %v3304_v9 }
 0x382   :  { %3149 = vmatpush3.bf16.msra.mxu0 %v3426_v20  ;;  %3152 = vmatprep.mubr.msk.bf16.mxu0 %vm60_vm0, %v3683_v59  ;;  %v3305_v20 = vld [vmem:[%s3858_s4 + $0x20] sm:$0xff]  }
 0x383   :  { %3150 = vmatprep.subr.bf16.mxu0 %v3438_v23  ;;  %3160 = vmatprep.mubr.msk.bf16.mxu1 %vm60_vm0, %v3305_v20 }
 0x386   :  { %3151 = vmatpush3.bf16.msra.mxu0 %v3438_v23 }
 0x387   :  { %3164 = vmatprep.subr.bf16.mxu0 %v3449_v24 }
 0x389   :  { %3153 = vmatmul.mubr.msk.bf16.vlgmr.msra.gmra.mxu0 %vm60_vm0, %v3681_v58 }
 0x38a   :  { %3165 = vmatpush3.bf16.msra.mxu0 %v3449_v24  ;;  %3168 = vmatprep.mubr.msk.bf16.mxu0 %vm60_vm0, %v3683_v59 }
 0x38b   :  { %3166 = vmatprep.subr.bf16.mxu0 %v3456_v25 }
 0x38e   :  { %3167 = vmatpush3.bf16.msra.mxu0 %v3456_v25 }
 0x38f   :  { %3180 = vmatprep.subr.bf16.mxu0 %v3467_v26 }
 0x391   :  { %3169 = vmatmul.mubr.msk.bf16.vlgmr.msra.gmra.mxu0 %vm60_vm0, %v3681_v58 }
 0x392   :  { %3181 = vmatpush3.bf16.msra.mxu0 %v3467_v26  ;;  %3184 = vmatprep.mubr.msk.bf16.mxu0 %vm60_vm0, %v3683_v59 }
 0x393   :  { %3182 = vmatprep.subr.bf16.mxu0 %v3474_v27 }
 0x396   :  { %3183 = vmatpush3.bf16.msra.mxu0 %v3474_v27 }
 0x397   :  { %3196 = vmatprep.subr.bf16.mxu0 %v3485_v28 }
 0x399   :  { %3185 = vmatmul.mubr.msk.bf16.vlgmr.msra.gmra.mxu0 %vm60_vm0, %v3681_v58 }
 0x39a   :  { %3197 = vmatpush3.bf16.msra.mxu0 %v3485_v28  ;;  %3200 = vmatprep.mubr.msk.bf16.mxu0 %vm60_vm0, %v3683_v59 }
 0x39b   :  { %3198 = vmatprep.subr.bf16.mxu0 %v3492_v29 }
 0x39e   :  { %3199 = vmatpush3.bf16.msra.mxu0 %v3492_v29 }
 0x39f   :  { %3212 = vmatprep.subr.bf16.mxu0 %v3503_v30 }
 0x3a1   :  { %3201 = vmatmul.mubr.msk.bf16.vlgmr.msra.gmra.mxu0 %vm60_vm0, %v3681_v58 }
 0x3a2   :  { %3213 = vmatpush3.bf16.msra.mxu0 %v3503_v30  ;;  %3216 = vmatprep.mubr.msk.bf16.mxu0 %vm60_vm0, %v3683_v59 }
 0x3a3   :  { %3214 = vmatprep.subr.bf16.mxu0 %v3510_v31 }
 0x3a6   :  { %3215 = vmatpush3.bf16.msra.mxu0 %v3510_v31 }
 0x3a7   :  { %3228 = vmatprep.subr.bf16.mxu0 %v3521_v32 }
 0x3a9   :  { %3217 = vmatmul.mubr.msk.bf16.vlgmr.msra.gmra.mxu0 %vm60_vm0, %v3681_v58 }
 0x3aa   :  { %3229 = vmatpush3.bf16.msra.mxu0 %v3521_v32  ;;  %3232 = vmatprep.mubr.msk.bf16.mxu0 %vm60_vm0, %v3683_v59 }
 0x3ab   :  { %3230 = vmatprep.subr.bf16.mxu0 %v3528_v33 }
 0x3ae   :  { %3231 = vmatpush3.bf16.msra.mxu0 %v3528_v33 }
 0x3af   :  { %3244 = vmatprep.subr.bf16.mxu0 %v3539_v34 }
 0x3b1   :  { %3233 = vmatmul.mubr.msk.bf16.vlgmr.msra.gmra.mxu0 %vm60_vm0, %v3681_v58 }
 0x3b2   :  { %3245 = vmatpush3.bf16.msra.mxu0 %v3539_v34  ;;  %3248 = vmatprep.mubr.msk.bf16.mxu0 %vm60_vm0, %v3683_v59  ;;  %v3315_v59 = vld [vmem:[%s3858_s4 + $0x70] sm:$0xff]  }
 0x3b3   :  { %3246 = vmatprep.subr.bf16.mxu0 %v3546_v35 }
 0x3b6   :  { %3247 = vmatpush3.bf16.msra.mxu0 %v3546_v35  ;;  %v3306_v35 = vld [vmem:[%s3858_s4 + $0x28] sm:$0xff]  }
 0x3b9   :  { %3249 = vmatmul.mubr.msk.bf16.vlgmr.msra.gmra.mxu0 %vm60_vm0, %v3681_v58  ;;  %v3314_v58 = vld [vmem:[%s3858_s4 + $0x68] sm:$0xff]  }
 0x441   :  { %v3769_v23 = vpop.f32.mrf.mxu0  ;;  %v3146_v56 = vpop.f32.mrf.mxu1 }
 0x443   :  { %v3771_v24 = vpop.f32.mrf.mxu0  ;;  %v1613_v7 = vpop.f32.mrf.mxu1 }
 0x445   :  { %v3773_v25 = vpop.f32.mrf.mxu0  ;;  %v3147_v8 = vpop.f32.mrf.mxu1 }
 0x447   :  { %v3775_v26 = vpop.f32.mrf.mxu0  ;;  %v1616_v9 = vpop.f32.mrf.mxu1 }
 0x449   :  { %v3154_v27 = vpop.f32.mrf.mxu0 }
 0x44b   :  { %v1662_v28 = vpop.f32.mrf.mxu0 }
 0x44d   :  { %v3155_v29 = vpop.f32.mrf.mxu0 }
 0x44e   :  { %v1683_v30 = vpack.c.bf16 %v3155_v29, %v3154_v27 }
 0x44f   :  { %v1665_v31 = vpop.f32.mrf.mxu0 }
 0x450   :  { %v1682_v32 = vpack.c.bf16 %v1665_v31, %v1662_v28  ;;  %3156 = vmatprep.subr.bf16.mxu1 %v1683_v30 }
 0x451   :  { %3157 = vmatpush3.bf16.msra.mxu1 %v1683_v30  ;;  %v3170_v33 = vpop.f32.mrf.mxu0 }
 0x452   :  { %3158 = vmatprep.subr.bf16.mxu1 %v1682_v32 }
 0x453   :  { %v1787_v34 = vpop.f32.mrf.mxu0 }
 0x455   :  { %3159 = vmatpush3.bf16.msra.mxu1 %v1682_v32  ;;  %v3171_v11 = vpop.f32.mrf.mxu0 }
 0x456   :  { %v1808_v10 = vpack.c.bf16 %v3171_v11, %v3170_v33 }
 0x457   :  { %v1790_v12 = vpop.f32.mrf.mxu0 }
 0x458   :  { %v1807_v13 = vpack.c.bf16 %v1790_v12, %v1787_v34  ;;  %3161 = vmatmul.mubr.msk.bf16.vlgmr.msra.gmra.mxu1 %vm60_vm0, %v3306_v35  ;;  %3172 = vmatprep.subr.bf16.mxu1 %v1808_v10 }
 0x459   :  { %3173 = vmatpush3.bf16.msra.mxu1 %v1808_v10  ;;  %v3186_v15 = vpop.f32.mrf.mxu0  ;;  %3176 = vmatprep.mubr.msk.bf16.mxu1 %vm60_vm0, %v3307_v57 }
 0x45a   :  { %3174 = vmatprep.subr.bf16.mxu1 %v1807_v13 }
 0x45b   :  { %v1912_v16 = vpop.f32.mrf.mxu0 }
 0x45d   :  { %3175 = vmatpush3.bf16.msra.mxu1 %v1807_v13  ;;  %v3187_v17 = vpop.f32.mrf.mxu0 }
 0x45e   :  { %v1933_v21 = vpack.c.bf16 %v3187_v17, %v3186_v15 }
 0x45f   :  { %v1915_v36 = vpop.f32.mrf.mxu0 }
 0x460   :  { %v1932_v41 = vpack.c.bf16 %v1915_v36, %v1912_v16  ;;  %3177 = vmatmul.mubr.msk.bf16.vlgmr.msra.gmra.mxu1 %vm60_vm0, %v3308_v14  ;;  %3188 = vmatprep.subr.bf16.mxu1 %v1933_v21  ;;  %v2510_v14 = vpop.permute.xlu0 %2509  ;;  %v1614_v36 = vadd.f32 %v1613_v7, %v3771_v24 }
 0x461   :  { %3189 = vmatpush3.bf16.msra.mxu1 %v1933_v21  ;;  %v3202_v18 = vpop.f32.mrf.mxu0  ;;  %3192 = vmatprep.mubr.msk.bf16.mxu1 %vm60_vm0, %v3309_v19  ;;  %v1622_v19 = vadd.f32 %v3146_v56, %v3769_v23 }
 0x462   :  { %3190 = vmatprep.subr.bf16.mxu1 %v1932_v41 }
 0x463   :  { %v2037_v22 = vpop.f32.mrf.mxu0 }
 0x465   :  { %3191 = vmatpush3.bf16.msra.mxu1 %v1932_v41  ;;  %v3203_v39 = vpop.f32.mrf.mxu0 }
 0x466   :  { %v2058_v1 = vpack.c.bf16 %v3203_v39, %v3202_v18  ;;  %v2515_v18 = vpop.permute.xlu1 %2514 }
 0x467   :  { %v2040_v38 = vpop.f32.mrf.mxu0 }
 0x468   :  { %v2057_v40 = vpack.c.bf16 %v2040_v38, %v2037_v22  ;;  %3193 = vmatmul.mubr.msk.bf16.vlgmr.msra.gmra.mxu1 %vm60_vm0, %v3310_v37  ;;  %3204 = vmatprep.subr.bf16.mxu1 %v2058_v1  ;;  %v1625_v37 = vadd.f32 %v3147_v8, %v3773_v25 }
 0x469   :  { %3205 = vmatpush3.bf16.msra.mxu1 %v2058_v1  ;;  %v3218_v45 = vpop.f32.mrf.mxu0  ;;  %3208 = vmatprep.mubr.msk.bf16.mxu1 %vm60_vm0, %v3311_v44  ;;  %v2520_v1 = vpop.permute.xlu0 %2519 }
 0x46a   :  { %3206 = vmatprep.subr.bf16.mxu1 %v2057_v40  ;;  %v2525_v24 = vpop.permute.xlu1 %2524 }
 0x46b   :  { %v2162_v48 = vpop.f32.mrf.mxu0 }
 0x46d   :  { %3207 = vmatpush3.bf16.msra.mxu1 %v2057_v40  ;;  %v3219_v3 = vpop.f32.mrf.mxu0  ;;  %v1617_v40 = vadd.f32 %v1616_v9, %v3775_v26 }
 0x46e   :  { %v2183_v50 = vpack.c.bf16 %v3219_v3, %v3218_v45 }
 0x46f   :  { %v2165_v51 = vpop.f32.mrf.mxu0 }
 0x470   :  { %v2182_v52 = vpack.c.bf16 %v2165_v51, %v2162_v48  ;;  %3209 = vmatmul.mubr.msk.bf16.vlgmr.msra.gmra.mxu1 %vm60_vm0, %v3312_v49  ;;  %3220 = vmatprep.subr.bf16.mxu1 %v2183_v50 }
 0x471   :  { %3221 = vmatpush3.bf16.msra.mxu1 %v2183_v50  ;;  %v3234_v53 = vpop.f32.mrf.mxu0  ;;  %3224 = vmatprep.mubr.msk.bf16.mxu1 %vm60_vm0, %v3313_v43 }
 0x472   :  { %3222 = vmatprep.subr.bf16.mxu1 %v2182_v52 }
 0x473   :  { %v2287_v47 = vpop.f32.mrf.mxu0 }
 0x475   :  { %3223 = vmatpush3.bf16.msra.mxu1 %v2182_v52  ;;  %v3235_v46 = vpop.f32.mrf.mxu0 }
 0x476   :  { %v2308_v42 = vpack.c.bf16 %v3235_v46, %v3234_v53  ;;  %v2538_v46 = vpop.permute.xlu0 %2537 }
 0x477   :  { %v2290_v60 = vpop.f32.mrf.mxu0 }
 0x478   :  { %v2307_v61 = vpack.c.bf16 %v2290_v60, %v2287_v47  ;;  %3225 = vmatmul.mubr.msk.bf16.vlgmr.msra.gmra.mxu1 %vm60_vm0, %v3314_v58  ;;  %3236 = vmatprep.subr.bf16.mxu1 %v2308_v42 }
 0x479   :  { %3237 = vmatpush3.bf16.msra.mxu1 %v2308_v42  ;;  %v3250_v54 = vpop.f32.mrf.mxu0  ;;  %3240 = vmatprep.mubr.msk.bf16.mxu1 %vm60_vm0, %v3315_v59 }
 0x47a   :  { %3238 = vmatprep.subr.bf16.mxu1 %v2307_v61 }
 0x47b   :  { %v2412_v62 = vpop.f32.mrf.mxu0 }
 0x47d   :  { %3239 = vmatpush3.bf16.msra.mxu1 %v2307_v61  ;;  %v3251_v0 = vpop.f32.mrf.mxu0 }
 0x47e   :  { %v2433_v2 = vpack.c.bf16 %v3251_v0, %v3250_v54 }
 0x47f   :  { %v2415_v4 = vpop.f32.mrf.mxu0 }
 0x480   :  { %v2432_v5 = vpack.c.bf16 %v2415_v4, %v2412_v62  ;;  %3241 = vmatmul.mubr.msk.bf16.vlgmr.msra.gmra.mxu1 %vm60_vm0, %v3316_v63  ;;  %3252 = vmatprep.subr.bf16.mxu1 %v2433_v2  ;;  %v3321_v4 = vld [vmem:[%s3852_s0 + $0x8] sm:$0xff]  }
 0x481   :  { %3253 = vmatpush3.bf16.msra.mxu1 %v2433_v2  ;;  %3256 = vmatprep.mubr.msk.bf16.mxu1 %vm60_vm0, %v3317_v55  ;;  %v2543_v2 = vpop.permute.xlu1 %2542 }
 0x482   :  { %3254 = vmatprep.subr.bf16.mxu1 %v2432_v5 }
 0x485   :  { %3255 = vmatpush3.bf16.msra.mxu1 %v2432_v5  ;;  %v2561_v5 = vunpack.c.l.bf16 %v3321_v4 }
 0x488   :  { %3257 = vmatmul.mubr.msk.bf16.vlgmr.msra.gmra.mxu1 %vm60_vm0, %v3318_v6 }
 0x518   :  { %v3162_v20 = vpop.f32.mrf.mxu1 }
 0x519   :  { %v1751_v41 = vadd.f32 %v3162_v20, %v1622_v19  ;;  %v2548_v20 = vpop.permute.xlu0 %2547 }
 0x51a   :  { %v1734_v27 = vpop.f32.mrf.mxu1 }
 0x51b   :  { %v1749_v39 = vadd.f32 %v1734_v27, %v1614_v36  ;;  %v3322_v27 = vld [vmem:[%s3852_s0] sm:$0xff]  }
 0x51c   :  { %v3163_v28 = vpop.f32.mrf.mxu1 }
 0x51d   :  { %v1752_v45 = vadd.f32 %v3163_v28, %v1625_v37  ;;  %v2559_v28 = vunpack.c.l.bf16 %v3322_v27 }
 0x51e   :  { %v1737_v29 = vpop.f32.mrf.mxu1 }
 0x51f   :  { %v1750_v43 = vadd.f32 %v1737_v29, %v1617_v40 }
 0x520   :  { %v3178_v30 = vpop.f32.mrf.mxu1 }
 0x521   :  { %v1876_v44 = vadd.f32 %v3178_v30, %v1751_v41 }
 0x522   :  { %v1859_v31 = vpop.f32.mrf.mxu1 }
 0x523   :  { %v1874_v48 = vadd.f32 %v1859_v31, %v1749_v39 }
 0x524   :  { %v3179_v32 = vpop.f32.mrf.mxu1 }
 0x525   :  { %v1877_v23 = vadd.f32 %v3179_v32, %v1752_v45 }
 0x526   :  { %v1862_v33 = vpop.f32.mrf.mxu1 }
 0x527   :  { %v1875_v53 = vadd.f32 %v1862_v33, %v1750_v43 }
 0x528   :  { %v3194_v34 = vpop.f32.mrf.mxu1 }
 0x529   :  { %v2001_v49 = vadd.f32 %v3194_v34, %v1876_v44  ;;  %v2562_v34 = vunpack.c.h.bf16 %v3321_v4 }
 0x52a   :  { %v1984_v35 = vpop.f32.mrf.mxu1 }
 0x52b   :  { %v1999_v50 = vadd.f32 %v1984_v35, %v1874_v48 }
 0x52c   :  { %v3195_v11 = vpop.f32.mrf.mxu1 }
 0x52d   :  { %v2002_v47 = vadd.f32 %v3195_v11, %v1877_v23 }
 0x52e   :  { %v1987_v57 = vpop.f32.mrf.mxu1 }
 0x52f   :  { %v2000_v42 = vadd.f32 %v1987_v57, %v1875_v53 }
 0x530   :  { %v3210_v10 = vpop.f32.mrf.mxu1 }
 0x531   :  { %v2126_v51 = vadd.f32 %v3210_v10, %v2001_v49 }
 0x532   :  { %v2109_v12 = vpop.f32.mrf.mxu1 }
 0x533   :  { %v2124_v58 = vadd.f32 %v2109_v12, %v1999_v50 }
 0x534   :  { %v3211_v13 = vpop.f32.mrf.mxu1 }
 0x535   :  { %v2127_v60 = vadd.f32 %v3211_v13, %v2002_v47  ;;  %v2553_v13 = vpop.permute.xlu1 %2552 }
 0x536   :  { %v2112_v15 = vpop.f32.mrf.mxu1 }
 0x537   :  { %v2125_v62 = vadd.f32 %v2112_v15, %v2000_v42  ;;  %v2560_v15 = vunpack.c.h.bf16 %v3322_v27 }
 0x538   :  { %v3226_v16 = vpop.f32.mrf.mxu1 }
 0x539   :  { %v2251_v25 = vadd.f32 %v3226_v16, %v2126_v51 }
 0x53a   :  { %v2234_v17 = vpop.f32.mrf.mxu1 }
 0x53b   :  { %v2249_v61 = vadd.f32 %v2234_v17, %v2124_v58 }
 0x53c   :  { %v3227_v21 = vpop.f32.mrf.mxu1 }
 0x53d   :  { %v2252_v63 = vadd.f32 %v3227_v21, %v2127_v60 }
 0x53e   :  { %v2237_v22 = vpop.f32.mrf.mxu1 }
 0x53f   :  { %v2250_v56 = vadd.f32 %v2237_v22, %v2125_v62 }
 0x540   :  { %v3242_v38 = vpop.f32.mrf.mxu1 }
 0x541   :  { %v2376_v26 = vadd.f32 %v3242_v38, %v2251_v25 }
 0x542   :  { %v2359_v3 = vpop.f32.mrf.mxu1 }
 0x543   :  { %v2374_v0 = vadd.f32 %v2359_v3, %v2249_v61 }
 0x544   :  { %v3243_v52 = vpop.f32.mrf.mxu1 }
 0x545   :  { %v2377_v7 = vadd.f32 %v3243_v52, %v2252_v63 }
 0x546   :  { %v2362_v59 = vpop.f32.mrf.mxu1 }
 0x547   :  { %v2375_v30 = vadd.f32 %v2362_v59, %v2250_v56 }
 0x548   :  { %v3258_v54 = vpop.f32.mrf.mxu1 }
 0x549   :  { %v2501_v55 = vadd.f32 %v3258_v54, %v2376_v26 }
 0x54a   :  { %v2484_v6 = vpop.f32.mrf.mxu1 }
 0x54b   :  { %v2529_v8 = vmul.f32 %v2520_v1, %v2501_v55  ;;  %v2499_v9 = vadd.f32 %v2484_v6, %v2374_v0 }
 0x54c   :  { %v3259_v29 = vpop.f32.mrf.mxu1 }
 0x54d   :  { %v2557_v31 = vadd.f32 %v2548_v20, %v2529_v8  ;;  %v2527_v32 = vmul.f32 %v2510_v14, %v2499_v9  ;;  %v2502_v33 = vadd.f32 %v3259_v29, %v2377_v7 }
 0x54e   :  { %v2487_v35 = vpop.f32.mrf.mxu1 }
 0x54f   :  { %v2565_v11 = vadd.f32 %v2561_v5, %v2557_v31  ;;  %v2555_v57 = vadd.f32 %v2538_v46, %v2527_v32  ;;  %v2530_v10 = vmul.f32 %v2525_v24, %v2502_v33  ;;  %v2500_v12 = vadd.f32 %v2487_v35, %v2375_v30 }
 0x551   :  { %v2569_v16 = vmax.f32 %v2565_v11, 0.0  ;;  %v2563_v17 = vadd.f32 %v2559_v28, %v2555_v57  ;;  %v2558_v19 = vadd.f32 %v2553_v13, %v2530_v10  ;;  %v2528_v21 = vmul.f32 %v2515_v18, %v2500_v12 }
 0x553   :  { %v2826_v36 = vpack.c.bf16 %v2569_v16, %v2569_v16  ;;  %v2567_v41 = vmax.f32 %v2563_v17, 0.0  ;;  %v2566_v22 = vadd.f32 %v2562_v34, %v2558_v19  ;;  %v2556_v37 = vadd.f32 %v2543_v2, %v2528_v21 }
 0x555   :  { %2590 = vst.msk [vmem:[%s3859_s8 + $0x8] sm:$0xf] %vm2587_vm1, %v2826_v36  ;;  %v2824_v14 = vpack.c.bf16 %v2567_v41, %v2567_v41  ;;  %v2570_v39 = vmax.f32 %v2566_v22, 0.0  ;;  %v2564_v44 = vadd.f32 %v2560_v15, %v2556_v37 }
 0x557   :  { %2588 = vst.msk [vmem:[%s3859_s8] sm:$0xf] %vm2587_vm1, %v2824_v14  ;;  %v2827_v1 = vpack.c.bf16 %v2570_v39, %v2570_v39  ;;  %v2568_v38 = vmax.f32 %v2564_v44, 0.0 }
 0x559   :  { %2591 = vst.msk [vmem:[%s3859_s8 + $0xc] sm:$0xf] %vm2587_vm1, %v2827_v1  ;;  %v2825_v18 = vpack.c.bf16 %v2568_v38, %v2568_v38 }
 0x55b   :  { %2589 = vst.msk [vmem:[%s3859_s8 + $0x4] sm:$0xf] %vm2587_vm1, %v2825_v18 }

// kernel: resnet_feature_extractor.8
= control target key start
LH: loop header
LB: loop body
LE: loop exit
PB: predicated region body
PF: predicated region fallthrough
CT: control target
= control target key end

     0   :  { %v4494_v0 = vmov 0.0   ;;  %vm4495_vm0 = vmmov 0   ;;  %vm173_vm1 = vcmask 130048   ;;  %v4496_v19 = vmov 0   ;;  %s5283_s11 = inlined_call_operand.vmem [shape: bf16[128,32], index: 11, kind: input, shape index: {}]   ;;  %s5284_s0 = inlined_call_operand.vmem [shape: bf16[16,128], index: 0, kind: input, shape index: {}]   ;;  %s5285_s10 = inlined_call_operand.vmem [shape: bf16[9,128,32], index: 10, kind: input, shape index: {}]   ;;  %s5286_s7 = inlined_call_operand.vmem [shape: bf16[32,16], index: 7, kind: input, shape index: {}]   ;;  %s5287_s2 = inlined_call_operand.vmem [shape: f32[32,1], index: 2, kind: input, shape index: {}]   ;;  %s5288_s3 = inlined_call_operand.vmem [shape: f32[32,1], index: 3, kind: input, shape index: {}]   ;;  %s5289_s8 = inlined_call_operand.vmem [shape: f32[32,1], index: 8, kind: input, shape index: {}]   ;;  %s5290_s5 = inlined_call_operand.vmem [shape: f32[32,1], index: 5, kind: input, shape index: {}]   ;;  %s5291_s9 = inlined_call_operand.vmem [shape: f32[32,1], index: 9, kind: input, shape index: {}]   ;;  %s5292_s1 = inlined_call_operand.vmem [shape: bf16[9,32,16], index: 1, kind: input, shape index: {}]   ;;  %s5293_s6 = inlined_call_operand.vmem [shape: f32[32,1], index: 6, kind: input, shape index: {}]   ;;  %s5294_s12 = inlined_call_operand.vmem [shape: bf16[9,32,32], index: 12, kind: input, shape index: {}]   ;;  %s5295_s4 = inlined_call_operand.vmem [shape: bf16[9,32,32], index: 4, kind: input, shape index: {}]   ;;  %s5296_s13 = inlined_call_operand.vmem [shape: bf16[32,32], index: 13, kind: output, shape index: {}]  }
   0x1   :  { %3947 = vmatprep.subr.bf16.mxu0 %v4494_v0  ;;  %v4356_v1 = vld [vmem:[%s5283_s11 + $0x38] sm:$0xff]   ;;  %3963 = vmatprep.mubr.msk.bf16.mxu0 %vm4495_vm0, %v4494_v0  ;;  %v4357_v2 = vld [vmem:[%s5283_s11 + $0x30] sm:$0xff]   ;;  %v4358_v3 = vld [vmem:[%s5283_s11 + $0x28] sm:$0xff]   ;;  %vm1982_vm2 = vcmask 261120   ;;  %vm3321_vm3 = vcmask 257024  }
   0x2   :  { %3948 = vmatpush3.bf16.msra.mxu0 %v4356_v1  ;;  %v4359_v4 = vld [vmem:[%s5283_s11 + $0x20] sm:$0xff]   ;;  %v4360_v5 = vld [vmem:[%s5283_s11 + $0x18] sm:$0xff]   ;;  %v4361_v6 = vld [vmem:[%s5283_s11 + $0x10] sm:$0xff]   ;;  %4354 = vset.pattern.permute.xlu0 %v4496_v19 }
   0x3   :  { %3949 = vmatprep.subr.bf16.mxu0 %v4494_v0  ;;  %v4362_v7 = vld [vmem:[%s5283_s11 + $0x8] sm:$0xff]   ;;  %v4363_v8 = vld [vmem:[%s5283_s11] sm:$0xff]   ;;  %v4365_v10 = vld [vmem:[%s5285_s10 + $0x78] sm:$0xff]   ;;  %4355 = vset.pattern.permute.xlu1 %v4496_v19 }
   0x4   :  { %v4604_v9 = vld [vmem:[%s5284_s0] sm:$0xff]   ;;  %v4366_v11 = vld [vmem:[%s5285_s10 + $0x70] sm:$0xff]   ;;  %v4367_v12 = vld [vmem:[%s5285_s10 + $0x68] sm:$0xff]  }
   0x5   :  { %v4368_v13 = vld [vmem:[%s5286_s7] sm:$0xff]   ;;  %v4372_v15 = vld [vmem:[%s5285_s10 + $0x58] sm:$0xff]   ;;  %v4374_v16 = vld [vmem:[%s5285_s10 + $0x50] sm:$0xff]  }
   0x6   :  { %3950 = vmatpush3.bf16.msra.mxu0 %v4357_v2  ;;  %3969 = vmatprep.mubr.msk.bf16.mxu1 %vm173_vm1, %v4368_v13  ;;  %v4370_v14 = vld [vmem:[%s5285_s10 + $0x60] sm:$0xff]   ;;  %v4376_v17 = vld [vmem:[%s5285_s10 + $0x48] sm:$0xff]   ;;  %v1906_v21 = vld [vmem:[%s5287_s2 + $0x10] sm:$0xff] }
   0x7   :  { %3951 = vmatprep.subr.bf16.mxu0 %v4494_v0  ;;  %v4378_v18 = vld [vmem:[%s5285_s10 + $0x40] sm:$0xff]   ;;  %1920 = vperm.xlu1 %4355, %v1906_v21   ;;  %v1905_v22 = vld [vmem:[%s5287_s2 + $0x8] sm:$0xff]  ;;  %v1907_v23 = vld [vmem:[%s5287_s2 + $0x18] sm:$0xff] }
   0x8   :  { %v1904_v20 = vld [vmem:[%s5287_s2] sm:$0xff]  ;;  %v1933_v25 = vld [vmem:[%s5288_s3 + $0x8] sm:$0xff]  ;;  %v1934_v26 = vld [vmem:[%s5288_s3 + $0x10] sm:$0xff] }
   0x9   :  { %1910 = vperm.xlu0 %4354, %v1904_v20   ;;  %v1932_v24 = vld [vmem:[%s5288_s3] sm:$0xff]  ;;  %v1935_v27 = vld [vmem:[%s5288_s3 + $0x18] sm:$0xff]  ;;  %v230_v29 = vld [vmem:[%s5289_s8 + $0x8] sm:$0xff] }
   0xa   :  { %3952 = vmatpush3.bf16.msra.mxu0 %v4358_v3  ;;  %v229_v28 = vld [vmem:[%s5289_s8] sm:$0xff]  ;;  %v231_v30 = vld [vmem:[%s5289_s8 + $0x10] sm:$0xff]  ;;  %v232_v31 = vld [vmem:[%s5289_s8 + $0x18] sm:$0xff] }
   0xb   :  { %3953 = vmatprep.subr.bf16.mxu0 %v4494_v0  ;;  %1925 = vperm.xlu1 %4355, %v1907_v23   ;;  %v3241_v32 = vld [vmem:[%s5290_s5] sm:$0xff]  ;;  %v3242_v33 = vld [vmem:[%s5290_s5 + $0x8] sm:$0xff]  ;;  %v3243_v34 = vld [vmem:[%s5290_s5 + $0x10] sm:$0xff] }
   0xc   :  { %v3244_v35 = vld [vmem:[%s5290_s5 + $0x18] sm:$0xff]  ;;  %v257_v36 = vld [vmem:[%s5291_s9] sm:$0xff]  ;;  %v258_v37 = vld [vmem:[%s5291_s9 + $0x8] sm:$0xff] }
   0xd   :  { %1915 = vperm.xlu0 %4354, %v1905_v22   ;;  %v259_v38 = vld [vmem:[%s5291_s9 + $0x10] sm:$0xff]  ;;  %v260_v39 = vld [vmem:[%s5291_s9 + $0x18] sm:$0xff]  ;;  %v4369_v45 = vld [vmem:[%s5286_s7 + $0x8] sm:$0xff]  }
   0xe   :  { %3954 = vmatpush3.bf16.msra.mxu0 %v4359_v4  ;;  %v4371_v46 = vld [vmem:[%s5285_s10 + $0x38] sm:$0xff]   ;;  %v4373_v47 = vld [vmem:[%s5285_s10 + $0x30] sm:$0xff]   ;;  %v4375_v48 = vld [vmem:[%s5285_s10 + $0x28] sm:$0xff]  }
   0xf   :  { %3955 = vmatprep.subr.bf16.mxu0 %v4494_v0  ;;  %1943 = vperm.xlu1 %4355, %v1933_v25   ;;  %v4377_v49 = vld [vmem:[%s5285_s10 + $0x20] sm:$0xff]   ;;  %v4379_v50 = vld [vmem:[%s5285_s10 + $0x18] sm:$0xff]   ;;  %v4380_v51 = vld [vmem:[%s5285_s10 + $0x10] sm:$0xff]  }
  0x10   :  { %v4381_v52 = vld [vmem:[%s5285_s10 + $0x8] sm:$0xff]   ;;  %v4382_v53 = vld [vmem:[%s5285_s10] sm:$0xff]   ;;  %v4383_v54 = vld [vmem:[%s5292_s1 + $0x10] sm:$0xff]  }
  0x11   :  { %1938 = vperm.xlu0 %4354, %v1932_v24   ;;  %v4384_v60 = vld [vmem:[%s5292_s1 + $0x18] sm:$0xff]   ;;  %v4385_v61 = vld [vmem:[%s5292_s1] sm:$0xff]  }
  0x12   :  { %3956 = vmatpush3.bf16.msra.mxu0 %v4360_v5  ;;  %v4390_v13 = vld [vmem:[%s5285_s10 + $0xa0] sm:$0xff]  }
  0x13   :  { %3957 = vmatprep.subr.bf16.mxu0 %v4494_v0  ;;  %1953 = vperm.xlu1 %4355, %v1935_v27  }
  0x15   :  { %1948 = vperm.xlu0 %4354, %v1934_v26  }
  0x16   :  { %3958 = vmatpush3.bf16.msra.mxu0 %v4361_v6 }
  0x17   :  { %3959 = vmatprep.subr.bf16.mxu0 %v4494_v0  ;;  %240 = vperm.xlu1 %4355, %v230_v29  }
  0x19   :  { %235 = vperm.xlu0 %4354, %v229_v28  }
  0x1a   :  { %3960 = vmatpush3.bf16.msra.mxu0 %v4362_v7 }
  0x1b   :  { %3961 = vmatprep.subr.bf16.mxu0 %v4494_v0  ;;  %250 = vperm.xlu1 %4355, %v232_v31  }
  0x1d   :  { %245 = vperm.xlu0 %4354, %v231_v30  }
  0x1e   :  { %3962 = vmatpush3.bf16.msra.mxu0 %v4363_v8  ;;  %v4386_v8 = vld [vmem:[%s5292_s1 + $0x8] sm:$0xff]  }
  0x1f   :  { %3993 = vmatprep.subr.bf16.mxu0 %v4494_v0  ;;  %3252 = vperm.xlu1 %4355, %v3242_v33   ;;  %v4396_v33 = vld [vmem:[%s5292_s1 + $0x28] sm:$0xff]  }
  0x21   :  { %3964 = vmatmul.mubr.bf16.vlgmr.msra.gmra.mxu0 %v4604_v9  ;;  %3247 = vperm.xlu0 %4354, %v3241_v32  }
  0x22   :  { %3994 = vmatpush3.bf16.msra.mxu0 %v4365_v10  ;;  %4009 = vmatprep.mubr.msk.bf16.mxu0 %vm4495_vm0, %v4494_v0  ;;  %v4387_v10 = vld [vmem:[%s5285_s10 + $0xb8] sm:$0xff]  }
  0x23   :  { %3995 = vmatprep.subr.bf16.mxu0 %v4494_v0  ;;  %3262 = vperm.xlu1 %4355, %v3244_v35   ;;  %v4398_v35 = vld [vmem:[%s5285_s10 + $0xf0] sm:$0xff]  }
  0x25   :  { %3257 = vperm.xlu0 %4354, %v3243_v34   ;;  %v4397_v34 = vld [vmem:[%s5285_s10 + $0xf8] sm:$0xff]  }
  0x26   :  { %3996 = vmatpush3.bf16.msra.mxu0 %v4366_v11  ;;  %v4388_v11 = vld [vmem:[%s5285_s10 + $0xb0] sm:$0xff]  }
  0x27   :  { %3997 = vmatprep.subr.bf16.mxu0 %v4494_v0  ;;  %268 = vperm.xlu1 %4355, %v258_v37   ;;  %v4400_v37 = vld [vmem:[%s5285_s10 + $0xe0] sm:$0xff]  }
  0x29   :  { %263 = vperm.xlu0 %4354, %v257_v36   ;;  %v4399_v36 = vld [vmem:[%s5285_s10 + $0xe8] sm:$0xff]  }
  0x2a   :  { %3998 = vmatpush3.bf16.msra.mxu0 %v4367_v12  ;;  %v4389_v12 = vld [vmem:[%s5285_s10 + $0xa8] sm:$0xff]  }
  0x2b   :  { %3999 = vmatprep.subr.bf16.mxu0 %v4494_v0  ;;  %278 = vperm.xlu1 %4355, %v260_v39   ;;  %v4402_v39 = vld [vmem:[%s5285_s10 + $0xd0] sm:$0xff]  }
  0x2d   :  { %273 = vperm.xlu0 %4354, %v259_v38   ;;  %v4401_v38 = vld [vmem:[%s5285_s10 + $0xd8] sm:$0xff]  }
  0x2e   :  { %4000 = vmatpush3.bf16.msra.mxu0 %v4370_v14  ;;  %v4391_v14 = vld [vmem:[%s5285_s10 + $0x98] sm:$0xff]  }
  0x2f   :  { %4001 = vmatprep.subr.bf16.mxu0 %v4494_v0 }
  0x32   :  { %4002 = vmatpush3.bf16.msra.mxu0 %v4372_v15  ;;  %v4392_v15 = vld [vmem:[%s5285_s10 + $0x90] sm:$0xff]  }
  0x33   :  { %4003 = vmatprep.subr.bf16.mxu0 %v4494_v0 }
  0x36   :  { %4004 = vmatpush3.bf16.msra.mxu0 %v4374_v16  ;;  %v4393_v16 = vld [vmem:[%s5285_s10 + $0x88] sm:$0xff]  }
  0x37   :  { %4005 = vmatprep.subr.bf16.mxu0 %v4494_v0 }
  0x3a   :  { %4006 = vmatpush3.bf16.msra.mxu0 %v4376_v17  ;;  %v4394_v17 = vld [vmem:[%s5285_s10 + $0x80] sm:$0xff]  }
  0x3b   :  { %4007 = vmatprep.subr.bf16.mxu0 %v4494_v0 }
  0x3e   :  { %4008 = vmatpush3.bf16.msra.mxu0 %v4378_v18  ;;  %v4395_v18 = vld [vmem:[%s5292_s1 + $0x20] sm:$0xff]  }
  0x41   :  { %4010 = vmatmul.mubr.bf16.vlgmr.msra.gmra.mxu0 %v4604_v9 }
  0x42   :  { %4047 = vmatprep.mubr.msk.bf16.mxu0 %vm173_vm1, %v4395_v18 }
  0xe1   :  { %v151_v40 = vpop.f32.mrf.mxu0 }
  0xe3   :  { %v3965_v41 = vpop.f32.mrf.mxu0 }
  0xe4   :  { %v4404_v41 = vld [vmem:[%s5285_s10 + $0xc0] sm:$0xff]  }
  0xe5   :  { %v154_v42 = vpop.f32.mrf.mxu0 }
  0xe6   :  { %v162_v43 = vpack.c.bf16 %v154_v42, %v151_v40  ;;  %v4403_v40 = vld [vmem:[%s5285_s10 + $0xc8] sm:$0xff]   ;;  %v4405_v42 = vld [vmem:[%s5292_s1 + $0x30] sm:$0xff]  }
  0xe7   :  { %v3966_v44 = vpop.f32.mrf.mxu0 }
  0xe8   :  { %3967 = vmatprep.subr.bf16.mxu1 %v162_v43 }
  0xe9   :  { %3968 = vmatpush3.bf16.msra.mxu1 %v162_v43 }
  0xea   :  { %3973 = vmatprep.subr.bf16.mxu1 %v4494_v0 }
  0xec   :  { %3970 = vmatmul.mubr.msk.bf16.vlgmr.msra.gmra.mxu1 %vm173_vm1, %v4369_v45 }
  0xed   :  { %3974 = vmatpush3.bf16.msra.mxu1 %v4371_v46  ;;  %3989 = vmatprep.mubr.msk.bf16.mxu1 %vm4495_vm0, %v4494_v0 }
  0xee   :  { %3975 = vmatprep.subr.bf16.mxu1 %v4494_v0 }
  0xf1   :  { %3976 = vmatpush3.bf16.msra.mxu1 %v4373_v47 }
  0xf2   :  { %3977 = vmatprep.subr.bf16.mxu1 %v4494_v0 }
  0xf5   :  { %3978 = vmatpush3.bf16.msra.mxu1 %v4375_v48 }
  0xf6   :  { %3979 = vmatprep.subr.bf16.mxu1 %v4494_v0 }
  0xf9   :  { %3980 = vmatpush3.bf16.msra.mxu1 %v4377_v49 }
  0xfa   :  { %3981 = vmatprep.subr.bf16.mxu1 %v4494_v0 }
  0xfd   :  { %3982 = vmatpush3.bf16.msra.mxu1 %v4379_v50 }
  0xfe   :  { %3983 = vmatprep.subr.bf16.mxu1 %v4494_v0 }
 0x101   :  { %3984 = vmatpush3.bf16.msra.mxu1 %v4380_v51  ;;  %v494_v55 = vpop.f32.mrf.mxu0 }
 0x102   :  { %3985 = vmatprep.subr.bf16.mxu1 %v4494_v0 }
 0x103   :  { %v4011_v56 = vpop.f32.mrf.mxu0 }
 0x105   :  { %3986 = vmatpush3.bf16.msra.mxu1 %v4381_v52  ;;  %v497_v57 = vpop.f32.mrf.mxu0 }
 0x106   :  { %3987 = vmatprep.subr.bf16.mxu1 %v4494_v0  ;;  %v506_v58 = vpack.c.bf16 %v497_v57, %v494_v55 }
 0x107   :  { %v4012_v59 = vpop.f32.mrf.mxu0 }
 0x108   :  { %v4406_v59 = vld [vmem:[%s5292_s1 + $0x38] sm:$0xff]  }
 0x109   :  { %3988 = vmatpush3.bf16.msra.mxu1 %v4382_v53 }
 0x10a   :  { %4013 = vmatprep.subr.bf16.mxu1 %v506_v58 }
 0x10c   :  { %3990 = vmatmul.mubr.bf16.vlgmr.msra.gmra.mxu1 %v4604_v9 }
 0x10d   :  { %4015 = vmatprep.mubr.msk.bf16.mxu1 %vm173_vm1, %v4383_v54  ;;  %4014 = vmatpush3.bf16.msra.mxu1 %v506_v58 }
 0x114   :  { %4016 = vmatmul.mubr.msk.bf16.vlgmr.msra.gmra.mxu1 %vm173_vm1, %v4384_v60  ;;  %v4407_v60 = vld [vmem:[%s5285_s10 + $0x138] sm:$0xff]  }
 0x115   :  { %4021 = vmatprep.mubr.msk.bf16.mxu1 %vm173_vm1, %v4385_v61  ;;  %v4408_v61 = vld [vmem:[%s5285_s10 + $0x130] sm:$0xff]  }
 0x1ac   :  { %v4757_v62 = vpop.f32.mrf.mxu1 }
 0x1ae   :  { %v4759_v63 = vpop.f32.mrf.mxu1 }
 0x1b0   :  { %v4761_v1 = vpop.f32.mrf.mxu1 }
 0x1b2   :  { %v4763_v2 = vpop.f32.mrf.mxu1 }
 0x1cc   :  { %v383_v3 = vpop.f32.mrf.mxu1 }
 0x1ce   :  { %v3991_v4 = vpop.f32.mrf.mxu1 }
 0x1cf   :  { %v4410_v4 = vld [vmem:[%s5285_s10 + $0x120] sm:$0xff]  }
 0x1d0   :  { %v386_v5 = vpop.f32.mrf.mxu1 }
 0x1d1   :  { %v394_v6 = vpack.c.bf16 %v386_v5, %v383_v3  ;;  %v4409_v3 = vld [vmem:[%s5285_s10 + $0x128] sm:$0xff]   ;;  %v4411_v5 = vld [vmem:[%s5285_s10 + $0x118] sm:$0xff]  }
 0x1d2   :  { %v3992_v7 = vpop.f32.mrf.mxu1 }
 0x1d3   :  { %4019 = vmatprep.subr.bf16.mxu1 %v394_v6  ;;  %v4413_v7 = vld [vmem:[%s5285_s10 + $0x108] sm:$0xff]  }
 0x1d4   :  { %4020 = vmatpush3.bf16.msra.mxu1 %v394_v6  ;;  %v4017_v19 = vpop.f32.mrf.mxu1  ;;  %v4412_v6 = vld [vmem:[%s5285_s10 + $0x110] sm:$0xff]  }
 0x1d5   :  { %4025 = vmatprep.subr.bf16.mxu1 %v4494_v0 }
 0x1d6   :  { %v557_v20 = vpop.f32.mrf.mxu1 }
 0x1d7   :  { %4022 = vmatmul.mubr.msk.bf16.vlgmr.msra.gmra.mxu1 %vm173_vm1, %v4386_v8  ;;  %v4414_v8 = vld [vmem:[%s5285_s10 + $0x100] sm:$0xff]  }
 0x1d8   :  { %4026 = vmatpush3.bf16.msra.mxu1 %v4387_v10  ;;  %4041 = vmatprep.mubr.msk.bf16.mxu1 %vm4495_vm0, %v4494_v0  ;;  %v4018_v21 = vpop.f32.mrf.mxu1  ;;  %v4415_v10 = vld [vmem:[%s5292_s1 + $0x40] sm:$0xff]  }
 0x1d9   :  { %4027 = vmatprep.subr.bf16.mxu1 %v4494_v0 }
 0x1da   :  { %v560_v22 = vpop.f32.mrf.mxu1 }
 0x1dc   :  { %4028 = vmatpush3.bf16.msra.mxu1 %v4388_v11 }
 0x1dd   :  { %4029 = vmatprep.subr.bf16.mxu1 %v4494_v0 }
 0x1e0   :  { %4030 = vmatpush3.bf16.msra.mxu1 %v4389_v12 }
 0x1e1   :  { %4031 = vmatprep.subr.bf16.mxu1 %v4494_v0 }
 0x1e4   :  { %4032 = vmatpush3.bf16.msra.mxu1 %v4390_v13 }
 0x1e5   :  { %4033 = vmatprep.subr.bf16.mxu1 %v4494_v0 }
 0x1e8   :  { %4034 = vmatpush3.bf16.msra.mxu1 %v4391_v14 }
 0x1e9   :  { %4035 = vmatprep.subr.bf16.mxu1 %v4494_v0 }
 0x1ec   :  { %4036 = vmatpush3.bf16.msra.mxu1 %v4392_v15 }
 0x1ed   :  { %4037 = vmatprep.subr.bf16.mxu1 %v4494_v0 }
 0x1f0   :  { %4038 = vmatpush3.bf16.msra.mxu1 %v4393_v16 }
 0x1f1   :  { %4039 = vmatprep.subr.bf16.mxu1 %v4494_v0 }
 0x1f4   :  { %4040 = vmatpush3.bf16.msra.mxu1 %v4394_v17 }
 0x1f7   :  { %4042 = vmatmul.mubr.bf16.vlgmr.msra.gmra.mxu1 %v4604_v9 }
 0x1f8   :  { %4073 = vmatprep.mubr.msk.bf16.mxu1 %vm173_vm1, %v4405_v42 }
 0x297   :  { %v4023_v23 = vpop.f32.mrf.mxu1 }
 0x298   :  { %v631_v43 = vadd.f32 %v4023_v23, %v4017_v19 }
 0x299   :  { %v622_v24 = vpop.f32.mrf.mxu1 }
 0x29a   :  { %v623_v45 = vadd.f32 %v622_v24, %v557_v20  ;;  %v4416_v24 = vld [vmem:[%s5292_s1 + $0x48] sm:$0xff]  }
 0x29b   :  { %v4024_v25 = vpop.f32.mrf.mxu1 }
 0x29c   :  { %v634_v48 = vadd.f32 %v4024_v25, %v4018_v21  ;;  %v4417_v25 = vld [vmem:[%s5285_s10 + $0x178] sm:$0xff]  }
 0x29d   :  { %v625_v26 = vpop.f32.mrf.mxu1 }
 0x29e   :  { %v626_v27 = vadd.f32 %v625_v26, %v560_v22  ;;  %v4418_v26 = vld [vmem:[%s5285_s10 + $0x170] sm:$0xff]  }
 0x2b7   :  { %v736_v28 = vpop.f32.mrf.mxu1 }
 0x2b9   :  { %v4043_v29 = vpop.f32.mrf.mxu1 }
 0x2ba   :  { %v4421_v29 = vld [vmem:[%s5285_s10 + $0x158] sm:$0xff]  }
 0x2bb   :  { %v739_v30 = vpop.f32.mrf.mxu1 }
 0x2bc   :  { %v748_v31 = vpack.c.bf16 %v739_v30, %v736_v28  ;;  %v4420_v28 = vld [vmem:[%s5285_s10 + $0x160] sm:$0xff]   ;;  %v4422_v30 = vld [vmem:[%s5285_s10 + $0x150] sm:$0xff]  }
 0x2bd   :  { %v4044_v32 = vpop.f32.mrf.mxu1 }
 0x2be   :  { %4045 = vmatprep.subr.bf16.mxu0 %v748_v31  ;;  %v4424_v32 = vld [vmem:[%s5285_s10 + $0x140] sm:$0xff]  }
 0x2bf   :  { %4046 = vmatpush3.bf16.msra.mxu0 %v748_v31  ;;  %v4423_v31 = vld [vmem:[%s5285_s10 + $0x148] sm:$0xff]  }
 0x2c0   :  { %4051 = vmatprep.subr.bf16.mxu0 %v4494_v0 }
 0x2c2   :  { %4048 = vmatmul.mubr.msk.bf16.vlgmr.msra.gmra.mxu0 %vm173_vm1, %v4396_v33  ;;  %v4425_v33 = vld [vmem:[%s5292_s1 + $0x50] sm:$0xff]  }
 0x2c3   :  { %4052 = vmatpush3.bf16.msra.mxu0 %v4397_v34  ;;  %4067 = vmatprep.mubr.msk.bf16.mxu0 %vm4495_vm0, %v4494_v0 }
 0x2c4   :  { %4053 = vmatprep.subr.bf16.mxu0 %v4494_v0 }
 0x2c7   :  { %4054 = vmatpush3.bf16.msra.mxu0 %v4398_v35 }
 0x2c8   :  { %4055 = vmatprep.subr.bf16.mxu0 %v4494_v0 }
 0x2cb   :  { %4056 = vmatpush3.bf16.msra.mxu0 %v4399_v36 }
 0x2cc   :  { %4057 = vmatprep.subr.bf16.mxu0 %v4494_v0 }
 0x2cf   :  { %4058 = vmatpush3.bf16.msra.mxu0 %v4400_v37 }
 0x2d0   :  { %4059 = vmatprep.subr.bf16.mxu0 %v4494_v0 }
 0x2d3   :  { %4060 = vmatpush3.bf16.msra.mxu0 %v4401_v38 }
 0x2d4   :  { %4061 = vmatprep.subr.bf16.mxu0 %v4494_v0 }
 0x2d7   :  { %4062 = vmatpush3.bf16.msra.mxu0 %v4402_v39 }
 0x2d8   :  { %4063 = vmatprep.subr.bf16.mxu0 %v4494_v0 }
 0x2db   :  { %4064 = vmatpush3.bf16.msra.mxu0 %v4403_v40 }
 0x2dc   :  { %4065 = vmatprep.subr.bf16.mxu0 %v4494_v0 }
 0x2df   :  { %4066 = vmatpush3.bf16.msra.mxu0 %v4404_v41 }
 0x2e2   :  { %4068 = vmatmul.mubr.bf16.vlgmr.msra.gmra.mxu0 %v4604_v9 }
 0x2e3   :  { %4099 = vmatprep.mubr.msk.bf16.mxu0 %vm173_vm1, %v4415_v10 }
 0x382   :  { %v4049_v44 = vpop.f32.mrf.mxu0 }
 0x383   :  { %v816_v46 = vadd.f32 %v4049_v44, %v631_v43 }
 0x384   :  { %v799_v47 = vpop.f32.mrf.mxu0 }
 0x385   :  { %v814_v49 = vadd.f32 %v799_v47, %v623_v45  ;;  %v4426_v47 = vld [vmem:[%s5292_s1 + $0x58] sm:$0xff]  }
 0x386   :  { %v4050_v50 = vpop.f32.mrf.mxu0 }
 0x387   :  { %v817_v51 = vadd.f32 %v4050_v50, %v634_v48  ;;  %v4427_v48 = vld [vmem:[%s5285_s10 + $0x1b8] sm:$0xff]   ;;  %v4429_v50 = vld [vmem:[%s5285_s10 + $0x1a8] sm:$0xff]  }
 0x388   :  { %v802_v52 = vpop.f32.mrf.mxu0 }
 0x389   :  { %v815_v53 = vadd.f32 %v802_v52, %v626_v27  ;;  %v4419_v27 = vld [vmem:[%s5285_s10 + $0x168] sm:$0xff]   ;;  %v4431_v52 = vld [vmem:[%s5285_s10 + $0x198] sm:$0xff]  }
 0x3a2   :  { %v917_v54 = vpop.f32.mrf.mxu0 }
 0x3a4   :  { %v4069_v55 = vpop.f32.mrf.mxu0 }
 0x3a5   :  { %v4434_v55 = vld [vmem:[%s5285_s10 + $0x180] sm:$0xff]  }
 0x3a6   :  { %v920_v56 = vpop.f32.mrf.mxu0 }
 0x3a7   :  { %v929_v57 = vpack.c.bf16 %v920_v56, %v917_v54  ;;  %v4433_v54 = vld [vmem:[%s5285_s10 + $0x188] sm:$0xff]   ;;  %v4435_v56 = vld [vmem:[%s5292_s1 + $0x60] sm:$0xff]  }
 0x3a8   :  { %v4070_v58 = vpop.f32.mrf.mxu0 }
 0x3a9   :  { %4071 = vmatprep.subr.bf16.mxu1 %v929_v57 }
 0x3aa   :  { %4072 = vmatpush3.bf16.msra.mxu1 %v929_v57 }
 0x3ab   :  { %4077 = vmatprep.subr.bf16.mxu1 %v4494_v0 }
 0x3ad   :  { %4074 = vmatmul.mubr.msk.bf16.vlgmr.msra.gmra.mxu1 %vm173_vm1, %v4406_v59 }
 0x3ae   :  { %4078 = vmatpush3.bf16.msra.mxu1 %v4407_v60  ;;  %4093 = vmatprep.mubr.msk.bf16.mxu1 %vm4495_vm0, %v4494_v0 }
 0x3af   :  { %4079 = vmatprep.subr.bf16.mxu1 %v4494_v0 }
 0x3b2   :  { %4080 = vmatpush3.bf16.msra.mxu1 %v4408_v61 }
 0x3b3   :  { %4081 = vmatprep.subr.bf16.mxu1 %v4494_v0 }
 0x3b6   :  { %4082 = vmatpush3.bf16.msra.mxu1 %v4409_v3 }
 0x3b7   :  { %4083 = vmatprep.subr.bf16.mxu1 %v4494_v0 }
 0x3ba   :  { %4084 = vmatpush3.bf16.msra.mxu1 %v4410_v4 }
 0x3bb   :  { %4085 = vmatprep.subr.bf16.mxu1 %v4494_v0 }
 0x3be   :  { %4086 = vmatpush3.bf16.msra.mxu1 %v4411_v5 }
 0x3bf   :  { %4087 = vmatprep.subr.bf16.mxu1 %v4494_v0 }
 0x3c2   :  { %4088 = vmatpush3.bf16.msra.mxu1 %v4412_v6 }
 0x3c3   :  { %4089 = vmatprep.subr.bf16.mxu1 %v4494_v0 }
 0x3c6   :  { %4090 = vmatpush3.bf16.msra.mxu1 %v4413_v7 }
 0x3c7   :  { %4091 = vmatprep.subr.bf16.mxu1 %v4494_v0 }
 0x3ca   :  { %4092 = vmatpush3.bf16.msra.mxu1 %v4414_v8 }
 0x3cd   :  { %4094 = vmatmul.mubr.bf16.vlgmr.msra.gmra.mxu1 %v4604_v9 }
 0x3ce   :  { %4125 = vmatprep.mubr.msk.bf16.mxu1 %vm173_vm1, %v4425_v33 }
 0x46d   :  { %v4075_v11 = vpop.f32.mrf.mxu1 }
 0x46e   :  { %v997_v12 = vadd.f32 %v4075_v11, %v816_v46 }
 0x46f   :  { %v980_v13 = vpop.f32.mrf.mxu1 }
 0x470   :  { %v995_v14 = vadd.f32 %v980_v13, %v814_v49  ;;  %v4428_v49 = vld [vmem:[%s5285_s10 + $0x1b0] sm:$0xff]  }
 0x471   :  { %v4076_v15 = vpop.f32.mrf.mxu1  ;;  %v4438_v13 = vld [vmem:[%s5285_s10 + $0x1f0] sm:$0xff]  }
 0x472   :  { %v998_v16 = vadd.f32 %v4076_v15, %v817_v51  ;;  %v4430_v51 = vld [vmem:[%s5285_s10 + $0x1a0] sm:$0xff]  }
 0x473   :  { %v983_v17 = vpop.f32.mrf.mxu1  ;;  %v4440_v15 = vld [vmem:[%s5285_s10 + $0x1e0] sm:$0xff]  }
 0x474   :  { %v996_v18 = vadd.f32 %v983_v17, %v815_v53  ;;  %v4432_v53 = vld [vmem:[%s5285_s10 + $0x190] sm:$0xff]  }
 0x475   :  { %v4442_v17 = vld [vmem:[%s5285_s10 + $0x1d0] sm:$0xff]  }
 0x48d   :  { %v1098_v19 = vpop.f32.mrf.mxu1 }
 0x48f   :  { %v4095_v20 = vpop.f32.mrf.mxu1 }
 0x490   :  { %v4493_v20 = vld [vmem:[%s5284_s0] sm:$0xff]  }
 0x491   :  { %v1101_v21 = vpop.f32.mrf.mxu1 }
 0x492   :  { %v1110_v22 = vpack.c.bf16 %v1101_v21, %v1098_v19  ;;  %v4444_v19 = vld [vmem:[%s5285_s10 + $0x1c0] sm:$0xff]   ;;  %v4445_v21 = vld [vmem:[%s5292_s1 + $0x70] sm:$0xff]  }
 0x493   :  { %v4096_v23 = vpop.f32.mrf.mxu1 }
 0x494   :  { %4097 = vmatprep.subr.bf16.mxu0 %v1110_v22 }
 0x495   :  { %4098 = vmatpush3.bf16.msra.mxu0 %v1110_v22 }
 0x496   :  { %4103 = vmatprep.subr.bf16.mxu0 %v4494_v0 }
 0x498   :  { %4100 = vmatmul.mubr.msk.bf16.vlgmr.msra.gmra.mxu0 %vm173_vm1, %v4416_v24 }
 0x499   :  { %4104 = vmatpush3.bf16.msra.mxu0 %v4417_v25  ;;  %4119 = vmatprep.mubr.msk.bf16.mxu0 %vm4495_vm0, %v4494_v0 }
 0x49a   :  { %4105 = vmatprep.subr.bf16.mxu0 %v4494_v0 }
 0x49d   :  { %4106 = vmatpush3.bf16.msra.mxu0 %v4418_v26 }
 0x49e   :  { %4107 = vmatprep.subr.bf16.mxu0 %v4494_v0 }
 0x4a1   :  { %4108 = vmatpush3.bf16.msra.mxu0 %v4419_v27 }
 0x4a2   :  { %4109 = vmatprep.subr.bf16.mxu0 %v4494_v0 }
 0x4a5   :  { %4110 = vmatpush3.bf16.msra.mxu0 %v4420_v28 }
 0x4a6   :  { %4111 = vmatprep.subr.bf16.mxu0 %v4494_v0 }
 0x4a9   :  { %4112 = vmatpush3.bf16.msra.mxu0 %v4421_v29 }
 0x4aa   :  { %4113 = vmatprep.subr.bf16.mxu0 %v4494_v0 }
 0x4ad   :  { %4114 = vmatpush3.bf16.msra.mxu0 %v4422_v30 }
 0x4ae   :  { %4115 = vmatprep.subr.bf16.mxu0 %v4494_v0 }
 0x4b1   :  { %4116 = vmatpush3.bf16.msra.mxu0 %v4423_v31 }
 0x4b2   :  { %4117 = vmatprep.subr.bf16.mxu0 %v4494_v0 }
 0x4b5   :  { %4118 = vmatpush3.bf16.msra.mxu0 %v4424_v32 }
 0x4b8   :  { %4120 = vmatmul.mubr.bf16.vlgmr.msra.gmra.mxu0 %v4604_v9 }
 0x4b9   :  { %4151 = vmatprep.mubr.msk.bf16.mxu0 %vm173_vm1, %v4435_v56 }
 0x558   :  { %v4101_v34 = vpop.f32.mrf.mxu0 }
 0x559   :  { %v1178_v35 = vadd.f32 %v4101_v34, %v997_v12  ;;  %v4437_v12 = vld [vmem:[%s5285_s10 + $0x1f8] sm:$0xff]  }
 0x55a   :  { %v1161_v36 = vpop.f32.mrf.mxu0 }
 0x55b   :  { %v1176_v37 = vadd.f32 %v1161_v36, %v995_v14  ;;  %v4439_v14 = vld [vmem:[%s5285_s10 + $0x1e8] sm:$0xff]   ;;  %v4447_v36 = vld [vmem:[%s5285_s10 + $0x238] sm:$0xff]  }
 0x55c   :  { %v4102_v38 = vpop.f32.mrf.mxu0 }
 0x55d   :  { %v1179_v39 = vadd.f32 %v4102_v38, %v998_v16  ;;  %v4441_v16 = vld [vmem:[%s5285_s10 + $0x1d8] sm:$0xff]   ;;  %v4449_v38 = vld [vmem:[%s5285_s10 + $0x228] sm:$0xff]  }
 0x55e   :  { %v1164_v40 = vpop.f32.mrf.mxu0 }
 0x55f   :  { %v1177_v41 = vadd.f32 %v1164_v40, %v996_v18  ;;  %v4443_v18 = vld [vmem:[%s5285_s10 + $0x1c8] sm:$0xff]   ;;  %v4451_v40 = vld [vmem:[%s5285_s10 + $0x218] sm:$0xff]  }
 0x578   :  { %v1279_v42 = vpop.f32.mrf.mxu0 }
 0x57a   :  { %v4121_v43 = vpop.f32.mrf.mxu0 }
 0x57b   :  { %v4454_v43 = vld [vmem:[%s5285_s10 + $0x200] sm:$0xff]  }
 0x57c   :  { %v1282_v44 = vpop.f32.mrf.mxu0 }
 0x57d   :  { %v1291_v45 = vpack.c.bf16 %v1282_v44, %v1279_v42  ;;  %v4453_v42 = vld [vmem:[%s5285_s10 + $0x208] sm:$0xff]   ;;  %v4455_v44 = vld [vmem:[%s5292_s1 + $0x80] sm:$0xff]  }
 0x57e   :  { %v4122_v46 = vpop.f32.mrf.mxu0 }
 0x57f   :  { %4123 = vmatprep.subr.bf16.mxu1 %v1291_v45  ;;  %v3269_v46 = vld [vmem:[%s5293_s6] sm:$0xff] }
 0x580   :  { %4124 = vmatpush3.bf16.msra.mxu1 %v1291_v45  ;;  %v3270_v45 = vld [vmem:[%s5293_s6 + $0x8] sm:$0xff]  ;;  %3275 = vperm.xlu0 %4354, %v3269_v46  }
 0x581   :  { %4129 = vmatprep.subr.bf16.mxu1 %v4494_v0  ;;  %3280 = vperm.xlu1 %4355, %v3270_v45  }
 0x583   :  { %4126 = vmatmul.mubr.msk.bf16.vlgmr.msra.gmra.mxu1 %vm173_vm1, %v4426_v47  ;;  %v3271_v47 = vld [vmem:[%s5293_s6 + $0x10] sm:$0xff] }
 0x584   :  { %4130 = vmatpush3.bf16.msra.mxu1 %v4427_v48  ;;  %4145 = vmatprep.mubr.msk.bf16.mxu1 %vm4495_vm0, %v4494_v0 }
 0x585   :  { %4131 = vmatprep.subr.bf16.mxu1 %v4494_v0  ;;  %3285 = vperm.xlu0 %4354, %v3271_v47  }
 0x588   :  { %4132 = vmatpush3.bf16.msra.mxu1 %v4428_v49 }
 0x589   :  { %4133 = vmatprep.subr.bf16.mxu1 %v4494_v0 }
 0x58c   :  { %4134 = vmatpush3.bf16.msra.mxu1 %v4429_v50 }
 0x58d   :  { %4135 = vmatprep.subr.bf16.mxu1 %v4494_v0 }
 0x590   :  { %4136 = vmatpush3.bf16.msra.mxu1 %v4430_v51 }
 0x591   :  { %4137 = vmatprep.subr.bf16.mxu1 %v4494_v0 }
 0x594   :  { %4138 = vmatpush3.bf16.msra.mxu1 %v4431_v52 }
 0x595   :  { %4139 = vmatprep.subr.bf16.mxu1 %v4494_v0 }
 0x598   :  { %4140 = vmatpush3.bf16.msra.mxu1 %v4432_v53 }
 0x599   :  { %4141 = vmatprep.subr.bf16.mxu1 %v4494_v0 }
 0x59c   :  { %4142 = vmatpush3.bf16.msra.mxu1 %v4433_v54 }
 0x59d   :  { %4143 = vmatprep.subr.bf16.mxu1 %v4494_v0 }
 0x5a0   :  { %4144 = vmatpush3.bf16.msra.mxu1 %v4434_v55 }
 0x5a3   :  { %4146 = vmatmul.mubr.bf16.vlgmr.msra.gmra.mxu1 %v4604_v9  ;;  %v4436_v9 = vld [vmem:[%s5292_s1 + $0x68] sm:$0xff]  }
 0x5a4   :  { %4177 = vmatprep.mubr.msk.bf16.mxu1 %vm173_vm1, %v4445_v21 }
 0x643   :  { %v4127_v57 = vpop.f32.mrf.mxu1 }
 0x644   :  { %v1359_v58 = vadd.f32 %v4127_v57, %v1178_v35  ;;  %v4446_v35 = vld [vmem:[%s5292_s1 + $0x78] sm:$0xff]  }
 0x645   :  { %v1342_v59 = vpop.f32.mrf.mxu1 }
 0x646   :  { %v1357_v60 = vadd.f32 %v1342_v59, %v1176_v37  ;;  %v4448_v37 = vld [vmem:[%s5285_s10 + $0x230] sm:$0xff]  }
 0x647   :  { %v4128_v61 = vpop.f32.mrf.mxu1 }
 0x648   :  { %v1360_v3 = vadd.f32 %v4128_v61, %v1179_v39  ;;  %v4450_v39 = vld [vmem:[%s5285_s10 + $0x220] sm:$0xff]   ;;  %v4456_v61 = vld [vmem:[%s5292_s1 + $0x88] sm:$0xff]  }
 0x649   :  { %v1345_v4 = vpop.f32.mrf.mxu1 }
 0x64a   :  { %v1358_v5 = vadd.f32 %v1345_v4, %v1177_v41  ;;  %v4452_v41 = vld [vmem:[%s5285_s10 + $0x210] sm:$0xff]   ;;  %v4458_v4 = vld [vmem:[%s5294_s12] sm:$0xff]  }
 0x663   :  { %v1460_v6 = vpop.f32.mrf.mxu1 }
 0x665   :  { %v4147_v7 = vpop.f32.mrf.mxu1 }
 0x666   :  { %v1921_v7 = vpop.permute.xlu1 %1920 }
 0x667   :  { %v1463_v8 = vpop.f32.mrf.mxu1 }
 0x668   :  { %v1472_v10 = vpack.c.bf16 %v1463_v8, %v1460_v6  ;;  %v1911_v6 = vpop.permute.xlu0 %1910 }
 0x669   :  { %v4148_v11 = vpop.f32.mrf.mxu1 }
 0x66a   :  { %4149 = vmatprep.subr.bf16.mxu0 %v1472_v10 }
 0x66b   :  { %4150 = vmatpush3.bf16.msra.mxu0 %v1472_v10  ;;  %v1926_v10 = vpop.permute.xlu1 %1925 }
 0x66c   :  { %4155 = vmatprep.subr.bf16.mxu0 %v4494_v0  ;;  %v1916_v8 = vpop.permute.xlu0 %1915 }
 0x66e   :  { %4152 = vmatmul.mubr.msk.bf16.vlgmr.msra.gmra.mxu0 %vm173_vm1, %v4436_v9 }
 0x66f   :  { %4156 = vmatpush3.bf16.msra.mxu0 %v4437_v12  ;;  %4171 = vmatprep.mubr.msk.bf16.mxu0 %vm4495_vm0, %v4494_v0 }
 0x670   :  { %4157 = vmatprep.subr.bf16.mxu0 %v4494_v0  ;;  %v1939_v11 = vpop.permute.xlu0 %1938 }
 0x673   :  { %4158 = vmatpush3.bf16.msra.mxu0 %v4438_v13  ;;  %v1944_v13 = vpop.permute.xlu1 %1943 }
 0x674   :  { %4159 = vmatprep.subr.bf16.mxu0 %v4494_v0 }
 0x677   :  { %4160 = vmatpush3.bf16.msra.mxu0 %v4439_v14 }
 0x678   :  { %4161 = vmatprep.subr.bf16.mxu0 %v4494_v0 }
 0x67b   :  { %4162 = vmatpush3.bf16.msra.mxu0 %v4440_v15 }
 0x67c   :  { %4163 = vmatprep.subr.bf16.mxu0 %v4494_v0 }
 0x67f   :  { %4164 = vmatpush3.bf16.msra.mxu0 %v4441_v16 }
 0x680   :  { %4165 = vmatprep.subr.bf16.mxu0 %v4494_v0 }
 0x683   :  { %4166 = vmatpush3.bf16.msra.mxu0 %v4442_v17 }
 0x684   :  { %4167 = vmatprep.subr.bf16.mxu0 %v4494_v0 }
 0x687   :  { %4168 = vmatpush3.bf16.msra.mxu0 %v4443_v18 }
 0x688   :  { %4169 = vmatprep.subr.bf16.mxu0 %v4494_v0 }
 0x68b   :  { %4170 = vmatpush3.bf16.msra.mxu0 %v4444_v19 }
 0x68e   :  { %4172 = vmatmul.mubr.bf16.vlgmr.msra.gmra.mxu0 %v4493_v20 }
 0x68f   :  { %4203 = vmatprep.mubr.msk.bf16.mxu0 %vm173_vm1, %v4455_v44 }
 0x72e   :  { %v4153_v22 = vpop.f32.mrf.mxu0 }
 0x72f   :  { %v1540_v23 = vadd.f32 %v4153_v22, %v1359_v58 }
 0x730   :  { %v1523_v24 = vpop.f32.mrf.mxu0 }
 0x731   :  { %v1538_v25 = vadd.f32 %v1523_v24, %v1357_v60 }
 0x732   :  { %v4154_v26 = vpop.f32.mrf.mxu0 }
 0x733   :  { %v1541_v27 = vadd.f32 %v4154_v26, %v1360_v3  ;;  %v4457_v3 = vld [vmem:[%s5294_s12 + $0x8] sm:$0xff]  }
 0x734   :  { %v1526_v28 = vpop.f32.mrf.mxu0 }
 0x735   :  { %v1539_v29 = vadd.f32 %v1526_v28, %v1358_v5  ;;  %v4459_v5 = vld [vmem:[%s5294_s12 + $0x18] sm:$0xff]  }
 0x74e   :  { %v1641_v30 = vpop.f32.mrf.mxu0 }
 0x750   :  { %v4173_v31 = vpop.f32.mrf.mxu0 }
 0x752   :  { %v1644_v32 = vpop.f32.mrf.mxu0 }
 0x753   :  { %v1653_v33 = vpack.c.bf16 %v1644_v32, %v1641_v30 }
 0x754   :  { %v4174_v34 = vpop.f32.mrf.mxu0 }
 0x755   :  { %4175 = vmatprep.subr.bf16.mxu1 %v1653_v33 }
 0x756   :  { %4176 = vmatpush3.bf16.msra.mxu1 %v1653_v33 }
 0x757   :  { %4181 = vmatprep.subr.bf16.mxu1 %v4494_v0 }
 0x759   :  { %4178 = vmatmul.mubr.msk.bf16.vlgmr.msra.gmra.mxu1 %vm173_vm1, %v4446_v35 }
 0x75a   :  { %4182 = vmatpush3.bf16.msra.mxu1 %v4447_v36  ;;  %4197 = vmatprep.mubr.msk.bf16.mxu1 %vm4495_vm0, %v4494_v0  ;;  %v4460_v36 = vld [vmem:[%s5294_s12 + $0x10] sm:$0xff]  }
 0x75b   :  { %4183 = vmatprep.subr.bf16.mxu1 %v4494_v0 }
 0x75e   :  { %4184 = vmatpush3.bf16.msra.mxu1 %v4448_v37  ;;  %v4461_v37 = vld [vmem:[%s5295_s4 + $0x10] sm:$0xff]  }
 0x75f   :  { %4185 = vmatprep.subr.bf16.mxu1 %v4494_v0 }
 0x762   :  { %4186 = vmatpush3.bf16.msra.mxu1 %v4449_v38  ;;  %v4462_v38 = vld [vmem:[%s5295_s4] sm:$0xff]  }
 0x763   :  { %4187 = vmatprep.subr.bf16.mxu1 %v4494_v0 }
 0x766   :  { %4188 = vmatpush3.bf16.msra.mxu1 %v4450_v39 }
 0x767   :  { %4189 = vmatprep.subr.bf16.mxu1 %v4494_v0 }
 0x76a   :  { %4190 = vmatpush3.bf16.msra.mxu1 %v4451_v40 }
 0x76b   :  { %4191 = vmatprep.subr.bf16.mxu1 %v4494_v0 }
 0x76e   :  { %4192 = vmatpush3.bf16.msra.mxu1 %v4452_v41 }
 0x76f   :  { %4193 = vmatprep.subr.bf16.mxu1 %v4494_v0 }
 0x772   :  { %4194 = vmatpush3.bf16.msra.mxu1 %v4453_v42 }
 0x773   :  { %4195 = vmatprep.subr.bf16.mxu1 %v4494_v0  ;;  %v3272_v0 = vld [vmem:[%s5293_s6 + $0x18] sm:$0xff] }
 0x774   :  { %3290 = vperm.xlu1 %4355, %v3272_v0   ;;  %v4464_v0 = vld [vmem:[%s5295_s4 + $0x8] sm:$0xff]  }
 0x776   :  { %4196 = vmatpush3.bf16.msra.mxu1 %v4454_v43 }
 0x779   :  { %4198 = vmatmul.mubr.bf16.vlgmr.msra.gmra.mxu1 %v4493_v20  ;;  %v1949_v20 = vpop.permute.xlu0 %1948 }
 0x77a   :  { %4227 = vmatprep.mubr.msk.bf16.mxu1 %vm1982_vm2, %v4461_v37 }
 0x819   :  { %v4179_v48 = vpop.f32.mrf.mxu1 }
 0x81a   :  { %v1721_v49 = vadd.f32 %v4179_v48, %v1540_v23 }
 0x81b   :  { %v1704_v50 = vpop.f32.mrf.mxu1 }
 0x81c   :  { %v1719_v51 = vadd.f32 %v1704_v50, %v1538_v25  ;;  %v1954_v25 = vpop.permute.xlu1 %1953 }
 0x81d   :  { %v4180_v52 = vpop.f32.mrf.mxu1 }
 0x81e   :  { %v1722_v53 = vadd.f32 %v4180_v52, %v1541_v27  ;;  %v4463_v52 = vld [vmem:[%s5295_s4 + $0x18] sm:$0xff]  }
 0x81f   :  { %v1707_v54 = vpop.f32.mrf.mxu1 }
 0x820   :  { %v1720_v55 = vadd.f32 %v1707_v54, %v1539_v29  ;;  %v4467_v54 = vld [vmem:[%s5294_s12 + $0x38] sm:$0xff]  }
 0x839   :  { %v1822_v56 = vpop.f32.mrf.mxu1 }
 0x83b   :  { %v4199_v57 = vpop.f32.mrf.mxu1 }
 0x83c   :  { %v4470_v57 = vld [vmem:[%s5294_s12 + $0x40] sm:$0xff]  }
 0x83d   :  { %v1825_v58 = vpop.f32.mrf.mxu1 }
 0x83e   :  { %v1834_v59 = vpack.c.bf16 %v1825_v58, %v1822_v56  ;;  %v4469_v56 = vld [vmem:[%s5294_s12 + $0x48] sm:$0xff]   ;;  %v4471_v58 = vld [vmem:[%s5294_s12 + $0x58] sm:$0xff]  }
 0x83f   :  { %v4200_v60 = vpop.f32.mrf.mxu1 }
 0x840   :  { %4201 = vmatprep.subr.bf16.mxu0 %v1834_v59  ;;  %v4473_v60 = vld [vmem:[%s5294_s12 + $0x68] sm:$0xff]  }
 0x841   :  { %4202 = vmatpush3.bf16.msra.mxu0 %v1834_v59  ;;  %v4472_v59 = vld [vmem:[%s5294_s12 + $0x50] sm:$0xff]  }
 0x842   :  { %4207 = vmatprep.subr.bf16.mxu0 %v4457_v3 }
 0x844   :  { %4204 = vmatmul.mubr.msk.bf16.vlgmr.msra.gmra.mxu0 %vm173_vm1, %v4456_v61  ;;  %v4474_v61 = vld [vmem:[%s5294_s12 + $0x60] sm:$0xff]  }
 0x845   :  { %4208 = vmatpush3.bf16.msra.mxu0 %v4457_v3  ;;  %v4475_v3 = vld [vmem:[%s5294_s12 + $0x78] sm:$0xff]  }
 0x846   :  { %4209 = vmatprep.subr.bf16.mxu0 %v4458_v4 }
 0x849   :  { %4210 = vmatpush3.bf16.msra.mxu0 %v4458_v4  ;;  %v4476_v4 = vld [vmem:[%s5294_s12 + $0x70] sm:$0xff]  }
 0x84a   :  { %4215 = vmatprep.subr.bf16.mxu0 %v4459_v5 }
 0x904   :  { %v4205_v9 = vpop.f32.mrf.mxu0 }
 0x905   :  { %v1902_v12 = vadd.f32 %v4205_v9, %v1721_v49 }
 0x906   :  { %v1885_v14 = vpop.f32.mrf.mxu0 }
 0x907   :  { %v1930_v15 = vmul.f32 %v1921_v7, %v1902_v12  ;;  %v1900_v16 = vadd.f32 %v1885_v14, %v1719_v51  ;;  %v4465_v51 = vld [vmem:[%s5294_s12 + $0x28] sm:$0xff]   ;;  %v4479_v7 = vld [vmem:[%s5295_s4 + $0x20] sm:$0xff]  }
 0x908   :  { %v4206_v17 = vpop.f32.mrf.mxu0 }
 0x909   :  { %v1928_v18 = vmul.f32 %v1911_v6, %v1900_v16  ;;  %v1903_v19 = vadd.f32 %v4206_v17, %v1722_v53  ;;  %v1958_v22 = vadd.f32 %v1949_v20, %v1930_v15  ;;  %v4466_v53 = vld [vmem:[%s5294_s12 + $0x20] sm:$0xff]   ;;  %v4480_v20 = vld [vmem:[%s5295_s4 + $0x28] sm:$0xff]  }
 0x90a   :  { %v1888_v21 = vpop.f32.mrf.mxu0  ;;  %v4478_v6 = vld [vmem:[%s5294_s12 + $0x80] sm:$0xff]  }
 0x90b   :  { %v1931_v23 = vmul.f32 %v1926_v10, %v1903_v19  ;;  %v1901_v24 = vadd.f32 %v1888_v21, %v1720_v55  ;;  %v1956_v26 = vadd.f32 %v1939_v11, %v1928_v18  ;;  %v1962_v29 = vmax.f32 %v1958_v22, 0.0  ;;  %v4468_v55 = vld [vmem:[%s5294_s12 + $0x30] sm:$0xff]  }
 0x90c   :  { %v4481_v22 = vld [vmem:[%s5295_s4 + $0x30] sm:$0xff]  }
 0x90d   :  { %v1959_v27 = vadd.f32 %v1954_v25, %v1931_v23  ;;  %v1929_v28 = vmul.f32 %v1916_v8, %v1901_v24  ;;  %v1960_v32 = vmax.f32 %v1956_v26, 0.0 }
 0x90f   :  { %v1963_v30 = vmax.f32 %v1959_v27, 0.0  ;;  %v1957_v31 = vadd.f32 %v1944_v13, %v1929_v28  ;;  %v4482_v28 = vld [vmem:[%s5295_s4 + $0x38] sm:$0xff]  }
 0x911   :  { %v5092_v33 = vpack.c.bf16 %v1963_v30, %v1962_v29  ;;  %v1961_v34 = vmax.f32 %v1957_v31, 0.0  ;;  %v4483_v30 = vld [vmem:[%s5295_s4 + $0x40] sm:$0xff]  }
 0x913   :  { %v5094_v35 = vpack.c.bf16 %v1961_v34, %v1960_v32 }
 0x915   :  { %4211 = vmatprep.mubr.msk.bf16.mxu0 %vm1982_vm2, %v5094_v35 }
 0x916   :  { %4212 = vmatmul.mubr.msk.bf16.vlgmr.msra.gmra.mxu0 %vm1982_vm2, %v5092_v33 }
 0x917   :  { %4216 = vmatpush3.bf16.msra.mxu0 %v4459_v5  ;;  %4219 = vmatprep.mubr.msk.bf16.mxu0 %vm1982_vm2, %v5094_v35  ;;  %v4477_v5 = vld [vmem:[%s5294_s12 + $0x88] sm:$0xff]  }
 0x918   :  { %4217 = vmatprep.subr.bf16.mxu0 %v4460_v36 }
 0x91b   :  { %4218 = vmatpush3.bf16.msra.mxu0 %v4460_v36  ;;  %v4484_v36 = vld [vmem:[%s5295_s4 + $0x48] sm:$0xff]  }
 0x91e   :  { %4220 = vmatmul.mubr.msk.bf16.vlgmr.msra.gmra.mxu0 %vm1982_vm2, %v5092_v33 }
 0x91f   :  { %4235 = vmatprep.mubr.msk.bf16.mxu0 %vm1982_vm2, %v4462_v38  ;;  %v4485_v38 = vld [vmem:[%s5295_s4 + $0x50] sm:$0xff]  }
 0x9d6   :  { %v4213_v39 = vpop.f32.mrf.mxu0 }
 0x9d8   :  { %v2023_v40 = vpop.f32.mrf.mxu0 }
 0x9da   :  { %v4214_v41 = vpop.f32.mrf.mxu0 }
 0x9db   :  { %v2043_v42 = vpack.c.bf16 %v4214_v41, %v4213_v39 }
 0x9dc   :  { %v2026_v43 = vpop.f32.mrf.mxu0 }
 0x9dd   :  { %v2042_v44 = vpack.c.bf16 %v2026_v43, %v2023_v40  ;;  %4231 = vmatprep.subr.bf16.mxu0 %v2043_v42 }
 0x9de   :  { %v4221_v45 = vpop.f32.mrf.mxu0  ;;  %4232 = vmatpush3.bf16.msra.mxu0 %v2043_v42 }
 0x9df   :  { %4233 = vmatprep.subr.bf16.mxu0 %v2042_v44 }
 0x9e0   :  { %v2095_v46 = vpop.f32.mrf.mxu0 }
 0x9e2   :  { %v4222_v47 = vpop.f32.mrf.mxu0  ;;  %4234 = vmatpush3.bf16.msra.mxu0 %v2042_v44  ;;  %v4486_v44 = vld [vmem:[%s5295_s4 + $0x58] sm:$0xff]  }
 0x9e3   :  { %v2116_v48 = vpack.c.bf16 %v4222_v47, %v4221_v45 }
 0x9e4   :  { %v2098_v49 = vpop.f32.mrf.mxu0 }
 0x9e5   :  { %v2115_v50 = vpack.c.bf16 %v2098_v49, %v2095_v46  ;;  %4223 = vmatprep.subr.bf16.mxu1 %v2116_v48  ;;  %4236 = vmatmul.mubr.msk.bf16.vlgmr.msra.gmra.mxu0 %vm1982_vm2, %v4464_v0  ;;  %v4487_v46 = vld [vmem:[%s5295_s4 + $0x60] sm:$0xff]  }
 0x9e6   :  { %4224 = vmatpush3.bf16.msra.mxu1 %v2116_v48  ;;  %4251 = vmatprep.mubr.msk.bf16.mxu0 %vm1982_vm2, %v4479_v7 }
 0x9e7   :  { %4225 = vmatprep.subr.bf16.mxu1 %v2115_v50 }
 0x9ea   :  { %4226 = vmatpush3.bf16.msra.mxu1 %v2115_v50 }
 0x9eb   :  { %4239 = vmatprep.subr.bf16.mxu1 %v4465_v51 }
 0x9ed   :  { %4228 = vmatmul.mubr.msk.bf16.vlgmr.msra.gmra.mxu1 %vm1982_vm2, %v4463_v52 }
 0x9ee   :  { %4240 = vmatpush3.bf16.msra.mxu1 %v4465_v51  ;;  %4243 = vmatprep.mubr.msk.bf16.mxu1 %vm1982_vm2, %v5094_v35  ;;  %v4488_v51 = vld [vmem:[%s5295_s4 + $0x68] sm:$0xff]  }
 0x9ef   :  { %4241 = vmatprep.subr.bf16.mxu1 %v4466_v53 }
 0x9f2   :  { %4242 = vmatpush3.bf16.msra.mxu1 %v4466_v53  ;;  %v4489_v53 = vld [vmem:[%s5295_s4 + $0x70] sm:$0xff]  }
 0x9f3   :  { %4255 = vmatprep.subr.bf16.mxu1 %v4467_v54 }
 0x9f5   :  { %4244 = vmatmul.mubr.msk.bf16.vlgmr.msra.gmra.mxu1 %vm1982_vm2, %v5092_v33 }
 0x9f6   :  { %4256 = vmatpush3.bf16.msra.mxu1 %v4467_v54  ;;  %4259 = vmatprep.mubr.msk.bf16.mxu1 %vm1982_vm2, %v5094_v35 }
 0x9f7   :  { %4257 = vmatprep.subr.bf16.mxu1 %v4468_v55 }
 0x9fa   :  { %4258 = vmatpush3.bf16.msra.mxu1 %v4468_v55 }
 0x9fb   :  { %4271 = vmatprep.subr.bf16.mxu1 %v4469_v56 }
 0x9fd   :  { %4260 = vmatmul.mubr.msk.bf16.vlgmr.msra.gmra.mxu1 %vm1982_vm2, %v5092_v33 }
 0x9fe   :  { %4272 = vmatpush3.bf16.msra.mxu1 %v4469_v56  ;;  %4275 = vmatprep.mubr.msk.bf16.mxu1 %vm1982_vm2, %v5094_v35 }
 0x9ff   :  { %4273 = vmatprep.subr.bf16.mxu1 %v4470_v57 }
 0xa02   :  { %4274 = vmatpush3.bf16.msra.mxu1 %v4470_v57 }
 0xa03   :  { %4287 = vmatprep.subr.bf16.mxu1 %v4471_v58 }
 0xa05   :  { %4276 = vmatmul.mubr.msk.bf16.vlgmr.msra.gmra.mxu1 %vm1982_vm2, %v5092_v33 }
 0xa06   :  { %4288 = vmatpush3.bf16.msra.mxu1 %v4471_v58  ;;  %4291 = vmatprep.mubr.msk.bf16.mxu1 %vm1982_vm2, %v5094_v35 }
 0xa07   :  { %4289 = vmatprep.subr.bf16.mxu1 %v4472_v59 }
 0xa0a   :  { %4290 = vmatpush3.bf16.msra.mxu1 %v4472_v59  ;;  %v4490_v59 = vld [vmem:[%s5295_s4 + $0x78] sm:$0xff]  }
 0xa0b   :  { %4303 = vmatprep.subr.bf16.mxu1 %v4473_v60 }
 0xa0d   :  { %4292 = vmatmul.mubr.msk.bf16.vlgmr.msra.gmra.mxu1 %vm1982_vm2, %v5092_v33 }
 0xa0e   :  { %4304 = vmatpush3.bf16.msra.mxu1 %v4473_v60  ;;  %4307 = vmatprep.mubr.msk.bf16.mxu1 %vm1982_vm2, %v5094_v35 }
 0xa0f   :  { %4305 = vmatprep.subr.bf16.mxu1 %v4474_v61 }
 0xa12   :  { %4306 = vmatpush3.bf16.msra.mxu1 %v4474_v61  ;;  %v4491_v61 = vld [vmem:[%s5295_s4 + $0x80] sm:$0xff]  }
 0xa13   :  { %4319 = vmatprep.subr.bf16.mxu1 %v4475_v3 }
 0xa15   :  { %4308 = vmatmul.mubr.msk.bf16.vlgmr.msra.gmra.mxu1 %vm1982_vm2, %v5092_v33 }
 0xa16   :  { %4320 = vmatpush3.bf16.msra.mxu1 %v4475_v3  ;;  %4323 = vmatprep.mubr.msk.bf16.mxu1 %vm1982_vm2, %v5094_v35 }
 0xa17   :  { %4321 = vmatprep.subr.bf16.mxu1 %v4476_v4 }
 0xa1a   :  { %4322 = vmatpush3.bf16.msra.mxu1 %v4476_v4 }
 0xa1b   :  { %4335 = vmatprep.subr.bf16.mxu1 %v4477_v5 }
 0xa1d   :  { %4324 = vmatmul.mubr.msk.bf16.vlgmr.msra.gmra.mxu1 %vm1982_vm2, %v5092_v33 }
 0xa1e   :  { %4336 = vmatpush3.bf16.msra.mxu1 %v4477_v5  ;;  %4339 = vmatprep.mubr.msk.bf16.mxu1 %vm1982_vm2, %v5094_v35 }
 0xa1f   :  { %4337 = vmatprep.subr.bf16.mxu1 %v4478_v6 }
 0xa22   :  { %4338 = vmatpush3.bf16.msra.mxu1 %v4478_v6  ;;  %v4492_v6 = vld [vmem:[%s5295_s4 + $0x88] sm:$0xff]  }
 0xa25   :  { %4340 = vmatmul.mubr.msk.bf16.vlgmr.msra.gmra.mxu1 %vm1982_vm2, %v5092_v33 }
 0xaa5   :  { %v4237_v7 = vpop.f32.mrf.mxu0 }
 0xaad   :  { %v5197_v8 = vpop.f32.mrf.mxu1 }
 0xaaf   :  { %v5199_v10 = vpop.f32.mrf.mxu1 }
 0xab1   :  { %v5201_v11 = vpop.f32.mrf.mxu1 }
 0xab3   :  { %v5203_v9 = vpop.f32.mrf.mxu1 }
 0xab5   :  { %v4245_v12 = vpop.f32.mrf.mxu1 }
 0xab7   :  { %v2298_v13 = vpop.f32.mrf.mxu1 }
 0xab9   :  { %v4246_v14 = vpop.f32.mrf.mxu1 }
 0xaba   :  { %v2319_v15 = vpack.c.bf16 %v4246_v14, %v4245_v12  ;;  %v2232_v12 = vpop.f32.mrf.mxu0 }
 0xabb   :  { %v2301_v16 = vpop.f32.mrf.mxu1 }
 0xabc   :  { %v2318_v17 = vpack.c.bf16 %v2301_v16, %v2298_v13  ;;  %4247 = vmatprep.subr.bf16.mxu0 %v2319_v15  ;;  %v4238_v13 = vpop.f32.mrf.mxu0 }
 0xabd   :  { %4248 = vmatpush3.bf16.msra.mxu0 %v2319_v15  ;;  %v4261_v18 = vpop.f32.mrf.mxu1 }
 0xabe   :  { %4249 = vmatprep.subr.bf16.mxu0 %v2318_v17  ;;  %v2235_v14 = vpop.f32.mrf.mxu0 }
 0xabf   :  { %v2440_v19 = vpop.f32.mrf.mxu1 }
 0xac1   :  { %4250 = vmatpush3.bf16.msra.mxu0 %v2318_v17  ;;  %v4262_v21 = vpop.f32.mrf.mxu1 }
 0xac2   :  { %v2461_v23 = vpack.c.bf16 %v4262_v21, %v4261_v18  ;;  %v236_v21 = vpop.permute.xlu0 %235 }
 0xac3   :  { %v2443_v24 = vpop.f32.mrf.mxu1 }
 0xac4   :  { %v2460_v25 = vpack.c.bf16 %v2443_v24, %v2440_v19  ;;  %4252 = vmatmul.mubr.msk.bf16.vlgmr.msra.gmra.mxu0 %vm1982_vm2, %v4480_v20  ;;  %4263 = vmatprep.subr.bf16.mxu0 %v2461_v23  ;;  %v5257_v24 = vpop.permute.xlu1 %240 }
 0xac5   :  { %4264 = vmatpush3.bf16.msra.mxu0 %v2461_v23  ;;  %v4277_v26 = vpop.f32.mrf.mxu1  ;;  %4267 = vmatprep.mubr.msk.bf16.mxu0 %vm1982_vm2, %v4481_v22 }
 0xac6   :  { %4265 = vmatprep.subr.bf16.mxu0 %v2460_v25 }
 0xac7   :  { %v2582_v27 = vpop.f32.mrf.mxu1 }
 0xac9   :  { %4266 = vmatpush3.bf16.msra.mxu0 %v2460_v25  ;;  %v4278_v29 = vpop.f32.mrf.mxu1 }
 0xaca   :  { %v2603_v31 = vpack.c.bf16 %v4278_v29, %v4277_v26  ;;  %v246_v26 = vpop.permute.xlu0 %245  ;;  %v251_v29 = vpop.permute.xlu1 %250 }
 0xacb   :  { %v2585_v32 = vpop.f32.mrf.mxu1 }
 0xacc   :  { %v2602_v33 = vpack.c.bf16 %v2585_v32, %v2582_v27  ;;  %4268 = vmatmul.mubr.msk.bf16.vlgmr.msra.gmra.mxu0 %vm1982_vm2, %v4482_v28  ;;  %4279 = vmatprep.subr.bf16.mxu0 %v2603_v31 }
 0xacd   :  { %4280 = vmatpush3.bf16.msra.mxu0 %v2603_v31  ;;  %v4293_v34 = vpop.f32.mrf.mxu1  ;;  %4283 = vmatprep.mubr.msk.bf16.mxu0 %vm1982_vm2, %v4483_v30 }
 0xace   :  { %4281 = vmatprep.subr.bf16.mxu0 %v2602_v33  ;;  %v3248_v31 = vpop.permute.xlu0 %3247 }
 0xacf   :  { %v2724_v35 = vpop.f32.mrf.mxu1 }
 0xad1   :  { %4282 = vmatpush3.bf16.msra.mxu0 %v2602_v33  ;;  %v4294_v37 = vpop.f32.mrf.mxu1 }
 0xad2   :  { %v2745_v39 = vpack.c.bf16 %v4294_v37, %v4293_v34  ;;  %v5259_v34 = vpop.permute.xlu1 %3252 }
 0xad3   :  { %v2727_v40 = vpop.f32.mrf.mxu1 }
 0xad4   :  { %v2744_v41 = vpack.c.bf16 %v2727_v40, %v2724_v35  ;;  %4284 = vmatmul.mubr.msk.bf16.vlgmr.msra.gmra.mxu0 %vm1982_vm2, %v4484_v36  ;;  %4295 = vmatprep.subr.bf16.mxu0 %v2745_v39  ;;  %v3258_v36 = vpop.permute.xlu0 %3257 }
 0xad5   :  { %4296 = vmatpush3.bf16.msra.mxu0 %v2745_v39  ;;  %v4309_v42 = vpop.f32.mrf.mxu1  ;;  %4299 = vmatprep.mubr.msk.bf16.mxu0 %vm1982_vm2, %v4485_v38 }
 0xad6   :  { %4297 = vmatprep.subr.bf16.mxu0 %v2744_v41  ;;  %v3263_v39 = vpop.permute.xlu1 %3262 }
 0xad7   :  { %v2866_v43 = vpop.f32.mrf.mxu1 }
 0xad9   :  { %4298 = vmatpush3.bf16.msra.mxu0 %v2744_v41  ;;  %v4310_v45 = vpop.f32.mrf.mxu1  ;;  %v2241_v41 = vadd.f32 %v4237_v7, %v5197_v8 }
 0xada   :  { %v2887_v0 = vpack.c.bf16 %v4310_v45, %v4309_v42  ;;  %v264_v42 = vpop.permute.xlu0 %263 }
 0xadb   :  { %v2869_v47 = vpop.f32.mrf.mxu1 }
 0xadc   :  { %v2886_v48 = vpack.c.bf16 %v2869_v47, %v2866_v43  ;;  %4300 = vmatmul.mubr.msk.bf16.vlgmr.msra.gmra.mxu0 %vm1982_vm2, %v4486_v44  ;;  %4311 = vmatprep.subr.bf16.mxu0 %v2887_v0  ;;  %v2233_v44 = vadd.f32 %v2232_v12, %v5199_v10  ;;  %v2244_v47 = vadd.f32 %v4238_v13, %v5201_v11 }
 0xadd   :  { %4312 = vmatpush3.bf16.msra.mxu0 %v2887_v0  ;;  %v4325_v49 = vpop.f32.mrf.mxu1  ;;  %4315 = vmatprep.mubr.msk.bf16.mxu0 %vm1982_vm2, %v4487_v46  ;;  %v269_v0 = vpop.permute.xlu1 %268 }
 0xade   :  { %4313 = vmatprep.subr.bf16.mxu0 %v2886_v48 }
 0xadf   :  { %v3008_v50 = vpop.f32.mrf.mxu1 }
 0xae1   :  { %4314 = vmatpush3.bf16.msra.mxu0 %v2886_v48  ;;  %v4326_v52 = vpop.f32.mrf.mxu1 }
 0xae2   :  { %v3029_v54 = vpack.c.bf16 %v4326_v52, %v4325_v49 }
 0xae3   :  { %v3011_v55 = vpop.f32.mrf.mxu1 }
 0xae4   :  { %v3028_v56 = vpack.c.bf16 %v3011_v55, %v3008_v50  ;;  %4316 = vmatmul.mubr.msk.bf16.vlgmr.msra.gmra.mxu0 %vm1982_vm2, %v4488_v51  ;;  %4327 = vmatprep.subr.bf16.mxu0 %v3029_v54  ;;  %v2236_v51 = vadd.f32 %v2235_v14, %v5203_v9  ;;  %v274_v55 = vpop.permute.xlu0 %273  ;;  %v255_v14 = vmul.f32 %v4757_v62, %v246_v26 }
 0xae5   :  { %4328 = vmatpush3.bf16.msra.mxu0 %v3029_v54  ;;  %v4341_v57 = vpop.f32.mrf.mxu1  ;;  %4331 = vmatprep.mubr.msk.bf16.mxu0 %vm1982_vm2, %v4489_v53 }
 0xae6   :  { %4329 = vmatprep.subr.bf16.mxu0 %v3028_v56 }
 0xae7   :  { %v3150_v58 = vpop.f32.mrf.mxu1 }
 0xae9   :  { %4330 = vmatpush3.bf16.msra.mxu0 %v3028_v56  ;;  %v4342_v60 = vpop.f32.mrf.mxu1 }
 0xaea   :  { %v3171_v3 = vpack.c.bf16 %v4342_v60, %v4341_v57  ;;  %v279_v60 = vpop.permute.xlu1 %278 }
 0xaeb   :  { %v3153_v4 = vpop.f32.mrf.mxu1 }
 0xaec   :  { %v3170_v5 = vpack.c.bf16 %v3153_v4, %v3150_v58  ;;  %4332 = vmatmul.mubr.msk.bf16.vlgmr.msra.gmra.mxu0 %vm1982_vm2, %v4490_v59  ;;  %4343 = vmatprep.subr.bf16.mxu0 %v3171_v3 }
 0xaed   :  { %4344 = vmatpush3.bf16.msra.mxu0 %v3171_v3  ;;  %4347 = vmatprep.mubr.msk.bf16.mxu0 %vm1982_vm2, %v4491_v61 }
 0xaee   :  { %4345 = vmatprep.subr.bf16.mxu0 %v3170_v5 }
 0xaf1   :  { %4346 = vmatpush3.bf16.msra.mxu0 %v3170_v5  ;;  %v3276_v5 = vpop.permute.xlu0 %3275 }
 0xaf4   :  { %4348 = vmatmul.mubr.msk.bf16.vlgmr.msra.gmra.mxu0 %vm1982_vm2, %v4492_v6 }
 0xb84   :  { %v4253_v15 = vpop.f32.mrf.mxu0 }
 0xb85   :  { %v2387_v45 = vadd.f32 %v4253_v15, %v2241_v41 }
 0xb86   :  { %v2370_v16 = vpop.f32.mrf.mxu0 }
 0xb87   :  { %v2385_v48 = vadd.f32 %v2370_v16, %v2233_v44 }
 0xb88   :  { %v4254_v17 = vpop.f32.mrf.mxu0 }
 0xb89   :  { %v2388_v52 = vadd.f32 %v4254_v17, %v2244_v47 }
 0xb8a   :  { %v2373_v18 = vpop.f32.mrf.mxu0 }
 0xb8b   :  { %v2386_v8 = vadd.f32 %v2373_v18, %v2236_v51 }
 0xb8c   :  { %v4269_v19 = vpop.f32.mrf.mxu0 }
 0xb8d   :  { %v2529_v49 = vadd.f32 %v4269_v19, %v2387_v45 }
 0xb8e   :  { %v2512_v20 = vpop.f32.mrf.mxu0 }
 0xb8f   :  { %v2527_v53 = vadd.f32 %v2512_v20, %v2385_v48  ;;  %v253_v20 = vmul.f32 %v236_v21, %v4759_v63 }
 0xb90   :  { %v4270_v22 = vpop.f32.mrf.mxu0 }
 0xb91   :  { %v2530_v57 = vadd.f32 %v4270_v22, %v2388_v52  ;;  %v3281_v22 = vpop.permute.xlu1 %3280  ;;  %v281_v41 = vadd.f32 %v264_v42, %v253_v20 }
 0xb92   :  { %v2515_v23 = vpop.f32.mrf.mxu0 }
 0xb93   :  { %v2528_v61 = vadd.f32 %v2515_v23, %v2386_v8 }
 0xb94   :  { %v4285_v25 = vpop.f32.mrf.mxu0 }
 0xb95   :  { %v2671_v54 = vadd.f32 %v4285_v25, %v2529_v49  ;;  %v3291_v47 = vpop.permute.xlu1 %3290 }
 0xb96   :  { %v2654_v27 = vpop.f32.mrf.mxu0 }
 0xb97   :  { %v2669_v58 = vadd.f32 %v2654_v27, %v2527_v53 }
 0xb98   :  { %v4286_v28 = vpop.f32.mrf.mxu0 }
 0xb99   :  { %v2672_v3 = vadd.f32 %v4286_v28, %v2530_v57 }
 0xb9a   :  { %v2657_v30 = vpop.f32.mrf.mxu0 }
 0xb9b   :  { %v2670_v7 = vadd.f32 %v2657_v30, %v2528_v61  ;;  %v256_v30 = vmul.f32 %v4761_v1, %v251_v29 }
 0xb9c   :  { %v4301_v32 = vpop.f32.mrf.mxu0 }
 0xb9d   :  { %v2813_v59 = vadd.f32 %v4301_v32, %v2671_v54 }
 0xb9e   :  { %v2796_v33 = vpop.f32.mrf.mxu0 }
 0xb9f   :  { %v2811_v4 = vadd.f32 %v2796_v33, %v2669_v58  ;;  %v283_v33 = vadd.f32 %v274_v55, %v255_v14 }
 0xba0   :  { %v4302_v35 = vpop.f32.mrf.mxu0 }
 0xba1   :  { %v2814_v12 = vadd.f32 %v4302_v35, %v2672_v3  ;;  %v3286_v35 = vpop.permute.xlu0 %3285 }
 0xba2   :  { %v2799_v37 = vpop.f32.mrf.mxu0 }
 0xba3   :  { %v2812_v16 = vadd.f32 %v2799_v37, %v2670_v7 }
 0xba4   :  { %v4317_v38 = vpop.f32.mrf.mxu0 }
 0xba5   :  { %v2955_v11 = vadd.f32 %v4317_v38, %v2813_v59 }
 0xba6   :  { %v2938_v40 = vpop.f32.mrf.mxu0 }
 0xba7   :  { %v2953_v9 = vadd.f32 %v2938_v40, %v2811_v4 }
 0xba8   :  { %v4318_v43 = vpop.f32.mrf.mxu0 }
 0xba9   :  { %v2956_v17 = vadd.f32 %v4318_v43, %v2814_v12  ;;  %v254_v43 = vmul.f32 %v5257_v24, %v4763_v2 }
 0xbaa   :  { %v2941_v46 = vpop.f32.mrf.mxu0 }
 0xbab   :  { %v2954_v25 = vadd.f32 %v2941_v46, %v2812_v16 }
 0xbac   :  { %v4333_v50 = vpop.f32.mrf.mxu0 }
 0xbad   :  { %v3097_v13 = vadd.f32 %v4333_v50, %v2955_v11  ;;  %v282_v50 = vadd.f32 %v269_v0, %v254_v43 }
 0xbae   :  { %v3080_v56 = vpop.f32.mrf.mxu0 }
 0xbaf   :  { %v3095_v18 = vadd.f32 %v3080_v56, %v2953_v9 }
 0xbb0   :  { %v4334_v10 = vpop.f32.mrf.mxu0 }
 0xbb1   :  { %v3098_v27 = vadd.f32 %v4334_v10, %v2956_v17 }
 0xbb2   :  { %v3083_v6 = vpop.f32.mrf.mxu0 }
 0xbb3   :  { %v3096_v40 = vadd.f32 %v3083_v6, %v2954_v25 }
 0xbb4   :  { %v4349_v15 = vpop.f32.mrf.mxu0 }
 0xbb5   :  { %v3239_v19 = vadd.f32 %v4349_v15, %v3097_v13 }
 0xbb6   :  { %v3222_v23 = vpop.f32.mrf.mxu0 }
 0xbb7   :  { %v3267_v28 = vmul.f32 %v3258_v36, %v3239_v19  ;;  %v3237_v32 = vadd.f32 %v3222_v23, %v3095_v18  ;;  %v284_v36 = vadd.f32 %v279_v60, %v256_v30 }
 0xbb8   :  { %v4350_v38 = vpop.f32.mrf.mxu0 }
 0xbb9   :  { %v3295_v62 = vadd.f32 %v3286_v35, %v3267_v28  ;;  %v3265_v26 = vmul.f32 %v3248_v31, %v3237_v32  ;;  %v3240_v37 = vadd.f32 %v4350_v38, %v3098_v27 }
 0xbba   :  { %v3225_v63 = vpop.f32.mrf.mxu0 }
 0xbbb   :  { %v3299_v21 = vadd.f32 %v3295_v62, %v283_v33  ;;  %v3293_v44 = vadd.f32 %v3276_v5, %v3265_v26  ;;  %v3268_v45 = vmul.f32 %v3263_v39, %v3240_v37  ;;  %v3238_v46 = vadd.f32 %v3225_v63, %v3096_v40 }
 0xbbd   :  { %v3303_v48 = vmax.f32 %v3299_v21, 0.0  ;;  %v3297_v49 = vadd.f32 %v3293_v44, %v281_v41  ;;  %v3296_v1 = vadd.f32 %v3291_v47, %v3268_v45  ;;  %v3266_v29 = vmul.f32 %v5259_v34, %v3238_v46 }
 0xbbf   :  { %v3753_v31 = vpack.c.bf16 %v3303_v48, %v3303_v48  ;;  %v3301_v51 = vmax.f32 %v3297_v49, 0.0  ;;  %v3300_v42 = vadd.f32 %v3296_v1, %v284_v36  ;;  %v3294_v52 = vadd.f32 %v3281_v22, %v3266_v29 }
 0xbc1   :  { %3324 = vst.msk [vmem:[%s5296_s13 + $0x8] sm:$0xf] %vm3321_vm3, %v3753_v31  ;;  %v3751_v2 = vpack.c.bf16 %v3301_v51, %v3301_v51  ;;  %v3304_v24 = vmax.f32 %v3300_v42, 0.0  ;;  %v3298_v39 = vadd.f32 %v3294_v52, %v282_v50 }
 0xbc3   :  { %3322 = vst.msk [vmem:[%s5296_s13] sm:$0xf] %vm3321_vm3, %v3751_v2  ;;  %v3754_v53 = vpack.c.bf16 %v3304_v24, %v3304_v24  ;;  %v3302_v54 = vmax.f32 %v3298_v39, 0.0 }
 0xbc5   :  { %3325 = vst.msk [vmem:[%s5296_s13 + $0xc] sm:$0xf] %vm3321_vm3, %v3754_v53  ;;  %v3752_v34 = vpack.c.bf16 %v3302_v54, %v3302_v54 }
 0xbc7   :  { %3323 = vst.msk [vmem:[%s5296_s13 + $0x4] sm:$0xf] %vm3321_vm3, %v3752_v34 }

</bundles_post_ra>
